<compile_context>
chip_gen: v7x
topology: tpu7x:2x2x1
jax: 0.10.0
libtpu: 0.0.40
codegen_flags: <defaults>
</compile_context>

<pallas_src>
import functools
import math

import jax
import jax.numpy as jnp
from jax import lax
from jax.experimental import pallas as pl
from jax.experimental.pallas import tpu as pltpu


# ---------------------------------------------------------------------------
# polynomial activations exactly as in the reference PyTorch module
# ---------------------------------------------------------------------------
def _silu_poly(x):
    return 0.125 * x * x + 0.5 * x + 0.125


def _softplus_poly(x):
    return 0.0625 * x * x + 0.5 * x + 1.0


def _round_up(x, m):
    return (x + m - 1) // m * m


def _dbc_layout(dt_rank, d_state):
    """Column offsets of the fused (delta | B | C) projection weight.

    Each segment starts at a 128-aligned column so the output slices of the
    single fused matmul stay lane-aligned.
    """
    seg_b = _round_up(max(dt_rank, 1), 128)
    seg_c = seg_b + _round_up(d_state, 128)
    dbc_cols = seg_c + _round_up(d_state, 128)
    return seg_b, seg_c, dbc_cols


def _vmem_capacity_bytes():
    try:
        info = pltpu.get_tpu_info()
        cap = getattr(info, "vmem_capacity_bytes", None)
        if cap:
            return int(cap)
    except Exception:
        pass
    return 64 * 2 ** 20          # conservative: v7x per-TensorCore VMEM


# ---------------------------------------------------------------------------
# Pallas kernel: one MambaBlock (+ residual) for one (batch, time-chunk) tile
# ---------------------------------------------------------------------------
def mamba_block_kernel(
    # inputs
    x_ref,        # (1, Tb, d_model)            f32
    w_in_x_ref,   # (d_model, d_inner)          mm_dtype
    w_in_z_ref,   # (d_model, d_inner)          mm_dtype
    w_conv_ref,   # (K, d_inner)                f32
    b_conv_ref,   # (1, d_inner)                f32
    w_dbc_ref,    # (d_inner, dbc_cols)         mm_dtype   fused delta|B|C
    w_dt_ref,     # (dt_rank, d_inner)          mm_dtype
    b_dt_ref,     # (1, d_inner)                f32
    a_log_t_ref,  # (d_state, d_inner)          f32        A_log transposed
    d_skip_ref,   # (1, d_inner)                f32
    w_out_ref,    # (d_inner, d_model)          mm_dtype
    # output
    o_ref,        # (1, Tb, d_model)            f32
    # scratch (persists across grid steps)
    h_s,          # (d_state, d_inner)          f32        SSM state carry
    ccar_s,       # (K-1, d_inner)              f32        conv carry rows
    da_s,         # (Ts, d_state, d_inner)      scan_dtype exp(delta*A)
    bx_s,         # (Ts, d_state, d_inner)      scan_dtype delta*B*x -> h_t
    dlt_s,        # (Tb, d_inner)               f32        delta
    xc_s,         # (Tb, d_inner)               f32        conv+silu output
    bm_s,         # (Tb, d_state)               f32        B
    cm_s,         # (Tb, d_state)               f32        C
    ys_s,         # (Tb, d_inner)               f32        scan output y
    *,
    d_inner, d_state, dt_rank, d_conv, block, scan_chunk, unroll, cb_size,
    mm_dtype, scan_dtype,
):
    K = d_conv
    Tb = block
    Ts = scan_chunk
    n_sub = Tb // Ts
    n_cb = d_inner // cb_size
    seg_b, seg_c, _ = _dbc_layout(dt_rank, d_state)

    # --- reset carried state at the first time-chunk of each sequence -------
    @pl.when(pl.program_id(1) == 0)
    def _():
        h_s[...] = jnp.zeros_like(h_s)
        ccar_s[...] = jnp.zeros_like(ccar_s)

    x_in = x_ref[0]                                        # (Tb, d_model) f32
    xm = x_in.astype(mm_dtype)

    # --- in_proj: pre-split weights -> lane-aligned x / z branches ----------
    xc_lin = jnp.dot(xm, w_in_x_ref[...], preferred_element_type=jnp.float32)
    z = jnp.dot(xm, w_in_z_ref[...], preferred_element_type=jnp.float32)

    # --- depthwise causal conv1d: (K-1)-row carry, window built in registers
    prev = ccar_s[...]                                     # (K-1, d_inner)
    ccar_s[...] = xc_lin[Tb - (K - 1):, :]                 # carry for next chunk
    pv = jnp.concatenate([prev, xc_lin], axis=0)           # (Tb+K-1, d_inner)
    wc = w_conv_ref[...]
    acc = jnp.broadcast_to(b_conv_ref[...], (Tb, d_inner))
    for k in range(K):                                     # static unroll (K=4)
        acc = acc + wc[k:k + 1, :] * pv[k:k + Tb, :]
    xc = _silu_poly(acc)                                   # (Tb, d_inner)
    xc_s[...] = xc

    # --- fused x_proj (delta_r | B | C in one 128-aligned matmul) + dt_proj -
    xcm = xc.astype(mm_dtype)
    dbc = jnp.dot(xcm, w_dbc_ref[...], preferred_element_type=jnp.float32)
    bm_s[...] = dbc[:, seg_b:seg_b + d_state]
    cm_s[...] = dbc[:, seg_c:seg_c + d_state]
    delta_r = dbc[:, :dt_rank].astype(mm_dtype)
    dlt_s[...] = _softplus_poly(
        jnp.dot(delta_r, w_dt_ref[...], preferred_element_type=jnp.float32)
        + b_dt_ref[...])

    A_T = -jnp.exp(a_log_t_ref[...])                       # (d_state, d_inner)

    # --- selective scan: dynamic sub-chunk loop, channel-blocked over lanes -
    def sub_chunk(s, carry):
        row0 = pl.multiple_of(s * Ts, Ts)
        dlt = dlt_s[pl.ds(row0, Ts), :]                    # (Ts, d_inner)
        xcs = xc_s[pl.ds(row0, Ts), :]
        bms = bm_s[pl.ds(row0, Ts), :]                     # (Ts, d_state)
        cms = cm_s[pl.ds(row0, Ts), :]

        da_s[...] = jnp.exp(dlt[:, None, :] * A_T[None, :, :]).astype(scan_dtype)
        bx_s[...] = ((dlt * xcs)[:, None, :] * bms[:, :, None]).astype(scan_dtype)

        # recurrence: h kept in vregs per channel block for the whole sub-chunk
        for cb in range(n_cb):                             # static, small n_cb
            csl = pl.ds(cb * cb_size, cb_size)

            def scan_blk(blk, h, csl=csl):
                t0 = pl.multiple_of(blk * unroll, unroll)
                for u in range(unroll):                    # static unroll
                    t = t0 + u
                    h = (da_s[t, :, csl].astype(jnp.float32) * h
                         + bx_s[t, :, csl].astype(jnp.float32))
                    bx_s[t, :, csl] = h.astype(scan_dtype)  # bx_s now holds h_t
                return h

            h = lax.fori_loop(0, Ts // unroll, scan_blk, h_s[:, csl])
            h_s[:, csl] = h

        # batched C-reduction + one aligned store per sub-chunk
        ys_s[pl.ds(row0, Ts), :] = jnp.sum(
            bx_s[...].astype(jnp.float32) * cms[:, :, None], axis=1)
        return carry

    lax.fori_loop(0, n_sub, sub_chunk, 0)

    # --- D skip, gate with silu(z), out_proj, residual -----------------------
    y = ys_s[...] + d_skip_ref[...] * xc_s[...]
    gated = (y * _silu_poly(z)).astype(mm_dtype)
    out = jnp.dot(gated, w_out_ref[...], preferred_element_type=jnp.float32)
    o_ref[0] = out + x_ref[0]


# ---------------------------------------------------------------------------
# wrapper: one pallas_call per layer
# ---------------------------------------------------------------------------
def make_layer_fn(B, L, d_model, d_inner, d_state, dt_rank, d_conv, *,
                  block=None, scan_chunk=None, unroll=8, cb_size=None,
                  matmul_dtype=jnp.bfloat16, scan_dtype=jnp.float32,
                  single_buffer_weights=True):
    assert d_conv >= 2
    if block is None:
        block = min(L, 256)            # raise toward 256-512 on v6e/v5e
    if scan_chunk is None:
        scan_chunk = min(block, 32)    # shrink to 16 on v7x if VMEM-tight
    assert L % block == 0
    assert block % scan_chunk == 0
    assert block >= d_conv - 1
    unroll = max(1, min(unroll, scan_chunk))
    while scan_chunk % unroll != 0:
        unroll -= 1
    if cb_size is None:
        if d_inner <= 512:
            cb_size = d_inner
        else:
            cb_size = 512
            while cb_size > 128 and d_inner % cb_size != 0:
                cb_size -= 128
            if d_inner % cb_size != 0:
                cb_size = d_inner
    assert d_inner % cb_size == 0
    n_chunks = L // block
    K = d_conv
    _, _, dbc_cols = _dbc_layout(dt_rank, d_state)

    kernel = functools.partial(
        mamba_block_kernel,
        d_inner=d_inner, d_state=d_state, dt_rank=dt_rank, d_conv=d_conv,
        block=block, scan_chunk=scan_chunk, unroll=unroll, cb_size=cb_size,
        mm_dtype=matmul_dtype, scan_dtype=scan_dtype)

    # invariant weight inputs: constant index map => single-buffer them so
    # they are resident once (not twice) -- key to fitting v7x's 64 MiB VMEM.
    if single_buffer_weights:
        def rep(shape):
            return pl.BlockSpec(shape, lambda b, c: (0,) * len(shape),
                                pipeline_mode=pl.Buffered(1))
    else:
        def rep(shape):
            return pl.BlockSpec(shape, lambda b, c: (0,) * len(shape))

    in_specs = [
        pl.BlockSpec((1, block, d_model), lambda b, c: (b, c, 0)),  # x
        rep((d_model, d_inner)),     # w_in_x
        rep((d_model, d_inner)),     # w_in_z
        rep((K, d_inner)),           # w_conv
        rep((1, d_inner)),           # b_conv
        rep((d_inner, dbc_cols)),    # w_dbc (fused delta|B|C)
        rep((dt_rank, d_inner)),     # w_dt
        rep((1, d_inner)),           # b_dt
        rep((d_state, d_inner)),     # A_log^T
        rep((1, d_inner)),           # D
        rep((d_inner, d_model)),     # w_out
    ]
    out_specs = pl.BlockSpec((1, block, d_model), lambda b, c: (b, c, 0))

    scratch_shapes = [
        pltpu.VMEM((d_state, d_inner), jnp.float32),              # h carry
        pltpu.VMEM((K - 1, d_inner), jnp.float32),                # conv carry
        pltpu.VMEM((scan_chunk, d_state, d_inner), scan_dtype),   # deltaA
        pltpu.VMEM((scan_chunk, d_state, d_inner), scan_dtype),   # deltaB*x -> h
        pltpu.VMEM((block, d_inner), jnp.float32),                # delta
        pltpu.VMEM((block, d_inner), jnp.float32),                # xc
        pltpu.VMEM((block, d_state), jnp.float32),                # B
        pltpu.VMEM((block, d_state), jnp.float32),                # C
        pltpu.VMEM((block, d_inner), jnp.float32),                # y
    ]

    # --- VMEM budget (padded) and per-generation limit -----------------------
    f32b = 4
    mmb = jnp.dtype(matmul_dtype).itemsize
    scb = jnp.dtype(scan_dtype).itemsize
    dip = _round_up(d_inner, 128)
    dmp = _round_up(d_model, 128)
    ds_sub = _round_up(d_state, 8)
    ds_lane = _round_up(d_state, 128)
    blkp = _round_up(block, 8)
    scratch_b = (f32b * (ds_sub * dip
                         + _round_up(K - 1, 8) * dip
                         + 3 * blkp * dip
                         + 2 * blkp * ds_lane)
                 + 2 * scb * scan_chunk * ds_sub * dip)
    io_b = 2 * 2 * f32b * blkp * dmp
    wbuf = 1 if single_buffer_weights else 2
    w_b = wbuf * (mmb * (2 * _round_up(d_model, 8) * dip
                         + _round_up(d_inner, 8) * _round_up(dbc_cols, 128)
                         + _round_up(dt_rank, 8) * dip
                         + _round_up(d_inner, 8) * dmp)
                  + f32b * (_round_up(K, 8) * dip + 3 * 8 * dip + ds_sub * dip))
    est = scratch_b + io_b + w_b
    cap = _vmem_capacity_bytes()
    vmem_limit = int(max(16 * 2 ** 20,
                         min(int(1.3 * est) + (8 << 20), cap - (4 << 20))))

    # --- advisory cost estimate ----------------------------------------------
    mm_flops_row = 2 * (d_model * 2 * d_inner + d_inner * dbc_cols
                        + dt_rank * d_inner + d_inner * d_model)
    scan_flops_row = 6 * d_state * d_inner + 12 * d_inner + 2 * K * d_inner
    w_bytes = (mmb * (2 * d_model * d_inner + d_inner * dbc_cols
                      + dt_rank * d_inner + d_inner * d_model)
               + f32b * ((K + 3) * d_inner + d_state * d_inner))
    cost = pl.CostEstimate(
        flops=int(B * L * (mm_flops_row + scan_flops_row)),
        transcendentals=int(B * L * d_state * d_inner
                            + B * n_chunks * d_state * d_inner),
        bytes_accessed=int(2 * B * L * d_model * f32b + w_bytes))

    grid_spec = pltpu.PrefetchScalarGridSpec(
        num_scalar_prefetch=0,
        grid=(B, n_chunks),
        in_specs=in_specs,
        out_specs=out_specs,
        scratch_shapes=scratch_shapes,
    )

    return pl.pallas_call(
        kernel,
        out_shape=jax.ShapeDtypeStruct((B, L, d_model), jnp.float32),
        grid_spec=grid_spec,
        compiler_params=pltpu.CompilerParams(
            dimension_semantics=("parallel", "arbitrary"),
            vmem_limit_bytes=vmem_limit),
        cost_estimate=cost,
    )


# ---------------------------------------------------------------------------
# deterministic parameter init (mirrors the PyTorch __init__ distributions)
# ---------------------------------------------------------------------------
def init_layer_params(key, d_model, d_inner, d_state, dt_rank, d_conv,
                      dt_min=0.001, dt_max=0.1, dt_scale=1.0,
                      dt_init_floor=1e-4):
    ks = jax.random.split(key, 7)
    lim_in = 1.0 / math.sqrt(d_model)
    w_in = jax.random.uniform(ks[0], (2 * d_inner, d_model), jnp.float32,
                              -lim_in, lim_in)
    lim_c = 1.0 / math.sqrt(d_conv)
    w_conv = jax.random.uniform(ks[1], (d_inner, d_conv), jnp.float32,
                                -lim_c, lim_c)
    b_conv = jax.random.uniform(ks[2], (d_inner,), jnp.float32, -lim_c, lim_c)
    lim_x = 1.0 / math.sqrt(d_inner)
    w_xp = jax.random.uniform(ks[3], (dt_rank + 2 * d_state, d_inner),
                              jnp.float32, -lim_x, lim_x)
    dt_init_std = dt_rank ** (-0.5) * dt_scale
    w_dt = jax.random.uniform(ks[4], (d_inner, dt_rank), jnp.float32,
                              -dt_init_std, dt_init_std)
    dt = jnp.exp(jax.random.uniform(ks[5], (d_inner,), jnp.float32)
                 * (math.log(dt_max) - math.log(dt_min)) + math.log(dt_min))
    dt = jnp.maximum(dt, dt_init_floor)
    b_dt = dt + jnp.log(-jnp.expm1(-dt))
    A_log = jnp.log(jnp.tile(
        jnp.arange(1, d_state + 1, dtype=jnp.float32)[None, :], (d_inner, 1)))
    D = jnp.ones((d_inner,), jnp.float32)
    w_out = jax.random.uniform(ks[6], (d_model, d_inner), jnp.float32,
                               -lim_x, lim_x)
    return dict(w_in=w_in, w_conv=w_conv, b_conv=b_conv, w_xp=w_xp, w_dt=w_dt,
                b_dt=b_dt, A_log=A_log, D=D, w_out=w_out)


def pack_layer_params(p, d_inner, d_state, dt_rank, matmul_dtype):
    mm = matmul_dtype
    w_in_x = jnp.asarray(p["w_in"][:d_inner].T, mm)
    w_in_z = jnp.asarray(p["w_in"][d_inner:].T, mm)
    w_conv = p["w_conv"].T
    b_conv = p["b_conv"][None, :]
    seg_b, seg_c, dbc_cols = _dbc_layout(dt_rank, d_state)
    w_dbc = jnp.zeros((d_inner, dbc_cols), jnp.float32)
    w_dbc = w_dbc.at[:, :dt_rank].set(p["w_xp"][:dt_rank].T)
    w_dbc = w_dbc.at[:, seg_b:seg_b + d_state].set(
        p["w_xp"][dt_rank:dt_rank + d_state].T)
    w_dbc = w_dbc.at[:, seg_c:seg_c + d_state].set(
        p["w_xp"][dt_rank + d_state:].T)
    w_dbc = jnp.asarray(w_dbc, mm)
    w_dt = jnp.asarray(p["w_dt"].T, mm)
    b_dt = p["b_dt"][None, :]
    a_log_t = p["A_log"].T
    d_skip = p["D"][None, :]
    w_out = jnp.asarray(p["w_out"].T, mm)
    return (w_in_x, w_in_z, w_conv, b_conv, w_dbc, w_dt, b_dt, a_log_t,
            d_skip, w_out)


def mamba_forward(x, packed_layers, layer_fn):
    # NOTE: ResidualBlock.forward is `mixer(x) + x` (its RMSNorm is constructed
    # but never applied in the reference), so each layer is block + skip.
    for args in packed_layers:
        x = layer_fn(x, *args)
    return x


# ---------------------------------------------------------------------------
# pure-JAX reference (straight transcription of the PyTorch module)
# ---------------------------------------------------------------------------
def mamba_forward_ref(x, raw_layers, d_inner, d_state, dt_rank, d_conv):
    K = d_conv
    for p in raw_layers:
        B_, L_, _ = x.shape
        xz = x @ p["w_in"].T
        xc, z = xz[..., :d_inner], xz[..., d_inner:]
        xpad = jnp.pad(xc, ((0, 0), (K - 1, 0), (0, 0)))
        conv = jnp.broadcast_to(p["b_conv"], xc.shape)
        for k in range(K):
            conv = conv + p["w_conv"][:, k] * xpad[:, k:k + L_, :]
        xc = _silu_poly(conv)
        dbc = xc @ p["w_xp"].T
        delta_r = dbc[..., :dt_rank]
        Bm = dbc[..., dt_rank:dt_rank + d_state]
        Cm = dbc[..., dt_rank + d_state:]
        delta = _softplus_poly(delta_r @ p["w_dt"].T + p["b_dt"])
        A = -jnp.exp(p["A_log"])
        dA = jnp.exp(delta[..., None] * A)
        bx = (delta * xc)[..., None] * Bm[..., None, :]

        def step(h, ins):
            dA_t, bx_t = ins
            h = dA_t * h + bx_t
            return h, h

        h0 = jnp.zeros((B_, d_inner, d_state), jnp.float32)
        _, hs = lax.scan(step, h0,
                         (jnp.moveaxis(dA, 1, 0), jnp.moveaxis(bx, 1, 0)))
        hs = jnp.moveaxis(hs, 0, 1)
        y = jnp.einsum("blds,bls->bld", hs, Cm)
        y = y + p["D"] * xc
        out = (y * _silu_poly(z)) @ p["w_out"].T
        x = out + x
    return x


if __name__ == "__main__":
    jax.config.update("jax_default_matmul_precision", "highest")

    # MambaConfig(d_model=32, n_layers=2): d_inner=64, dt_rank=2, d_state=64, d_conv=4
    B, L = 2, 32
    d_model, n_layers = 32, 2
    expand_factor, d_state, d_conv = 2, 64, 4
    d_inner = expand_factor * d_model
    dt_rank = math.ceil(d_model / 16)

    key = jax.random.PRNGKey(0)
    k_x, k_p = jax.random.split(key)
    x = jax.random.normal(k_x, (B, L, d_model), jnp.float32)
    layer_keys = jax.random.split(k_p, n_layers)
    raw = [init_layer_params(k, d_model, d_inner, d_state, dt_rank, d_conv)
           for k in layer_keys]

    # small block / scan_chunk so the toy run exercises the cross-chunk h and
    # conv carries, the dynamic sub-chunk loop and the unrolled scan loop.
    common = dict(block=16, scan_chunk=8, unroll=4)

    def run(matmul_dtype, single_buffer):
        layer = make_layer_fn(B, L, d_model, d_inner, d_state, dt_rank, d_conv,
                              matmul_dtype=matmul_dtype,
                              single_buffer_weights=single_buffer, **common)
        packed = [pack_layer_params(p, d_inner, d_state, dt_rank, matmul_dtype)
                  for p in raw]
        return jax.block_until_ready(mamba_forward(x, packed, layer))

    # exact (f32 matmul) path; fall back to default weight buffering if the
    # installed JAX rejects pl.Buffered(1) on pallas_call BlockSpecs.
    try:
        out_f32 = run(jnp.float32, True)
        single_buffer = True
    except Exception:
        out_f32 = run(jnp.float32, False)
        single_buffer = False

    ref = jax.block_until_ready(
        mamba_forward_ref(x, raw, d_inner, d_state, dt_rank, d_conv))
    assert out_f32.shape == (B, L, d_model)
    err_f32 = float(jnp.max(jnp.abs(out_f32 - ref)))
    assert err_f32 < 3e-2, f"f32 kernel mismatch vs reference: {err_f32}"

    # bf16 matmul-input path (recommended on v6e/v7x); scan stays f32.
    out_bf16 = run(jnp.bfloat16, single_buffer)
    assert bool(jnp.all(jnp.isfinite(out_bf16)))
    err_bf16 = float(jnp.max(jnp.abs(out_bf16 - ref)))
    assert err_bf16 < 0.3, f"bf16 kernel sanity check failed: {err_bf16}"

    print("KERNEL_OK")
</pallas_src>

<mosaic_0001>
module attributes {stable_mosaic.version = 11 : i64} {
  func.func @mamba_block_kernel(%arg0: i32, %arg1: i32, %arg2: memref<1x16x32xf32, #tpu.memory_space<vmem>>, %arg3: memref<32x64xf32, #tpu.memory_space<vmem>>, %arg4: memref<32x64xf32, #tpu.memory_space<vmem>>, %arg5: memref<4x64xf32, #tpu.memory_space<vmem>>, %arg6: memref<1x64xf32, #tpu.memory_space<vmem>>, %arg7: memref<64x384xf32, #tpu.memory_space<vmem>>, %arg8: memref<2x64xf32, #tpu.memory_space<vmem>>, %arg9: memref<1x64xf32, #tpu.memory_space<vmem>>, %arg10: memref<64x64xf32, #tpu.memory_space<vmem>>, %arg11: memref<1x64xf32, #tpu.memory_space<vmem>>, %arg12: memref<64x32xf32, #tpu.memory_space<vmem>>, %arg13: memref<1x16x32xf32, #tpu.memory_space<vmem>>, %arg14: memref<64x64xf32, #tpu.memory_space<vmem>>, %arg15: memref<3x64xf32, #tpu.memory_space<vmem>>, %arg16: memref<8x64x64xf32, #tpu.memory_space<vmem>>, %arg17: memref<8x64x64xf32, #tpu.memory_space<vmem>>, %arg18: memref<16x64xf32, #tpu.memory_space<vmem>>, %arg19: memref<16x64xf32, #tpu.memory_space<vmem>>, %arg20: memref<16x64xf32, #tpu.memory_space<vmem>>, %arg21: memref<16x64xf32, #tpu.memory_space<vmem>>, %arg22: memref<16x64xf32, #tpu.memory_space<vmem>>) attributes {dimension_semantics = [#tpu.dimension_semantics<parallel>, #tpu.dimension_semantics<arbitrary>], iteration_bounds = array<i64: 2, 2>, scalar_prefetch = 0 : i64, scratch_operands = 9 : i64, tpu.core_type = #tpu.core_type<tc>, window_params = [{transform_indices = @transform_0, window_bounds = array<i64: 1, 16, 32>}, {pipeline_mode = #tpu.pipeline_mode<synchronous>, transform_indices = @transform_1, window_bounds = array<i64: 32, 64>}, {pipeline_mode = #tpu.pipeline_mode<synchronous>, transform_indices = @transform_2, window_bounds = array<i64: 32, 64>}, {pipeline_mode = #tpu.pipeline_mode<synchronous>, transform_indices = @transform_3, window_bounds = array<i64: 4, 64>}, {pipeline_mode = #tpu.pipeline_mode<synchronous>, transform_indices = @transform_4, window_bounds = array<i64: 1, 64>}, {pipeline_mode = #tpu.pipeline_mode<synchronous>, transform_indices = @transform_5, window_bounds = array<i64: 64, 384>}, {pipeline_mode = #tpu.pipeline_mode<synchronous>, transform_indices = @transform_6, window_bounds = array<i64: 2, 64>}, {pipeline_mode = #tpu.pipeline_mode<synchronous>, transform_indices = @transform_7, window_bounds = array<i64: 1, 64>}, {pipeline_mode = #tpu.pipeline_mode<synchronous>, transform_indices = @transform_8, window_bounds = array<i64: 64, 64>}, {pipeline_mode = #tpu.pipeline_mode<synchronous>, transform_indices = @transform_9, window_bounds = array<i64: 1, 64>}, {pipeline_mode = #tpu.pipeline_mode<synchronous>, transform_indices = @transform_10, window_bounds = array<i64: 64, 32>}, {transform_indices = @transform_11, window_bounds = array<i64: 1, 16, 32>}]} {
    %c0_i32 = arith.constant 0 : i32
    %0 = arith.cmpi eq, %arg1, %c0_i32 : i32
    %1 = arith.extui %0 : i1 to i32
    %c0_i32_0 = arith.constant 0 : i32
    %2 = arith.cmpi ne, %1, %c0_i32_0 : i32
    scf.if %2 {
      %cst_61 = arith.constant 0.000000e+00 : f32
      %95 = vector.broadcast %cst_61 : f32 to vector<64x64xf32>
      %c0_62 = arith.constant 0 : index
      %c0_63 = arith.constant 0 : index
      %96 = vector.load %arg14[%c0_62, %c0_63] : memref<64x64xf32, #tpu.memory_space<vmem>>, vector<64x64xf32>
      tpu.vector_store %arg14[%c0_62, %c0_63], %95 {strides = array<i32>} : memref<64x64xf32, #tpu.memory_space<vmem>>, vector<64x64xf32>,
      %cst_64 = arith.constant 0.000000e+00 : f32
      %97 = vector.broadcast %cst_64 : f32 to vector<3x64xf32>
      %c0_65 = arith.constant 0 : index
      %c0_66 = arith.constant 0 : index
      %98 = vector.load %arg15[%c0_65, %c0_66] : memref<3x64xf32, #tpu.memory_space<vmem>>, vector<3x64xf32>
      tpu.vector_store %arg15[%c0_65, %c0_66], %97 {strides = array<i32>} : memref<3x64xf32, #tpu.memory_space<vmem>>, vector<3x64xf32>,
    } else {
    }
    %c0 = arith.constant 0 : index
    %c0_1 = arith.constant 0 : index
    %c0_2 = arith.constant 0 : index
    %3 = vector.load %arg2[%c0, %c0_1, %c0_2] : memref<1x16x32xf32, #tpu.memory_space<vmem>>, vector<1x16x32xf32>
    %4 = vector.shape_cast %3 : vector<1x16x32xf32> to vector<16x32xf32>
    %c0_3 = arith.constant 0 : index
    %c0_4 = arith.constant 0 : index
    %5 = vector.load %arg3[%c0_3, %c0_4] : memref<32x64xf32, #tpu.memory_space<vmem>>, vector<32x64xf32>
    %cst = arith.constant dense<0.000000e+00> : vector<16x64xf32>
    %6 = tpu.matmul %4, %5, %cst {dimension_numbers = #tpu.dot_dimension_numbers<[1], [0], [0], [1], [0, 0, 1, 1], [], []>, precision = #tpu.contract_precision<fp32>} : vector<16x32xf32>, vector<32x64xf32>, vector<16x64xf32> -> vector<16x64xf32>
    %c0_5 = arith.constant 0 : index
    %c0_6 = arith.constant 0 : index
    %7 = vector.load %arg4[%c0_5, %c0_6] : memref<32x64xf32, #tpu.memory_space<vmem>>, vector<32x64xf32>
    %cst_7 = arith.constant dense<0.000000e+00> : vector<16x64xf32>
    %8 = tpu.matmul %4, %7, %cst_7 {dimension_numbers = #tpu.dot_dimension_numbers<[1], [0], [0], [1], [0, 0, 1, 1], [], []>, precision = #tpu.contract_precision<fp32>} : vector<16x32xf32>, vector<32x64xf32>, vector<16x64xf32> -> vector<16x64xf32>
    %c0_8 = arith.constant 0 : index
    %c0_9 = arith.constant 0 : index
    %9 = vector.load %arg15[%c0_8, %c0_9] : memref<3x64xf32, #tpu.memory_space<vmem>>, vector<3x64xf32>
    %10 = vector.extract_strided_slice %6 {offsets = [13, 0], sizes = [3, 64], strides = [1, 1]} : vector<16x64xf32> to vector<3x64xf32>
    %c0_10 = arith.constant 0 : index
    %c0_11 = arith.constant 0 : index
    %11 = vector.load %arg15[%c0_10, %c0_11] : memref<3x64xf32, #tpu.memory_space<vmem>>, vector<3x64xf32>
    tpu.vector_store %arg15[%c0_10, %c0_11], %10 {strides = array<i32>} : memref<3x64xf32, #tpu.memory_space<vmem>>, vector<3x64xf32>,
    %12 = tpu.concatenate %9, %6 in 0 : vector<3x64xf32>, vector<16x64xf32> -> vector<19x64xf32>
    %c0_12 = arith.constant 0 : index
    %c0_13 = arith.constant 0 : index
    %13 = vector.load %arg5[%c0_12, %c0_13] : memref<4x64xf32, #tpu.memory_space<vmem>>, vector<4x64xf32>
    %c0_14 = arith.constant 0 : index
    %c0_15 = arith.constant 0 : index
    %14 = vector.load %arg6[%c0_14, %c0_15] : memref<1x64xf32, #tpu.memory_space<vmem>>, vector<1x64xf32>
    %15 = vector.shape_cast %14 : vector<1x64xf32> to vector<1x64xf32>
    %16 = vector.broadcast %15 : vector<1x64xf32> to vector<16x64xf32>
    %17 = vector.extract_strided_slice %13 {offsets = [0, 0], sizes = [1, 64], strides = [1, 1]} : vector<4x64xf32> to vector<1x64xf32>
    %18 = vector.extract_strided_slice %12 {offsets = [0, 0], sizes = [16, 64], strides = [1, 1]} : vector<19x64xf32> to vector<16x64xf32>
    %19 = vector.broadcast %17 : vector<1x64xf32> to vector<16x64xf32>
    %20 = arith.mulf %19, %18 : vector<16x64xf32>
    %21 = arith.addf %16, %20 : vector<16x64xf32>
    %22 = vector.extract_strided_slice %13 {offsets = [1, 0], sizes = [1, 64], strides = [1, 1]} : vector<4x64xf32> to vector<1x64xf32>
    %23 = vector.extract_strided_slice %12 {offsets = [1, 0], sizes = [16, 64], strides = [1, 1]} : vector<19x64xf32> to vector<16x64xf32>
    %24 = vector.broadcast %22 : vector<1x64xf32> to vector<16x64xf32>
    %25 = arith.mulf %24, %23 : vector<16x64xf32>
    %26 = arith.addf %21, %25 : vector<16x64xf32>
    %27 = vector.extract_strided_slice %13 {offsets = [2, 0], sizes = [1, 64], strides = [1, 1]} : vector<4x64xf32> to vector<1x64xf32>
    %28 = vector.extract_strided_slice %12 {offsets = [2, 0], sizes = [16, 64], strides = [1, 1]} : vector<19x64xf32> to vector<16x64xf32>
    %29 = vector.broadcast %27 : vector<1x64xf32> to vector<16x64xf32>
    %30 = arith.mulf %29, %28 : vector<16x64xf32>
    %31 = arith.addf %26, %30 : vector<16x64xf32>
    %32 = vector.extract_strided_slice %13 {offsets = [3, 0], sizes = [1, 64], strides = [1, 1]} : vector<4x64xf32> to vector<1x64xf32>
    %33 = vector.extract_strided_slice %12 {offsets = [3, 0], sizes = [16, 64], strides = [1, 1]} : vector<19x64xf32> to vector<16x64xf32>
    %34 = vector.broadcast %32 : vector<1x64xf32> to vector<16x64xf32>
    %35 = arith.mulf %34, %33 : vector<16x64xf32>
    %36 = arith.addf %31, %35 : vector<16x64xf32>
    %cst_16 = arith.constant 1.250000e-01 : f32
    %37 = vector.broadcast %cst_16 : f32 to vector<16x64xf32>
    %38 = arith.mulf %37, %36 : vector<16x64xf32>
    %39 = arith.mulf %38, %36 : vector<16x64xf32>
    %cst_17 = arith.constant 5.000000e-01 : f32
    %40 = vector.broadcast %cst_17 : f32 to vector<16x64xf32>
    %41 = arith.mulf %40, %36 : vector<16x64xf32>
    %42 = arith.addf %39, %41 : vector<16x64xf32>
    %cst_18 = arith.constant 1.250000e-01 : f32
    %43 = vector.broadcast %cst_18 : f32 to vector<16x64xf32>
    %44 = arith.addf %42, %43 : vector<16x64xf32>
    %c0_19 = arith.constant 0 : index
    %c0_20 = arith.constant 0 : index
    %45 = vector.load %arg19[%c0_19, %c0_20] : memref<16x64xf32, #tpu.memory_space<vmem>>, vector<16x64xf32>
    tpu.vector_store %arg19[%c0_19, %c0_20], %44 {strides = array<i32>} : memref<16x64xf32, #tpu.memory_space<vmem>>, vector<16x64xf32>,
    %c0_21 = arith.constant 0 : index
    %c0_22 = arith.constant 0 : index
    %46 = vector.load %arg7[%c0_21, %c0_22] : memref<64x384xf32, #tpu.memory_space<vmem>>, vector<64x384xf32>
    %cst_23 = arith.constant dense<0.000000e+00> : vector<16x384xf32>
    %47 = tpu.matmul %44, %46, %cst_23 {dimension_numbers = #tpu.dot_dimension_numbers<[1], [0], [0], [1], [0, 0, 1, 1], [], []>, precision = #tpu.contract_precision<fp32>} : vector<16x64xf32>, vector<64x384xf32>, vector<16x384xf32> -> vector<16x384xf32>
    %48 = vector.extract_strided_slice %47 {offsets = [0, 128], sizes = [16, 64], strides = [1, 1]} : vector<16x384xf32> to vector<16x64xf32>
    %c0_24 = arith.constant 0 : index
    %c0_25 = arith.constant 0 : index
    %49 = vector.load %arg20[%c0_24, %c0_25] : memref<16x64xf32, #tpu.memory_space<vmem>>, vector<16x64xf32>
    tpu.vector_store %arg20[%c0_24, %c0_25], %48 {strides = array<i32>} : memref<16x64xf32, #tpu.memory_space<vmem>>, vector<16x64xf32>,
    %50 = vector.extract_strided_slice %47 {offsets = [0, 256], sizes = [16, 64], strides = [1, 1]} : vector<16x384xf32> to vector<16x64xf32>
    %c0_26 = arith.constant 0 : index
    %c0_27 = arith.constant 0 : index
    %51 = vector.load %arg21[%c0_26, %c0_27] : memref<16x64xf32, #tpu.memory_space<vmem>>, vector<16x64xf32>
    tpu.vector_store %arg21[%c0_26, %c0_27], %50 {strides = array<i32>} : memref<16x64xf32, #tpu.memory_space<vmem>>, vector<16x64xf32>,
    %52 = vector.extract_strided_slice %47 {offsets = [0, 0], sizes = [16, 2], strides = [1, 1]} : vector<16x384xf32> to vector<16x2xf32>
    %c0_28 = arith.constant 0 : index
    %c0_29 = arith.constant 0 : index
    %53 = vector.load %arg8[%c0_28, %c0_29] : memref<2x64xf32, #tpu.memory_space<vmem>>, vector<2x64xf32>
    %cst_30 = arith.constant dense<0.000000e+00> : vector<16x64xf32>
    %54 = tpu.matmul %52, %53, %cst_30 {dimension_numbers = #tpu.dot_dimension_numbers<[1], [0], [0], [1], [0, 0, 1, 1], [], []>, precision = #tpu.contract_precision<fp32>} : vector<16x2xf32>, vector<2x64xf32>, vector<16x64xf32> -> vector<16x64xf32>
    %c0_31 = arith.constant 0 : index
    %c0_32 = arith.constant 0 : index
    %55 = vector.load %arg9[%c0_31, %c0_32] : memref<1x64xf32, #tpu.memory_space<vmem>>, vector<1x64xf32>
    %56 = vector.broadcast %55 : vector<1x64xf32> to vector<16x64xf32>
    %57 = arith.addf %54, %56 : vector<16x64xf32>
    %cst_33 = arith.constant 6.250000e-02 : f32
    %58 = vector.broadcast %cst_33 : f32 to vector<16x64xf32>
    %59 = arith.mulf %58, %57 : vector<16x64xf32>
    %60 = arith.mulf %59, %57 : vector<16x64xf32>
    %cst_34 = arith.constant 5.000000e-01 : f32
    %61 = vector.broadcast %cst_34 : f32 to vector<16x64xf32>
    %62 = arith.mulf %61, %57 : vector<16x64xf32>
    %63 = arith.addf %60, %62 : vector<16x64xf32>
    %cst_35 = arith.constant 1.000000e+00 : f32
    %64 = vector.broadcast %cst_35 : f32 to vector<16x64xf32>
    %65 = arith.addf %63, %64 : vector<16x64xf32>
    %c0_36 = arith.constant 0 : index
    %c0_37 = arith.constant 0 : index
    %66 = vector.load %arg18[%c0_36, %c0_37] : memref<16x64xf32, #tpu.memory_space<vmem>>, vector<16x64xf32>
    tpu.vector_store %arg18[%c0_36, %c0_37], %65 {strides = array<i32>} : memref<16x64xf32, #tpu.memory_space<vmem>>, vector<16x64xf32>,
    %c0_38 = arith.constant 0 : index
    %c0_39 = arith.constant 0 : index
    %67 = vector.load %arg10[%c0_38, %c0_39] : memref<64x64xf32, #tpu.memory_space<vmem>>, vector<64x64xf32>
    %68 = math.exp %67 : vector<64x64xf32>
    %cst_40 = arith.constant 0.000000e+00 : f32
    %69 = vector.broadcast %cst_40 : f32 to vector<64x64xf32>
    %70 = arith.subf %69, %68 : vector<64x64xf32>
    %c0_i32_41 = arith.constant 0 : i32
    %c2_i32 = arith.constant 2 : i32
    %71 = arith.addi %c0_i32_41, %c2_i32 : i32
    %c1_i32 = arith.constant 1 : i32
    scf.for %arg23 = %c0_i32_41 to %71 step %c1_i32  : i32 {
      %c8_i32 = arith.constant 8 : i32
      %95 = arith.muli %arg23, %c8_i32 : i32
      %96 = tpu.assume_multiple %95, 8 : i32
      %97 = arith.index_cast %96 : i32 to index
      %c0_61 = arith.constant 0 : index
      %98 = vector.load %arg18[%97, %c0_61] : memref<16x64xf32, #tpu.memory_space<vmem>>, vector<8x64xf32>
      %99 = arith.index_cast %96 : i32 to index
      %c0_62 = arith.constant 0 : index
      %100 = vector.load %arg19[%99, %c0_62] : memref<16x64xf32, #tpu.memory_space<vmem>>, vector<8x64xf32>
      %101 = arith.index_cast %96 : i32 to index
      %c0_63 = arith.constant 0 : index
      %102 = vector.load %arg20[%101, %c0_63] : memref<16x64xf32, #tpu.memory_space<vmem>>, vector<8x64xf32>
      %103 = arith.index_cast %96 : i32 to index
      %c0_64 = arith.constant 0 : index
      %104 = vector.load %arg21[%103, %c0_64] : memref<16x64xf32, #tpu.memory_space<vmem>>, vector<8x64xf32>
      %105 = vector.shape_cast %98 : vector<8x64xf32> to vector<8x1x64xf32>
      %106 = vector.shape_cast %70 : vector<64x64xf32> to vector<1x64x64xf32>
      %107 = vector.broadcast %105 : vector<8x1x64xf32> to vector<8x64x64xf32>
      %108 = vector.broadcast %106 : vector<1x64x64xf32> to vector<8x64x64xf32>
      %109 = arith.mulf %107, %108 : vector<8x64x64xf32>
      %110 = math.exp %109 : vector<8x64x64xf32>
      %c0_65 = arith.constant 0 : index
      %c0_66 = arith.constant 0 : index
      %c0_67 = arith.constant 0 : index
      %111 = vector.load %arg16[%c0_65, %c0_66, %c0_67] : memref<8x64x64xf32, #tpu.memory_space<vmem>>, vector<8x64x64xf32>
      tpu.vector_store %arg16[%c0_65, %c0_66, %c0_67], %110 {strides = array<i32>} : memref<8x64x64xf32, #tpu.memory_space<vmem>>, vector<8x64x64xf32>,
      %112 = arith.mulf %98, %100 : vector<8x64xf32>
      %113 = vector.shape_cast %112 : vector<8x64xf32> to vector<8x1x64xf32>
      %114 = vector.shape_cast %102 : vector<8x64xf32> to vector<8x64x1xf32>
      %115 = vector.broadcast %113 : vector<8x1x64xf32> to vector<8x64x64xf32>
      %116 = vector.broadcast %114 : vector<8x64x1xf32> to vector<8x64x64xf32>
      %117 = arith.mulf %115, %116 : vector<8x64x64xf32>
      %c0_68 = arith.constant 0 : index
      %c0_69 = arith.constant 0 : index
      %c0_70 = arith.constant 0 : index
      %118 = vector.load %arg17[%c0_68, %c0_69, %c0_70] : memref<8x64x64xf32, #tpu.memory_space<vmem>>, vector<8x64x64xf32>
      tpu.vector_store %arg17[%c0_68, %c0_69, %c0_70], %117 {strides = array<i32>} : memref<8x64x64xf32, #tpu.memory_space<vmem>>, vector<8x64x64xf32>,
      %c0_71 = arith.constant 0 : index
      %c0_72 = arith.constant 0 : index
      %119 = vector.load %arg14[%c0_71, %c0_72] : memref<64x64xf32, #tpu.memory_space<vmem>>, vector<64x64xf32>
      %c0_i32_73 = arith.constant 0 : i32
      %c2_i32_74 = arith.constant 2 : i32
      %120 = arith.addi %c0_i32_73, %c2_i32_74 : i32
      %c1_i32_75 = arith.constant 1 : i32
      %121 = scf.for %arg24 = %c0_i32_73 to %120 step %c1_i32_75 iter_args(%arg25 = %119) -> (vector<64x64xf32>)  : i32 {
        %c4_i32 = arith.constant 4 : i32
        %130 = arith.muli %arg24, %c4_i32 : i32
        %131 = tpu.assume_multiple %130, 4 : i32
        %c0_i32_84 = arith.constant 0 : i32
        %132 = arith.addi %131, %c0_i32_84 : i32
        %133 = arith.index_cast %132 : i32 to index
        %c0_85 = arith.constant 0 : index
        %c0_86 = arith.constant 0 : index
        %134 = vector.load %arg16[%133, %c0_85, %c0_86] : memref<8x64x64xf32, #tpu.memory_space<vmem>>, vector<1x64x64xf32>
        %135 = vector.shape_cast %134 : vector<1x64x64xf32> to vector<64x64xf32>
        %136 = arith.mulf %135, %arg25 : vector<64x64xf32>
        %137 = arith.index_cast %132 : i32 to index
        %c0_87 = arith.constant 0 : index
        %c0_88 = arith.constant 0 : index
        %138 = vector.load %arg17[%137, %c0_87, %c0_88] : memref<8x64x64xf32, #tpu.memory_space<vmem>>, vector<1x64x64xf32>
        %139 = vector.shape_cast %138 : vector<1x64x64xf32> to vector<64x64xf32>
        %140 = arith.addf %136, %139 : vector<64x64xf32>
        %141 = arith.index_cast %132 : i32 to index
        %c0_89 = arith.constant 0 : index
        %c0_90 = arith.constant 0 : index
        %142 = vector.load %arg17[%141, %c0_89, %c0_90] : memref<8x64x64xf32, #tpu.memory_space<vmem>>, vector<1x64x64xf32>
        %143 = vector.shape_cast %142 : vector<1x64x64xf32> to vector<64x64xf32>
        %144 = vector.shape_cast %140 : vector<64x64xf32> to vector<1x64x64xf32>
        tpu.vector_store %arg17[%141, %c0_89, %c0_90], %144 {strides = array<i32>} : memref<8x64x64xf32, #tpu.memory_space<vmem>>, vector<1x64x64xf32>,
        %c1_i32_91 = arith.constant 1 : i32
        %145 = arith.addi %131, %c1_i32_91 : i32
        %146 = arith.index_cast %145 : i32 to index
        %c0_92 = arith.constant 0 : index
        %c0_93 = arith.constant 0 : index
        %147 = vector.load %arg16[%146, %c0_92, %c0_93] : memref<8x64x64xf32, #tpu.memory_space<vmem>>, vector<1x64x64xf32>
        %148 = vector.shape_cast %147 : vector<1x64x64xf32> to vector<64x64xf32>
        %149 = arith.mulf %148, %140 : vector<64x64xf32>
        %150 = arith.index_cast %145 : i32 to index
        %c0_94 = arith.constant 0 : index
        %c0_95 = arith.constant 0 : index
        %151 = vector.load %arg17[%150, %c0_94, %c0_95] : memref<8x64x64xf32, #tpu.memory_space<vmem>>, vector<1x64x64xf32>
        %152 = vector.shape_cast %151 : vector<1x64x64xf32> to vector<64x64xf32>
        %153 = arith.addf %149, %152 : vector<64x64xf32>
        %154 = arith.index_cast %145 : i32 to index
        %c0_96 = arith.constant 0 : index
        %c0_97 = arith.constant 0 : index
        %155 = vector.load %arg17[%154, %c0_96, %c0_97] : memref<8x64x64xf32, #tpu.memory_space<vmem>>, vector<1x64x64xf32>
        %156 = vector.shape_cast %155 : vector<1x64x64xf32> to vector<64x64xf32>
        %157 = vector.shape_cast %153 : vector<64x64xf32> to vector<1x64x64xf32>
        tpu.vector_store %arg17[%154, %c0_96, %c0_97], %157 {strides = array<i32>} : memref<8x64x64xf32, #tpu.memory_space<vmem>>, vector<1x64x64xf32>,
        %c2_i32_98 = arith.constant 2 : i32
        %158 = arith.addi %131, %c2_i32_98 : i32
        %159 = arith.index_cast %158 : i32 to index
        %c0_99 = arith.constant 0 : index
        %c0_100 = arith.constant 0 : index
        %160 = vector.load %arg16[%159, %c0_99, %c0_100] : memref<8x64x64xf32, #tpu.memory_space<vmem>>, vector<1x64x64xf32>
        %161 = vector.shape_cast %160 : vector<1x64x64xf32> to vector<64x64xf32>
        %162 = arith.mulf %161, %153 : vector<64x64xf32>
        %163 = arith.index_cast %158 : i32 to index
        %c0_101 = arith.constant 0 : index
        %c0_102 = arith.constant 0 : index
        %164 = vector.load %arg17[%163, %c0_101, %c0_102] : memref<8x64x64xf32, #tpu.memory_space<vmem>>, vector<1x64x64xf32>
        %165 = vector.shape_cast %164 : vector<1x64x64xf32> to vector<64x64xf32>
        %166 = arith.addf %162, %165 : vector<64x64xf32>
        %167 = arith.index_cast %158 : i32 to index
        %c0_103 = arith.constant 0 : index
        %c0_104 = arith.constant 0 : index
        %168 = vector.load %arg17[%167, %c0_103, %c0_104] : memref<8x64x64xf32, #tpu.memory_space<vmem>>, vector<1x64x64xf32>
        %169 = vector.shape_cast %168 : vector<1x64x64xf32> to vector<64x64xf32>
        %170 = vector.shape_cast %166 : vector<64x64xf32> to vector<1x64x64xf32>
        tpu.vector_store %arg17[%167, %c0_103, %c0_104], %170 {strides = array<i32>} : memref<8x64x64xf32, #tpu.memory_space<vmem>>, vector<1x64x64xf32>,
        %c3_i32 = arith.constant 3 : i32
        %171 = arith.addi %131, %c3_i32 : i32
        %172 = arith.index_cast %171 : i32 to index
        %c0_105 = arith.constant 0 : index
        %c0_106 = arith.constant 0 : index
        %173 = vector.load %arg16[%172, %c0_105, %c0_106] : memref<8x64x64xf32, #tpu.memory_space<vmem>>, vector<1x64x64xf32>
        %174 = vector.shape_cast %173 : vector<1x64x64xf32> to vector<64x64xf32>
        %175 = arith.mulf %174, %166 : vector<64x64xf32>
        %176 = arith.index_cast %171 : i32 to index
        %c0_107 = arith.constant 0 : index
        %c0_108 = arith.constant 0 : index
        %177 = vector.load %arg17[%176, %c0_107, %c0_108] : memref<8x64x64xf32, #tpu.memory_space<vmem>>, vector<1x64x64xf32>
        %178 = vector.shape_cast %177 : vector<1x64x64xf32> to vector<64x64xf32>
        %179 = arith.addf %175, %178 : vector<64x64xf32>
        %180 = arith.index_cast %171 : i32 to index
        %c0_109 = arith.constant 0 : index
        %c0_110 = arith.constant 0 : index
        %181 = vector.load %arg17[%180, %c0_109, %c0_110] : memref<8x64x64xf32, #tpu.memory_space<vmem>>, vector<1x64x64xf32>
        %182 = vector.shape_cast %181 : vector<1x64x64xf32> to vector<64x64xf32>
        %183 = vector.shape_cast %179 : vector<64x64xf32> to vector<1x64x64xf32>
        tpu.vector_store %arg17[%180, %c0_109, %c0_110], %183 {strides = array<i32>} : memref<8x64x64xf32, #tpu.memory_space<vmem>>, vector<1x64x64xf32>,
        scf.yield %179 : vector<64x64xf32>
      }
      %c2_i32_76 = arith.constant 2 : i32
      %c0_77 = arith.constant 0 : index
      %c0_78 = arith.constant 0 : index
      %122 = vector.load %arg14[%c0_77, %c0_78] : memref<64x64xf32, #tpu.memory_space<vmem>>, vector<64x64xf32>
      tpu.vector_store %arg14[%c0_77, %c0_78], %121 {strides = array<i32>} : memref<64x64xf32, #tpu.memory_space<vmem>>, vector<64x64xf32>,
      %c0_79 = arith.constant 0 : index
      %c0_80 = arith.constant 0 : index
      %c0_81 = arith.constant 0 : index
      %123 = vector.load %arg17[%c0_79, %c0_80, %c0_81] : memref<8x64x64xf32, #tpu.memory_space<vmem>>, vector<8x64x64xf32>
      %124 = vector.shape_cast %104 : vector<8x64xf32> to vector<8x64x1xf32>
      %125 = vector.broadcast %124 : vector<8x64x1xf32> to vector<8x64x64xf32>
      %126 = arith.mulf %123, %125 : vector<8x64x64xf32>
      %cst_82 = arith.constant dense<0.000000e+00> : vector<8x64xf32>
      %127 = vector.multi_reduction <add>, %126, %cst_82 [1] : vector<8x64x64xf32> to vector<8x64xf32>
      %128 = arith.index_cast %96 : i32 to index
      %c0_83 = arith.constant 0 : index
      %129 = vector.load %arg22[%128, %c0_83] : memref<16x64xf32, #tpu.memory_space<vmem>>, vector<8x64xf32>
      tpu.vector_store %arg22[%128, %c0_83], %127 {strides = array<i32>} : memref<16x64xf32, #tpu.memory_space<vmem>>, vector<8x64xf32>,
    }
    %c2_i32_42 = arith.constant 2 : i32
    %c0_43 = arith.constant 0 : index
    %c0_44 = arith.constant 0 : index
    %72 = vector.load %arg22[%c0_43, %c0_44] : memref<16x64xf32, #tpu.memory_space<vmem>>, vector<16x64xf32>
    %c0_45 = arith.constant 0 : index
    %c0_46 = arith.constant 0 : index
    %73 = vector.load %arg11[%c0_45, %c0_46] : memref<1x64xf32, #tpu.memory_space<vmem>>, vector<1x64xf32>
    %c0_47 = arith.constant 0 : index
    %c0_48 = arith.constant 0 : index
    %74 = vector.load %arg19[%c0_47, %c0_48] : memref<16x64xf32, #tpu.memory_space<vmem>>, vector<16x64xf32>
    %75 = vector.broadcast %73 : vector<1x64xf32> to vector<16x64xf32>
    %76 = arith.mulf %75, %74 : vector<16x64xf32>
    %77 = arith.addf %72, %76 : vector<16x64xf32>
    %cst_49 = arith.constant 1.250000e-01 : f32
    %78 = vector.broadcast %cst_49 : f32 to vector<16x64xf32>
    %79 = arith.mulf %78, %8 : vector<16x64xf32>
    %80 = arith.mulf %79, %8 : vector<16x64xf32>
    %cst_50 = arith.constant 5.000000e-01 : f32
    %81 = vector.broadcast %cst_50 : f32 to vector<16x64xf32>
    %82 = arith.mulf %81, %8 : vector<16x64xf32>
    %83 = arith.addf %80, %82 : vector<16x64xf32>
    %cst_51 = arith.constant 1.250000e-01 : f32
    %84 = vector.broadcast %cst_51 : f32 to vector<16x64xf32>
    %85 = arith.addf %83, %84 : vector<16x64xf32>
    %86 = arith.mulf %77, %85 : vector<16x64xf32>
    %c0_52 = arith.constant 0 : index
    %c0_53 = arith.constant 0 : index
    %87 = vector.load %arg12[%c0_52, %c0_53] : memref<64x32xf32, #tpu.memory_space<vmem>>, vector<64x32xf32>
    %cst_54 = arith.constant dense<0.000000e+00> : vector<16x32xf32>
    %88 = tpu.matmul %86, %87, %cst_54 {dimension_numbers = #tpu.dot_dimension_numbers<[1], [0], [0], [1], [0, 0, 1, 1], [], []>, precision = #tpu.contract_precision<fp32>} : vector<16x64xf32>, vector<64x32xf32>, vector<16x32xf32> -> vector<16x32xf32>
    %c0_55 = arith.constant 0 : index
    %c0_56 = arith.constant 0 : index
    %c0_57 = arith.constant 0 : index
    %89 = vector.load %arg2[%c0_55, %c0_56, %c0_57] : memref<1x16x32xf32, #tpu.memory_space<vmem>>, vector<1x16x32xf32>
    %90 = vector.shape_cast %89 : vector<1x16x32xf32> to vector<16x32xf32>
    %91 = arith.addf %88, %90 : vector<16x32xf32>
    %c0_58 = arith.constant 0 : index
    %c0_59 = arith.constant 0 : index
    %c0_60 = arith.constant 0 : index
    %92 = vector.load %arg13[%c0_58, %c0_59, %c0_60] : memref<1x16x32xf32, #tpu.memory_space<vmem>>, vector<1x16x32xf32>
    %93 = vector.shape_cast %92 : vector<1x16x32xf32> to vector<16x32xf32>
    %94 = vector.shape_cast %91 : vector<16x32xf32> to vector<1x16x32xf32>
    tpu.vector_store %arg13[%c0_58, %c0_59, %c0_60], %94 {strides = array<i32>} : memref<1x16x32xf32, #tpu.memory_space<vmem>>, vector<1x16x32xf32>,
    return
  }
  func.func @transform_0(%arg0: i32, %arg1: i32) -> (i32, i32, i32) {
    %c0_i32 = arith.constant 0 : i32
    %c0_i32_0 = arith.constant 0 : i32
    return %arg0, %arg1, %c0_i32 : i32, i32, i32
  }
  func.func @transform_1(%arg0: i32, %arg1: i32) -> (i32, i32) {
    %c0_i32 = arith.constant 0 : i32
    %c0_i32_0 = arith.constant 0 : i32
    %c0_i32_1 = arith.constant 0 : i32
    return %c0_i32, %c0_i32_0 : i32, i32
  }
  func.func @transform_2(%arg0: i32, %arg1: i32) -> (i32, i32) {
    %c0_i32 = arith.constant 0 : i32
    %c0_i32_0 = arith.constant 0 : i32
    %c0_i32_1 = arith.constant 0 : i32
    return %c0_i32, %c0_i32_0 : i32, i32
  }
  func.func @transform_3(%arg0: i32, %arg1: i32) -> (i32, i32) {
    %c0_i32 = arith.constant 0 : i32
    %c0_i32_0 = arith.constant 0 : i32
    %c0_i32_1 = arith.constant 0 : i32
    return %c0_i32, %c0_i32_0 : i32, i32
  }
  func.func @transform_4(%arg0: i32, %arg1: i32) -> (i32, i32) {
    %c0_i32 = arith.constant 0 : i32
    %c0_i32_0 = arith.constant 0 : i32
    %c0_i32_1 = arith.constant 0 : i32
    return %c0_i32, %c0_i32_0 : i32, i32
  }
  func.func @transform_5(%arg0: i32, %arg1: i32) -> (i32, i32) {
    %c0_i32 = arith.constant 0 : i32
    %c0_i32_0 = arith.constant 0 : i32
    %c0_i32_1 = arith.constant 0 : i32
    return %c0_i32, %c0_i32_0 : i32, i32
  }
  func.func @transform_6(%arg0: i32, %arg1: i32) -> (i32, i32) {
    %c0_i32 = arith.constant 0 : i32
    %c0_i32_0 = arith.constant 0 : i32
    %c0_i32_1 = arith.constant 0 : i32
    return %c0_i32, %c0_i32_0 : i32, i32
  }
  func.func @transform_7(%arg0: i32, %arg1: i32) -> (i32, i32) {
    %c0_i32 = arith.constant 0 : i32
    %c0_i32_0 = arith.constant 0 : i32
    %c0_i32_1 = arith.constant 0 : i32
    return %c0_i32, %c0_i32_0 : i32, i32
  }
  func.func @transform_8(%arg0: i32, %arg1: i32) -> (i32, i32) {
    %c0_i32 = arith.constant 0 : i32
    %c0_i32_0 = arith.constant 0 : i32
    %c0_i32_1 = arith.constant 0 : i32
    return %c0_i32, %c0_i32_0 : i32, i32
  }
  func.func @transform_9(%arg0: i32, %arg1: i32) -> (i32, i32) {
    %c0_i32 = arith.constant 0 : i32
    %c0_i32_0 = arith.constant 0 : i32
    %c0_i32_1 = arith.constant 0 : i32
    return %c0_i32, %c0_i32_0 : i32, i32
  }
  func.func @transform_10(%arg0: i32, %arg1: i32) -> (i32, i32) {
    %c0_i32 = arith.constant 0 : i32
    %c0_i32_0 = arith.constant 0 : i32
    %c0_i32_1 = arith.constant 0 : i32
    return %c0_i32, %c0_i32_0 : i32, i32
  }
  func.func @transform_11(%arg0: i32, %arg1: i32) -> (i32, i32, i32) {
    %c0_i32 = arith.constant 0 : i32
    %c0_i32_0 = arith.constant 0 : i32
    return %arg0, %arg1, %c0_i32 : i32, i32, i32
  }
}

module attributes {stable_mosaic.version = 11 : i64} {
  func.func @mamba_block_kernel(%arg0: i32, %arg1: i32, %arg2: memref<1x16x32xf32, #tpu.memory_space<vmem>>, %arg3: memref<32x64xf32, #tpu.memory_space<vmem>>, %arg4: memref<32x64xf32, #tpu.memory_space<vmem>>, %arg5: memref<4x64xf32, #tpu.memory_space<vmem>>, %arg6: memref<1x64xf32, #tpu.memory_space<vmem>>, %arg7: memref<64x384xf32, #tpu.memory_space<vmem>>, %arg8: memref<2x64xf32, #tpu.memory_space<vmem>>, %arg9: memref<1x64xf32, #tpu.memory_space<vmem>>, %arg10: memref<64x64xf32, #tpu.memory_space<vmem>>, %arg11: memref<1x64xf32, #tpu.memory_space<vmem>>, %arg12: memref<64x32xf32, #tpu.memory_space<vmem>>, %arg13: memref<1x16x32xf32, #tpu.memory_space<vmem>>, %arg14: memref<64x64xf32, #tpu.memory_space<vmem>>, %arg15: memref<3x64xf32, #tpu.memory_space<vmem>>, %arg16: memref<8x64x64xf32, #tpu.memory_space<vmem>>, %arg17: memref<8x64x64xf32, #tpu.memory_space<vmem>>, %arg18: memref<16x64xf32, #tpu.memory_space<vmem>>, %arg19: memref<16x64xf32, #tpu.memory_space<vmem>>, %arg20: memref<16x64xf32, #tpu.memory_space<vmem>>, %arg21: memref<16x64xf32, #tpu.memory_space<vmem>>, %arg22: memref<16x64xf32, #tpu.memory_space<vmem>>) attributes {dimension_semantics = [#tpu.dimension_semantics<parallel>, #tpu.dimension_semantics<arbitrary>], iteration_bounds = array<i64: 2, 2>, scalar_prefetch = 0 : i64, scratch_operands = 9 : i64, tpu.core_type = #tpu.core_type<tc>, window_params = [{transform_indices = @transform_0, window_bounds = array<i64: 1, 16, 32>}, {pipeline_mode = #tpu.pipeline_mode<synchronous>, transform_indices = @transform_1, window_bounds = array<i64: 32, 64>}, {pipeline_mode = #tpu.pipeline_mode<synchronous>, transform_indices = @transform_2, window_bounds = array<i64: 32, 64>}, {pipeline_mode = #tpu.pipeline_mode<synchronous>, transform_indices = @transform_3, window_bounds = array<i64: 4, 64>}, {pipeline_mode = #tpu.pipeline_mode<synchronous>, transform_indices = @transform_4, window_bounds = array<i64: 1, 64>}, {pipeline_mode = #tpu.pipeline_mode<synchronous>, transform_indices = @transform_5, window_bounds = array<i64: 64, 384>}, {pipeline_mode = #tpu.pipeline_mode<synchronous>, transform_indices = @transform_6, window_bounds = array<i64: 2, 64>}, {pipeline_mode = #tpu.pipeline_mode<synchronous>, transform_indices = @transform_7, window_bounds = array<i64: 1, 64>}, {pipeline_mode = #tpu.pipeline_mode<synchronous>, transform_indices = @transform_8, window_bounds = array<i64: 64, 64>}, {pipeline_mode = #tpu.pipeline_mode<synchronous>, transform_indices = @transform_9, window_bounds = array<i64: 1, 64>}, {pipeline_mode = #tpu.pipeline_mode<synchronous>, transform_indices = @transform_10, window_bounds = array<i64: 64, 32>}, {transform_indices = @transform_11, window_bounds = array<i64: 1, 16, 32>}]} {
    %c0_i32 = arith.constant 0 : i32
    %0 = arith.cmpi eq, %arg1, %c0_i32 : i32
    %1 = arith.extui %0 : i1 to i32
    %c0_i32_0 = arith.constant 0 : i32
    %2 = arith.cmpi ne, %1, %c0_i32_0 : i32
    scf.if %2 {
      %cst_61 = arith.constant 0.000000e+00 : f32
      %95 = vector.broadcast %cst_61 : f32 to vector<64x64xf32>
      %c0_62 = arith.constant 0 : index
      %c0_63 = arith.constant 0 : index
      %96 = vector.load %arg14[%c0_62, %c0_63] : memref<64x64xf32, #tpu.memory_space<vmem>>, vector<64x64xf32>
      tpu.vector_store %arg14[%c0_62, %c0_63], %95 {strides = array<i32>} : memref<64x64xf32, #tpu.memory_space<vmem>>, vector<64x64xf32>,
      %cst_64 = arith.constant 0.000000e+00 : f32
      %97 = vector.broadcast %cst_64 : f32 to vector<3x64xf32>
      %c0_65 = arith.constant 0 : index
      %c0_66 = arith.constant 0 : index
      %98 = vector.load %arg15[%c0_65, %c0_66] : memref<3x64xf32, #tpu.memory_space<vmem>>, vector<3x64xf32>
      tpu.vector_store %arg15[%c0_65, %c0_66], %97 {strides = array<i32>} : memref<3x64xf32, #tpu.memory_space<vmem>>, vector<3x64xf32>,
    } else {
    }
    %c0 = arith.constant 0 : index
    %c0_1 = arith.constant 0 : index
    %c0_2 = arith.constant 0 : index
    %3 = vector.load %arg2[%c0, %c0_1, %c0_2] : memref<1x16x32xf32, #tpu.memory_space<vmem>>, vector<1x16x32xf32>
    %4 = vector.shape_cast %3 : vector<1x16x32xf32> to vector<16x32xf32>
    %c0_3 = arith.constant 0 : index
    %c0_4 = arith.constant 0 : index
    %5 = vector.load %arg3[%c0_3, %c0_4] : memref<32x64xf32, #tpu.memory_space<vmem>>, vector<32x64xf32>
    %cst = arith.constant dense<0.000000e+00> : vector<16x64xf32>
    %6 = tpu.matmul %4, %5, %cst {dimension_numbers = #tpu.dot_dimension_numbers<[1], [0], [0], [1], [0, 0, 1, 1], [], []>, precision = #tpu.contract_precision<fp32>} : vector<16x32xf32>, vector<32x64xf32>, vector<16x64xf32> -> vector<16x64xf32>
    %c0_5 = arith.constant 0 : index
    %c0_6 = arith.constant 0 : index
    %7 = vector.load %arg4[%c0_5, %c0_6] : memref<32x64xf32, #tpu.memory_space<vmem>>, vector<32x64xf32>
    %cst_7 = arith.constant dense<0.000000e+00> : vector<16x64xf32>
    %8 = tpu.matmul %4, %7, %cst_7 {dimension_numbers = #tpu.dot_dimension_numbers<[1], [0], [0], [1], [0, 0, 1, 1], [], []>, precision = #tpu.contract_precision<fp32>} : vector<16x32xf32>, vector<32x64xf32>, vector<16x64xf32> -> vector<16x64xf32>
    %c0_8 = arith.constant 0 : index
    %c0_9 = arith.constant 0 : index
    %9 = vector.load %arg15[%c0_8, %c0_9] : memref<3x64xf32, #tpu.memory_space<vmem>>, vector<3x64xf32>
    %10 = vector.extract_strided_slice %6 {offsets = [13, 0], sizes = [3, 64], strides = [1, 1]} : vector<16x64xf32> to vector<3x64xf32>
    %c0_10 = arith.constant 0 : index
    %c0_11 = arith.constant 0 : index
    %11 = vector.load %arg15[%c0_10, %c0_11] : memref<3x64xf32, #tpu.memory_space<vmem>>, vector<3x64xf32>
    tpu.vector_store %arg15[%c0_10, %c0_11], %10 {strides = array<i32>} : memref<3x64xf32, #tpu.memory_space<vmem>>, vector<3x64xf32>,
    %12 = tpu.concatenate %9, %6 in 0 : vector<3x64xf32>, vector<16x64xf32> -> vector<19x64xf32>
    %c0_12 = arith.constant 0 : index
    %c0_13 = arith.constant 0 : index
    %13 = vector.load %arg5[%c0_12, %c0_13] : memref<4x64xf32, #tpu.memory_space<vmem>>, vector<4x64xf32>
    %c0_14 = arith.constant 0 : index
    %c0_15 = arith.constant 0 : index
    %14 = vector.load %arg6[%c0_14, %c0_15] : memref<1x64xf32, #tpu.memory_space<vmem>>, vector<1x64xf32>
    %15 = vector.shape_cast %14 : vector<1x64xf32> to vector<1x64xf32>
    %16 = vector.broadcast %15 : vector<1x64xf32> to vector<16x64xf32>
    %17 = vector.extract_strided_slice %13 {offsets = [0, 0], sizes = [1, 64], strides = [1, 1]} : vector<4x64xf32> to vector<1x64xf32>
    %18 = vector.extract_strided_slice %12 {offsets = [0, 0], sizes = [16, 64], strides = [1, 1]} : vector<19x64xf32> to vector<16x64xf32>
    %19 = vector.broadcast %17 : vector<1x64xf32> to vector<16x64xf32>
    %20 = arith.mulf %19, %18 : vector<16x64xf32>
    %21 = arith.addf %16, %20 : vector<16x64xf32>
    %22 = vector.extract_strided_slice %13 {offsets = [1, 0], sizes = [1, 64], strides = [1, 1]} : vector<4x64xf32> to vector<1x64xf32>
    %23 = vector.extract_strided_slice %12 {offsets = [1, 0], sizes = [16, 64], strides = [1, 1]} : vector<19x64xf32> to vector<16x64xf32>
    %24 = vector.broadcast %22 : vector<1x64xf32> to vector<16x64xf32>
    %25 = arith.mulf %24, %23 : vector<16x64xf32>
    %26 = arith.addf %21, %25 : vector<16x64xf32>
    %27 = vector.extract_strided_slice %13 {offsets = [2, 0], sizes = [1, 64], strides = [1, 1]} : vector<4x64xf32> to vector<1x64xf32>
    %28 = vector.extract_strided_slice %12 {offsets = [2, 0], sizes = [16, 64], strides = [1, 1]} : vector<19x64xf32> to vector<16x64xf32>
    %29 = vector.broadcast %27 : vector<1x64xf32> to vector<16x64xf32>
    %30 = arith.mulf %29, %28 : vector<16x64xf32>
    %31 = arith.addf %26, %30 : vector<16x64xf32>
    %32 = vector.extract_strided_slice %13 {offsets = [3, 0], sizes = [1, 64], strides = [1, 1]} : vector<4x64xf32> to vector<1x64xf32>
    %33 = vector.extract_strided_slice %12 {offsets = [3, 0], sizes = [16, 64], strides = [1, 1]} : vector<19x64xf32> to vector<16x64xf32>
    %34 = vector.broadcast %32 : vector<1x64xf32> to vector<16x64xf32>
    %35 = arith.mulf %34, %33 : vector<16x64xf32>
    %36 = arith.addf %31, %35 : vector<16x64xf32>
    %cst_16 = arith.constant 1.250000e-01 : f32
    %37 = vector.broadcast %cst_16 : f32 to vector<16x64xf32>
    %38 = arith.mulf %37, %36 : vector<16x64xf32>
    %39 = arith.mulf %38, %36 : vector<16x64xf32>
    %cst_17 = arith.constant 5.000000e-01 : f32
    %40 = vector.broadcast %cst_17 : f32 to vector<16x64xf32>
    %41 = arith.mulf %40, %36 : vector<16x64xf32>
    %42 = arith.addf %39, %41 : vector<16x64xf32>
    %cst_18 = arith.constant 1.250000e-01 : f32
    %43 = vector.broadcast %cst_18 : f32 to vector<16x64xf32>
    %44 = arith.addf %42, %43 : vector<16x64xf32>
    %c0_19 = arith.constant 0 : index
    %c0_20 = arith.constant 0 : index
    %45 = vector.load %arg19[%c0_19, %c0_20] : memref<16x64xf32, #tpu.memory_space<vmem>>, vector<16x64xf32>
    tpu.vector_store %arg19[%c0_19, %c0_20], %44 {strides = array<i32>} : memref<16x64xf32, #tpu.memory_space<vmem>>, vector<16x64xf32>,
    %c0_21 = arith.constant 0 : index
    %c0_22 = arith.constant 0 : index
    %46 = vector.load %arg7[%c0_21, %c0_22] : memref<64x384xf32, #tpu.memory_space<vmem>>, vector<64x384xf32>
    %cst_23 = arith.constant dense<0.000000e+00> : vector<16x384xf32>
    %47 = tpu.matmul %44, %46, %cst_23 {dimension_numbers = #tpu.dot_dimension_numbers<[1], [0], [0], [1], [0, 0, 1, 1], [], []>, precision = #tpu.contract_precision<fp32>} : vector<16x64xf32>, vector<64x384xf32>, vector<16x384xf32> -> vector<16x384xf32>
    %48 = vector.extract_strided_slice %47 {offsets = [0, 128], sizes = [16, 64], strides = [1, 1]} : vector<16x384xf32> to vector<16x64xf32>
    %c0_24 = arith.constant 0 : index
    %c0_25 = arith.constant 0 : index
    %49 = vector.load %arg20[%c0_24, %c0_25] : memref<16x64xf32, #tpu.memory_space<vmem>>, vector<16x64xf32>
    tpu.vector_store %arg20[%c0_24, %c0_25], %48 {strides = array<i32>} : memref<16x64xf32, #tpu.memory_space<vmem>>, vector<16x64xf32>,
    %50 = vector.extract_strided_slice %47 {offsets = [0, 256], sizes = [16, 64], strides = [1, 1]} : vector<16x384xf32> to vector<16x64xf32>
    %c0_26 = arith.constant 0 : index
    %c0_27 = arith.constant 0 : index
    %51 = vector.load %arg21[%c0_26, %c0_27] : memref<16x64xf32, #tpu.memory_space<vmem>>, vector<16x64xf32>
    tpu.vector_store %arg21[%c0_26, %c0_27], %50 {strides = array<i32>} : memref<16x64xf32, #tpu.memory_space<vmem>>, vector<16x64xf32>,
    %52 = vector.extract_strided_slice %47 {offsets = [0, 0], sizes = [16, 2], strides = [1, 1]} : vector<16x384xf32> to vector<16x2xf32>
    %c0_28 = arith.constant 0 : index
    %c0_29 = arith.constant 0 : index
    %53 = vector.load %arg8[%c0_28, %c0_29] : memref<2x64xf32, #tpu.memory_space<vmem>>, vector<2x64xf32>
    %cst_30 = arith.constant dense<0.000000e+00> : vector<16x64xf32>
    %54 = tpu.matmul %52, %53, %cst_30 {dimension_numbers = #tpu.dot_dimension_numbers<[1], [0], [0], [1], [0, 0, 1, 1], [], []>, precision = #tpu.contract_precision<fp32>} : vector<16x2xf32>, vector<2x64xf32>, vector<16x64xf32> -> vector<16x64xf32>
    %c0_31 = arith.constant 0 : index
    %c0_32 = arith.constant 0 : index
    %55 = vector.load %arg9[%c0_31, %c0_32] : memref<1x64xf32, #tpu.memory_space<vmem>>, vector<1x64xf32>
    %56 = vector.broadcast %55 : vector<1x64xf32> to vector<16x64xf32>
    %57 = arith.addf %54, %56 : vector<16x64xf32>
    %cst_33 = arith.constant 6.250000e-02 : f32
    %58 = vector.broadcast %cst_33 : f32 to vector<16x64xf32>
    %59 = arith.mulf %58, %57 : vector<16x64xf32>
    %60 = arith.mulf %59, %57 : vector<16x64xf32>
    %cst_34 = arith.constant 5.000000e-01 : f32
    %61 = vector.broadcast %cst_34 : f32 to vector<16x64xf32>
    %62 = arith.mulf %61, %57 : vector<16x64xf32>
    %63 = arith.addf %60, %62 : vector<16x64xf32>
    %cst_35 = arith.constant 1.000000e+00 : f32
    %64 = vector.broadcast %cst_35 : f32 to vector<16x64xf32>
    %65 = arith.addf %63, %64 : vector<16x64xf32>
    %c0_36 = arith.constant 0 : index
    %c0_37 = arith.constant 0 : index
    %66 = vector.load %arg18[%c0_36, %c0_37] : memref<16x64xf32, #tpu.memory_space<vmem>>, vector<16x64xf32>
    tpu.vector_store %arg18[%c0_36, %c0_37], %65 {strides = array<i32>} : memref<16x64xf32, #tpu.memory_space<vmem>>, vector<16x64xf32>,
    %c0_38 = arith.constant 0 : index
    %c0_39 = arith.constant 0 : index
    %67 = vector.load %arg10[%c0_38, %c0_39] : memref<64x64xf32, #tpu.memory_space<vmem>>, vector<64x64xf32>
    %68 = math.exp %67 : vector<64x64xf32>
    %cst_40 = arith.constant 0.000000e+00 : f32
    %69 = vector.broadcast %cst_40 : f32 to vector<64x64xf32>
    %70 = arith.subf %69, %68 : vector<64x64xf32>
    %c0_i32_41 = arith.constant 0 : i32
    %c2_i32 = arith.constant 2 : i32
    %71 = arith.addi %c0_i32_41, %c2_i32 : i32
    %c1_i32 = arith.constant 1 : i32
    scf.for %arg23 = %c0_i32_41 to %71 step %c1_i32  : i32 {
      %c8_i32 = arith.constant 8 : i32
      %95 = arith.muli %arg23, %c8_i32 : i32
      %96 = tpu.assume_multiple %95, 8 : i32
      %97 = arith.index_cast %96 : i32 to index
      %c0_61 = arith.constant 0 : index
      %98 = vector.load %arg18[%97, %c0_61] : memref<16x64xf32, #tpu.memory_space<vmem>>, vector<8x64xf32>
      %99 = arith.index_cast %96 : i32 to index
      %c0_62 = arith.constant 0 : index
      %100 = vector.load %arg19[%99, %c0_62] : memref<16x64xf32, #tpu.memory_space<vmem>>, vector<8x64xf32>
      %101 = arith.index_cast %96 : i32 to index
      %c0_63 = arith.constant 0 : index
      %102 = vector.load %arg20[%101, %c0_63] : memref<16x64xf32, #tpu.memory_space<vmem>>, vector<8x64xf32>
      %103 = arith.index_cast %96 : i32 to index
      %c0_64 = arith.constant 0 : index
      %104 = vector.load %arg21[%103, %c0_64] : memref<16x64xf32, #tpu.memory_space<vmem>>, vector<8x64xf32>
      %105 = vector.shape_cast %98 : vector<8x64xf32> to vector<8x1x64xf32>
      %106 = vector.shape_cast %70 : vector<64x64xf32> to vector<1x64x64xf32>
      %107 = vector.broadcast %105 : vector<8x1x64xf32> to vector<8x64x64xf32>
      %108 = vector.broadcast %106 : vector<1x64x64xf32> to vector<8x64x64xf32>
      %109 = arith.mulf %107, %108 : vector<8x64x64xf32>
      %110 = math.exp %109 : vector<8x64x64xf32>
      %c0_65 = arith.constant 0 : index
      %c0_66 = arith.constant 0 : index
      %c0_67 = arith.constant 0 : index
      %111 = vector.load %arg16[%c0_65, %c0_66, %c0_67] : memref<8x64x64xf32, #tpu.memory_space<vmem>>, vector<8x64x64xf32>
      tpu.vector_store %arg16[%c0_65, %c0_66, %c0_67], %110 {strides = array<i32>} : memref<8x64x64xf32, #tpu.memory_space<vmem>>, vector<8x64x64xf32>,
      %112 = arith.mulf %98, %100 : vector<8x64xf32>
      %113 = vector.shape_cast %112 : vector<8x64xf32> to vector<8x1x64xf32>
      %114 = vector.shape_cast %102 : vector<8x64xf32> to vector<8x64x1xf32>
      %115 = vector.broadcast %113 : vector<8x1x64xf32> to vector<8x64x64xf32>
      %116 = vector.broadcast %114 : vector<8x64x1xf32> to vector<8x64x64xf32>
      %117 = arith.mulf %115, %116 : vector<8x64x64xf32>
      %c0_68 = arith.constant 0 : index
      %c0_69 = arith.constant 0 : index
      %c0_70 = arith.constant 0 : index
      %118 = vector.load %arg17[%c0_68, %c0_69, %c0_70] : memref<8x64x64xf32, #tpu.memory_space<vmem>>, vector<8x64x64xf32>
      tpu.vector_store %arg17[%c0_68, %c0_69, %c0_70], %117 {strides = array<i32>} : memref<8x64x64xf32, #tpu.memory_space<vmem>>, vector<8x64x64xf32>,
      %c0_71 = arith.constant 0 : index
      %c0_72 = arith.constant 0 : index
      %119 = vector.load %arg14[%c0_71, %c0_72] : memref<64x64xf32, #tpu.memory_space<vmem>>, vector<64x64xf32>
      %c0_i32_73 = arith.constant 0 : i32
      %c2_i32_74 = arith.constant 2 : i32
      %120 = arith.addi %c0_i32_73, %c2_i32_74 : i32
      %c1_i32_75 = arith.constant 1 : i32
      %121 = scf.for %arg24 = %c0_i32_73 to %120 step %c1_i32_75 iter_args(%arg25 = %119) -> (vector<64x64xf32>)  : i32 {
        %c4_i32 = arith.constant 4 : i32
        %130 = arith.muli %arg24, %c4_i32 : i32
        %131 = tpu.assume_multiple %130, 4 : i32
        %c0_i32_84 = arith.constant 0 : i32
        %132 = arith.addi %131, %c0_i32_84 : i32
        %133 = arith.index_cast %132 : i32 to index
        %c0_85 = arith.constant 0 : index
        %c0_86 = arith.constant 0 : index
        %134 = vector.load %arg16[%133, %c0_85, %c0_86] : memref<8x64x64xf32, #tpu.memory_space<vmem>>, vector<1x64x64xf32>
        %135 = vector.shape_cast %134 : vector<1x64x64xf32> to vector<64x64xf32>
        %136 = arith.mulf %135, %arg25 : vector<64x64xf32>
        %137 = arith.index_cast %132 : i32 to index
        %c0_87 = arith.constant 0 : index
        %c0_88 = arith.constant 0 : index
        %138 = vector.load %arg17[%137, %c0_87, %c0_88] : memref<8x64x64xf32, #tpu.memory_space<vmem>>, vector<1x64x64xf32>
        %139 = vector.shape_cast %138 : vector<1x64x64xf32> to vector<64x64xf32>
        %140 = arith.addf %136, %139 : vector<64x64xf32>
        %141 = arith.index_cast %132 : i32 to index
        %c0_89 = arith.constant 0 : index
        %c0_90 = arith.constant 0 : index
        %142 = vector.load %arg17[%141, %c0_89, %c0_90] : memref<8x64x64xf32, #tpu.memory_space<vmem>>, vector<1x64x64xf32>
        %143 = vector.shape_cast %142 : vector<1x64x64xf32> to vector<64x64xf32>
        %144 = vector.shape_cast %140 : vector<64x64xf32> to vector<1x64x64xf32>
        tpu.vector_store %arg17[%141, %c0_89, %c0_90], %144 {strides = array<i32>} : memref<8x64x64xf32, #tpu.memory_space<vmem>>, vector<1x64x64xf32>,
        %c1_i32_91 = arith.constant 1 : i32
        %145 = arith.addi %131, %c1_i32_91 : i32
        %146 = arith.index_cast %145 : i32 to index
        %c0_92 = arith.constant 0 : index
        %c0_93 = arith.constant 0 : index
        %147 = vector.load %arg16[%146, %c0_92, %c0_93] : memref<8x64x64xf32, #tpu.memory_space<vmem>>, vector<1x64x64xf32>
        %148 = vector.shape_cast %147 : vector<1x64x64xf32> to vector<64x64xf32>
        %149 = arith.mulf %148, %140 : vector<64x64xf32>
        %150 = arith.index_cast %145 : i32 to index
        %c0_94 = arith.constant 0 : index
        %c0_95 = arith.constant 0 : index
        %151 = vector.load %arg17[%150, %c0_94, %c0_95] : memref<8x64x64xf32, #tpu.memory_space<vmem>>, vector<1x64x64xf32>
        %152 = vector.shape_cast %151 : vector<1x64x64xf32> to vector<64x64xf32>
        %153 = arith.addf %149, %152 : vector<64x64xf32>
        %154 = arith.index_cast %145 : i32 to index
        %c0_96 = arith.constant 0 : index
        %c0_97 = arith.constant 0 : index
        %155 = vector.load %arg17[%154, %c0_96, %c0_97] : memref<8x64x64xf32, #tpu.memory_space<vmem>>, vector<1x64x64xf32>
        %156 = vector.shape_cast %155 : vector<1x64x64xf32> to vector<64x64xf32>
        %157 = vector.shape_cast %153 : vector<64x64xf32> to vector<1x64x64xf32>
        tpu.vector_store %arg17[%154, %c0_96, %c0_97], %157 {strides = array<i32>} : memref<8x64x64xf32, #tpu.memory_space<vmem>>, vector<1x64x64xf32>,
        %c2_i32_98 = arith.constant 2 : i32
        %158 = arith.addi %131, %c2_i32_98 : i32
        %159 = arith.index_cast %158 : i32 to index
        %c0_99 = arith.constant 0 : index
        %c0_100 = arith.constant 0 : index
        %160 = vector.load %arg16[%159, %c0_99, %c0_100] : memref<8x64x64xf32, #tpu.memory_space<vmem>>, vector<1x64x64xf32>
        %161 = vector.shape_cast %160 : vector<1x64x64xf32> to vector<64x64xf32>
        %162 = arith.mulf %161, %153 : vector<64x64xf32>
        %163 = arith.index_cast %158 : i32 to index
        %c0_101 = arith.constant 0 : index
        %c0_102 = arith.constant 0 : index
        %164 = vector.load %arg17[%163, %c0_101, %c0_102] : memref<8x64x64xf32, #tpu.memory_space<vmem>>, vector<1x64x64xf32>
        %165 = vector.shape_cast %164 : vector<1x64x64xf32> to vector<64x64xf32>
        %166 = arith.addf %162, %165 : vector<64x64xf32>
        %167 = arith.index_cast %158 : i32 to index
        %c0_103 = arith.constant 0 : index
        %c0_104 = arith.constant 0 : index
        %168 = vector.load %arg17[%167, %c0_103, %c0_104] : memref<8x64x64xf32, #tpu.memory_space<vmem>>, vector<1x64x64xf32>
        %169 = vector.shape_cast %168 : vector<1x64x64xf32> to vector<64x64xf32>
        %170 = vector.shape_cast %166 : vector<64x64xf32> to vector<1x64x64xf32>
        tpu.vector_store %arg17[%167, %c0_103, %c0_104], %170 {strides = array<i32>} : memref<8x64x64xf32, #tpu.memory_space<vmem>>, vector<1x64x64xf32>,
        %c3_i32 = arith.constant 3 : i32
        %171 = arith.addi %131, %c3_i32 : i32
        %172 = arith.index_cast %171 : i32 to index
        %c0_105 = arith.constant 0 : index
        %c0_106 = arith.constant 0 : index
        %173 = vector.load %arg16[%172, %c0_105, %c0_106] : memref<8x64x64xf32, #tpu.memory_space<vmem>>, vector<1x64x64xf32>
        %174 = vector.shape_cast %173 : vector<1x64x64xf32> to vector<64x64xf32>
        %175 = arith.mulf %174, %166 : vector<64x64xf32>
        %176 = arith.index_cast %171 : i32 to index
        %c0_107 = arith.constant 0 : index
        %c0_108 = arith.constant 0 : index
        %177 = vector.load %arg17[%176, %c0_107, %c0_108] : memref<8x64x64xf32, #tpu.memory_space<vmem>>, vector<1x64x64xf32>
        %178 = vector.shape_cast %177 : vector<1x64x64xf32> to vector<64x64xf32>
        %179 = arith.addf %175, %178 : vector<64x64xf32>
        %180 = arith.index_cast %171 : i32 to index
        %c0_109 = arith.constant 0 : index
        %c0_110 = arith.constant 0 : index
        %181 = vector.load %arg17[%180, %c0_109, %c0_110] : memref<8x64x64xf32, #tpu.memory_space<vmem>>, vector<1x64x64xf32>
        %182 = vector.shape_cast %181 : vector<1x64x64xf32> to vector<64x64xf32>
        %183 = vector.shape_cast %179 : vector<64x64xf32> to vector<1x64x64xf32>
        tpu.vector_store %arg17[%180, %c0_109, %c0_110], %183 {strides = array<i32>} : memref<8x64x64xf32, #tpu.memory_space<vmem>>, vector<1x64x64xf32>,
        scf.yield %179 : vector<64x64xf32>
      }
      %c2_i32_76 = arith.constant 2 : i32
      %c0_77 = arith.constant 0 : index
      %c0_78 = arith.constant 0 : index
      %122 = vector.load %arg14[%c0_77, %c0_78] : memref<64x64xf32, #tpu.memory_space<vmem>>, vector<64x64xf32>
      tpu.vector_store %arg14[%c0_77, %c0_78], %121 {strides = array<i32>} : memref<64x64xf32, #tpu.memory_space<vmem>>, vector<64x64xf32>,
      %c0_79 = arith.constant 0 : index
      %c0_80 = arith.constant 0 : index
      %c0_81 = arith.constant 0 : index
      %123 = vector.load %arg17[%c0_79, %c0_80, %c0_81] : memref<8x64x64xf32, #tpu.memory_space<vmem>>, vector<8x64x64xf32>
      %124 = vector.shape_cast %104 : vector<8x64xf32> to vector<8x64x1xf32>
      %125 = vector.broadcast %124 : vector<8x64x1xf32> to vector<8x64x64xf32>
      %126 = arith.mulf %123, %125 : vector<8x64x64xf32>
      %cst_82 = arith.constant dense<0.000000e+00> : vector<8x64xf32>
      %127 = vector.multi_reduction <add>, %126, %cst_82 [1] : vector<8x64x64xf32> to vector<8x64xf32>
      %128 = arith.index_cast %96 : i32 to index
      %c0_83 = arith.constant 0 : index
      %129 = vector.load %arg22[%128, %c0_83] : memref<16x64xf32, #tpu.memory_space<vmem>>, vector<8x64xf32>
      tpu.vector_store %arg22[%128, %c0_83], %127 {strides = array<i32>} : memref<16x64xf32, #tpu.memory_space<vmem>>, vector<8x64xf32>,
    }
    %c2_i32_42 = arith.constant 2 : i32
    %c0_43 = arith.constant 0 : index
    %c0_44 = arith.constant 0 : index
    %72 = vector.load %arg22[%c0_43, %c0_44] : memref<16x64xf32, #tpu.memory_space<vmem>>, vector<16x64xf32>
    %c0_45 = arith.constant 0 : index
    %c0_46 = arith.constant 0 : index
    %73 = vector.load %arg11[%c0_45, %c0_46] : memref<1x64xf32, #tpu.memory_space<vmem>>, vector<1x64xf32>
    %c0_47 = arith.constant 0 : index
    %c0_48 = arith.constant 0 : index
    %74 = vector.load %arg19[%c0_47, %c0_48] : memref<16x64xf32, #tpu.memory_space<vmem>>, vector<16x64xf32>
    %75 = vector.broadcast %73 : vector<1x64xf32> to vector<16x64xf32>
    %76 = arith.mulf %75, %74 : vector<16x64xf32>
    %77 = arith.addf %72, %76 : vector<16x64xf32>
    %cst_49 = arith.constant 1.250000e-01 : f32
    %78 = vector.broadcast %cst_49 : f32 to vector<16x64xf32>
    %79 = arith.mulf %78, %8 : vector<16x64xf32>
    %80 = arith.mulf %79, %8 : vector<16x64xf32>
    %cst_50 = arith.constant 5.000000e-01 : f32
    %81 = vector.broadcast %cst_50 : f32 to vector<16x64xf32>
    %82 = arith.mulf %81, %8 : vector<16x64xf32>
    %83 = arith.addf %80, %82 : vector<16x64xf32>
    %cst_51 = arith.constant 1.250000e-01 : f32
    %84 = vector.broadcast %cst_51 : f32 to vector<16x64xf32>
    %85 = arith.addf %83, %84 : vector<16x64xf32>
    %86 = arith.mulf %77, %85 : vector<16x64xf32>
    %c0_52 = arith.constant 0 : index
    %c0_53 = arith.constant 0 : index
    %87 = vector.load %arg12[%c0_52, %c0_53] : memref<64x32xf32, #tpu.memory_space<vmem>>, vector<64x32xf32>
    %cst_54 = arith.constant dense<0.000000e+00> : vector<16x32xf32>
    %88 = tpu.matmul %86, %87, %cst_54 {dimension_numbers = #tpu.dot_dimension_numbers<[1], [0], [0], [1], [0, 0, 1, 1], [], []>, precision = #tpu.contract_precision<fp32>} : vector<16x64xf32>, vector<64x32xf32>, vector<16x32xf32> -> vector<16x32xf32>
    %c0_55 = arith.constant 0 : index
    %c0_56 = arith.constant 0 : index
    %c0_57 = arith.constant 0 : index
    %89 = vector.load %arg2[%c0_55, %c0_56, %c0_57] : memref<1x16x32xf32, #tpu.memory_space<vmem>>, vector<1x16x32xf32>
    %90 = vector.shape_cast %89 : vector<1x16x32xf32> to vector<16x32xf32>
    %91 = arith.addf %88, %90 : vector<16x32xf32>
    %c0_58 = arith.constant 0 : index
    %c0_59 = arith.constant 0 : index
    %c0_60 = arith.constant 0 : index
    %92 = vector.load %arg13[%c0_58, %c0_59, %c0_60] : memref<1x16x32xf32, #tpu.memory_space<vmem>>, vector<1x16x32xf32>
    %93 = vector.shape_cast %92 : vector<1x16x32xf32> to vector<16x32xf32>
    %94 = vector.shape_cast %91 : vector<16x32xf32> to vector<1x16x32xf32>
    tpu.vector_store %arg13[%c0_58, %c0_59, %c0_60], %94 {strides = array<i32>} : memref<1x16x32xf32, #tpu.memory_space<vmem>>, vector<1x16x32xf32>,
    return
  }
  func.func @transform_0(%arg0: i32, %arg1: i32) -> (i32, i32, i32) {
    %c0_i32 = arith.constant 0 : i32
    %c0_i32_0 = arith.constant 0 : i32
    return %arg0, %arg1, %c0_i32 : i32, i32, i32
  }
  func.func @transform_1(%arg0: i32, %arg1: i32) -> (i32, i32) {
    %c0_i32 = arith.constant 0 : i32
    %c0_i32_0 = arith.constant 0 : i32
    %c0_i32_1 = arith.constant 0 : i32
    return %c0_i32, %c0_i32_0 : i32, i32
  }
  func.func @transform_2(%arg0: i32, %arg1: i32) -> (i32, i32) {
    %c0_i32 = arith.constant 0 : i32
    %c0_i32_0 = arith.constant 0 : i32
    %c0_i32_1 = arith.constant 0 : i32
    return %c0_i32, %c0_i32_0 : i32, i32
  }
  func.func @transform_3(%arg0: i32, %arg1: i32) -> (i32, i32) {
    %c0_i32 = arith.constant 0 : i32
    %c0_i32_0 = arith.constant 0 : i32
    %c0_i32_1 = arith.constant 0 : i32
    return %c0_i32, %c0_i32_0 : i32, i32
  }
  func.func @transform_4(%arg0: i32, %arg1: i32) -> (i32, i32) {
    %c0_i32 = arith.constant 0 : i32
    %c0_i32_0 = arith.constant 0 : i32
    %c0_i32_1 = arith.constant 0 : i32
    return %c0_i32, %c0_i32_0 : i32, i32
  }
  func.func @transform_5(%arg0: i32, %arg1: i32) -> (i32, i32) {
    %c0_i32 = arith.constant 0 : i32
    %c0_i32_0 = arith.constant 0 : i32
    %c0_i32_1 = arith.constant 0 : i32
    return %c0_i32, %c0_i32_0 : i32, i32
  }
  func.func @transform_6(%arg0: i32, %arg1: i32) -> (i32, i32) {
    %c0_i32 = arith.constant 0 : i32
    %c0_i32_0 = arith.constant 0 : i32
    %c0_i32_1 = arith.constant 0 : i32
    return %c0_i32, %c0_i32_0 : i32, i32
  }
  func.func @transform_7(%arg0: i32, %arg1: i32) -> (i32, i32) {
    %c0_i32 = arith.constant 0 : i32
    %c0_i32_0 = arith.constant 0 : i32
    %c0_i32_1 = arith.constant 0 : i32
    return %c0_i32, %c0_i32_0 : i32, i32
  }
  func.func @transform_8(%arg0: i32, %arg1: i32) -> (i32, i32) {
    %c0_i32 = arith.constant 0 : i32
    %c0_i32_0 = arith.constant 0 : i32
    %c0_i32_1 = arith.constant 0 : i32
    return %c0_i32, %c0_i32_0 : i32, i32
  }
  func.func @transform_9(%arg0: i32, %arg1: i32) -> (i32, i32) {
    %c0_i32 = arith.constant 0 : i32
    %c0_i32_0 = arith.constant 0 : i32
    %c0_i32_1 = arith.constant 0 : i32
    return %c0_i32, %c0_i32_0 : i32, i32
  }
  func.func @transform_10(%arg0: i32, %arg1: i32) -> (i32, i32) {
    %c0_i32 = arith.constant 0 : i32
    %c0_i32_0 = arith.constant 0 : i32
    %c0_i32_1 = arith.constant 0 : i32
    return %c0_i32, %c0_i32_0 : i32, i32
  }
  func.func @transform_11(%arg0: i32, %arg1: i32) -> (i32, i32, i32) {
    %c0_i32 = arith.constant 0 : i32
    %c0_i32_0 = arith.constant 0 : i32
    return %arg0, %arg1, %c0_i32 : i32, i32, i32
  }
}

</mosaic_0001>

<bundles_post_ra>
// kernel: tpu_custom_call.1
= control target key start
LH: loop header
LB: loop body
LE: loop exit
PB: predicated region body
PF: predicated region fallthrough
CT: control target
= control target key end

     0   :  { %s9808_s0 = inlined_call_operand.vmem [shape: f32[2,32,32], index: 0, kind: input, shape index: {}]   ;;  %s9809_s1 = inlined_call_operand.vmem [shape: f32[32,64], index: 1, kind: input, shape index: {}]   ;;  %s9810_s2 = inlined_call_operand.hbm [shape: f32[32,64], index: 2, kind: input, shape index: {}]   ;;  %s9811_s3 = inlined_call_operand.vmem [shape: f32[4,64], index: 3, kind: input, shape index: {}]   ;;  %s9812_s4 = inlined_call_operand.vmem [shape: f32[1,64], index: 4, kind: input, shape index: {}]   ;;  %s9813_s5 = inlined_call_operand.hbm [shape: f32[64,384], index: 5, kind: input, shape index: {}]   ;;  %s9814_s6 = inlined_call_operand.hbm [shape: f32[2,64], index: 6, kind: input, shape index: {}]   ;;  %s9815_s7 = inlined_call_operand.hbm [shape: f32[1,64], index: 7, kind: input, shape index: {}]   ;;  %s9816_s8 = inlined_call_operand.hbm [shape: f32[64,64], index: 8, kind: input, shape index: {}]   ;;  %s9817_s9 = inlined_call_operand.hbm [shape: f32[1,64], index: 9, kind: input, shape index: {}]   ;;  %s9818_s10 = inlined_call_operand.vmem [shape: f32[64,32], index: 10, kind: input, shape index: {}]   ;;  %s9819_s11 = inlined_call_operand.hbm [shape: f32[2,32,32], index: 11, kind: output, shape index: {}]  }
   0x1   :  { %9842 = sst [smem:[#allocation41_spill]] %s9818_s10 }
   0x2   :  { %9843 = sst [smem:[#allocation42_spill]] %s9819_s11 }
   0x3   :  { %16 = vsyncpa [#allocation12], 0 }
   0x4   :  { %17 = vsyncpa [#allocation15], 0 }
   0x5   :  { %18 = vsyncpa [#allocation18], 0 }
   0x6   :  { %19 = vsyncpa [#allocation21], 0 }
   0x7   :  { %20 = vsyncpa [#allocation13], 0 }
   0x8   :  { %22 = vsyncpa [#allocation13 + $0x1], 0  ;;  %s8056_s17 = smov 0   ;;  %s8058_s18 = smov 0  }
   0x9   :  { %s8060_s19 = smov 0   ;;  %s8062_s20 = smov 0  }
   0xa   :  { %s8064_s21 = smov 0   ;;  %s8066_s22 = smov 0  }
   0xb   :  { %s8068_s23 = smov 0   ;;  %s8070_s24 = smov 0  }
   0xc LB: > { %9844 = sst [smem:[#allocation28_spill]] %s7910_s17  ;;  %s6072_s25 = sadd.s32 4294967295, %s7938_s24   ;;  %s7938_s24 = sphi %s8070_s24, %s28_s24   ;;  %s7934_s23 = sphi %s8068_s23, %s9889_s23   ;;  %s7930_s22 = sphi %s8066_s22, %s9893_s22   ;;  %s7926_s21 = sphi %s8064_s21, %s9887_s21   ;;  %s7922_s20 = sphi %s8062_s20, %s9886_s20   ;;  %s7918_s19 = sphi %s8060_s19, %s9892_s19   ;;  %s7914_s18 = sphi %s8058_s18, %s9891_s18   ;;  %s7910_s17 = sphi %s8056_s17, %s9890_s17  }
   0xd   : > { %9845 = sst [smem:[#allocation29_spill]] %s7918_s19  ;;  %s6073_s26 = sadd.s32 4294967294, %s7938_s24  }
   0xe   : > { %9846 = sst [smem:[#allocation30_spill]] %s7930_s22  ;;  %s37_s27 = sadd.s32 1, %s7930_s22 }
   0xf   : > { %9847 = sst [smem:[#allocation31_spill]] %s7934_s23  ;;  %s40_s28 = sadd.s32 1, %s7934_s23 }
  0x10   : > { %9848 = sst [smem:[#allocation32_spill]] %s7938_s24  ;;  %p38_p0 = scmp.ge.s32.totalorder %s37_s27, 2 }
  0x11   : > { %s287_s29 = sadd.s32 1, %s7918_s19  ;;  %p297_p1 = scmp.ne.s32.totalorder %s7918_s19, %s7914_s18 }
  0x12   : > { %p298_p2 = scmp.eq.s32.totalorder %s6072_s25, 3  ;;  %s9895_s27 = smov (%p38_p0, %s37_s27), 0 }
  0x13   : > { %9849 = sst [smem:[#allocation33_spill]] %s9895_s27  ;;  %s9897_s28 = smov (!%p38_p0, %s40_s28), %s7934_s23 }
  0x14   : > { %s283_s30 = ssub.s32 %s7930_s22, %s9895_s27  ;;  %p8108_p3 = por %p298_p2, %p297_p1 }
  0x15   : > { %p42_p4 = scmp.ge.s32.totalorder %s9897_s28, 2  ;;  %p303_p5 = scmp.ne.s32.totalorder %s7914_s18, %s7910_s17 }
  0x16   : > { %s9850_s12 = scalar_select %p8108_p3, 1, 0 }
  0x17   : > { %p304_p6 = scmp.eq.s32.totalorder %s6073_s26, 3  ;;  %p6074_p7 = scmp.ge.s32.totalorder %s7938_s24, 1 }
  0x18   : > { %9851 = sst [smem:[#allocation34_spill]] %s9850_s12  ;;  %s9899_s28 = smov (%p42_p4, %s9897_s28), 0 }
  0x19   : > { %9852 = sst [smem:[#allocation35_spill]] %s9899_s28  ;;  %p8117_p8 = por %p304_p6, %p303_p5 }
  0x1a   : > { %p311_p9 = scmp.lt.s32.totalorder %s7938_s24, 5  ;;  %s282_s14 = ssub.s32 %s7934_s23, %s9899_s28 }
  0x1b   : > { %s9853_s13 = scalar_select %p8117_p8, 1, 0 }
  0x1c   : > { %s284_s15 = sor.u32 %s283_s30, %s282_s14  ;;  %p8124_p10 = pnand %p6074_p7, %p311_p9 }
  0x1d   : > { %9854 = sst [smem:[#allocation36_spill]] %s9853_s13  ;;  %p285_p11 = scmp.eq.s32.totalorder %s284_s15, 0 }
  0x1e   : > { %s9855_s16 = scalar_select %p8124_p10, 1, 0 }
  0x1f   : > { %p8128_p12 = scmp.eq.s32.totalorder %s6072_s25, 0  ;;  %p7281_p13 = pneg %p8124_p10 }
  0x20   : > { %s8135_s26 = scalar_select %p285_p11, %s7918_s19, %s287_s29  }
  0x21   : > { %s9856_s27 = scalar_select %p8128_p12, 1, 0 }
  0x22   : > { %9857 = sst [smem:[#allocation37_spill]] %s8135_s26  ;;  %p8139_p0 = pnand %p8128_p12, %p7281_p13 }
  0x23   : > { %s7980_s30 = smov [#allocation14]   ;;  %s7620_s25 = scalar_lea.hbm %s9813_s5, 3072 }
  0x24   : > { %s345_s14 = sshll.u32 %s7980_s30, 4  ;;  %p7621_p1 = scmp.ne.s32.totalorder %s9813_s5, %s7620_s25  ;;  %s346_s14 = int_to_ptr.vmem [resolvable:$true] %s345_s14 }
  0x25   : > { %p8151_p2 = pneg %p8139_p0  ;;  %p7627_p6 = scmp.lt.u32.totalorder %s7620_s25, %s9813_s5 }
  0x27   : > { %p7623_p4 = pnand %p8151_p2, %p7621_p1 }
  0x29   : > { %p7624_p5 = pneg %p7623_p4 }
  0x2b   : > { %p7629_p7 = pnand %p7627_p6, %p7624_p5 }
  0x2d   : > { %7632 = shalt.err (!%p7629_p7)
}
  0x2e   : > { %s7633_s28 = scalar_lea.vmem %s346_s14, 3072  ;;  %p7641_p8 = scmp.lt.s32.totalorder %s346_s14, %s346_s14 }
  0x2f   : > { %p7634_p9 = scmp.ne.s32.totalorder %s346_s14, %s7633_s28  ;;  %p7642_p3 = scmp.lt.s32.totalorder %s7633_s28, %s7633_s28 }
  0x31   : > { %p7636_p11 = pnand %p7634_p9, %p8151_p2  ;;  %p7643_p12 = por %p7642_p3, %p7641_p8 }
  0x33   : > { %p7637_p13 = pneg %p7636_p11 }
  0x35   : > { %p7644_p10 = pnand %p7643_p12, %p7637_p13 }
  0x37   : > { %7647 = shalt.err (!%p7644_p10)
}
  0x38   : > { %s7981_s23 = smov 384   ;;  %s7982_s13 = smov 24  }
  0x39   : > { %7287 = dma.hbm_to_vmem [thread:$0]  (!%p8139_p0), %s9813_s5, 3072, %s346_s14, [#allocation15], %s7981_s23, %s7981_s23, %s7982_s13  }
  0x3a   : > { %s7983_s25 = smov [#allocation17]   ;;  %s7648_s24 = scalar_lea.hbm %s9815_s7, 16 }
  0x3b   : > { %s370_s30 = sshll.u32 %s7983_s25, 4  ;;  %p7649_p3 = scmp.ne.s32.totalorder %s9815_s7, %s7648_s24  ;;  %s371_s30 = int_to_ptr.vmem [resolvable:$true] %s370_s30 }
  0x3c   : > { %p7655_p12 = scmp.lt.u32.totalorder %s7648_s24, %s9815_s7 }
  0x3d   : > { %p7651_p8 = pnand %p7649_p3, %p8151_p2 }
  0x3f   : > { %p7652_p10 = pneg %p7651_p8 }
  0x41   : > { %p7657_p1 = pnand %p7655_p12, %p7652_p10 }
  0x43   : > { %7660 = shalt.err (!%p7657_p1)
}
  0x44   : > { %s7661_s14 = scalar_lea.vmem %s371_s30, 16  ;;  %s7668_s17 = scalar_lea.vmem %s371_s30, 32 }
  0x45   : > { %p7662_p4 = scmp.ne.s32.totalorder %s371_s30, %s7661_s14  ;;  %p7669_p7 = scmp.lt.s32.totalorder %s371_s30, %s371_s30 }
  0x46   : > { %p7670_p9 = scmp.lt.s32.totalorder %s7668_s17, %s7661_s14 }
  0x47   : > { %p7664_p5 = pnand %p7662_p4, %p8151_p2 }
  0x48   : > { %p7671_p11 = por %p7670_p9, %p7669_p7 }
  0x49   : > { %p7665_p6 = pneg %p7664_p5 }
  0x4b   : > { %p7672_p13 = pnand %p7671_p11, %p7665_p6 }
  0x4d   : > { %7675 = shalt.err (!%p7672_p13)
}
  0x4e   : > { %7293 = dma.hbm_to_vmem [thread:$0]  (!%p8139_p0), %s9815_s7, 16, %s371_s30, [#allocation18]  }
  0x4f   : > { %s7984_s10 = smov [#allocation11]   ;;  %s7676_s13 = scalar_lea.hbm %s9810_s2, 512 }
  0x50   : > { %s326_s24 = sshll.u32 %s7984_s10, 4  ;;  %p7677_p3 = scmp.ne.s32.totalorder %s9810_s2, %s7676_s13  ;;  %s327_s24 = int_to_ptr.vmem [resolvable:$true] %s326_s24 }
  0x51   : > { %p7683_p12 = scmp.lt.u32.totalorder %s7676_s13, %s9810_s2 }
  0x52   : > { %p7679_p8 = pnand %p7677_p3, %p8151_p2 }
  0x54   : > { %p7680_p10 = pneg %p7679_p8 }
  0x56   : > { %p7685_p1 = pnand %p7683_p12, %p7680_p10 }
  0x58   : > { %7688 = shalt.err (!%p7685_p1)
}
  0x59   : > { %s7689_s30 = scalar_lea.vmem %s327_s24, 512  ;;  %p7697_p7 = scmp.lt.s32.totalorder %s327_s24, %s327_s24 }
  0x5a   : > { %p7690_p4 = scmp.ne.s32.totalorder %s327_s24, %s7689_s30  ;;  %p7698_p9 = scmp.lt.s32.totalorder %s7689_s30, %s7689_s30 }
  0x5c   : > { %p7692_p5 = pnand %p7690_p4, %p8151_p2  ;;  %p7699_p11 = por %p7698_p9, %p7697_p7 }
  0x5e   : > { %p7693_p6 = pneg %p7692_p5 }
  0x60   : > { %p7700_p13 = pnand %p7699_p11, %p7693_p6 }
  0x62   : > { %7703 = shalt.err (!%p7700_p13)
}
  0x63   : > { %s7985_s14 = smov 128   ;;  %s7986_s17 = smov 8  }
  0x64   : > { %7284 = dma.hbm_to_vmem [thread:$0]  (!%p8139_p0), %s9810_s2, 512, %s327_s24, [#allocation12], %s7985_s14, %s7985_s14, %s7986_s17  }
  0x65   : > { %s7987_s10 = smov [#allocation16]   ;;  %s7988_s23 = smov [#allocation19]  }
  0x66   : > { %s359_s12 = sshll.u32 %s7987_s10, 4  ;;  %s380_s13 = sshll.u32 %s7988_s23, 4  ;;  %s360_s12 = int_to_ptr.vmem [resolvable:$true] %s359_s12  ;;  %s8206_s13 = int_to_ptr.vmem [resolvable:$true] %s380_s13 }
  0x67   : > { %s7704_s25 = scalar_lea.hbm %s9814_s6, 32 }
  0x68   : > { %p7705_p3 = scmp.ne.s32.totalorder %s9814_s6, %s7704_s25  ;;  %p7711_p12 = scmp.lt.u32.totalorder %s7704_s25, %s9814_s6 }
  0x6a   : > { %p7707_p8 = pnand %p7705_p3, %p8151_p2 }
  0x6c   : > { %p7708_p10 = pneg %p7707_p8 }
  0x6e   : > { %p7713_p1 = pnand %p7711_p12, %p7708_p10 }
  0x70   : > { %7716 = shalt.err (!%p7713_p1)
}
  0x71   : > { %s7717_s19 = scalar_lea.vmem %s360_s12, 32  ;;  %p7725_p7 = scmp.lt.s32.totalorder %s360_s12, %s360_s12 }
  0x72   : > { %p7718_p4 = scmp.ne.s32.totalorder %s360_s12, %s7717_s19  ;;  %p7726_p9 = scmp.lt.s32.totalorder %s7717_s19, %s7717_s19 }
  0x74   : > { %p7720_p5 = pnand %p7718_p4, %p8151_p2  ;;  %p7727_p11 = por %p7726_p9, %p7725_p7 }
  0x76   : > { %p7721_p6 = pneg %p7720_p5 }
  0x78   : > { %p7728_p13 = pnand %p7727_p11, %p7721_p6 }
  0x7a   : > { %7731 = shalt.err (!%p7728_p13)
}
  0x7b   : > { %7290 = dma.hbm_to_vmem [thread:$0]  (!%p8139_p0), %s9814_s6, 32, %s360_s12, [#allocation15]  }
  0x7c   : > { %s7732_s25 = scalar_lea.hbm %s9816_s8, 1024 }
  0x7d   : > { %p7733_p3 = scmp.ne.s32.totalorder %s9816_s8, %s7732_s25  ;;  %p7739_p12 = scmp.lt.u32.totalorder %s7732_s25, %s9816_s8 }
  0x7f   : > { %p7735_p8 = pnand %p7733_p3, %p8151_p2 }
  0x81   : > { %p7736_p10 = pneg %p7735_p8 }
  0x83   : > { %p7741_p1 = pnand %p7739_p12, %p7736_p10 }
  0x85   : > { %7744 = shalt.err (!%p7741_p1)
}
  0x86   : > { %s7745_s12 = scalar_lea.vmem %s8206_s13, 1024  ;;  %p7753_p7 = scmp.lt.s32.totalorder %s8206_s13, %s8206_s13 }
  0x87   : > { %p7746_p4 = scmp.ne.s32.totalorder %s8206_s13, %s7745_s12  ;;  %p7754_p9 = scmp.lt.s32.totalorder %s7745_s12, %s7745_s12 }
  0x89   : > { %p7748_p5 = pnand %p7746_p4, %p8151_p2  ;;  %p7755_p11 = por %p7754_p9, %p7753_p7 }
  0x8b   : > { %p7749_p6 = pneg %p7748_p5 }
  0x8d   : > { %p7756_p13 = pnand %p7755_p11, %p7749_p6 }
  0x8f   : > { %7759 = shalt.err (!%p7756_p13)
}
  0x90   : > { %7296 = dma.hbm_to_vmem [thread:$0]  (!%p8139_p0), %s9816_s8, 1024, %s8206_s13, [#allocation18], %s7985_s14, %s7985_s14, %s7986_s17  }
  0x91   : > { %s7989_s23 = smov [#allocation20]   ;;  %s7760_s28 = scalar_lea.hbm %s9817_s9, 16 }
  0x92   : > { %s394_s26 = sshll.u32 %s7989_s23, 4  ;;  %p7761_p3 = scmp.ne.s32.totalorder %s9817_s9, %s7760_s28  ;;  %s395_s26 = int_to_ptr.vmem [resolvable:$true] %s394_s26 }
  0x93   : > { %p7767_p12 = scmp.lt.u32.totalorder %s7760_s28, %s9817_s9 }
  0x94   : > { %p7763_p8 = pnand %p7761_p3, %p8151_p2 }
  0x96   : > { %p7764_p10 = pneg %p7763_p8 }
  0x98   : > { %p7769_p1 = pnand %p7767_p12, %p7764_p10 }
  0x9a   : > { %7772 = shalt.err (!%p7769_p1)
}
  0x9b   : > { %s7773_s14 = scalar_lea.vmem %s395_s26, 16  ;;  %s7780_s17 = scalar_lea.vmem %s395_s26, 32 }
  0x9c   : > { %p7774_p4 = scmp.ne.s32.totalorder %s395_s26, %s7773_s14  ;;  %p7781_p7 = scmp.lt.s32.totalorder %s395_s26, %s395_s26 }
  0x9d   : > { %p7782_p9 = scmp.lt.s32.totalorder %s7780_s17, %s7773_s14 }
  0x9e   : > { %p7776_p5 = pnand %p7774_p4, %p8151_p2 }
  0x9f   : > { %p7783_p11 = por %p7782_p9, %p7781_p7 }
  0xa0   : > { %p7777_p6 = pneg %p7776_p5 }
  0xa2   : > { %p7784_p13 = pnand %p7783_p11, %p7777_p6 }
  0xa4   : > { %7787 = shalt.err (!%p7784_p13)
}
  0xa5   : > { %7299 = dma.hbm_to_vmem [thread:$0]  (!%p8139_p0), %s9817_s9, 16, %s395_s26, [#allocation21]  }
  0xa6   : > { %p9860_p3 = scmp.ne.s32.totalorder %s9855_s16, 0 }
  0xa8   : > { %423 = sbr.rel (%p9860_p3) target bundleno = 1899 (0x76b), region = 64 }
  0xaf   : > { %p9861_p8 = scmp.ne.s32.totalorder %s9856_s27, 0 }
  0xb1   : > { %7889 = dma.done.wait (%p9861_p8), [#allocation12], 512  }
  0xb2   : > { %7891 = vsyncadd (%p9861_p8), [#allocation12], 4294966784 }
  0xb3   : > { %7893 = dma.done.wait (%p9861_p8), [#allocation15], 3104  }
  0xb4   : > { %7895 = vsyncadd (%p9861_p8), [#allocation15], 4294964192 }
  0xb5   : > { %7897 = dma.done.wait (%p9861_p8), [#allocation18], 1040  }
  0xb6   : > { %7899 = vsyncadd (%p9861_p8), [#allocation18], 4294966256 }
  0xb7   : > { %7901 = dma.done.wait (%p9861_p8), [#allocation21], 16  }
  0xb8   : > { %7903 = vsyncadd (%p9861_p8), [#allocation21], 4294967280  ;;  %s484_s22 = sand.u32 1, %s7914_s18   ;;  %s8290_s16 = sshll.u32 %s7922_s20, 1 }
  0xb9   : > { %s6089_s29 = sshll.u32 %s484_s22, 4  ;;  %p488_p0 = scmp.lt.s32.totalorder %s7926_s21, 1 }
  0xba   : > { %p490_p2 = scmp.lt.s32.totalorder %s8290_s16, 3  ;;  %s8303_s11 = scalar_lea.vmem [#allocation22], %s6089_s29 }
  0xbb   : > { %s489_s10 = scalar_select %p488_p0, %s7926_s21, 1 }
  0xbc   : > { %s491_s23 = scalar_select %p490_p2, %s8290_s16, 3 }
  0xbd   : > { %s6091_s26 = sshll.u32 %s489_s10, 2  ;;  %p6093_p10 = scmp.ne.s32.totalorder %s7922_s20, 0 }
  0xbe   : > { %s493_s15 = sadd.s32 %s6091_s26, %s491_s23  ;;  %vm502_vm0 = vcmask (!%p6093_p10), 523264   ;;  %vm511_vm1 = vcmask (!%p6093_p10), 518144   ;;  %v7990_v0 = vmov (!%p6093_p10), 0.0  }
  0xbf   : > { %s6092_s27 = sshll.u32 %s493_s15, 3  ;;  %501 = sbr.rel (%p6093_p10) target bundleno = 198 (0xc6), region = 92  ;;  %503 = vst.msk [vmem:[#allocation2] sm:$0xff] (!%p6093_p10), %vm502_vm0, %v7990_v0  ;;  %504 = vst.msk [vmem:[#allocation2 + $0x8] sm:$0xff] (!%p6093_p10), %vm502_vm0, %v7990_v0 }
  0xc0   : > { %s8301_s30 = scalar_lea.vmem %s9808_s0, %s6092_s27  ;;  %505 = vst.msk [vmem:[#allocation2 + $0x10] sm:$0xff] (!%p6093_p10), %vm502_vm0, %v7990_v0  ;;  %506 = vst.msk [vmem:[#allocation2 + $0x18] sm:$0xff] (!%p6093_p10), %vm502_vm0, %v7990_v0 }
  0xc1   : > { %507 = vst.msk [vmem:[#allocation2 + $0x20] sm:$0xff] (!%p6093_p10), %vm502_vm0, %v7990_v0  ;;  %508 = vst.msk [vmem:[#allocation2 + $0x28] sm:$0xff] (!%p6093_p10), %vm502_vm0, %v7990_v0 }
  0xc2   : > { %509 = vst.msk [vmem:[#allocation2 + $0x30] sm:$0xff] (!%p6093_p10), %vm502_vm0, %v7990_v0  ;;  %510 = vst.msk [vmem:[#allocation2 + $0x38] sm:$0xff] (!%p6093_p10), %vm502_vm0, %v7990_v0 }
  0xc3   : > { %512 = vst.msk [vmem:[#allocation3] sm:$0x7] (!%p6093_p10), %vm511_vm1, %v7990_v0 }
  0xc6 PF: > { %v515_v1 = vld [vmem:[%s9809_s1] sm:$0xff]  ;;  %v516_v2 = vld [vmem:[%s9809_s1 + $0x8] sm:$0xff]  ;;  %v517_v3 = vld [vmem:[%s9809_s1 + $0x10] sm:$0xff]  ;;  %vm519_vm2 = vcmask 261120   ;;  %vm1587_vm3 = vcmask 523269   ;;  %vm1591_vm4 = vcmask 1042432  }
  0xc7   : > { %v527_v4 = vand.u32 4294901760, %v515_v1  ;;  %v530_v5 = vand.u32 4294901760, %v516_v2  ;;  %v518_v6 = vld [vmem:[%s9809_s1 + $0x18] sm:$0xff]  ;;  %v533_v7 = vand.u32 4294901760, %v517_v3  ;;  %v513_v8 = vld [vmem:[%s8301_s30] sm:$0xff]  ;;  %v514_v9 = vld [vmem:[%s8301_s30 + $0x8] sm:$0xff] }
  0xc8   : > { %v536_v10 = vand.u32 4294901760, %v518_v6  ;;  %v521_v11 = vsel %vm519_vm2, %v513_v8, 0  ;;  %v524_v12 = vsel %vm519_vm2, %v514_v9, 0  ;;  %v1054_v24 = vld [vmem:[#allocation11] sm:$0xff]  ;;  %v1055_v31 = vld [vmem:[#allocation11 + $0x8] sm:$0xff]  ;;  %v1056_v36 = vld [vmem:[#allocation11 + $0x10] sm:$0xff] }
  0xc9   : > { %v8322_v13 = vpack.c.bf16 %v530_v5, %v527_v4  ;;  %v8324_v14 = vand.u32 4294901760, %v521_v11  ;;  %v8326_v15 = vand.u32 4294901760, %v524_v12  ;;  %v8328_v16 = vsub.f32 %v515_v1, %v527_v4  ;;  %v1057_v37 = vld [vmem:[#allocation11 + $0x18] sm:$0xff]  ;;  %s8847_s27 = smov 0  }
  0xca   : > { %v8330_v17 = vpack.c.bf16 %v536_v10, %v533_v7  ;;  %v8332_v18 = vsub.f32 %v516_v2, %v530_v5  ;;  %v8334_v19 = vsub.f32 %v517_v3, %v533_v7  ;;  %v8336_v20 = vsub.f32 %v518_v6, %v536_v10 }
  0xcb   : > { %6798 = vmatprep.subr.bf16.mxu0 %v8322_v13  ;;  %v8340_v21 = vsub.f32 %v521_v11, %v8324_v14  ;;  %v8343_v22 = vsub.f32 %v524_v12, %v8326_v15  ;;  %v618_v23 = vand.u32 4294901760, %v8328_v16  ;;  %v1059_v35 = vand.u32 4294901760, %v1054_v24 }
  0xcc   : > { %6800 = vmatpush3.bf16.msra.mxu0 %v8322_v13  ;;  %v625_v25 = vand.u32 4294901760, %v8332_v18  ;;  %v632_v26 = vand.u32 4294901760, %v8334_v19  ;;  %v639_v27 = vand.u32 4294901760, %v8336_v20  ;;  %v1062_v44 = vand.u32 4294901760, %v1055_v31 }
  0xcd   : > { %6802 = vmatprep.subr.bf16.mxu0 %v8330_v17  ;;  %v8352_v28 = vand.u32 4294901760, %v8340_v21  ;;  %v8355_v29 = vand.u32 4294901760, %v8343_v22  ;;  %v619_v30 = vsub.f32 %v8328_v16, %v618_v23  ;;  %v1065_v47 = vand.u32 4294901760, %v1056_v36 }
  0xce   : > { %v626_v32 = vsub.f32 %v8332_v18, %v625_v25  ;;  %v633_v33 = vsub.f32 %v8334_v19, %v632_v26  ;;  %v640_v34 = vsub.f32 %v8336_v20, %v639_v27  ;;  %v1068_v48 = vand.u32 4294901760, %v1057_v37 }
  0xcf   : > { %v598_v38 = vsub.f32 %v8340_v21, %v8352_v28  ;;  %v608_v39 = vsub.f32 %v8343_v22, %v8355_v29  ;;  %v620_v40 = vand.u32 4294901760, %v619_v30  ;;  %v8374_v51 = vpack.c.bf16 %v1062_v44, %v1059_v35 }
  0xd0   : > { %6804 = vmatpush3.bf16.msra.mxu0 %v8330_v17  ;;  %v627_v41 = vand.u32 4294901760, %v626_v32  ;;  %v634_v42 = vand.u32 4294901760, %v633_v33  ;;  %v641_v43 = vand.u32 4294901760, %v640_v34  ;;  %v8376_v52 = vsub.f32 %v1054_v24, %v1059_v35  ;;  %v1694_v32 = vld [vmem:[#allocation14 + $0x30] sm:$0xff]  ;;  %v1697_v33 = vld [vmem:[#allocation14 + $0x48] sm:$0xff] }
  0xd1   : > { %v599_v45 = vand.u32 4294901760, %v598_v38  ;;  %v609_v46 = vand.u32 4294901760, %v608_v39  ;;  %v8378_v53 = vsub.f32 %v1055_v31, %v1062_v44  ;;  %v8380_v54 = vsub.f32 %v1056_v36, %v1065_v47  ;;  %6846 = vmatprep.subr.bf16.mxu1 %v8374_v51 }
  0xd2   : > { %v6805_v49 = vpack.c.bf16 %v627_v41, %v620_v40  ;;  %v6809_v50 = vpack.c.bf16 %v641_v43, %v634_v42  ;;  %v8382_v55 = vpack.c.bf16 %v1068_v48, %v1065_v47  ;;  %v1150_v56 = vand.u32 4294901760, %v8376_v52  ;;  %6848 = vmatpush3.bf16.msra.mxu1 %v8374_v51  ;;  %v1701_v41 = vld [vmem:[#allocation14 + $0x68] sm:$0xff]  ;;  %v1704_v42 = vld [vmem:[#allocation14 + $0x80] sm:$0xff] }
  0xd3   : > { %6415 = vmatprep.mubr.f32.mxu0 %v599_v45  ;;  %6481 = vmatprep.mubr.f32.mxu1 %v599_v45  ;;  %v8385_v57 = vsub.f32 %v1057_v37, %v1068_v48  ;;  %v1157_v58 = vand.u32 4294901760, %v8378_v53  ;;  %v1164_v59 = vand.u32 4294901760, %v8380_v54  ;;  %v6813_v60 = vpack.c.bf16 %v8332_v18, %v8328_v16  ;;  %v1700_v43 = vld [vmem:[#allocation14 + $0x60] sm:$0xff]  ;;  %v1703_v48 = vld [vmem:[#allocation14 + $0x78] sm:$0xff] }
  0xd4   : > { %6416 = vmatmul.mubr.f32.vlgmr.msra.gmra.mrb[0].mxu0 %v609_v46  ;;  %6806 = vmatprep.subr.bf16.mxu0 %v6805_v49  ;;  %v1151_v61 = vsub.f32 %v8376_v52, %v1150_v56  ;;  %v6817_v5 = vpack.c.bf16 %v8336_v20, %v8334_v19  ;;  %v6861_v9 = vpack.c.bf16 %v8378_v53, %v8376_v52  ;;  %v1728_v35 = vand.u32 4294901760, %v1694_v32 }
  0xd5   : > { %6808 = vmatpush3.bf16.msra.mxu0 %v6805_v49  ;;  %6426 = vmatprep.mubr.f32.mxu0 %v8324_v14  ;;  %v1171_v62 = vand.u32 4294901760, %v8385_v57  ;;  %v1158_v63 = vsub.f32 %v8378_v53, %v1157_v58  ;;  %v1165_v0 = vsub.f32 %v8380_v54, %v1164_v59  ;;  %v6865_v10 = vpack.c.bf16 %v8385_v57, %v8380_v54  ;;  %v1707_v49 = vld [vmem:[#allocation14 + $0x98] sm:$0xff] }
  0xd6   : > { %6810 = vmatprep.subr.bf16.mxu0 %v6809_v50  ;;  %6850 = vmatprep.subr.bf16.mxu1 %v8382_v55  ;;  %v1152_v1 = vand.u32 4294901760, %v1151_v61  ;;  %v6829_v11 = vpack.c.bf16 %v625_v25, %v618_v23  ;;  %v6833_v12 = vpack.c.bf16 %v639_v27, %v632_v26  ;;  %v6877_v16 = vpack.c.bf16 %v1157_v58, %v1150_v56  ;;  %v1709_v56 = vld [vmem:[#allocation14 + $0xa8] sm:$0xff] }
  0xd7   : > { %v1172_v2 = vsub.f32 %v8385_v57, %v1171_v62  ;;  %v1159_v3 = vand.u32 4294901760, %v1158_v63  ;;  %v1166_v4 = vand.u32 4294901760, %v1165_v0  ;;  %6852 = vmatpush3.bf16.msra.mxu1 %v8382_v55  ;;  %v6881_v18 = vpack.c.bf16 %v1171_v62, %v1164_v59 }
  0xd8   : > { %v1732_v36 = vand.u32 4294901760, %v1697_v33  ;;  %v8478_v44 = vsub.f32 %v1694_v32, %v1728_v35  ;;  %v1738_v47 = vand.u32 4294901760, %v1704_v42  ;;  %v1736_v52 = vand.u32 4294901760, %v1700_v43 }
  0xd9   : > { %6812 = vmatpush3.bf16.msra.mxu0 %v6809_v50  ;;  %v1173_v6 = vand.u32 4294901760, %v1172_v2  ;;  %v6853_v7 = vpack.c.bf16 %v1159_v3, %v1152_v1  ;;  %v1710_v50 = vld [vmem:[#allocation14 + $0xb0] sm:$0xff]  ;;  %v1740_v53 = vand.u32 4294901760, %v1703_v48  ;;  %v1742_v63 = vand.u32 4294901760, %v1707_v49 }
  0xda   : > { %6814 = vmatprep.subr.bf16.mxu0 %v6813_v60  ;;  %6482 = vmatmul.mubr.f32.vlgmr.msra.gmra.mrb[0].mxu1 %v609_v46  ;;  %v8480_v45 = vsub.f32 %v1697_v33, %v1732_v36  ;;  %v1734_v46 = vand.u32 4294901760, %v1701_v41  ;;  %v8492_v59 = vsub.f32 %v1704_v42, %v1738_v47  ;;  %v8496_v61 = vsub.f32 %v1700_v43, %v1736_v52 }
  0xdb   : > { %v6857_v8 = vpack.c.bf16 %v1173_v6, %v1166_v4  ;;  %6854 = vmatprep.subr.bf16.mxu1 %v6853_v7  ;;  %6492 = vmatprep.mubr.f32.mxu1 %v8324_v14  ;;  %v8498_v62 = vsub.f32 %v1703_v48, %v1740_v53  ;;  %v1746_v0 = vand.u32 4294901760, %v1710_v50  ;;  %v1748_v3 = vand.u32 4294901760, %v1709_v56 }
  0xdc   : > { %6427 = vmatmul.mubr.f32.vlgmr.msra.gmra.mrb[0].mxu0 %v8326_v15  ;;  %6856 = vmatpush3.bf16.msra.mxu1 %v6853_v7  ;;  %v6931_v57 = vpack.c.bf16 %v8480_v45, %v8478_v44  ;;  %v8490_v58 = vsub.f32 %v1701_v41, %v1734_v46  ;;  %v8503_v4 = vpack.c.bf16 %v1738_v47, %v1734_v46  ;;  %v1883_v47 = vand.u32 4294901760, %v8492_v59 }
  0xdd   : > { %6816 = vmatpush3.bf16.msra.mxu0 %v6813_v60  ;;  %6437 = vmatprep.mubr.f32.mxu0 %v8340_v21  ;;  %v8494_v60 = vpack.c.bf16 %v1732_v36, %v1728_v35  ;;  %v8507_v6 = vsub.f32 %v1707_v49, %v1742_v63  ;;  %v8509_v7 = vsub.f32 %v1710_v50, %v1746_v0  ;;  %v1877_v50 = vand.u32 4294901760, %v8496_v61 }
  0xde   : > { %6818 = vmatprep.subr.bf16.mxu0 %v6817_v5  ;;  %6858 = vmatprep.subr.bf16.mxu1 %v6857_v8  ;;  %v6933_v1 = vpack.c.bf16 %v8492_v59, %v8490_v58  ;;  %v1871_v46 = vand.u32 4294901760, %v8490_v58  ;;  %vm1625_vm5 = vcmask 1046528   ;;  %vm1645_vm6 = vcmask 1045504  }
  0xdf   : > { %vm1665_vm7 = vcmask 1044480   ;;  %vm1685_vm8 = vcmask 523264   ;;  %vm3013_vm9 = vcmask 1041408   ;;  %vm3006_vm10 = vcmask 15360  }
  0xe0   : > { %6860 = vmatpush3.bf16.msra.mxu1 %v6857_v8 }
  0xe1   : > { %6820 = vmatpush3.bf16.msra.mxu0 %v6817_v5  ;;  %6862 = vmatprep.subr.bf16.mxu1 %v6861_v9  ;;  %v6935_v5 = vpack.c.bf16 %v8498_v62, %v8496_v61 }
  0xe2   : > { %6822 = vmatprep.subr.bf16.mxu0 %v8322_v13 }
  0xe3   : > { %6493 = vmatmul.mubr.f32.vlgmr.msra.gmra.mrb[0].mxu1 %v8326_v15 }
  0xe4   : > { %6438 = vmatmul.mubr.f32.vlgmr.msra.gmra.mrb[0].mxu0 %v8343_v22  ;;  %6864 = vmatpush3.bf16.msra.mxu1 %v6861_v9  ;;  %v8514_v9 = vsub.f32 %v1709_v56, %v1748_v3 }
  0xe5   : > { %6824 = vmatpush3.bf16.msra.mxu0 %v8322_v13  ;;  %6448 = vmatprep.mubr.f32.mxu0 %v8352_v28 }
  0xe6   : > { %6826 = vmatprep.subr.bf16.mxu0 %v8330_v17  ;;  %6503 = vmatprep.mubr.f32.mxu1 %v8340_v21  ;;  %v1688_v21 = vld [vmem:[#allocation14] sm:$0xff] }
  0xe7   : > { %6866 = vmatprep.subr.bf16.mxu1 %v6865_v10  ;;  %v1720_v23 = vand.u32 4294901760, %v1688_v21 }
  0xe8   : > { %6868 = vmatpush3.bf16.msra.mxu1 %v6865_v10  ;;  %v8516_v10 = vpack.c.bf16 %v1740_v53, %v1736_v52  ;;  %v1878_v52 = vsub.f32 %v8496_v61, %v1877_v50 }
  0xe9   : > { %6828 = vmatpush3.bf16.msra.mxu0 %v8330_v17  ;;  %6870 = vmatprep.subr.bf16.mxu1 %v8374_v51  ;;  %v8462_v27 = vsub.f32 %v1688_v21, %v1720_v23 }
  0xea   : > { %6830 = vmatprep.subr.bf16.mxu0 %v6829_v11 }
  0xeb   : > { %6504 = vmatmul.mubr.f32.vlgmr.msra.gmra.mrb[0].mxu1 %v8343_v22  ;;  %v1691_v22 = vld [vmem:[#allocation14 + $0x18] sm:$0xff] }
  0xec   : > { %6449 = vmatmul.mubr.f32.vlgmr.msra.gmra.mrb[0].mxu0 %v8355_v29  ;;  %6872 = vmatpush3.bf16.msra.mxu1 %v8374_v51  ;;  %v1724_v24 = vand.u32 4294901760, %v1691_v22 }
  0xed   : > { %6832 = vmatpush3.bf16.msra.mxu0 %v6829_v11  ;;  %6459 = vmatprep.mubr.f32.mxu0 %v8324_v14  ;;  %v6937_v11 = vpack.c.bf16 %v8509_v7, %v8507_v6 }
  0xee   : > { %6834 = vmatprep.subr.bf16.mxu0 %v6833_v12  ;;  %6514 = vmatprep.mubr.f32.mxu1 %v8352_v28  ;;  %v1695_v28 = vld [vmem:[#allocation14 + $0x38] sm:$0xff]  ;;  %v8476_v40 = vpack.c.bf16 %v1724_v24, %v1720_v23 }
  0xef   : > { %6874 = vmatprep.subr.bf16.mxu1 %v8382_v55  ;;  %v1726_v30 = vand.u32 4294901760, %v1695_v28 }
  0xf0   : > { %6876 = vmatpush3.bf16.msra.mxu1 %v8382_v55 }
  0xf1   : > { %6836 = vmatpush3.bf16.msra.mxu0 %v6833_v12  ;;  %6878 = vmatprep.subr.bf16.mxu1 %v6877_v16  ;;  %v8470_v37 = vsub.f32 %v1695_v28, %v1726_v30  ;;  %v7991_v12 = vmov 0.0  }
  0xf2   : > { %6838 = vmatprep.subr.bf16.mxu0 %v8322_v13 }
  0xf3   : > { %6515 = vmatmul.mubr.f32.vlgmr.msra.gmra.mrb[0].mxu1 %v8355_v29  ;;  %v1698_v29 = vld [vmem:[#allocation14 + $0x50] sm:$0xff] }
  0xf4   : > { %6460 = vmatmul.mubr.f32.vlgmr.msra.gmra.mrb[0].mxu0 %v8326_v15  ;;  %6880 = vmatpush3.bf16.msra.mxu1 %v6877_v16  ;;  %v1730_v31 = vand.u32 4294901760, %v1698_v29 }
  0xf5   : > { %6840 = vmatpush3.bf16.msra.mxu0 %v8322_v13  ;;  %6470 = vmatprep.mubr.f32.mxu0 %v8324_v14  ;;  %v1689_v13 = vld [vmem:[#allocation14 + $0x8] sm:$0xff] }
  0xf6   : > { %6842 = vmatprep.subr.bf16.mxu0 %v8330_v17  ;;  %6525 = vmatprep.mubr.f32.mxu1 %v8324_v14  ;;  %v1718_v19 = vand.u32 4294901760, %v1689_v13  ;;  %v8472_v38 = vsub.f32 %v1698_v29, %v1730_v31  ;;  %v8485_v54 = vpack.c.bf16 %v1730_v31, %v1726_v30  ;;  %v1847_v30 = vand.u32 4294901760, %v8470_v37 }
  0xf7   : > { %6882 = vmatprep.subr.bf16.mxu1 %v6881_v18 }
  0xf8   : > { %6884 = vmatpush3.bf16.msra.mxu1 %v6881_v18  ;;  %v8458_v25 = vsub.f32 %v1689_v13, %v1718_v19  ;;  %v1859_v31 = vand.u32 4294901760, %v8472_v38 }
  0xf9   : > { %6844 = vmatpush3.bf16.msra.mxu0 %v8330_v17  ;;  %6886 = vmatprep.subr.bf16.mxu1 %v8374_v51  ;;  %v1692_v17 = vld [vmem:[#allocation14 + $0x20] sm:$0xff] }
  0xfa   : > { %v1722_v20 = vand.u32 4294901760, %v1692_v17  ;;  %v1823_v18 = vand.u32 4294901760, %v8458_v25 }
  0xfb   : > { %6526 = vmatmul.mubr.f32.vlgmr.msra.gmra.mrb[0].mxu1 %v8326_v15 }
  0xfc   : > { %6471 = vmatmul.mubr.f32.vlgmr.msra.gmra.mrb[0].mxu0 %v8326_v15  ;;  %6888 = vmatpush3.bf16.msra.mxu1 %v8374_v51  ;;  %v8460_v26 = vsub.f32 %v1692_v17, %v1722_v20  ;;  %v8474_v39 = vpack.c.bf16 %v1722_v20, %v1718_v19  ;;  %v6929_v51 = vpack.c.bf16 %v8472_v38, %v8470_v37  ;;  %v1829_v17 = vand.u32 4294901760, %v8462_v27 }
  0xfd   : > { %6536 = vmatprep.mubr.f32.mxu1 %v8324_v14  ;;  %6890 = vmatprep.subr.bf16.mxu1 %v8382_v55  ;;  %v8464_v14 = vsub.f32 %v1691_v22, %v1724_v24  ;;  %v8531_v20 = vpack.c.bf16 %v1746_v0, %v1742_v63  ;;  %v1824_v22 = vsub.f32 %v8458_v25, %v1823_v18  ;;  %v1907_v63 = vand.u32 4294901760, %v8509_v7 }
  0xfe   : > { %2076 = vmatprep.mubr.f32.mxu0 %v7991_v12  ;;  %v1835_v13 = vand.u32 4294901760, %v8460_v26  ;;  %v1830_v24 = vsub.f32 %v8462_v27, %v1829_v17  ;;  %v1879_v0 = vand.u32 4294901760, %v1878_v52 }
  0xff   : > { %v6927_v34 = vpack.c.bf16 %v8464_v14, %v8462_v27  ;;  %v1841_v19 = vand.u32 4294901760, %v8464_v14  ;;  %v1825_v29 = vand.u32 4294901760, %v1824_v22  ;;  %v1848_v27 = vsub.f32 %v8470_v37, %v1847_v30 }
 0x100   : > { %6892 = vmatpush3.bf16.msra.mxu1 %v8382_v55  ;;  %v1706_v55 = vld [vmem:[#allocation14 + $0x90] sm:$0xff]  ;;  %v1836_v23 = vsub.f32 %v8460_v26, %v1835_v13  ;;  %v1831_v32 = vand.u32 4294901760, %v1830_v24  ;;  %v1889_v37 = vand.u32 4294901760, %v8498_v62  ;;  %v1908_v61 = vsub.f32 %v8509_v7, %v1907_v63 }
 0x101   : > { %6894 = vmatprep.subr.bf16.mxu1 %v8474_v39  ;;  %v1744_v2 = vand.u32 4294901760, %v1706_v55  ;;  %v1842_v28 = vsub.f32 %v8464_v14, %v1841_v19  ;;  %v1860_v14 = vsub.f32 %v8472_v38, %v1859_v31  ;;  %v1849_v42 = vand.u32 4294901760, %v1848_v27 }
 0x102   : > { %v1890_v53 = vsub.f32 %v8498_v62, %v1889_v37  ;;  %v8577_v24 = vpack.c.bf16 %v1841_v19, %v1829_v17 }
 0x103   : > { %6537 = vmatmul.mubr.f32.vlgmr.msra.gmra.mrb[0].mxu1 %v8326_v15  ;;  %v6925_v15 = vpack.c.bf16 %v8460_v26, %v8458_v25  ;;  %v8512_v8 = vsub.f32 %v1706_v55, %v1744_v2  ;;  %v8533_v21 = vpack.c.bf16 %v1748_v3, %v1744_v2  ;;  %v1843_v33 = vand.u32 4294901760, %v1842_v28 }
 0x104   : > { %6896 = vmatpush1.bf16.msra.mxu1 %v8476_v40  ;;  %1798 = vmatprep.mubr.f32.mxu1 %v7991_v12  ;;  %v1853_v25 = vand.u32 4294901760, %v8478_v44  ;;  %v1865_v26 = vand.u32 4294901760, %v8480_v45  ;;  %v1861_v43 = vand.u32 4294901760, %v1860_v14 }
 0x105   : > { %6926 = vmatprep.subr.bf16.mxu0 %v6925_v15  ;;  %6898 = vmatprep.subr.bf16.mxu1 %v8485_v54  ;;  %v6939_v16 = vpack.c.bf16 %v8514_v9, %v8512_v8  ;;  %v1837_v15 = vand.u32 4294901760, %v1836_v23  ;;  %v8547_v35 = vpack.c.bf16 %v1843_v33, %v1831_v32  ;;  %v1901_v2 = vand.u32 4294901760, %v8512_v8 }
 0x106   : > { %6928 = vmatpush1.bf16.msra.mxu0 %v6927_v34  ;;  %v1854_v36 = vsub.f32 %v8478_v44, %v1853_v25  ;;  %v1866_v41 = vsub.f32 %v8480_v45, %v1865_v26  ;;  %v8555_v38 = vpack.c.bf16 %v1861_v43, %v1849_v42  ;;  %v1884_v44 = vsub.f32 %v8492_v59, %v1883_v47 }
 0x107   : > { %6930 = vmatprep.subr.bf16.mxu0 %v6929_v51  ;;  %v6909_v34 = vpack.c.bf16 %v1837_v15, %v1825_v29  ;;  %v1872_v51 = vsub.f32 %v8490_v58, %v1871_v46  ;;  %v1913_v58 = vand.u32 4294901760, %v8514_v9  ;;  %v1902_v62 = vsub.f32 %v8512_v8, %v1901_v2 }
 0x108   : > { %6900 = vmatpush1.bf16.msra.mxu1 %v8494_v60  ;;  %v1855_v48 = vand.u32 4294901760, %v1854_v36  ;;  %v1867_v49 = vand.u32 4294901760, %v1866_v41  ;;  %v1885_v56 = vand.u32 4294901760, %v1884_v44  ;;  %v1909_v23 = vand.u32 4294901760, %v1908_v61 }
 0x109   : > { %6902 = vmatprep.subr.bf16.mxu1 %v8503_v4  ;;  %v1873_v55 = vand.u32 4294901760, %v1872_v51  ;;  %v1903_v28 = vand.u32 4294901760, %v1902_v62  ;;  %v8585_v7 = vpack.c.bf16 %v1865_v26, %v1853_v25  ;;  %v8587_v33 = vpack.c.bf16 %v1883_v47, %v1871_v46 }
 0x10a   : > { %6932 = vmatpush1.bf16.msra.mxu0 %v6931_v57  ;;  %v8559_v45 = vpack.c.bf16 %v1867_v49, %v1855_v48  ;;  %v1895_v57 = vand.u32 4294901760, %v8507_v6  ;;  %v8589_v8 = vpack.c.bf16 %v1889_v37, %v1877_v50  ;;  %v6094_v37 = vld [vmem:[%s9812_s4] ss:$0 sm:$0xff] }
 0x10b   : > { %6934 = vmatprep.subr.bf16.mxu0 %v6933_v1  ;;  %v1891_v1 = vand.u32 4294901760, %v1890_v53  ;;  %v8567_v3 = vpack.c.bf16 %v1885_v56, %v1873_v55 }
 0x10c   : > { %6904 = vmatpush1.bf16.msra.mxu1 %v8516_v10  ;;  %v1896_v59 = vsub.f32 %v8507_v6, %v1895_v57  ;;  %v8583_v6 = vpack.c.bf16 %v1859_v31, %v1847_v30  ;;  %v1599_v30 = vld [vmem:[%s9811_s3] sm:$0xf] }
 0x10d   : > { %6906 = vmatprep.subr.bf16.mxu1 %v8531_v20 }
 0x10e   : > { %6936 = vmatpush1.bf16.msra.mxu0 %v6935_v5  ;;  %v8571_v5 = vpack.c.bf16 %v1891_v1, %v1879_v0  ;;  %v1897_v22 = vand.u32 4294901760, %v1896_v59 }
 0x10f   : > { %6938 = vmatprep.subr.bf16.mxu0 %v6937_v11  ;;  %v1914_v11 = vsub.f32 %v8514_v9, %v1913_v58  ;;  %v8591_v9 = vpack.c.bf16 %v1907_v63, %v1895_v57 }
 0x110   : > { %6908 = vmatpush1.bf16.msra.mxu1 %v8533_v21  ;;  %v8579_v15 = vpack.c.bf16 %v1909_v23, %v1897_v22 }
 0x111   : > { %6910 = vmatprep.subr.bf16.mxu1 %v6909_v34  ;;  %v1915_v29 = vand.u32 4294901760, %v1914_v11  ;;  %v1586_v34 = vld [vmem:[#allocation3] sm:$0x7] }
 0x112   : > { %6940 = vmatpush1.bf16.msra.mxu0 %v6939_v16  ;;  %v8575_v16 = vpack.c.bf16 %v1835_v13, %v1823_v18  ;;  %v8593_v18 = vpack.c.bf16 %v1913_v58, %v1901_v2  ;;  %v1607_v13 = vlaneseq }
 0x113   : > { %6942 = vmatprep.subr.bf16.mxu0 %v8474_v39  ;;  %v8581_v32 = vpack.c.bf16 %v1915_v29, %v1903_v28 }
 0x114   : > { %v8595_v17 = vshrl.u32 %v1607_v13, 7 }
 0x116   : > { %9862 = vst [vmem:[#allocation38_spill] sm:$0xff] %v8595_v17  ;;  %v8598_v19 = vsub.s32 1, %v8595_v17  ;;  %v8604_v31 = vsub.s32 2, %v8595_v17  ;;  %v8607_v25 = vsub.s32 3, %v8595_v17  ;;  %v8610_v26 = vsub.s32 0, %v8595_v17 }
 0x118   : > { %9863 = vst [vmem:[#allocation39_spill] sm:$0xff] %v8598_v19  ;;  %v1618_v27 = vrot.slane %v1599_v30, %v8598_v19  ;;  %v1638_v36 = vrot.slane %v1599_v30, %v8604_v31  ;;  %v1658_v42 = vrot.slane %v1599_v30, %v8607_v25  ;;  %v1610_v46 = vrot.slane %v1599_v30, %v8610_v26 }
 0x1cf   : > { %v6472_v14 = vpop.f32.mrb[0].mxu0 }
 0x1d0   : > { %1588 = vst.msk [vmem:[#allocation3 - $0x5] sm:$0xe0] %vm1587_vm3, %v6472_v14  ;;  %v1593_v41 = vrot.slane %v6472_v14, 5  ;;  %v1044_v43 = vpop.f32.mrb[1].mxu0 }
 0x1d1   : > { %v1592_v47 = vrot.slane %v1044_v43, 5 }
 0x1d2   : > { %v1621_v48 = vmul.f32 %v1618_v27, %v1593_v41  ;;  %v1641_v44 = vmul.f32 %v1638_v36, %v1593_v41  ;;  %v1661_v52 = vmul.f32 %v1658_v42, %v1593_v41 }
 0x1d3   : > { %v1594_v49 = vsel %vm1591_vm4, %v1592_v47, %v1593_v41  ;;  %v1598_v50 = vsel %vm1591_vm4, %v1586_v34, %v1592_v47 }
 0x1d4   : > { %v1629_v51 = vrot.slane %v1621_v48, 1  ;;  %v1611_v53 = vmul.f32 %v1610_v46, %v1598_v50  ;;  %v1612_v55 = vmul.f32 %v1610_v46, %v1594_v49  ;;  %v1619_v56 = vmul.f32 %v1618_v27, %v1598_v50 }
 0x1d5   : > { %v1620_v57 = vmul.f32 %v1618_v27, %v1594_v49  ;;  %v1639_v63 = vmul.f32 %v1638_v36, %v1598_v50  ;;  %v1640_v1 = vmul.f32 %v1638_v36, %v1594_v49  ;;  %v1659_v2 = vmul.f32 %v1658_v42, %v1598_v50 }
 0x1d6   : > { %v1613_v0 = vadd.f32 %v6094_v37, %v1611_v53  ;;  %v1660_v58 = vmul.f32 %v1658_v42, %v1594_v49  ;;  %v1614_v59 = vadd.f32 %v6094_v37, %v1612_v55  ;;  %v1626_v61 = vrot.slane %v1619_v56, 1  ;;  %v8625_v55 = vpop.f32.mrb[0].mxu1 }
 0x1d7   : > { %v1627_v62 = vrot.slane %v1620_v57, 1  ;;  %v1646_v11 = vrot.slane %v1639_v63, 2  ;;  %v1649_v22 = vrot.slane %v1641_v44, 2  ;;  %v1647_v23 = vrot.slane %v1640_v1, 2  ;;  %v8627_v63 = vpop.f32.mrb[1].mxu1 }
 0x1d8   : > { %v1666_v28 = vrot.slane %v1659_v2, 3  ;;  %v1667_v29 = vrot.slane %v1660_v58, 3  ;;  %v1669_v13 = vrot.slane %v1661_v52, 3 }
 0x1d9   : > { %v1628_v30 = vsel %vm1625_vm5, %v1626_v61, %v1627_v62  ;;  %v1630_v34 = vsel %vm1625_vm5, %v1627_v62, %v1629_v51  ;;  %v1648_v41 = vsel %vm1645_vm6, %v1646_v11, %v1647_v23  ;;  %v1650_v36 = vsel %vm1645_vm6, %v1647_v23, %v1649_v22 }
 0x1da   : > { %v1633_v14 = vadd.f32 %v1628_v30, %v1613_v0  ;;  %v1634_v27 = vadd.f32 %v1630_v34, %v1614_v59  ;;  %v1668_v42 = vsel %vm1665_vm7, %v1666_v28, %v1667_v29  ;;  %v1670_v43 = vsel %vm1665_vm7, %v1667_v29, %v1669_v13  ;;  %v1690_v34 = vld [vmem:[#allocation14 + $0x10] sm:$0xff] }
 0x1dc   : > { %v1653_v46 = vadd.f32 %v1648_v41, %v1633_v14  ;;  %v1654_v47 = vadd.f32 %v1650_v36, %v1634_v27  ;;  %v1693_v14 = vld [vmem:[#allocation14 + $0x28] sm:$0xff]  ;;  %v1699_v41 = vld [vmem:[#allocation14 + $0x58] sm:$0xff] }
 0x1dd   : > { %v2418_v27 = vand.u32 4294901760, %v1693_v14 }
 0x1de   : > { %v1673_v48 = vadd.f32 %v1668_v42, %v1653_v46  ;;  %v1674_v49 = vadd.f32 %v1670_v43, %v1654_v47  ;;  %v2424_v43 = vand.u32 4294901760, %v1699_v41  ;;  %v1702_v46 = vld [vmem:[#allocation14 + $0x70] sm:$0xff]  ;;  %v1711_v47 = vld [vmem:[#allocation14 + $0xb8] sm:$0xff] }
 0x1df   : > { %v8680_v42 = vsub.f32 %v1693_v14, %v2418_v27 }
 0x1e0   : > { %v1675_v50 = vmul.f32 0.125, %v1673_v48  ;;  %v1676_v37 = vmul.f32 0.125, %v1674_v49  ;;  %v1679_v52 = vmul.f32 0.5, %v1673_v48  ;;  %v1680_v51 = vmul.f32 0.5, %v1674_v49 }
 0x1e2   : > { %v1677_v44 = vmul.f32 %v1675_v50, %v1673_v48  ;;  %v1678_v53 = vmul.f32 %v1676_v37, %v1674_v49  ;;  %v8694_v50 = vsub.f32 %v1699_v41, %v2424_v43  ;;  %v2427_v37 = vand.u32 4294901760, %v1702_v46 }
 0x1e4   : > { %v1681_v56 = vadd.f32 %v1679_v52, %v1677_v44  ;;  %v1682_v57 = vadd.f32 %v1680_v51, %v1678_v53  ;;  %v2436_v44 = vand.u32 4294901760, %v1711_v47  ;;  %v2531_v51 = vand.u32 4294901760, %v8694_v50 }
 0x1e6   : > { %v1683_v0 = vadd.f32 0.125, %v1681_v56  ;;  %v1684_v1 = vadd.f32 0.125, %v1682_v57  ;;  %v8717_v56 = vsub.f32 %v1702_v46, %v2427_v37 }
 0x1e8   : > { %1686 = vst.msk [vmem:[#allocation7] sm:$0xff] %vm1685_vm8, %v1683_v0  ;;  %v1713_v2 = vsel %vm1685_vm8, %v1683_v0, 0  ;;  %1687 = vst.msk [vmem:[#allocation7 + $0x8] sm:$0xff] %vm1685_vm8, %v1684_v1  ;;  %v1716_v58 = vsel %vm1685_vm8, %v1684_v1, 0 }
 0x1e9   : > { %v8633_v59 = vand.u32 4294901760, %v1713_v2  ;;  %v8635_v61 = vand.u32 4294901760, %v1716_v58 }
 0x1eb   : > { %v8638_v62 = vsub.f32 %v1713_v2, %v8633_v59  ;;  %v8641_v11 = vsub.f32 %v1716_v58, %v8635_v61 }
 0x1ed   : > { %2079 = vmatmul.mubr.f32.vlgmr.msra.gmra.mrb[2].mxu0 %v8638_v62  ;;  %v8645_v22 = vand.u32 4294901760, %v8638_v62  ;;  %v8648_v23 = vand.u32 4294901760, %v8641_v11 }
 0x1ee   : > { %6944 = vmatpush1.bf16.msra.mxu0 %v8476_v40  ;;  %2084 = vmatprep.mubr.f32.mxu0 %v7991_v12 }
 0x1ef   : > { %6946 = vmatprep.subr.bf16.mxu0 %v8485_v54  ;;  %v1802_v28 = vsub.f32 %v8638_v62, %v8645_v22  ;;  %v1813_v13 = vsub.f32 %v8641_v11, %v8648_v23 }
 0x1f1   : > { %2087 = vmatmul.mubr.f32.gmra.mrb[4].mxu0 %v8641_v11  ;;  %v8656_v29 = vand.u32 4294901760, %v1802_v28  ;;  %v8667_v30 = vand.u32 4294901760, %v1813_v13 }
 0x1f2   : > { %6948 = vmatpush1.bf16.msra.mxu0 %v8494_v60  ;;  %2173 = vmatprep.mubr.f32.mxu0 %v7991_v12 }
 0x1f3   : > { %1804 = vmatmul.mubr.f32.vlgmr.msra.gmra.mrb[2].mxu1 %v8656_v29  ;;  %6950 = vmatprep.subr.bf16.mxu0 %v8503_v4 }
 0x1f4   : > { %6912 = vmatpush1.bf16.msra.mxu1 %v8547_v35  ;;  %1809 = vmatprep.mubr.f32.mxu1 %v7991_v12  ;;  %v2415_v35 = vand.u32 4294901760, %v1690_v34 }
 0x1f5   : > { %6914 = vmatprep.subr.bf16.mxu1 %v8555_v38  ;;  %v1696_v38 = vld [vmem:[#allocation14 + $0x40] sm:$0xff] }
 0x1f6   : > { %6952 = vmatpush1.bf16.msra.mxu0 %v8516_v10  ;;  %v8678_v36 = vsub.f32 %v1690_v34, %v2415_v35  ;;  %v8739_v34 = vsub.f32 %v1711_v47, %v2436_v44 }
 0x1f7   : > { %1815 = vmatmul.mubr.f32.gmra.mrb[4].mxu1 %v8667_v30  ;;  %6954 = vmatprep.subr.bf16.mxu0 %v8531_v20 }
 0x1f8   : > { %6916 = vmatpush1.bf16.msra.mxu1 %v8559_v45  ;;  %1965 = vmatprep.mubr.f32.mxu1 %v7991_v12  ;;  %v8684_v45 = vpack.c.bf16 %v2418_v27, %v2415_v35  ;;  %v2510_v48 = vand.u32 4294901760, %v8678_v36 }
 0x1f9   : > { %6918 = vmatprep.subr.bf16.mxu1 %v8567_v3  ;;  %v2421_v3 = vand.u32 4294901760, %v1696_v38 }
 0x1fa   : > { %6956 = vmatpush1.bf16.msra.mxu0 %v8533_v21  ;;  %v2511_v52 = vsub.f32 %v8678_v36, %v2510_v48 }
 0x1fb   : > { %6958 = vmatprep.subr.bf16.mxu0 %v8575_v16  ;;  %v1705_v16 = vld [vmem:[#allocation14 + $0x88] sm:$0xff]  ;;  %v8692_v49 = vsub.f32 %v1696_v38, %v2421_v3 }
 0x1fc   : > { %6920 = vmatpush1.bf16.msra.mxu1 %v8571_v5  ;;  %v1708_v5 = vld [vmem:[#allocation14 + $0xa0] sm:$0xff]  ;;  %v2512_v1 = vand.u32 4294901760, %v2511_v52 }
 0x1fd   : > { %2177 = vmatmul.mubr.f32.vlgmr.msra.gmra.mrb[2].mxu0 %v8645_v22  ;;  %6922 = vmatprep.subr.bf16.mxu1 %v8579_v15  ;;  %v2517_v15 = vand.u32 4294901760, %v8680_v42  ;;  %v2524_v53 = vand.u32 4294901760, %v8692_v49 }
 0x1fe   : > { %6960 = vmatpush1.bf16.msra.mxu0 %v8577_v24  ;;  %2182 = vmatprep.mubr.f32.mxu0 %v7991_v12  ;;  %v8698_v24 = vpack.c.bf16 %v2424_v43, %v2421_v3 }
 0x1ff   : > { %6962 = vmatprep.subr.bf16.mxu0 %v8583_v6  ;;  %v2430_v6 = vand.u32 4294901760, %v1705_v16  ;;  %v2525_v58 = vsub.f32 %v8692_v49, %v2524_v53 }
 0x200   : > { %6924 = vmatpush1.bf16.msra.mxu1 %v8581_v32  ;;  %v2433_v32 = vand.u32 4294901760, %v1708_v5 }
 0x201   : > { %2186 = vmatmul.mubr.f32.gmra.mrb[4].mxu0 %v8648_v23  ;;  %6990 = vmatprep.subr.bf16.mxu1 %v8684_v45  ;;  %v8719_v57 = vsub.f32 %v1705_v16, %v2430_v6  ;;  %v2526_v14 = vand.u32 4294901760, %v2525_v58 }
 0x202   : > { %6964 = vmatpush1.bf16.msra.mxu0 %v8585_v7  ;;  %2304 = vmatprep.mubr.f32.mxu0 %v7991_v12  ;;  %v2518_v7 = vsub.f32 %v8680_v42, %v2517_v15  ;;  %v8724_v0 = vpack.c.bf16 %v2436_v44, %v2433_v32  ;;  %v8737_v13 = vsub.f32 %v1708_v5, %v2433_v32 }
 0x203   : > { %1967 = vmatmul.mubr.f32.vlgmr.msra.gmra.mrb[2].mxu1 %v8633_v59  ;;  %6966 = vmatprep.subr.bf16.mxu0 %v8587_v33  ;;  %v8715_v33 = vpack.c.bf16 %v2430_v6, %v2427_v37  ;;  %v2545_v28 = vand.u32 4294901760, %v8719_v57 }
 0x204   : > { %6992 = vmatpush3.bf16.msra.mxu1 %v8684_v45  ;;  %1972 = vmatprep.mubr.f32.mxu1 %v7991_v12  ;;  %v2519_v2 = vand.u32 4294901760, %v2518_v7 }
 0x205   : > { %6994 = vmatprep.subr.bf16.mxu1 %v8698_v24  ;;  %v2546_v38 = vsub.f32 %v8719_v57, %v2545_v28 }
 0x206   : > { %6968 = vmatpush1.bf16.msra.mxu0 %v8589_v8  ;;  %v2532_v8 = vsub.f32 %v8694_v50, %v2531_v51 }
 0x207   : > { %1974 = vmatmul.mubr.f32.gmra.mrb[4].mxu1 %v8635_v61  ;;  %6970 = vmatprep.subr.bf16.mxu0 %v8591_v9  ;;  %v2538_v9 = vand.u32 4294901760, %v8717_v56  ;;  %v2547_v43 = vand.u32 4294901760, %v2546_v38  ;;  %v3522_v38 = vld [vmem:[#allocation19 + $0x20] sm:$0xff] }
 0x208   : > { %6996 = vmatpush3.bf16.msra.mxu1 %v8698_v24  ;;  %6555 = vmatprep.mubr.f32.mxu1 %v8656_v29  ;;  %v7005_v29 = vpack.c.bf16 %v2519_v2, %v2512_v1  ;;  %v2533_v35 = vand.u32 4294901760, %v2532_v8 }
 0x209   : > { %6998 = vmatprep.subr.bf16.mxu1 %v8715_v33  ;;  %v2539_v27 = vsub.f32 %v8717_v56, %v2538_v9 }
 0x20a   : > { %6972 = vmatpush1.bf16.msra.mxu0 %v8593_v18  ;;  %v2552_v18 = vand.u32 4294901760, %v8737_v13  ;;  %v7009_v41 = vpack.c.bf16 %v2533_v35, %v2526_v14  ;;  %v3519_v14 = vld [vmem:[#allocation19 + $0x8] sm:$0xff]  ;;  %v3520_v35 = vld [vmem:[#allocation19 + $0x10] sm:$0xff] }
 0x20b   : > { %6974 = vmatprep.subr.bf16.mxu0 %v8474_v39  ;;  %v2559_v39 = vand.u32 4294901760, %v8739_v34  ;;  %v2540_v3 = vand.u32 4294901760, %v2539_v27  ;;  %v3521_v27 = vld [vmem:[#allocation19 + $0x18] sm:$0xff] }
 0x20c   : > { %7000 = vmatpush3.bf16.msra.mxu1 %v8715_v33  ;;  %v2553_v46 = vsub.f32 %v8737_v13, %v2552_v18 }
 0x20d   : > { %2306 = vmatmul.mubr.f32.vlgmr.msra.gmra.mrb[2].mxu0 %v8633_v59  ;;  %7002 = vmatprep.subr.bf16.mxu1 %v8724_v0 }
 0x20e   : > { %6976 = vmatpush1.bf16.msra.mxu0 %v8476_v40  ;;  %2311 = vmatprep.mubr.f32.mxu0 %v7991_v12  ;;  %v2560_v40 = vsub.f32 %v8739_v34, %v2559_v39  ;;  %v2554_v16 = vand.u32 4294901760, %v2553_v46  ;;  %v3525_v46 = vld [vmem:[#allocation19 + $0x38] sm:$0xff] }
 0x20f   : > { %6978 = vmatprep.subr.bf16.mxu0 %v8485_v54  ;;  %v7013_v54 = vpack.c.bf16 %v2547_v43, %v2540_v3  ;;  %v3528_v3 = vmul.f32 1.442695, %v3519_v14  ;;  %v3530_v43 = vmul.f32 1.442695, %v3520_v35 }
 0x210   : > { %7004 = vmatpush3.bf16.msra.mxu1 %v8724_v0  ;;  %v2561_v5 = vand.u32 4294901760, %v2560_v40  ;;  %v3532_v40 = vmul.f32 1.442695, %v3521_v27 }
 0x211   : > { %2313 = vmatmul.mubr.f32.gmra.mrb[4].mxu0 %v8635_v61  ;;  %7006 = vmatprep.subr.bf16.mxu1 %v7005_v29 }
 0x212   : > { %6980 = vmatpush1.bf16.msra.mxu0 %v8494_v60  ;;  %2399 = vmatprep.mubr.f32.mxu0 %v7991_v12  ;;  %v7017_v60 = vpack.c.bf16 %v2561_v5, %v2554_v16 }
 0x213   : > { %6556 = vmatmul.mubr.f32.vlgmr.msra.gmra.mrb[6].mxu1 %v8667_v30  ;;  %6982 = vmatprep.subr.bf16.mxu0 %v8503_v4  ;;  %v7021_v4 = vpack.c.bf16 %v8680_v42, %v8678_v36 }
 0x214   : > { %7008 = vmatpush3.bf16.msra.mxu1 %v7005_v29  ;;  %6574 = vmatprep.mubr.f32.mxu1 %v8633_v59  ;;  %v3518_v29 = vld [vmem:[#allocation19] sm:$0xff] }
 0x215   : > { %7010 = vmatprep.subr.bf16.mxu1 %v7009_v41 }
 0x216   : > { %6984 = vmatpush1.bf16.msra.mxu0 %v8516_v10  ;;  %v7025_v10 = vpack.c.bf16 %v8694_v50, %v8692_v49 }
 0x217   : > { %6986 = vmatprep.subr.bf16.mxu0 %v8531_v20  ;;  %v7029_v20 = vpack.c.bf16 %v8719_v57, %v8717_v56 }
 0x218   : > { %7012 = vmatpush3.bf16.msra.mxu1 %v7009_v41  ;;  %v3524_v41 = vld [vmem:[#allocation19 + $0x30] sm:$0xff] }
 0x219   : > { %7014 = vmatprep.subr.bf16.mxu1 %v7013_v54  ;;  %v3538_v5 = vmul.f32 1.442695, %v3524_v41 }
 0x21a   : > { %6988 = vmatpush1.bf16.msra.mxu0 %v8533_v21  ;;  %v7053_v21 = vpack.c.bf16 %v2517_v15, %v2510_v48 }
 0x21c   : > { %7016 = vmatpush3.bf16.msra.mxu1 %v7013_v54  ;;  %v3534_v54 = vmul.f32 1.442695, %v3522_v38 }
 0x21d   : > { %2401 = vmatmul.mubr.f32.vlgmr.msra.gmra.mrb[2].mxu0 %v8633_v59  ;;  %7018 = vmatprep.subr.bf16.mxu1 %v7017_v60 }
 0x21e   : > { %2406 = vmatprep.mubr.f32.mxu0 %v7991_v12  ;;  %v7033_v12 = vpack.c.bf16 %v8739_v34, %v8737_v13 }
 0x220   : > { %7020 = vmatpush3.bf16.msra.mxu1 %v7017_v60  ;;  %v3540_v60 = vmul.f32 1.442695, %v3525_v46 }
 0x221   : > { %2408 = vmatmul.mubr.f32.gmra.mrb[4].mxu0 %v8635_v61  ;;  %7022 = vmatprep.subr.bf16.mxu1 %v7021_v4 }
 0x223   : > { %6575 = vmatmul.mubr.f32.vlgmr.msra.gmra.mrb[6].mxu1 %v8635_v61 }
 0x224   : > { %7024 = vmatpush3.bf16.msra.mxu1 %v7021_v4  ;;  %6593 = vmatprep.mubr.f32.mxu1 %v8638_v62  ;;  %v7057_v62 = vpack.c.bf16 %v2531_v51, %v2524_v53 }
 0x225   : > { %7026 = vmatprep.subr.bf16.mxu1 %v7025_v10 }
 0x228   : > { %7028 = vmatpush3.bf16.msra.mxu1 %v7025_v10 }
 0x229   : > { %7030 = vmatprep.subr.bf16.mxu1 %v7029_v20 }
 0x22c   : > { %7032 = vmatpush3.bf16.msra.mxu1 %v7029_v20 }
 0x22d   : > { %7034 = vmatprep.subr.bf16.mxu1 %v7033_v12 }
 0x230   : > { %7036 = vmatpush3.bf16.msra.mxu1 %v7033_v12 }
 0x231   : > { %7038 = vmatprep.subr.bf16.mxu1 %v8684_v45 }
 0x233   : > { %6594 = vmatmul.mubr.f32.vlgmr.msra.gmra.mrb[6].mxu1 %v8641_v11  ;;  %v7061_v11 = vpack.c.bf16 %v2545_v28, %v2538_v9 }
 0x234   : > { %7040 = vmatpush3.bf16.msra.mxu1 %v8684_v45  ;;  %6612 = vmatprep.mubr.f32.mxu1 %v8645_v22  ;;  %v7065_v22 = vpack.c.bf16 %v2559_v39, %v2552_v18  ;;  %v3523_v18 = vld [vmem:[#allocation19 + $0x28] sm:$0xff]  ;;  %v3526_v39 = vmul.f32 1.442695, %v3518_v29 }
 0x235   : > { %7042 = vmatprep.subr.bf16.mxu1 %v8698_v24  ;;  %v3536_v16 = vmul.f32 1.442695, %v3523_v18 }
 0x236   : > { %7476 = vpow2.f32 %v3526_v39 }
 0x237   : > { %7478 = vpow2.f32 %v3528_v3 }
 0x238   : > { %7044 = vmatpush3.bf16.msra.mxu1 %v8698_v24  ;;  %7480 = vpow2.f32 %v3530_v43 }
 0x239   : > { %7046 = vmatprep.subr.bf16.mxu1 %v8715_v33  ;;  %7482 = vpow2.f32 %v3532_v40 }
 0x23a   : > { %7484 = vpow2.f32 %v3534_v54 }
 0x23b   : > { %7486 = vpow2.f32 %v3536_v16 }
 0x23c   : > { %7048 = vmatpush3.bf16.msra.mxu1 %v8715_v33  ;;  %7488 = vpow2.f32 %v3538_v5 }
 0x23d   : > { %7050 = vmatprep.subr.bf16.mxu1 %v8724_v0  ;;  %7490 = vpow2.f32 %v3540_v60 }
 0x240   : > { %7052 = vmatpush3.bf16.msra.mxu1 %v8724_v0  ;;  %v7477_v4 = vpop.eup %7476 }
 0x241   : > { %7054 = vmatprep.subr.bf16.mxu1 %v7053_v21  ;;  %v7479_v10 = vpop.eup %7478  ;;  %v8829_v20 = vsub.f32 0.0, %v7477_v4 }
 0x242   : > { %v7481_v12 = vpop.eup %7480 }
 0x243   : > { %6613 = vmatmul.mubr.f32.vlgmr.msra.gmra.mrb[6].mxu1 %v8648_v23  ;;  %v2998_v23 = vld [vmem:[#allocation16] sm:$0x3] }
 0x244   : > { %7056 = vmatpush3.bf16.msra.mxu1 %v7053_v21  ;;  %6631 = vmatprep.mubr.f32.mxu1 %v8633_v59  ;;  %v3015_v30 = vsel %vm3013_vm9, %v2998_v23, 0  ;;  %v8831_v21 = vsub.f32 0.0, %v7479_v10 }
 0x245   : > { %7058 = vmatprep.subr.bf16.mxu1 %v7057_v62  ;;  %v3018_v36 = vand.u32 4294901760, %v3015_v30 }
 0x248   : > { %7060 = vmatpush3.bf16.msra.mxu1 %v7057_v62  ;;  %v7483_v62 = vpop.eup %7482 }
 0x249   : > { %7062 = vmatprep.subr.bf16.mxu1 %v7061_v11  ;;  %v8835_v23 = vsub.f32 0.0, %v7483_v62 }
 0x24c   : > { %7064 = vmatpush3.bf16.msra.mxu1 %v7061_v11  ;;  %v8833_v11 = vsub.f32 0.0, %v7481_v12 }
 0x24d   : > { %7066 = vmatprep.subr.bf16.mxu1 %v7065_v22 }
 0x24e   : > { %9864 = vst [vmem:[#allocation40_spill] sm:$0xff] %v8833_v11 }
 0x250   : > { %7068 = vmatpush3.bf16.msra.mxu1 %v7065_v22  ;;  %v7485_v22 = vpop.eup %7484 }
 0x251   : > { %7070 = vmatprep.subr.bf16.mxu1 %v8684_v45 }
 0x253   : > { %6632 = vmatmul.mubr.f32.vlgmr.msra.gmra.mrb[6].mxu1 %v8635_v61 }
 0x254   : > { %7072 = vmatpush3.bf16.msra.mxu1 %v8684_v45  ;;  %6650 = vmatprep.mubr.f32.mxu1 %v8633_v59  ;;  %v3105_v59 = vsub.f32 %v3015_v30, %v3018_v36  ;;  %v7487_v30 = vpop.eup %7486 }
 0x255   : > { %7074 = vmatprep.subr.bf16.mxu1 %v8698_v24 }
 0x256   : > { %v3106_v42 = vand.u32 4294901760, %v3105_v59 }
 0x258   : > { %7076 = vmatpush3.bf16.msra.mxu1 %v8698_v24  ;;  %v3107_v45 = vsub.f32 %v3105_v59, %v3106_v42 }
 0x259   : > { %7078 = vmatprep.subr.bf16.mxu1 %v8715_v33 }
 0x25a   : > { %v3108_v47 = vand.u32 4294901760, %v3107_v45 }
 0x25c   : > { %7080 = vmatpush3.bf16.msra.mxu1 %v8715_v33 }
 0x25d   : > { %7082 = vmatprep.subr.bf16.mxu1 %v8724_v0 }
 0x260   : > { %7084 = vmatpush3.bf16.msra.mxu1 %v8724_v0 }
 0x261   : > { %6653 = vmatprep.subr.mxu1 %v3018_v36 }
 0x263   : > { %6651 = vmatmul.mubr.f32.vlgmr.msra.gmra.mrb[6].mxu1 %v8635_v61 }
 0x264   : > { %6654 = vmatpush3.msra.mxu1 %v3018_v36 }
 0x265   : > { %6658 = vmatprep.subr.mxu1 %v3108_v47 }
 0x2d6   : > { %v1968_v48 = vpop.f32.mrb[2].mxu1 }
 0x2d7   : > { %v1970_v15 = vpop.f32.mrb[3].mxu1 }
 0x2da   : > { %v1975_v49 = vpop.f32.mrb[4].mxu1 }
 0x2db   : > { %v1977_v50 = vpop.f32.mrb[5].mxu1 }
 0x2f0   : > { %v2402_v24 = vpop.f32.mrb[2].mxu0 }
 0x2f1   : > { %v7181_v37 = vadd.f32 %v2402_v24, %v1968_v48  ;;  %v2404_v6 = vpop.f32.mrb[3].mxu0 }
 0x2f2   : > { %v7182_v61 = vadd.f32 %v2404_v6, %v1970_v15  ;;  %v6095_v15 = vld [vmem:[#allocation17] ss:$0 sm:$0xff] }
 0x2f3   : > { %v3008_v32 = vsel %vm3006_vm10, %v7181_v37, 0 }
 0x2f4   : > { %v3083_v44 = vand.u32 4294901760, %v3008_v32  ;;  %2994 = vst.msk [vmem:[#allocation8] sm:$0xff] %vm1685_vm8, %v7182_v61  ;;  %v2409_v52 = vpop.f32.mrb[4].mxu0 }
 0x2f5   : > { %v7183_v7 = vadd.f32 %v2409_v52, %v1975_v49  ;;  %v2411_v53 = vpop.f32.mrb[5].mxu0 }
 0x2f6   : > { %v3084_v51 = vsub.f32 %v3008_v32, %v3083_v44  ;;  %v7184_v33 = vadd.f32 %v2411_v53, %v1977_v50 }
 0x2f7   : > { %v3011_v56 = vsel %vm3006_vm10, %v7183_v7, 0 }
 0x2f8   : > { %v3093_v57 = vand.u32 4294901760, %v3011_v56  ;;  %2995 = vst.msk [vmem:[#allocation8 + $0x8] sm:$0xff] %vm1685_vm8, %v7184_v33  ;;  %v3085_v0 = vand.u32 4294901760, %v3084_v51 }
 0x2fa   : > { %v3094_v1 = vsub.f32 %v3011_v56, %v3093_v57  ;;  %v3086_v2 = vsub.f32 %v3084_v51, %v3085_v0 }
 0x2fc   : > { %v3095_v58 = vand.u32 4294901760, %v3094_v1  ;;  %v3087_v8 = vand.u32 4294901760, %v3086_v2 }
 0x2fe   : > { %6655 = vmatprep.mubr.f32.mxu1 %v3087_v8  ;;  %v3096_v9 = vsub.f32 %v3094_v1, %v3095_v58 }
 0x300   : > { %v3097_v28 = vand.u32 4294901760, %v3096_v9 }
 0x302   : > { %6656 = vmatmul.mubr.f32.vlgmr.msra.gmra.mrb[8].mxu1 %v3097_v28 }
 0x303   : > { %6659 = vmatpush3.msra.mxu1 %v3108_v47  ;;  %6660 = vmatprep.mubr.f32.mxu1 %v3083_v44 }
 0x304   : > { %6663 = vmatprep.subr.mxu1 %v3105_v59 }
 0x30a   : > { %6661 = vmatmul.mubr.f32.vlgmr.msra.gmra.mrb[8].mxu1 %v3093_v57 }
 0x30b   : > { %6664 = vmatpush3.msra.mxu1 %v3105_v59  ;;  %6665 = vmatprep.mubr.f32.mxu1 %v3084_v51  ;;  %v7489_v59 = vpop.eup %7488 }
 0x30c   : > { %6668 = vmatprep.subr.mxu1 %v3018_v36  ;;  %v7491_v45 = vpop.eup %7490  ;;  %v8841_v47 = vsub.f32 0.0, %v7489_v59 }
 0x30d   : > { %v8843_v48 = vsub.f32 0.0, %v7491_v45 }
 0x312   : > { %6666 = vmatmul.mubr.f32.vlgmr.msra.gmra.mrb[8].mxu1 %v3094_v1 }
 0x313   : > { %6669 = vmatpush3.msra.mxu1 %v3018_v36  ;;  %6670 = vmatprep.mubr.f32.mxu1 %v3085_v0 }
 0x314   : > { %6673 = vmatprep.subr.mxu1 %v3106_v42 }
 0x31a   : > { %6671 = vmatmul.mubr.f32.vlgmr.msra.gmra.mrb[8].mxu1 %v3095_v58 }
 0x31b   : > { %6674 = vmatpush3.msra.mxu1 %v3106_v42  ;;  %6675 = vmatprep.mubr.f32.mxu1 %v3083_v44  ;;  %v8839_v42 = vsub.f32 0.0, %v7487_v30 }
 0x31c   : > { %6678 = vmatprep.subr.mxu1 %v3018_v36 }
 0x322   : > { %6676 = vmatmul.mubr.f32.vlgmr.msra.gmra.mrb[8].mxu1 %v3093_v57 }
 0x323   : > { %6679 = vmatpush3.msra.mxu1 %v3018_v36  ;;  %6680 = vmatprep.mubr.f32.mxu1 %v3083_v44  ;;  %v8837_v36 = vsub.f32 0.0, %v7485_v22 }
 0x32a   : > { %6681 = vmatmul.mubr.f32.vlgmr.msra.gmra.mrb[8].mxu1 %v3093_v57 }
 0x336   : > { %v6652_v13 = vpop.f32.mrb[6].mxu1 }
 0x337   : > { %2997 = vst.msk [vmem:[#allocation9 + $0x8] sm:$0xff] %vm1685_vm8, %v6652_v13  ;;  %v2984_v34 = vpop.f32.mrb[7].mxu1 }
 0x338   : > { %2996 = vst.msk [vmem:[#allocation9] sm:$0xff] %vm1685_vm8, %v2984_v34 }
 0x3fd   : > { %v6682_v49 = vpop.f32.mrb[8].mxu1 }
 0x3fe   : > { %v7185_v50 = vadd.f32 %v6682_v49, %v6095_v15  ;;  %v3496_v24 = vpop.f32.mrb[9].mxu1 }
 0x3ff   : > { %v7186_v37 = vadd.f32 %v6095_v15, %v3496_v24 }
 0x400   : > { %v3507_v6 = vmul.f32 0.0625, %v7185_v50  ;;  %v3511_v44 = vmul.f32 0.5, %v7185_v50 }
 0x401   : > { %v3506_v61 = vmul.f32 0.0625, %v7186_v37  ;;  %v3510_v7 = vmul.f32 0.5, %v7186_v37 }
 0x402   : > { %v3509_v32 = vmul.f32 %v7185_v50, %v3507_v6 }
 0x403   : > { %v3508_v52 = vmul.f32 %v7186_v37, %v3506_v61 }
 0x404   : > { %v3513_v53 = vadd.f32 %v3511_v44, %v3509_v32 }
 0x405   : > { %v3512_v51 = vadd.f32 %v3510_v7, %v3508_v52 }
 0x406   : > { %v3515_v33 = vadd.f32 1.0, %v3513_v53 }
 0x407   : > { %v3514_v56 = vadd.f32 1.0, %v3512_v51 }
 0x408   : > { %3517 = vst.msk [vmem:[#allocation6 + $0x8] sm:$0xff] %vm1685_vm8, %v3515_v33 }
 0x409   : > { %3516 = vst.msk [vmem:[#allocation6] sm:$0xff] %vm1685_vm8, %v3514_v56 }
 0x40a LB: >> { %v9865_v19 = vld [vmem:[#allocation39_spill] sm:$0xff]  ;;  %v9866_v17 = vld [vmem:[#allocation38_spill] sm:$0xff]  ;;  %v9867_v11 = vld [vmem:[#allocation40_spill] sm:$0xff]  ;;  %s8853_s25 = sshll.u32 %s7942_s27, 3  ;;  %v7992_v57 = vmov 1966171168   ;;  %s7942_s27 = sphi %s8847_s27, %s3555_s27  }
 0x40b   : >> { %v3568_v0 = vunpack.c.l.s4 %v7992_v57  ;;  %s3561_s28 = scalar_lea.vmem [#allocation8], %s8853_s25  ;;  %s3557_s24 = scalar_lea.vmem [#allocation6], %s8853_s25 }
 0x40c   : >> { %v8856_v1 = vld [vmem:[%s3561_s28] sm:$0xff]  ;;  %s3559_s12 = scalar_lea.vmem [#allocation7], %s8853_s25  ;;  %s3563_s20 = scalar_lea.vmem [#allocation9], %s8853_s25 }
 0x40d   : >> { %v3569_v2 = vunpack.c.0.s8 %v3568_v0  ;;  %v3965_v8 = vrot.slane %v8856_v1, %v8610_v26  ;;  %v3560_v9 = vld [vmem:[%s3559_s12] sm:$0xff]  ;;  %v4000_v39 = vrot.slane %v8856_v1, %v9865_v19  ;;  %v8901_v50 = vrot.slane %v8856_v1, %v8604_v31  ;;  %s9296_s14 = smov 0  }
 0x40e   : >> { %v8865_v28 = vld [vmem:[%s3563_s20] sm:$0xff] }
 0x40f   : >> { %3975 = vbcast.lane.b32.xlu1 %v3965_v8, 272  ;;  %3967 = vbcast.lane.b32.xlu0 %v3965_v8, 256  ;;  %v8868_v13 = vsub.s32 %v3569_v2, %v9866_v17 }
 0x410   : >> { %v8859_v58 = vld [vmem:[%s3557_s24] sm:$0xff] }
 0x411   : >> { %v8871_v34 = vmul.f32 %v3560_v9, %v8859_v58  ;;  %v3573_v14 = vrot.slane %v8859_v58, %v8868_v13 }
 0x413   : >> { %v3920_v29 = vrot.slane %v8871_v34, %v8868_v13  ;;  %3979 = vbcast.lane.b32.xlu1 %v3965_v8, 280  ;;  %3971 = vbcast.lane.b32.xlu0 %v3965_v8, 264  ;;  %v3589_v27 = vrot.slane %v3573_v14, %v8868_v13  ;;  %v3581_v43 = vcombine.high %v3573_v14, %v3573_v14 }
 0x415   : >> { %v8878_v35 = vrot.slane %v3920_v29, %v8868_v13  ;;  %v3618_v38 = vrot.slane %v3589_v27, %v8610_v26  ;;  %v8887_v40 = vrot.slane %v3581_v43, %v8868_v13  ;;  %v3928_v10 = vcombine.high %v3920_v29, %v3920_v29 }
 0x416   : >> { %v3611_v22 = vcombine.high %v3589_v27, %v3589_v27 }
 0x417   : >> { %3987 = vbcast.lane.b32.xlu1 %v3965_v8, 296  ;;  %3983 = vbcast.lane.b32.xlu0 %v3965_v8, 288  ;;  %v3655_v18 = vmul.f32 %v3618_v38, %v8829_v20  ;;  %v3656_v3 = vmul.f32 %v3618_v38, %v8831_v21  ;;  %v3622_v54 = vrot.slane %v8887_v40, %v8610_v26 }
 0x418   : >> { %v3657_v16 = vmul.f32 %v3618_v38, %v9867_v11  ;;  %v3658_v5 = vmul.f32 %v3618_v38, %v8835_v23  ;;  %v3659_v60 = vmul.f32 %v3618_v38, %v8837_v36  ;;  %v3660_v4 = vmul.f32 %v3618_v38, %v8839_v42 }
 0x419   : >> { %v3719_v41 = vmul.f32 1.442695, %v3655_v18  ;;  %v3721_v46 = vmul.f32 1.442695, %v3656_v3  ;;  %v3661_v12 = vmul.f32 %v3618_v38, %v8841_v47  ;;  %v3662_v30 = vmul.f32 %v3618_v38, %v8843_v48 }
 0x41a   : >> { %v3663_v59 = vmul.f32 %v3622_v54, %v8829_v20  ;;  %v3723_v45 = vmul.f32 1.442695, %v3657_v16  ;;  %v3725_v15 = vmul.f32 1.442695, %v3658_v5  ;;  %v3727_v49 = vmul.f32 1.442695, %v3659_v60 }
 0x41b   : >> { %3995 = vbcast.lane.b32.xlu1 %v3965_v8, 312  ;;  %3991 = vbcast.lane.b32.xlu0 %v3965_v8, 304  ;;  %7492 = vpow2.f32 %v3719_v41  ;;  %v3664_v24 = vmul.f32 %v3622_v54, %v8831_v21  ;;  %v3729_v37 = vmul.f32 1.442695, %v3660_v4  ;;  %v8905_v6 = vrot.slane %v3928_v10, %v8868_v13 }
 0x41c   : >> { %7494 = vpow2.f32 %v3721_v46  ;;  %v3665_v61 = vmul.f32 %v3622_v54, %v9867_v11  ;;  %v3731_v32 = vmul.f32 1.442695, %v3661_v12  ;;  %v3666_v44 = vmul.f32 %v3622_v54, %v8835_v23 }
 0x41d   : >> { %7496 = vpow2.f32 %v3723_v45  ;;  %v3733_v52 = vmul.f32 1.442695, %v3662_v30  ;;  %v3626_v7 = vrot.slane %v3611_v22, %v8610_v26  ;;  %v3667_v53 = vmul.f32 %v3622_v54, %v8837_v36 }
 0x41e   : >> { %7498 = vpow2.f32 %v3725_v15  ;;  %v3735_v51 = vmul.f32 1.442695, %v3663_v59  ;;  %v3668_v33 = vmul.f32 %v3622_v54, %v8839_v42  ;;  %v3737_v56 = vmul.f32 1.442695, %v3664_v24 }
 0x41f   : >> { %4006 = vbcast.lane.b32.xlu1 %v4000_v39, 264  ;;  %4002 = vbcast.lane.b32.xlu0 %v4000_v39, 256  ;;  %7500 = vpow2.f32 %v3727_v49  ;;  %v3669_v57 = vmul.f32 %v3622_v54, %v8841_v47  ;;  %v3739_v0 = vmul.f32 1.442695, %v3665_v61  ;;  %v3670_v8 = vmul.f32 %v3622_v54, %v8843_v48 }
 0x420   : >> { %7502 = vpow2.f32 %v3729_v37  ;;  %v3741_v9 = vmul.f32 1.442695, %v3666_v44  ;;  %v3613_v29 = vcombine.high %v8887_v40, %v8887_v40  ;;  %v3671_v14 = vmul.f32 %v3626_v7, %v8829_v20 }
 0x421   : >> { %7504 = vpow2.f32 %v3731_v32  ;;  %v3743_v27 = vmul.f32 1.442695, %v3667_v53  ;;  %v3672_v38 = vmul.f32 %v3626_v7, %v8831_v21  ;;  %v3745_v18 = vmul.f32 1.442695, %v3668_v33 }
 0x422   : >> { %7506 = vpow2.f32 %v3733_v52  ;;  %v3747_v41 = vmul.f32 1.442695, %v3669_v57  ;;  %v3566_v3 = vcombine.high %v8859_v58, %v8859_v58  ;;  %v3674_v43 = vmul.f32 %v3626_v7, %v8835_v23 }
 0x423   : >> { %4014 = vbcast.lane.b32.xlu1 %v4000_v39, 280  ;;  %4010 = vbcast.lane.b32.xlu0 %v4000_v39, 272  ;;  %7508 = vpow2.f32 %v3735_v51  ;;  %v3749_v46 = vmul.f32 1.442695, %v3670_v8  ;;  %v8928_v54 = vrot.slane %v3613_v29, %v8610_v26  ;;  %v3675_v16 = vmul.f32 %v3626_v7, %v8837_v36 }
 0x424   : >> { %7510 = vpow2.f32 %v3737_v56  ;;  %v3751_v5 = vmul.f32 1.442695, %v3671_v14  ;;  %v3676_v4 = vmul.f32 %v3626_v7, %v8839_v42  ;;  %v3753_v58 = vmul.f32 1.442695, %v3672_v38 }
 0x425   : >> { %v7493_v62 = vpop.eup %7492  ;;  %7512 = vpow2.f32 %v3739_v0  ;;  %v3677_v12 = vmul.f32 %v3626_v7, %v8841_v47  ;;  %v3678_v30 = vmul.f32 %v3626_v7, %v8843_v48  ;;  %v3757_v59 = vmul.f32 1.442695, %v3674_v43 }
 0x426   : >> { %3847 = vst.msk [vmem:[#allocation4] sm:$0xff] %vm1685_vm8, %v7493_v62  ;;  %v7495_v2 = vpop.eup %7494  ;;  %7514 = vpow2.f32 %v3741_v9  ;;  %v8940_v15 = vrot.slane %v3566_v3, %v8868_v13  ;;  %v3679_v49 = vmul.f32 %v8928_v54, %v8829_v20  ;;  %v3759_v24 = vmul.f32 1.442695, %v3675_v16 }
 0x427   : >> { %4022 = vbcast.lane.b32.xlu1 %v4000_v39, 296  ;;  %4018 = vbcast.lane.b32.xlu0 %v4000_v39, 288  ;;  %3848 = vst.msk [vmem:[#allocation4 + $0x8] sm:$0xff] %vm1685_vm8, %v7495_v2  ;;  %v7497_v40 = vpop.eup %7496  ;;  %7516 = vpow2.f32 %v3743_v27  ;;  %v8949_v61 = vrot.slane %v8856_v1, %v8607_v25  ;;  %v3680_v32 = vmul.f32 %v8928_v54, %v8831_v21  ;;  %v3761_v44 = vmul.f32 1.442695, %v3676_v4 }
 0x428   : >> { %v7499_v60 = vpop.eup %7498  ;;  %7518 = vpow2.f32 %v3745_v18  ;;  %3849 = vst.msk [vmem:[#allocation4 + $0x10] sm:$0xff] %vm1685_vm8, %v7497_v40  ;;  %v3681_v53 = vmul.f32 %v8928_v54, %v9867_v11  ;;  %v3682_v33 = vmul.f32 %v8928_v54, %v8835_v23  ;;  %v3765_v56 = vmul.f32 1.442695, %v3678_v30 }
 0x429   : >> { %v7501_v10 = vpop.eup %7500  ;;  %7520 = vpow2.f32 %v3747_v41  ;;  %3850 = vst.msk [vmem:[#allocation4 + $0x18] sm:$0xff] %vm1685_vm8, %v7499_v60  ;;  %v3683_v2 = vmul.f32 %v8928_v54, %v8837_v36  ;;  %v3767_v8 = vmul.f32 1.442695, %v3679_v49  ;;  %v3684_v29 = vmul.f32 %v8928_v54, %v8839_v42 }
 0x42a   : >> { %v7503_v22 = vpop.eup %7502  ;;  %7522 = vpow2.f32 %v3749_v46  ;;  %3851 = vst.msk [vmem:[#allocation4 + $0x20] sm:$0xff] %vm1685_vm8, %v7501_v10  ;;  %v3769_v14 = vmul.f32 1.442695, %v3680_v32  ;;  %v3913_v27 = vcombine.high %v8871_v34, %v8871_v34  ;;  %v3582_v18 = vcombine.high %v8940_v15, %v8940_v15 }
 0x42b   : >> { %4030 = vbcast.lane.b32.xlu1 %v4000_v39, 312  ;;  %4026 = vbcast.lane.b32.xlu0 %v4000_v39, 304  ;;  %v3673_v39 = vmul.f32 %v3626_v7, %v9867_v11  ;;  %v7505_v45 = vpop.eup %7504  ;;  %7524 = vpow2.f32 %v3751_v5  ;;  %3852 = vst.msk [vmem:[#allocation4 + $0x28] sm:$0xff] %vm1685_vm8, %v7503_v22  ;;  %v8956_v7 = vrot.slane %v8940_v15, %v8868_v13  ;;  %v3771_v41 = vmul.f32 1.442695, %v3681_v53 }
 0x42c   : >> { %v7507_v37 = vpop.eup %7506  ;;  %7526 = vpow2.f32 %v3753_v58  ;;  %3853 = vst.msk [vmem:[#allocation4 + $0x30] sm:$0xff] %vm1685_vm8, %v7505_v45  ;;  %v3686_v43 = vmul.f32 %v8928_v54, %v8843_v48  ;;  %v3773_v46 = vmul.f32 1.442695, %v3682_v33  ;;  %v8987_v34 = vrot.slane %v3913_v27, %v8868_v13 }
 0x42d   : >> { %v3755_v62 = vmul.f32 1.442695, %v3673_v39  ;;  %v7509_v52 = vpop.eup %7508  ;;  %3854 = vst.msk [vmem:[#allocation4 + $0x38] sm:$0xff] %vm1685_vm8, %v7507_v37  ;;  %v8966_v0 = vrot.slane %v8956_v7, %v8610_v26  ;;  %v3685_v39 = vmul.f32 %v8928_v54, %v8841_v47  ;;  %v3775_v5 = vmul.f32 1.442695, %v3683_v2 }
 0x42e   : >> { %v7511_v51 = vpop.eup %7510  ;;  %3855 = vst.msk [vmem:[#allocation4 + $0x40] sm:$0xff] %vm1685_vm8, %v7509_v52  ;;  %v3777_v4 = vmul.f32 1.442695, %v3684_v29  ;;  %v8999_v58 = vrot.slane %v8987_v34, %v8868_v13  ;;  %v3781_v45 = vmul.f32 1.442695, %v3686_v43 }
 0x42f   : >> { %4041 = vbcast.lane.b32.xlu1 %v8901_v50, 264  ;;  %4037 = vbcast.lane.b32.xlu0 %v8901_v50, 256  ;;  %7528 = vpow2.f32 %v3755_v62  ;;  %v7513_v57 = vpop.eup %7512  ;;  %3856 = vst.msk [vmem:[#allocation4 + $0x48] sm:$0xff] %vm1685_vm8, %v7511_v51  ;;  %v3687_v16 = vmul.f32 %v8966_v0, %v8829_v20  ;;  %v3688_v54 = vmul.f32 %v8966_v0, %v8831_v21  ;;  %v3779_v22 = vmul.f32 1.442695, %v3685_v39 }
 0x430   : >> { %7530 = vpow2.f32 %v3757_v59  ;;  %v7515_v9 = vpop.eup %7514  ;;  %3857 = vst.msk [vmem:[#allocation4 + $0x50] sm:$0xff] %vm1685_vm8, %v7513_v57  ;;  %v3689_v62 = vmul.f32 %v8966_v0, %v9867_v11  ;;  %v3690_v59 = vmul.f32 %v8966_v0, %v8835_v23  ;;  %v3692_v52 = vmul.f32 %v8966_v0, %v8839_v42 }
 0x431   : >> { %7532 = vpow2.f32 %v3759_v24  ;;  %v7517_v38 = vpop.eup %7516  ;;  %3858 = vst.msk [vmem:[#allocation4 + $0x58] sm:$0xff] %vm1685_vm8, %v7515_v9  ;;  %v3691_v24 = vmul.f32 %v8966_v0, %v8837_v36  ;;  %v3783_v37 = vmul.f32 1.442695, %v3687_v16  ;;  %v3785_v53 = vmul.f32 1.442695, %v3688_v54 }
 0x432   : >> { %7534 = vpow2.f32 %v3761_v44  ;;  %v7519_v3 = vpop.eup %7518  ;;  %3859 = vst.msk [vmem:[#allocation4 + $0x60] sm:$0xff] %vm1685_vm8, %v7517_v38  ;;  %v4104_v44 = vsub.s32 4, %v9866_v17  ;;  %v3693_v51 = vmul.f32 %v8966_v0, %v8841_v47  ;;  %v3787_v33 = vmul.f32 1.442695, %v3689_v62 }
 0x433   : >> { %4049 = vbcast.lane.b32.xlu1 %v8901_v50, 280  ;;  %4045 = vbcast.lane.b32.xlu0 %v8901_v50, 272  ;;  %v7521_v40 = vpop.eup %7520  ;;  %3860 = vst.msk [vmem:[#allocation4 + $0x68] sm:$0xff] %vm1685_vm8, %v7519_v3  ;;  %v3612_v57 = vcombine.high %v8956_v7, %v8956_v7  ;;  %v3694_v2 = vmul.f32 %v8966_v0, %v8843_v48  ;;  %v3793_v38 = vmul.f32 1.442695, %v3692_v52 }
 0x434   : >> { %v7523_v60 = vpop.eup %7522  ;;  %3861 = vst.msk [vmem:[#allocation4 + $0x70] sm:$0xff] %vm1685_vm8, %v7521_v40  ;;  %v9039_v7 = vrot.slane %v8856_v1, %v4104_v44 }
 0x435   : >> { %v7525_v10 = vpop.eup %7524  ;;  %3862 = vst.msk [vmem:[#allocation4 + $0x78] sm:$0xff] %vm1685_vm8, %v7523_v60  ;;  %v9050_v43 = vrot.slane %v3612_v57, %v8610_v26  ;;  %v3797_v40 = vmul.f32 1.442695, %v3694_v2 }
 0x436   : >> { %v7527_v30 = vpop.eup %7526  ;;  %3863 = vst.msk [vmem:[#allocation4 + $0x80] sm:$0xff] %vm1685_vm8, %v7525_v10 }
 0x437   : >> { %4057 = vbcast.lane.b32.xlu1 %v8901_v50, 296  ;;  %4053 = vbcast.lane.b32.xlu0 %v8901_v50, 288  ;;  %3864 = vst.msk [vmem:[#allocation4 + $0x88] sm:$0xff] %vm1685_vm8, %v7527_v30 }
 0x439   : >> { %v7529_v15 = vpop.eup %7528 }
 0x43a   : >> { %v7531_v32 = vpop.eup %7530  ;;  %3865 = vst.msk [vmem:[#allocation4 + $0x90] sm:$0xff] %vm1685_vm8, %v7529_v15 }
 0x43b   : >> { %4065 = vbcast.lane.b32.xlu1 %v8901_v50, 312  ;;  %4061 = vbcast.lane.b32.xlu0 %v8901_v50, 304  ;;  %v3763_v50 = vmul.f32 1.442695, %v3677_v12  ;;  %v9002_v12 = vrot.slane %v3582_v18, %v8868_v13  ;;  %3866 = vst.msk [vmem:[#allocation4 + $0x98] sm:$0xff] %vm1685_vm8, %v7531_v32 }
 0x43d   : >> { %7536 = vpow2.f32 %v3763_v50  ;;  %v9012_v49 = vrot.slane %v9002_v12, %v8610_v26  ;;  %v7533_v50 = vpop.eup %7532 }
 0x43e   : >> { %7538 = vpow2.f32 %v3765_v56  ;;  %v7535_v56 = vpop.eup %7534  ;;  %3867 = vst.msk [vmem:[#allocation4 + $0xa0] sm:$0xff] %vm1685_vm8, %v7533_v50  ;;  %v3705_v50 = vmul.f32 %v9050_v43, %v9867_v11 }
 0x43f   : >> { %4076 = vbcast.lane.b32.xlu1 %v8949_v61, 264  ;;  %4072 = vbcast.lane.b32.xlu0 %v8949_v61, 256  ;;  %7540 = vpow2.f32 %v3767_v8  ;;  %v3789_v8 = vmul.f32 1.442695, %v3690_v59  ;;  %v3695_v29 = vmul.f32 %v9012_v49, %v8829_v20  ;;  %3868 = vst.msk [vmem:[#allocation4 + $0xa8] sm:$0xff] %vm1685_vm8, %v7535_v56  ;;  %v3696_v0 = vmul.f32 %v9012_v49, %v8831_v21 }
 0x440   : >> { %7542 = vpow2.f32 %v3769_v14  ;;  %v3791_v14 = vmul.f32 1.442695, %v3691_v24  ;;  %v3697_v39 = vmul.f32 %v9012_v49, %v9867_v11  ;;  %v3702_v59 = vmul.f32 %v9012_v49, %v8843_v48 }
 0x441   : >> { %7544 = vpow2.f32 %v3771_v41  ;;  %v3795_v41 = vmul.f32 1.442695, %v3693_v51  ;;  %v3799_v60 = vmul.f32 1.442695, %v3695_v29  ;;  %v3801_v10 = vmul.f32 1.442695, %v3696_v0 }
 0x442   : >> { %7546 = vpow2.f32 %v3773_v46  ;;  %v3698_v46 = vmul.f32 %v9012_v49, %v8835_v23  ;;  %v3803_v30 = vmul.f32 1.442695, %v3697_v39  ;;  %v3614_v24 = vcombine.high %v9002_v12, %v9002_v12 }
 0x443   : >> { %4084 = vbcast.lane.b32.xlu1 %v8949_v61, 280  ;;  %4080 = vbcast.lane.b32.xlu0 %v8949_v61, 272  ;;  %7548 = vpow2.f32 %v3775_v5  ;;  %v3699_v5 = vmul.f32 %v9012_v49, %v8837_v36  ;;  %v3706_v56 = vmul.f32 %v9050_v43, %v8835_v23  ;;  %v3813_v57 = vmul.f32 1.442695, %v3702_v59 }
 0x444   : >> { %7550 = vpow2.f32 %v3777_v4  ;;  %v3700_v4 = vmul.f32 %v9012_v49, %v8839_v42  ;;  %v3708_v0 = vmul.f32 %v9050_v43, %v8839_v42  ;;  %v3709_v39 = vmul.f32 %v9050_v43, %v8841_v47 }
 0x445   : >> { %7552 = vpow2.f32 %v3779_v22  ;;  %v3701_v22 = vmul.f32 %v9012_v49, %v8841_v47  ;;  %v3807_v32 = vmul.f32 1.442695, %v3699_v5  ;;  %v3704_v49 = vmul.f32 %v9050_v43, %v8831_v21 }
 0x446   : >> { %7554 = vpow2.f32 %v3781_v45  ;;  %v3805_v45 = vmul.f32 1.442695, %v3698_v46  ;;  %v3821_v46 = vmul.f32 1.442695, %v3706_v56 }
 0x447   : >> { %4092 = vbcast.lane.b32.xlu1 %v8949_v61, 296  ;;  %4088 = vbcast.lane.b32.xlu0 %v8949_v61, 288  ;;  %v7537_v9 = vpop.eup %7536  ;;  %7556 = vpow2.f32 %v3783_v37  ;;  %v3703_v37 = vmul.f32 %v9050_v43, %v8829_v20  ;;  %v3811_v51 = vmul.f32 1.442695, %v3701_v22  ;;  %v3827_v22 = vmul.f32 1.442695, %v3709_v39 }
 0x448   : >> { %v7539_v27 = vpop.eup %7538  ;;  %7558 = vpow2.f32 %v3785_v53  ;;  %3869 = vst.msk [vmem:[#allocation4 + $0xb0] sm:$0xff] %vm1685_vm8, %v7537_v9  ;;  %v3809_v53 = vmul.f32 1.442695, %v3700_v4  ;;  %v3707_v9 = vmul.f32 %v9050_v43, %v8837_v36  ;;  %v3825_v4 = vmul.f32 1.442695, %v3708_v0 }
 0x449   : >> { %v7541_v18 = vpop.eup %7540  ;;  %7560 = vpow2.f32 %v3787_v33  ;;  %3870 = vst.msk [vmem:[#allocation4 + $0xb8] sm:$0xff] %vm1685_vm8, %v7539_v27  ;;  %v3815_v29 = vmul.f32 1.442695, %v3703_v37  ;;  %v4139_v27 = vsub.s32 5, %v9866_v17 }
 0x44a   : >> { %v7543_v3 = vpop.eup %7542  ;;  %7562 = vpow2.f32 %v3789_v8  ;;  %3871 = vst.msk [vmem:[#allocation4 + $0xc0] sm:$0xff] %vm1685_vm8, %v7541_v18  ;;  %v9089_v8 = vrot.slane %v3614_v24, %v8610_v26  ;;  %v3823_v5 = vmul.f32 1.442695, %v3707_v9 }
 0x44b   : >> { %4100 = vbcast.lane.b32.xlu1 %v8949_v61, 312  ;;  %4096 = vbcast.lane.b32.xlu0 %v8949_v61, 304  ;;  %v3929_v61 = vcombine.high %v8987_v34, %v8987_v34  ;;  %v7545_v16 = vpop.eup %7544  ;;  %7564 = vpow2.f32 %v3791_v14  ;;  %3872 = vst.msk [vmem:[#allocation4 + $0xc8] sm:$0xff] %vm1685_vm8, %v7543_v3  ;;  %v3710_v3 = vmul.f32 %v9050_v43, %v8843_v48 }
 0x44c   : >> { %v7547_v54 = vpop.eup %7546  ;;  %7566 = vpow2.f32 %v3793_v38  ;;  %3873 = vst.msk [vmem:[#allocation4 + $0xd0] sm:$0xff] %vm1685_vm8, %v7545_v16  ;;  %v3817_v38 = vmul.f32 1.442695, %v3704_v49  ;;  %v3711_v16 = vmul.f32 %v9089_v8, %v8829_v20  ;;  %v9114_v43 = vrot.slane %v8856_v1, %v4139_v27 }
 0x44d   : >> { %v9059_v34 = vrot.slane %v3929_v61, %v8868_v13  ;;  %v7549_v62 = vpop.eup %7548  ;;  %7568 = vpow2.f32 %v3795_v41  ;;  %3874 = vst.msk [vmem:[#allocation4 + $0xd8] sm:$0xff] %vm1685_vm8, %v7547_v54  ;;  %v3819_v41 = vmul.f32 1.442695, %v3705_v50  ;;  %v3712_v54 = vmul.f32 %v9089_v8, %v8831_v21 }
 0x44e   : >> { %v7551_v13 = vpop.eup %7550  ;;  %7570 = vpow2.f32 %v3797_v40  ;;  %3875 = vst.msk [vmem:[#allocation4 + $0xe0] sm:$0xff] %vm1685_vm8, %v7549_v62  ;;  %v3713_v62 = vmul.f32 %v9089_v8, %v9867_v11  ;;  %v3716_v37 = vmul.f32 %v9089_v8, %v8839_v42  ;;  %v3717_v49 = vmul.f32 %v9089_v8, %v8841_v47 }
 0x44f   : >> { %4111 = vbcast.lane.b32.xlu1 %v9039_v7, 264  ;;  %4107 = vbcast.lane.b32.xlu0 %v9039_v7, 256  ;;  %v7553_v15 = vpop.eup %7552  ;;  %7572 = vpow2.f32 %v3799_v60  ;;  %3876 = vst.msk [vmem:[#allocation4 + $0xe8] sm:$0xff] %vm1685_vm8, %v7551_v13  ;;  %v3829_v13 = vmul.f32 1.442695, %v3710_v3  ;;  %v3718_v50 = vmul.f32 %v9089_v8, %v8843_v48 }
 0x450   : >> { %v7555_v52 = vpop.eup %7554  ;;  %7574 = vpow2.f32 %v3801_v10  ;;  %3877 = vst.msk [vmem:[#allocation4 + $0xf0] sm:$0xff] %vm1685_vm8, %v7553_v15  ;;  %v3831_v15 = vmul.f32 1.442695, %v3711_v16 }
 0x451   : >> { %v7557_v12 = vpop.eup %7556  ;;  %7576 = vpow2.f32 %v3803_v30  ;;  %3878 = vst.msk [vmem:[#allocation4 + $0xf8] sm:$0xff] %vm1685_vm8, %v7555_v52  ;;  %v3714_v30 = vmul.f32 %v9089_v8, %v8835_v23 }
 0x452   : >> { %v7559_v33 = vpop.eup %7558  ;;  %7578 = vpow2.f32 %v3805_v45  ;;  %3879 = vst.msk [vmem:[#allocation4 + $0x100] sm:$0xff] %vm1685_vm8, %v7557_v12  ;;  %v3715_v45 = vmul.f32 %v9089_v8, %v8837_v36  ;;  %v3843_v8 = vmul.f32 1.442695, %v3717_v49  ;;  %v9186_v49 = vld [vmem:[#allocation2 + $0x30] sm:$0xff]  }
 0x453   : >> { %4119 = vbcast.lane.b32.xlu1 %v9039_v7, 280  ;;  %4115 = vbcast.lane.b32.xlu0 %v9039_v7, 272  ;;  %v7561_v2 = vpop.eup %7560  ;;  %7580 = vpow2.f32 %v3807_v32  ;;  %3880 = vst.msk [vmem:[#allocation4 + $0x108] sm:$0xff] %vm1685_vm8, %v7559_v33  ;;  %v3833_v32 = vmul.f32 1.442695, %v3712_v54 }
 0x454   : >> { %v7563_v14 = vpop.eup %7562  ;;  %7582 = vpow2.f32 %v3809_v53  ;;  %3881 = vst.msk [vmem:[#allocation4 + $0x110] sm:$0xff] %vm1685_vm8, %v7561_v2  ;;  %v3835_v53 = vmul.f32 1.442695, %v3713_v62  ;;  %v3839_v56 = vmul.f32 1.442695, %v3715_v45  ;;  %v4209_v62 = vsub.s32 7, %v9866_v17 }
 0x455   : >> { %v7565_v18 = vpop.eup %7564  ;;  %7584 = vpow2.f32 %v3811_v51  ;;  %3882 = vst.msk [vmem:[#allocation4 + $0x118] sm:$0xff] %vm1685_vm8, %v7563_v14  ;;  %v3837_v51 = vmul.f32 1.442695, %v3714_v30  ;;  %v3841_v2 = vmul.f32 1.442695, %v3716_v37  ;;  %v9174_v30 = vld [vmem:[#allocation2] sm:$0xff]  }
 0x456   : >> { %v7567_v61 = vpop.eup %7566  ;;  %7586 = vpow2.f32 %v3813_v57  ;;  %3883 = vst.msk [vmem:[#allocation4 + $0x120] sm:$0xff] %vm1685_vm8, %v7565_v18  ;;  %v3845_v14 = vmul.f32 1.442695, %v3718_v50  ;;  %v4174_v18 = vsub.s32 6, %v9866_v17  ;;  %v9182_v37 = vld [vmem:[#allocation2 + $0x20] sm:$0xff]  }
 0x457   : >> { %4127 = vbcast.lane.b32.xlu1 %v9039_v7, 296  ;;  %4123 = vbcast.lane.b32.xlu0 %v9039_v7, 288  ;;  %v7569_v40 = vpop.eup %7568  ;;  %7588 = vpow2.f32 %v3815_v29  ;;  %3884 = vst.msk [vmem:[#allocation4 + $0x128] sm:$0xff] %vm1685_vm8, %v7567_v61 }
 0x458   : >> { %v7571_v60 = vpop.eup %7570  ;;  %7590 = vpow2.f32 %v3817_v38  ;;  %3885 = vst.msk [vmem:[#allocation4 + $0x130] sm:$0xff] %vm1685_vm8, %v7569_v40 }
 0x459   : >> { %v7573_v10 = vpop.eup %7572  ;;  %7592 = vpow2.f32 %v3819_v41  ;;  %3886 = vst.msk [vmem:[#allocation4 + $0x138] sm:$0xff] %vm1685_vm8, %v7571_v60 }
 0x45a   : >> { %7594 = vpow2.f32 %v3821_v46  ;;  %3887 = vst.msk [vmem:[#allocation4 + $0x140] sm:$0xff] %vm1685_vm8, %v7573_v10  ;;  %v4175_v46 = vrot.slane %v8856_v1, %v4174_v18 }
 0x45b   : >> { %4135 = vbcast.lane.b32.xlu1 %v9039_v7, 312  ;;  %4131 = vbcast.lane.b32.xlu0 %v9039_v7, 304  ;;  %v7575_v7 = vpop.eup %7574  ;;  %7596 = vpow2.f32 %v3823_v5 }
 0x45c   : >> { %v7577_v59 = vpop.eup %7576  ;;  %3888 = vst.msk [vmem:[#allocation4 + $0x148] sm:$0xff] %vm1685_vm8, %v7575_v7  ;;  %7598 = vpow2.f32 %v3825_v4  ;;  %v4245_v7 = vrot.slane %v8878_v35, %v8610_v26 }
 0x45d   : >> { %v7579_v24 = vpop.eup %7578  ;;  %3889 = vst.msk [vmem:[#allocation4 + $0x150] sm:$0xff] %vm1685_vm8, %v7577_v59  ;;  %7600 = vpow2.f32 %v3827_v22  ;;  %v4210_v22 = vrot.slane %v8856_v1, %v4209_v62  ;;  %v9178_v59 = vld [vmem:[#allocation2 + $0x10] sm:$0xff]  }
 0x45e   : >> { %v7581_v52 = vpop.eup %7580  ;;  %3890 = vst.msk [vmem:[#allocation4 + $0x158] sm:$0xff] %vm1685_vm8, %v7579_v24  ;;  %7602 = vpow2.f32 %v3829_v13  ;;  %v9176_v13 = vld [vmem:[#allocation2 + $0x8] sm:$0xff]   ;;  %v9180_v24 = vld [vmem:[#allocation2 + $0x18] sm:$0xff]  }
 0x45f   : >> { %4146 = vbcast.lane.b32.xlu1 %v9114_v43, 264  ;;  %4142 = vbcast.lane.b32.xlu0 %v9114_v43, 256  ;;  %v7583_v12 = vpop.eup %7582  ;;  %3891 = vst.msk [vmem:[#allocation4 + $0x160] sm:$0xff] %vm1685_vm8, %v7581_v52  ;;  %7604 = vpow2.f32 %v3831_v15 }
 0x460   : >> { %v7585_v33 = vpop.eup %7584  ;;  %3892 = vst.msk [vmem:[#allocation4 + $0x168] sm:$0xff] %vm1685_vm8, %v7583_v12  ;;  %7606 = vpow2.f32 %v3833_v32  ;;  %v9184_v32 = vld [vmem:[#allocation2 + $0x28] sm:$0xff]  }
 0x461   : >> { %v7587_v57 = vpop.eup %7586  ;;  %3893 = vst.msk [vmem:[#allocation4 + $0x170] sm:$0xff] %vm1685_vm8, %v7585_v33  ;;  %7608 = vpow2.f32 %v3835_v53  ;;  %v9188_v53 = vld [vmem:[#allocation2 + $0x38] sm:$0xff]  }
 0x462   : >> { %v7589_v9 = vpop.eup %7588  ;;  %3894 = vst.msk [vmem:[#allocation4 + $0x178] sm:$0xff] %vm1685_vm8, %v7587_v57  ;;  %7610 = vpow2.f32 %v3837_v51 }
 0x463   : >> { %4154 = vbcast.lane.b32.xlu1 %v9114_v43, 280  ;;  %4150 = vbcast.lane.b32.xlu0 %v9114_v43, 272  ;;  %v7591_v29 = vpop.eup %7590  ;;  %3895 = vst.msk [vmem:[#allocation4 + $0x180] sm:$0xff] %vm1685_vm8, %v7589_v9  ;;  %7612 = vpow2.f32 %v3839_v56 }
 0x464   : >> { %v7593_v0 = vpop.eup %7592  ;;  %3896 = vst.msk [vmem:[#allocation4 + $0x188] sm:$0xff] %vm1685_vm8, %v7591_v29  ;;  %7614 = vpow2.f32 %v3841_v2 }
 0x465   : >> { %v7595_v38 = vpop.eup %7594  ;;  %3897 = vst.msk [vmem:[#allocation4 + $0x190] sm:$0xff] %vm1685_vm8, %v7593_v0  ;;  %7616 = vpow2.f32 %v3843_v8 }
 0x466   : >> { %v7597_v39 = vpop.eup %7596  ;;  %3898 = vst.msk [vmem:[#allocation4 + $0x198] sm:$0xff] %vm1685_vm8, %v7595_v38  ;;  %7618 = vpow2.f32 %v3845_v14  ;;  %v4249_v38 = vrot.slane %v8905_v6, %v8610_v26 }
 0x467   : >> { %4162 = vbcast.lane.b32.xlu1 %v9114_v43, 296  ;;  %4158 = vbcast.lane.b32.xlu0 %v9114_v43, 288  ;;  %v7599_v41 = vpop.eup %7598  ;;  %3899 = vst.msk [vmem:[#allocation4 + $0x1a0] sm:$0xff] %vm1685_vm8, %v7597_v39 }
 0x468   : >> { %v7601_v61 = vpop.eup %7600  ;;  %3900 = vst.msk [vmem:[#allocation4 + $0x1a8] sm:$0xff] %vm1685_vm8, %v7599_v41 }
 0x469   : >> { %v7603_v3 = vpop.eup %7602  ;;  %3901 = vst.msk [vmem:[#allocation4 + $0x1b0] sm:$0xff] %vm1685_vm8, %v7601_v61 }
 0x46a   : >> { %v7605_v40 = vpop.eup %7604  ;;  %3902 = vst.msk [vmem:[#allocation4 + $0x1b8] sm:$0xff] %vm1685_vm8, %v7603_v3 }
 0x46b   : >> { %4170 = vbcast.lane.b32.xlu1 %v9114_v43, 312  ;;  %4166 = vbcast.lane.b32.xlu0 %v9114_v43, 304  ;;  %v7607_v16 = vpop.eup %7606  ;;  %3903 = vst.msk [vmem:[#allocation4 + $0x1c0] sm:$0xff] %vm1685_vm8, %v7605_v40 }
 0x46c   : >> { %v7609_v5 = vpop.eup %7608  ;;  %3904 = vst.msk [vmem:[#allocation4 + $0x1c8] sm:$0xff] %vm1685_vm8, %v7607_v16 }
 0x46d   : >> { %v7611_v60 = vpop.eup %7610  ;;  %3905 = vst.msk [vmem:[#allocation4 + $0x1d0] sm:$0xff] %vm1685_vm8, %v7609_v5 }
 0x46e   : >> { %v7613_v43 = vpop.eup %7612  ;;  %3906 = vst.msk [vmem:[#allocation4 + $0x1d8] sm:$0xff] %vm1685_vm8, %v7611_v60 }
 0x46f   : >> { %4181 = vbcast.lane.b32.xlu1 %v4175_v46, 264  ;;  %4177 = vbcast.lane.b32.xlu0 %v4175_v46, 256  ;;  %v7615_v54 = vpop.eup %7614  ;;  %3907 = vst.msk [vmem:[#allocation4 + $0x1e0] sm:$0xff] %vm1685_vm8, %v7613_v43 }
 0x470   : >> { %v7617_v4 = vpop.eup %7616  ;;  %3908 = vst.msk [vmem:[#allocation4 + $0x1e8] sm:$0xff] %vm1685_vm8, %v7615_v54 }
 0x471   : >> { %v7619_v10 = vpop.eup %7618  ;;  %3909 = vst.msk [vmem:[#allocation4 + $0x1f0] sm:$0xff] %vm1685_vm8, %v7617_v4 }
 0x472   : >> { %3910 = vst.msk [vmem:[#allocation4 + $0x1f8] sm:$0xff] %vm1685_vm8, %v7619_v10  ;;  %v3958_v10 = vcombine.high %v8878_v35, %v8878_v35 }
 0x473   : >> { %4189 = vbcast.lane.b32.xlu1 %v4175_v46, 280  ;;  %4185 = vbcast.lane.b32.xlu0 %v4175_v46, 272 }
 0x477   : >> { %4197 = vbcast.lane.b32.xlu1 %v4175_v46, 296  ;;  %4193 = vbcast.lane.b32.xlu0 %v4175_v46, 288 }
 0x47b   : >> { %4205 = vbcast.lane.b32.xlu1 %v4175_v46, 312  ;;  %4201 = vbcast.lane.b32.xlu0 %v4175_v46, 304 }
 0x47f   : >> { %4216 = vbcast.lane.b32.xlu1 %v4210_v22, 264  ;;  %4212 = vbcast.lane.b32.xlu0 %v4210_v22, 256 }
 0x481   : >> { %v3976_v45 = vpop.permute.xlu1 %3975  ;;  %v3968_v15 = vpop.permute.xlu0 %3967 }
 0x482   : >> { %v4284_v1 = vmul.f32 %v4245_v7, %v3976_v45  ;;  %v4282_v52 = vmul.f32 %v4245_v7, %v3968_v15 }
 0x483   : >> { %4224 = vbcast.lane.b32.xlu1 %v4210_v22, 280  ;;  %4220 = vbcast.lane.b32.xlu0 %v4210_v22, 272 }
 0x484   : >> { %4348 = vst.msk [vmem:[#allocation5 + $0x10] sm:$0xff] %vm1685_vm8, %v4284_v1  ;;  %4346 = vst.msk [vmem:[#allocation5] sm:$0xff] %vm1685_vm8, %v4282_v52  ;;  %v4253_v1 = vrot.slane %v3958_v10, %v8610_v26 }
 0x485   : >> { %v3980_v12 = vpop.permute.xlu1 %3979  ;;  %v3972_v50 = vpop.permute.xlu0 %3971 }
 0x486   : >> { %v4285_v51 = vmul.f32 %v4245_v7, %v3980_v12  ;;  %v4283_v33 = vmul.f32 %v4245_v7, %v3972_v50 }
 0x487   : >> { %4232 = vbcast.lane.b32.xlu1 %v4210_v22, 296  ;;  %4228 = vbcast.lane.b32.xlu0 %v4210_v22, 288 }
 0x488   : >> { %4349 = vst.msk [vmem:[#allocation5 + $0x18] sm:$0xff] %vm1685_vm8, %v4285_v51  ;;  %4347 = vst.msk [vmem:[#allocation5 + $0x8] sm:$0xff] %vm1685_vm8, %v4283_v33 }
 0x489   : >> { %v3988_v56 = vpop.permute.xlu1 %3987  ;;  %v3984_v57 = vpop.permute.xlu0 %3983 }
 0x48a   : >> { %v4287_v2 = vmul.f32 %v4245_v7, %v3988_v56  ;;  %v4286_v9 = vmul.f32 %v4245_v7, %v3984_v57 }
 0x48b   : >> { %4240 = vbcast.lane.b32.xlu1 %v4210_v22, 312  ;;  %4236 = vbcast.lane.b32.xlu0 %v4210_v22, 304 }
 0x48c   : >> { %4351 = vst.msk [vmem:[#allocation5 + $0x28] sm:$0xff] %vm1685_vm8, %v4287_v2  ;;  %4350 = vst.msk [vmem:[#allocation5 + $0x20] sm:$0xff] %vm1685_vm8, %v4286_v9 }
 0x48d   : >> { %v3996_v8 = vpop.permute.xlu1 %3995  ;;  %v3992_v29 = vpop.permute.xlu0 %3991 }
 0x48e   : >> { %v4289_v14 = vmul.f32 %v4245_v7, %v3996_v8  ;;  %v4288_v0 = vmul.f32 %v4245_v7, %v3992_v29 }
 0x490   : >> { %4353 = vst.msk [vmem:[#allocation5 + $0x38] sm:$0xff] %vm1685_vm8, %v4289_v14  ;;  %4352 = vst.msk [vmem:[#allocation5 + $0x30] sm:$0xff] %vm1685_vm8, %v4288_v0  ;;  %v3960_v14 = vcombine.high %v8905_v6, %v8905_v6 }
 0x491   : >> { %v4007_v39 = vpop.permute.xlu1 %4006  ;;  %v4003_v41 = vpop.permute.xlu0 %4002 }
 0x492   : >> { %v4291_v61 = vmul.f32 %v4249_v38, %v4007_v39  ;;  %v4290_v3 = vmul.f32 %v4249_v38, %v4003_v41 }
 0x494   : >> { %4355 = vst.msk [vmem:[#allocation5 + $0x48] sm:$0xff] %vm1685_vm8, %v4291_v61  ;;  %4354 = vst.msk [vmem:[#allocation5 + $0x40] sm:$0xff] %vm1685_vm8, %v4290_v3  ;;  %v4257_v61 = vrot.slane %v3960_v14, %v8610_v26 }
 0x495   : >> { %v4015_v46 = vpop.permute.xlu1 %4014  ;;  %v4011_v40 = vpop.permute.xlu0 %4010 }
 0x496   : >> { %v4293_v16 = vmul.f32 %v4249_v38, %v4015_v46  ;;  %v4292_v5 = vmul.f32 %v4249_v38, %v4011_v40 }
 0x498   : >> { %4357 = vst.msk [vmem:[#allocation5 + $0x58] sm:$0xff] %vm1685_vm8, %v4293_v16  ;;  %4356 = vst.msk [vmem:[#allocation5 + $0x50] sm:$0xff] %vm1685_vm8, %v4292_v5 }
 0x499   : >> { %v4023_v60 = vpop.permute.xlu1 %4022  ;;  %v4019_v43 = vpop.permute.xlu0 %4018 }
 0x49a   : >> { %v4295_v54 = vmul.f32 %v4249_v38, %v4023_v60  ;;  %v4294_v4 = vmul.f32 %v4249_v38, %v4019_v43 }
 0x49c   : >> { %4359 = vst.msk [vmem:[#allocation5 + $0x68] sm:$0xff] %vm1685_vm8, %v4295_v54  ;;  %4358 = vst.msk [vmem:[#allocation5 + $0x60] sm:$0xff] %vm1685_vm8, %v4294_v4 }
 0x49d   : >> { %v4031_v22 = vpop.permute.xlu1 %4030  ;;  %v4027_v7 = vpop.permute.xlu0 %4026 }
 0x49e   : >> { %v4297_v45 = vmul.f32 %v4249_v38, %v4031_v22  ;;  %v4296_v15 = vmul.f32 %v4249_v38, %v4027_v7 }
 0x4a0   : >> { %4361 = vst.msk [vmem:[#allocation5 + $0x78] sm:$0xff] %vm1685_vm8, %v4297_v45  ;;  %4360 = vst.msk [vmem:[#allocation5 + $0x70] sm:$0xff] %vm1685_vm8, %v4296_v15 }
 0x4a1   : >> { %v4042_v52 = vpop.permute.xlu1 %4041  ;;  %v4038_v12 = vpop.permute.xlu0 %4037 }
 0x4a2   : >> { %v4299_v50 = vmul.f32 %v4253_v1, %v4042_v52  ;;  %v4298_v51 = vmul.f32 %v4253_v1, %v4038_v12  ;;  %v4261_v52 = vrot.slane %v8999_v58, %v8610_v26 }
 0x4a4   : >> { %4363 = vst.msk [vmem:[#allocation5 + $0x88] sm:$0xff] %vm1685_vm8, %v4299_v50  ;;  %4362 = vst.msk [vmem:[#allocation5 + $0x80] sm:$0xff] %vm1685_vm8, %v4298_v51 }
 0x4a5   : >> { %v4050_v35 = vpop.permute.xlu1 %4049  ;;  %v4046_v33 = vpop.permute.xlu0 %4045 }
 0x4a6   : >> { %v4301_v56 = vmul.f32 %v4253_v1, %v4050_v35  ;;  %v4300_v57 = vmul.f32 %v4253_v1, %v4046_v33 }
 0x4a8   : >> { %4365 = vst.msk [vmem:[#allocation5 + $0x98] sm:$0xff] %vm1685_vm8, %v4301_v56  ;;  %4364 = vst.msk [vmem:[#allocation5 + $0x90] sm:$0xff] %vm1685_vm8, %v4300_v57 }
 0x4a9   : >> { %v4058_v2 = vpop.permute.xlu1 %4057  ;;  %v4054_v9 = vpop.permute.xlu0 %4053 }
 0x4aa   : >> { %v4303_v8 = vmul.f32 %v4253_v1, %v4058_v2  ;;  %v4302_v29 = vmul.f32 %v4253_v1, %v4054_v9 }
 0x4ac   : >> { %4367 = vst.msk [vmem:[#allocation5 + $0xa8] sm:$0xff] %vm1685_vm8, %v4303_v8  ;;  %4366 = vst.msk [vmem:[#allocation5 + $0xa0] sm:$0xff] %vm1685_vm8, %v4302_v29 }
 0x4ad   : >> { %v4066_v0 = vpop.permute.xlu1 %4065  ;;  %v4062_v38 = vpop.permute.xlu0 %4061 }
 0x4ae   : >> { %v4305_v39 = vmul.f32 %v4253_v1, %v4066_v0  ;;  %v4304_v41 = vmul.f32 %v4253_v1, %v4062_v38 }
 0x4b0   : >> { %4369 = vst.msk [vmem:[#allocation5 + $0xb8] sm:$0xff] %vm1685_vm8, %v4305_v39  ;;  %4368 = vst.msk [vmem:[#allocation5 + $0xb0] sm:$0xff] %vm1685_vm8, %v4304_v41 }
 0x4b1   : >> { %v4077_v3 = vpop.permute.xlu1 %4076  ;;  %v4073_v46 = vpop.permute.xlu0 %4072 }
 0x4b2   : >> { %v4307_v40 = vmul.f32 %v4257_v61, %v4077_v3  ;;  %v4306_v16 = vmul.f32 %v4257_v61, %v4073_v46 }
 0x4b4   : >> { %4371 = vst.msk [vmem:[#allocation5 + $0xc8] sm:$0xff] %vm1685_vm8, %v4307_v40  ;;  %4370 = vst.msk [vmem:[#allocation5 + $0xc0] sm:$0xff] %vm1685_vm8, %v4306_v16 }
 0x4b5   : >> { %v4085_v6 = vpop.permute.xlu1 %4084  ;;  %v4081_v5 = vpop.permute.xlu0 %4080 }
 0x4b6   : >> { %v4309_v60 = vmul.f32 %v4257_v61, %v4085_v6  ;;  %v4308_v43 = vmul.f32 %v4257_v61, %v4081_v5 }
 0x4b8   : >> { %4373 = vst.msk [vmem:[#allocation5 + $0xd8] sm:$0xff] %vm1685_vm8, %v4309_v60  ;;  %4372 = vst.msk [vmem:[#allocation5 + $0xd0] sm:$0xff] %vm1685_vm8, %v4308_v43 }
 0x4b9   : >> { %v4093_v54 = vpop.permute.xlu1 %4092  ;;  %v4089_v4 = vpop.permute.xlu0 %4088 }
 0x4ba   : >> { %v4311_v10 = vmul.f32 %v4257_v61, %v4093_v54  ;;  %v4310_v22 = vmul.f32 %v4257_v61, %v4089_v4 }
 0x4bc   : >> { %4375 = vst.msk [vmem:[#allocation5 + $0xe8] sm:$0xff] %vm1685_vm8, %v4311_v10  ;;  %4374 = vst.msk [vmem:[#allocation5 + $0xe0] sm:$0xff] %vm1685_vm8, %v4310_v22 }
 0x4bd   : >> { %v4101_v7 = vpop.permute.xlu1 %4100  ;;  %v4097_v45 = vpop.permute.xlu0 %4096 }
 0x4be   : >> { %v4313_v15 = vmul.f32 %v4257_v61, %v4101_v7  ;;  %v4312_v1 = vmul.f32 %v4257_v61, %v4097_v45  ;;  %v4265_v61 = vrot.slane %v9059_v34, %v8610_v26  ;;  %v3959_v7 = vcombine.high %v8999_v58, %v8999_v58 }
 0x4c0   : >> { %4377 = vst.msk [vmem:[#allocation5 + $0xf8] sm:$0xff] %vm1685_vm8, %v4313_v15  ;;  %4376 = vst.msk [vmem:[#allocation5 + $0xf0] sm:$0xff] %vm1685_vm8, %v4312_v1 }
 0x4c1   : >> { %v4112_v12 = vpop.permute.xlu1 %4111  ;;  %v4108_v50 = vpop.permute.xlu0 %4107 }
 0x4c2   : >> { %v4315_v51 = vmul.f32 %v4261_v52, %v4112_v12  ;;  %v4314_v35 = vmul.f32 %v4261_v52, %v4108_v50  ;;  %v4269_v12 = vrot.slane %v3959_v7, %v8610_v26 }
 0x4c4   : >> { %4379 = vst.msk [vmem:[#allocation5 + $0x108] sm:$0xff] %vm1685_vm8, %v4315_v51  ;;  %4378 = vst.msk [vmem:[#allocation5 + $0x100] sm:$0xff] %vm1685_vm8, %v4314_v35 }
 0x4c5   : >> { %v4120_v33 = vpop.permute.xlu1 %4119  ;;  %v4116_v56 = vpop.permute.xlu0 %4115 }
 0x4c6   : >> { %v4317_v57 = vmul.f32 %v4261_v52, %v4120_v33  ;;  %v4316_v2 = vmul.f32 %v4261_v52, %v4116_v56 }
 0x4c8   : >> { %4381 = vst.msk [vmem:[#allocation5 + $0x118] sm:$0xff] %vm1685_vm8, %v4317_v57  ;;  %4380 = vst.msk [vmem:[#allocation5 + $0x110] sm:$0xff] %vm1685_vm8, %v4316_v2 }
 0x4c9   : >> { %v4128_v9 = vpop.permute.xlu1 %4127  ;;  %v4124_v8 = vpop.permute.xlu0 %4123 }
 0x4ca   : >> { %v4319_v29 = vmul.f32 %v4261_v52, %v4128_v9  ;;  %v4318_v14 = vmul.f32 %v4261_v52, %v4124_v8 }
 0x4cc   : >> { %4383 = vst.msk [vmem:[#allocation5 + $0x128] sm:$0xff] %vm1685_vm8, %v4319_v29  ;;  %4382 = vst.msk [vmem:[#allocation5 + $0x120] sm:$0xff] %vm1685_vm8, %v4318_v14 }
 0x4cd   : >> { %v4136_v0 = vpop.permute.xlu1 %4135  ;;  %v4132_v38 = vpop.permute.xlu0 %4131 }
 0x4ce   : >> { %v4321_v39 = vmul.f32 %v4261_v52, %v4136_v0  ;;  %v4320_v41 = vmul.f32 %v4261_v52, %v4132_v38  ;;  %v3961_v0 = vcombine.high %v9059_v34, %v9059_v34 }
 0x4d0   : >> { %4385 = vst.msk [vmem:[#allocation5 + $0x138] sm:$0xff] %vm1685_vm8, %v4321_v39  ;;  %4384 = vst.msk [vmem:[#allocation5 + $0x130] sm:$0xff] %vm1685_vm8, %v4320_v41 }
 0x4d1   : >> { %v4147_v3 = vpop.permute.xlu1 %4146  ;;  %v4143_v46 = vpop.permute.xlu0 %4142 }
 0x4d2   : >> { %v4323_v40 = vmul.f32 %v4265_v61, %v4147_v3  ;;  %v4322_v16 = vmul.f32 %v4265_v61, %v4143_v46  ;;  %v4273_v3 = vrot.slane %v3961_v0, %v8610_v26 }
 0x4d4   : >> { %4387 = vst.msk [vmem:[#allocation5 + $0x148] sm:$0xff] %vm1685_vm8, %v4323_v40  ;;  %4386 = vst.msk [vmem:[#allocation5 + $0x140] sm:$0xff] %vm1685_vm8, %v4322_v16 }
 0x4d5   : >> { %v4155_v6 = vpop.permute.xlu1 %4154  ;;  %v4151_v5 = vpop.permute.xlu0 %4150 }
 0x4d6   : >> { %v4325_v60 = vmul.f32 %v4265_v61, %v4155_v6  ;;  %v4324_v43 = vmul.f32 %v4265_v61, %v4151_v5 }
 0x4d8   : >> { %4389 = vst.msk [vmem:[#allocation5 + $0x158] sm:$0xff] %vm1685_vm8, %v4325_v60  ;;  %4388 = vst.msk [vmem:[#allocation5 + $0x150] sm:$0xff] %vm1685_vm8, %v4324_v43 }
 0x4d9   : >> { %v4163_v54 = vpop.permute.xlu1 %4162  ;;  %v4159_v4 = vpop.permute.xlu0 %4158 }
 0x4da   : >> { %v4327_v10 = vmul.f32 %v4265_v61, %v4163_v54  ;;  %v4326_v22 = vmul.f32 %v4265_v61, %v4159_v4 }
 0x4dc   : >> { %4391 = vst.msk [vmem:[#allocation5 + $0x168] sm:$0xff] %vm1685_vm8, %v4327_v10  ;;  %4390 = vst.msk [vmem:[#allocation5 + $0x160] sm:$0xff] %vm1685_vm8, %v4326_v22 }
 0x4dd   : >> { %v4171_v45 = vpop.permute.xlu1 %4170  ;;  %v4167_v15 = vpop.permute.xlu0 %4166 }
 0x4de   : >> { %v4329_v1 = vmul.f32 %v4265_v61, %v4171_v45  ;;  %v4328_v52 = vmul.f32 %v4265_v61, %v4167_v15 }
 0x4e0   : >> { %4393 = vst.msk [vmem:[#allocation5 + $0x178] sm:$0xff] %vm1685_vm8, %v4329_v1  ;;  %4392 = vst.msk [vmem:[#allocation5 + $0x170] sm:$0xff] %vm1685_vm8, %v4328_v52 }
 0x4e1   : >> { %v4182_v50 = vpop.permute.xlu1 %4181  ;;  %v4178_v51 = vpop.permute.xlu0 %4177 }
 0x4e2   : >> { %v4331_v35 = vmul.f32 %v4269_v12, %v4182_v50  ;;  %v4330_v33 = vmul.f32 %v4269_v12, %v4178_v51 }
 0x4e4   : >> { %4395 = vst.msk [vmem:[#allocation5 + $0x188] sm:$0xff] %vm1685_vm8, %v4331_v35  ;;  %4394 = vst.msk [vmem:[#allocation5 + $0x180] sm:$0xff] %vm1685_vm8, %v4330_v33 }
 0x4e5   : >> { %v4190_v58 = vpop.permute.xlu1 %4189  ;;  %v4186_v56 = vpop.permute.xlu0 %4185 }
 0x4e6   : >> { %v4333_v57 = vmul.f32 %v4269_v12, %v4190_v58  ;;  %v4332_v2 = vmul.f32 %v4269_v12, %v4186_v56 }
 0x4e8   : >> { %4397 = vst.msk [vmem:[#allocation5 + $0x198] sm:$0xff] %vm1685_vm8, %v4333_v57  ;;  %4396 = vst.msk [vmem:[#allocation5 + $0x190] sm:$0xff] %vm1685_vm8, %v4332_v2 }
 0x4e9   : >> { %v4198_v9 = vpop.permute.xlu1 %4197  ;;  %v4194_v8 = vpop.permute.xlu0 %4193 }
 0x4ea   : >> { %v4335_v29 = vmul.f32 %v4269_v12, %v4198_v9  ;;  %v4334_v14 = vmul.f32 %v4269_v12, %v4194_v8 }
 0x4ec   : >> { %4399 = vst.msk [vmem:[#allocation5 + $0x1a8] sm:$0xff] %vm1685_vm8, %v4335_v29  ;;  %4398 = vst.msk [vmem:[#allocation5 + $0x1a0] sm:$0xff] %vm1685_vm8, %v4334_v14 }
 0x4ed   : >> { %v4206_v38 = vpop.permute.xlu1 %4205  ;;  %v4202_v39 = vpop.permute.xlu0 %4201 }
 0x4ee   : >> { %v4337_v41 = vmul.f32 %v4269_v12, %v4206_v38  ;;  %v4336_v61 = vmul.f32 %v4269_v12, %v4202_v39 }
 0x4f0   : >> { %4401 = vst.msk [vmem:[#allocation5 + $0x1b8] sm:$0xff] %vm1685_vm8, %v4337_v41  ;;  %4400 = vst.msk [vmem:[#allocation5 + $0x1b0] sm:$0xff] %vm1685_vm8, %v4336_v61 }
 0x4f1   : >> { %v4217_v46 = vpop.permute.xlu1 %4216  ;;  %v4213_v40 = vpop.permute.xlu0 %4212 }
 0x4f2   : >> { %v4339_v16 = vmul.f32 %v4273_v3, %v4217_v46  ;;  %v4338_v6 = vmul.f32 %v4273_v3, %v4213_v40 }
 0x4f4   : >> { %4403 = vst.msk [vmem:[#allocation5 + $0x1c8] sm:$0xff] %vm1685_vm8, %v4339_v16  ;;  %4402 = vst.msk [vmem:[#allocation5 + $0x1c0] sm:$0xff] %vm1685_vm8, %v4338_v6 }
 0x4f5   : >> { %v4225_v34 = vpop.permute.xlu1 %4224  ;;  %v4221_v5 = vpop.permute.xlu0 %4220 }
 0x4f6   : >> { %v4341_v60 = vmul.f32 %v4273_v3, %v4225_v34  ;;  %v4340_v43 = vmul.f32 %v4273_v3, %v4221_v5 }
 0x4f8   : >> { %4405 = vst.msk [vmem:[#allocation5 + $0x1d8] sm:$0xff] %vm1685_vm8, %v4341_v60  ;;  %4404 = vst.msk [vmem:[#allocation5 + $0x1d0] sm:$0xff] %vm1685_vm8, %v4340_v43 }
 0x4f9   : >> { %v4233_v54 = vpop.permute.xlu1 %4232  ;;  %v4229_v4 = vpop.permute.xlu0 %4228 }
 0x4fa   : >> { %v4343_v10 = vmul.f32 %v4273_v3, %v4233_v54  ;;  %v4342_v22 = vmul.f32 %v4273_v3, %v4229_v4 }
 0x4fc   : >> { %4407 = vst.msk [vmem:[#allocation5 + $0x1e8] sm:$0xff] %vm1685_vm8, %v4343_v10  ;;  %4406 = vst.msk [vmem:[#allocation5 + $0x1e0] sm:$0xff] %vm1685_vm8, %v4342_v22 }
 0x4fd   : >> { %v4241_v7 = vpop.permute.xlu1 %4240  ;;  %v4237_v45 = vpop.permute.xlu0 %4236 }
 0x4fe   : >> { %v4345_v15 = vmul.f32 %v4273_v3, %v4241_v7  ;;  %v4344_v1 = vmul.f32 %v4273_v3, %v4237_v45 }
 0x500   : >> { %4409 = vst.msk [vmem:[#allocation5 + $0x1f8] sm:$0xff] %vm1685_vm8, %v4345_v15  ;;  %4408 = vst.msk [vmem:[#allocation5 + $0x1f0] sm:$0xff] %vm1685_vm8, %v4344_v1 }
 0x501 LB: >>> { %s6190_s17 = sshll.u32 %s7978_s14, 8  ;;  %s4423_s14 = sadd.s32 1, %s7978_s14   ;;  %s7978_s14 = sphi %s9296_s14, %s4423_s14   ;;  %v7974_v30 = vphi %v9174_v30, %v9875_v30   ;;  %v7970_v13 = vphi %v9176_v13, %v9874_v13   ;;  %v7966_v59 = vphi %v9178_v59, %v9873_v59   ;;  %v7962_v24 = vphi %v9180_v24, %v9872_v24   ;;  %v7958_v37 = vphi %v9182_v37, %v9871_v37   ;;  %v7954_v32 = vphi %v9184_v32, %v9870_v32   ;;  %v7950_v49 = vphi %v9186_v49, %v9869_v49   ;;  %v7946_v53 = vphi %v9188_v53, %v9868_v53  }
 0x502   : >>> { %s9310_s13 = scalar_lea.vmem [#allocation4], %s6190_s17  ;;  %s9313_s19 = scalar_lea.vmem [#allocation5], %s6190_s17 }
 0x503   : >>> { %v4435_v52 = vld [vmem:[%s9310_s13] sm:$0xff]  ;;  %v4436_v50 = vld [vmem:[%s9310_s13 + $0x8] sm:$0xff]  ;;  %v4437_v58 = vld [vmem:[%s9310_s13 + $0x10] sm:$0xff]  ;;  %p4420_p12 = scmp.ge.s32.totalorder %s4423_s14, 2  }
 0x504   : >>> { %v4443_v51 = vmul.f32 %v7974_v30, %v4435_v52  ;;  %v4444_v35 = vmul.f32 %v7970_v13, %v4436_v50  ;;  %v4445_v57 = vmul.f32 %v7966_v59, %v4437_v58  ;;  %v4438_v2 = vld [vmem:[%s9310_s13 + $0x18] sm:$0xff]  ;;  %v4439_v8 = vld [vmem:[%s9310_s13 + $0x20] sm:$0xff]  ;;  %v4440_v13 = vld [vmem:[%s9310_s13 + $0x28] sm:$0xff]  ;;  %vm5200_vm11 = vcmask (%p4420_p12), 1041409   ;;  %s5215_s29 = scalar_lea.vmem (%p4420_p12), [#allocation10], %s8853_s25  ;;  %s3555_s27 = sadd.s32 (%p4420_p12), 1, %s7942_s27  }
 0x505   : >>> { %v4446_v0 = vmul.f32 %v7962_v24, %v4438_v2  ;;  %v4447_v38 = vmul.f32 %v7958_v37, %v4439_v8  ;;  %v4448_v61 = vmul.f32 %v7954_v32, %v4440_v13  ;;  %v4441_v59 = vld [vmem:[%s9310_s13 + $0x30] sm:$0xff]  ;;  %v4442_v46 = vld [vmem:[%s9310_s13 + $0x38] sm:$0xff]  ;;  %v6101_v32 = vld [vmem:[%s9310_s13 + $0x40] sm:$0xff]  ;;  %vm5202_vm12 = vcmask (%p4420_p12), 1042434   ;;  %p3552_p1 = scmp.ge.s32.totalorder (%p4420_p12), %s3555_s27, 2  }
 0x506   : >>> { %v4449_v40 = vmul.f32 %v7950_v49, %v4441_v59  ;;  %v4450_v16 = vmul.f32 %v7946_v53, %v4442_v46  ;;  %v6102_v43 = vld [vmem:[%s9310_s13 + $0x48] sm:$0xff]  ;;  %v6103_v4 = vld [vmem:[%s9310_s13 + $0x50] sm:$0xff]  ;;  %v6104_v45 = vld [vmem:[%s9310_s13 + $0x58] sm:$0xff]  ;;  %vm5204_vm13 = vcmask (%p4420_p12), 1043459   ;;  %vm5206_vm14 = vcmask (%p4420_p12), 1044484  }
 0x507   : >>> { %v4452_v12 = vld [vmem:[%s9313_s19] sm:$0xff]  ;;  %v4453_v33 = vld [vmem:[%s9313_s19 + $0x8] sm:$0xff]  ;;  %v4454_v56 = vld [vmem:[%s9313_s19 + $0x10] sm:$0xff]  ;;  %vm5208_vm15 = vcmask (%p4420_p12), 1045509   ;;  %vm5210_vm0 = vcmask (%p4420_p12), 1046534   ;;  %vm5212_vm1 = vcmask (%p4420_p12), 1047559  }
 0x508   : >>> { %v4455_v9 = vld [vmem:[%s9313_s19 + $0x18] sm:$0xff]  ;;  %v4460_v29 = vadd.f32 %v4452_v12, %v4443_v51  ;;  %v4461_v14 = vadd.f32 %v4453_v33, %v4444_v35  ;;  %v4456_v30 = vld [vmem:[%s9313_s19 + $0x20] sm:$0xff]  ;;  %v4457_v39 = vld [vmem:[%s9313_s19 + $0x28] sm:$0xff]  ;;  %v4462_v41 = vadd.f32 %v4454_v56, %v4445_v57 }
 0x509   : >>> { %v4458_v3 = vld [vmem:[%s9313_s19 + $0x30] sm:$0xff]  ;;  %v4463_v24 = vadd.f32 %v4455_v9, %v4446_v0  ;;  %v4464_v37 = vadd.f32 %v4456_v30, %v4447_v38  ;;  %v4459_v6 = vld [vmem:[%s9313_s19 + $0x38] sm:$0xff]  ;;  %v6111_v34 = vld [vmem:[%s9313_s19 + $0x40] sm:$0xff]  ;;  %v4465_v5 = vadd.f32 %v4457_v39, %v4448_v61 }
 0x50a   : >>> { %4468 = vst.msk [vmem:[%s9313_s19] sm:$0xff] %vm1685_vm8, %v4460_v29  ;;  %4469 = vst.msk [vmem:[%s9313_s19 + $0x8] sm:$0xff] %vm1685_vm8, %v4461_v14  ;;  %v4487_v60 = vmul.f32 %v6101_v32, %v4460_v29  ;;  %v6112_v54 = vld [vmem:[%s9313_s19 + $0x48] sm:$0xff]  ;;  %v4466_v49 = vadd.f32 %v4458_v3, %v4449_v40  ;;  %v4467_v53 = vadd.f32 %v4459_v6, %v4450_v16  ;;  %v6113_v7 = vld [vmem:[%s9313_s19 + $0x50] sm:$0xff] }
 0x50b   : >>> { %4470 = vst.msk [vmem:[%s9313_s19 + $0x10] sm:$0xff] %vm1685_vm8, %v4462_v41  ;;  %4471 = vst.msk [vmem:[%s9313_s19 + $0x18] sm:$0xff] %vm1685_vm8, %v4463_v24  ;;  %v4488_v10 = vmul.f32 %v6102_v43, %v4461_v14  ;;  %v4489_v22 = vmul.f32 %v6103_v4, %v4462_v41  ;;  %v6114_v15 = vld [vmem:[%s9313_s19 + $0x58] sm:$0xff]  ;;  %v4490_v52 = vmul.f32 %v6104_v45, %v4463_v24  ;;  %v6105_v12 = vld [vmem:[%s9310_s13 + $0x60] sm:$0xff] }
 0x50c   : >>> { %4472 = vst.msk [vmem:[%s9313_s19 + $0x20] sm:$0xff] %vm1685_vm8, %v4464_v37  ;;  %4473 = vst.msk [vmem:[%s9313_s19 + $0x28] sm:$0xff] %vm1685_vm8, %v4465_v5  ;;  %v4504_v1 = vadd.f32 %v6111_v34, %v4487_v60  ;;  %v6115_v50 = vld [vmem:[%s9313_s19 + $0x60] sm:$0xff]  ;;  %v6106_v51 = vld [vmem:[%s9310_s13 + $0x68] sm:$0xff]  ;;  %v4491_v58 = vmul.f32 %v6105_v12, %v4464_v37 }
 0x50d   : >>> { %4474 = vst.msk [vmem:[%s9313_s19 + $0x30] sm:$0xff] %vm1685_vm8, %v4466_v49  ;;  %4475 = vst.msk [vmem:[%s9313_s19 + $0x38] sm:$0xff] %vm1685_vm8, %v4467_v53  ;;  %v4505_v35 = vadd.f32 %v6112_v54, %v4488_v10  ;;  %v4506_v33 = vadd.f32 %v6113_v7, %v4489_v22  ;;  %v4492_v56 = vmul.f32 %v6106_v51, %v4465_v5  ;;  %v6116_v57 = vld [vmem:[%s9313_s19 + $0x68] sm:$0xff]  ;;  %v6107_v2 = vld [vmem:[%s9310_s13 + $0x70] sm:$0xff] }
 0x50e   : >>> { %v6117_v9 = vld [vmem:[%s9313_s19 + $0x70] sm:$0xff]  ;;  %6119 = vst.msk [vmem:[%s9313_s19 + $0x40] sm:$0xff] %vm1685_vm8, %v4504_v1  ;;  %v4507_v8 = vadd.f32 %v6114_v15, %v4490_v52  ;;  %v4493_v29 = vmul.f32 %v6107_v2, %v4466_v49  ;;  %v6108_v14 = vld [vmem:[%s9310_s13 + $0x78] sm:$0xff]  ;;  %v6129_v38 = vld [vmem:[%s9310_s13 + $0x80] sm:$0xff]  ;;  %v4508_v30 = vadd.f32 %v6115_v50, %v4491_v58 }
 0x50f   : >>> { %v6118_v0 = vld [vmem:[%s9313_s19 + $0x78] sm:$0xff]  ;;  %6120 = vst.msk [vmem:[%s9313_s19 + $0x48] sm:$0xff] %vm1685_vm8, %v4505_v35  ;;  %6121 = vst.msk [vmem:[%s9313_s19 + $0x50] sm:$0xff] %vm1685_vm8, %v4506_v33  ;;  %v4509_v13 = vadd.f32 %v6116_v57, %v4492_v56  ;;  %v4494_v39 = vmul.f32 %v6108_v14, %v4467_v53  ;;  %v4531_v41 = vmul.f32 %v6129_v38, %v4504_v1  ;;  %v6139_v61 = vld [vmem:[%s9313_s19 + $0x80] sm:$0xff] }
 0x510   : >>> { %v6130_v59 = vld [vmem:[%s9310_s13 + $0x88] sm:$0xff]  ;;  %6122 = vst.msk [vmem:[%s9313_s19 + $0x58] sm:$0xff] %vm1685_vm8, %v4507_v8  ;;  %v4510_v46 = vadd.f32 %v6117_v9, %v4493_v29  ;;  %v6131_v37 = vld [vmem:[%s9310_s13 + $0x90] sm:$0xff]  ;;  %v6132_v16 = vld [vmem:[%s9310_s13 + $0x98] sm:$0xff] }
 0x511   : >>> { %v6140_v3 = vld [vmem:[%s9313_s19 + $0x88] sm:$0xff]  ;;  %v4532_v24 = vmul.f32 %v6130_v59, %v4505_v35  ;;  %v6141_v40 = vld [vmem:[%s9313_s19 + $0x90] sm:$0xff]  ;;  %6123 = vst.msk [vmem:[%s9313_s19 + $0x60] sm:$0xff] %vm1685_vm8, %v4508_v30  ;;  %6124 = vst.msk [vmem:[%s9313_s19 + $0x68] sm:$0xff] %vm1685_vm8, %v4509_v13  ;;  %v4511_v6 = vadd.f32 %v6118_v0, %v4494_v39  ;;  %v4548_v32 = vadd.f32 %v6139_v61, %v4531_v41 }
 0x512   : >>> { %v4533_v34 = vmul.f32 %v6131_v37, %v4506_v33  ;;  %v4534_v5 = vmul.f32 %v6132_v16, %v4507_v8  ;;  %v6142_v60 = vld [vmem:[%s9313_s19 + $0x98] sm:$0xff]  ;;  %v6133_v43 = vld [vmem:[%s9310_s13 + $0xa0] sm:$0xff]  ;;  %6125 = vst.msk [vmem:[%s9313_s19 + $0x70] sm:$0xff] %vm1685_vm8, %v4510_v46  ;;  %v6134_v53 = vld [vmem:[%s9310_s13 + $0xa8] sm:$0xff] }
 0x513   : >>> { %v6143_v54 = vld [vmem:[%s9313_s19 + $0xa0] sm:$0xff]  ;;  %v4549_v4 = vadd.f32 %v6140_v3, %v4532_v24  ;;  %v4535_v49 = vmul.f32 %v6133_v43, %v4508_v30  ;;  %v6144_v10 = vld [vmem:[%s9313_s19 + $0xa8] sm:$0xff]  ;;  %v6135_v22 = vld [vmem:[%s9310_s13 + $0xb0] sm:$0xff]  ;;  %6126 = vst.msk [vmem:[%s9313_s19 + $0x78] sm:$0xff] %vm1685_vm8, %v4511_v6  ;;  %v4536_v15 = vmul.f32 %v6134_v53, %v4509_v13 }
 0x514   : >>> { %6147 = vst.msk [vmem:[%s9313_s19 + $0x80] sm:$0xff] %vm1685_vm8, %v4548_v32  ;;  %v4550_v7 = vadd.f32 %v6141_v40, %v4533_v34  ;;  %v4551_v45 = vadd.f32 %v6142_v60, %v4534_v5  ;;  %v4537_v1 = vmul.f32 %v6135_v22, %v4510_v46  ;;  %v6145_v52 = vld [vmem:[%s9313_s19 + $0xb0] sm:$0xff]  ;;  %v6136_v12 = vld [vmem:[%s9310_s13 + $0xb8] sm:$0xff]  ;;  %v6157_v33 = vld [vmem:[%s9310_s13 + $0xc0] sm:$0xff] }
 0x515   : >>> { %v6146_v50 = vld [vmem:[%s9313_s19 + $0xb8] sm:$0xff]  ;;  %6148 = vst.msk [vmem:[%s9313_s19 + $0x88] sm:$0xff] %vm1685_vm8, %v4549_v4  ;;  %v4552_v51 = vadd.f32 %v6143_v54, %v4535_v49  ;;  %v4538_v35 = vmul.f32 %v6136_v12, %v4511_v6  ;;  %v6167_v58 = vld [vmem:[%s9313_s19 + $0xc0] sm:$0xff]  ;;  %v6158_v56 = vld [vmem:[%s9310_s13 + $0xc8] sm:$0xff]  ;;  %v4553_v57 = vadd.f32 %v6144_v10, %v4536_v15  ;;  %v4575_v9 = vmul.f32 %v6157_v33, %v4548_v32 }
 0x516   : >>> { %6149 = vst.msk [vmem:[%s9313_s19 + $0x90] sm:$0xff] %vm1685_vm8, %v4550_v7  ;;  %6150 = vst.msk [vmem:[%s9313_s19 + $0x98] sm:$0xff] %vm1685_vm8, %v4551_v45  ;;  %v4554_v2 = vadd.f32 %v6145_v52, %v4537_v1  ;;  %v4576_v8 = vmul.f32 %v6158_v56, %v4549_v4  ;;  %v6168_v29 = vld [vmem:[%s9313_s19 + $0xc8] sm:$0xff]  ;;  %v6159_v14 = vld [vmem:[%s9310_s13 + $0xd0] sm:$0xff]  ;;  %v4753_v15 = vrot.slane (%p4420_p12), %v8865_v28, %v8604_v31 }
 0x517   : >>> { %v6169_v0 = vld [vmem:[%s9313_s19 + $0xd0] sm:$0xff]  ;;  %6151 = vst.msk [vmem:[%s9313_s19 + $0xa0] sm:$0xff] %vm1685_vm8, %v4552_v51  ;;  %v4555_v38 = vadd.f32 %v6146_v50, %v4538_v35  ;;  %v4577_v30 = vmul.f32 %v6159_v14, %v4550_v7  ;;  %v6160_v13 = vld [vmem:[%s9310_s13 + $0xd8] sm:$0xff]  ;;  %v6161_v41 = vld [vmem:[%s9310_s13 + $0xe0] sm:$0xff]  ;;  %v4592_v61 = vadd.f32 %v6167_v58, %v4575_v9   ;;  %v4788_v1 = vrot.slane (%p4420_p12), %v8865_v28, %v8607_v25 }
 0x518   : >>> { %v6170_v39 = vld [vmem:[%s9313_s19 + $0xd8] sm:$0xff]  ;;  %6152 = vst.msk [vmem:[%s9313_s19 + $0xa8] sm:$0xff] %vm1685_vm8, %v4553_v57  ;;  %6153 = vst.msk [vmem:[%s9313_s19 + $0xb0] sm:$0xff] %vm1685_vm8, %v4554_v2  ;;  %v4593_v3 = vadd.f32 %v6168_v29, %v4576_v8   ;;  %v4578_v59 = vmul.f32 %v6160_v13, %v4551_v45  ;;  %v4579_v46 = vmul.f32 %v6161_v41, %v4552_v51  ;;  %v6171_v24 = vld [vmem:[%s9313_s19 + $0xe0] sm:$0xff] }
 0x519   : >>> { %v6162_v37 = vld [vmem:[%s9310_s13 + $0xe8] sm:$0xff]  ;;  %6154 = vst.msk [vmem:[%s9313_s19 + $0xb8] sm:$0xff] %vm1685_vm8, %v4555_v38  ;;  %v4594_v16 = vadd.f32 %v6169_v0, %v4577_v30   ;;  %v6163_v32 = vld [vmem:[%s9310_s13 + $0xf0] sm:$0xff]  ;;  %v6164_v5 = vld [vmem:[%s9310_s13 + $0xf8] sm:$0xff]  ;;  %v9875_v30 = vmov %v4592_v61  ;;  %4422 = sbr.rel (!%p4420_p12) target bundleno = 1281 (0x501), region = 155  ;;  %v4683_v45 = vrot.slane (%p4420_p12), %v8865_v28, %v8610_v26  ;;  %v4823_v52 = vrot.slane (%p4420_p12), %v8865_v28, %v4104_v44 }
 0x51a   : >>> { %v6172_v40 = vld [vmem:[%s9313_s19 + $0xe8] sm:$0xff]  ;;  %v4580_v6 = vmul.f32 %v6162_v37, %v4553_v57  ;;  %v6173_v34 = vld [vmem:[%s9313_s19 + $0xf0] sm:$0xff]  ;;  %6175 = vst.msk [vmem:[%s9313_s19 + $0xc0] sm:$0xff] %vm1685_vm8, %v4592_v61  ;;  %6176 = vst.msk [vmem:[%s9313_s19 + $0xc8] sm:$0xff] %vm1685_vm8, %v4593_v3  ;;  %v4595_v60 = vadd.f32 %v6170_v39, %v4578_v59   ;;  %v4596_v43 = vadd.f32 %v6171_v24, %v4579_v46   ;;  %v9874_v13 = vmov %v4593_v3 }
 0x51b   : >>> { %v4581_v54 = vmul.f32 %v6163_v32, %v4554_v2  ;;  %v4582_v4 = vmul.f32 %v6164_v5, %v4555_v38  ;;  %v6174_v49 = vld [vmem:[%s9313_s19 + $0xf8] sm:$0xff]  ;;  %6177 = vst.msk [vmem:[%s9313_s19 + $0xd0] sm:$0xff] %vm1685_vm8, %v4594_v16  ;;  %v9873_v59 = vmov %v4594_v16  ;;  %4608 = vst.msk [vmem:[#allocation2] sm:$0xff] (%p4420_p12), %vm1685_vm8, %v4592_v61  ;;  %4693 = vbcast.lane.b32.xlu1 (%p4420_p12), %v4683_v45, 272  ;;  %4685 = vbcast.lane.b32.xlu0 (%p4420_p12), %v4683_v45, 256 }
 0x51c   : >>> { %v4597_v10 = vadd.f32 %v6172_v40, %v4580_v6   ;;  %6178 = vst.msk [vmem:[%s9313_s19 + $0xd8] sm:$0xff] %vm1685_vm8, %v4595_v60  ;;  %6179 = vst.msk [vmem:[%s9313_s19 + $0xe0] sm:$0xff] %vm1685_vm8, %v4596_v43  ;;  %v9871_v37 = vmov %v4596_v43  ;;  %v9872_v24 = vmov %v4595_v60  ;;  %v4858_v12 = vrot.slane (%p4420_p12), %v8865_v28, %v4139_v27 }
 0x51d   : >>> { %v4598_v22 = vadd.f32 %v6173_v34, %v4581_v54   ;;  %v4599_v7 = vadd.f32 %v6174_v49, %v4582_v4   ;;  %4609 = vst.msk [vmem:[#allocation2 + $0x8] sm:$0xff] (%p4420_p12), %vm1685_vm8, %v4593_v3  ;;  %4610 = vst.msk [vmem:[#allocation2 + $0x10] sm:$0xff] (%p4420_p12), %vm1685_vm8, %v4594_v16  ;;  %v4893_v50 = vrot.slane (%p4420_p12), %v8865_v28, %v4174_v18 }
 0x51e   : >>> { %6180 = vst.msk [vmem:[%s9313_s19 + $0xe8] sm:$0xff] %vm1685_vm8, %v4597_v10  ;;  %v9870_v32 = vmov %v4597_v10  ;;  %4611 = vst.msk [vmem:[#allocation2 + $0x18] sm:$0xff] (%p4420_p12), %vm1685_vm8, %v4595_v60  ;;  %v4928_v44 = vrot.slane (%p4420_p12), %v8865_v28, %v4209_v62 }
 0x51f   : >>> { %6181 = vst.msk [vmem:[%s9313_s19 + $0xf0] sm:$0xff] %vm1685_vm8, %v4598_v22  ;;  %6182 = vst.msk [vmem:[%s9313_s19 + $0xf8] sm:$0xff] %vm1685_vm8, %v4599_v7  ;;  %v9868_v53 = vmov %v4599_v7  ;;  %v9869_v49 = vmov %v4598_v22  ;;  %4697 = vbcast.lane.b32.xlu1 (%p4420_p12), %v4683_v45, 280  ;;  %4689 = vbcast.lane.b32.xlu0 (%p4420_p12), %v4683_v45, 264 }
 0x520   : >> { %4612 = vst.msk [vmem:[#allocation2 + $0x20] sm:$0xff] %vm1685_vm8, %v4596_v43  ;;  %4613 = vst.msk [vmem:[#allocation2 + $0x28] sm:$0xff] %vm1685_vm8, %v4597_v10  ;;  %v4718_v53 = vrot.slane %v8865_v28, %v9865_v19  ;;  %s9876_s26 = sld [smem:[#allocation41_spill]] (%p3552_p1)  ;;  %s6186_s15 = sshll.u32 (%p3552_p1), %s7926_s21, 2 }
 0x521   : >> { %4614 = vst.msk [vmem:[#allocation2 + $0x30] sm:$0xff] %vm1685_vm8, %v4598_v22  ;;  %4615 = vst.msk [vmem:[#allocation2 + $0x38] sm:$0xff] %vm1685_vm8, %v4599_v7  ;;  %s5855_s28 = sadd.s32 (%p3552_p1), %s6186_s15, %s8290_s16  ;;  %s9877_s24 = sld [smem:[#allocation34_spill]] (%p3552_p1) }
 0x522   : > { %s6187_s12 = sshll.u32 (%p3552_p1), %s5855_s28, 7  ;;  %s5858_s27 = sshll.u32 (%p3552_p1), %s8303_s11, 4  ;;  %s9748_s27 = int_to_ptr.vmem [resolvable:$true] %s5858_s27 }
 0x523   : >> { %4705 = vbcast.lane.b32.xlu1 %v4683_v45, 296  ;;  %4701 = vbcast.lane.b32.xlu0 %v4683_v45, 288  ;;  %s9878_s14 = sld [smem:[#allocation42_spill]] (%p3552_p1)  ;;  %s9756_s21 = scalar_lea.sflag (%p3552_p1), [#allocation13], %s484_s22 }
 0x524   : > { %s7788_s16 = scalar_lea.vmem (%p3552_p1), %s9748_s27, 256 }
 0x525   : > { %p7789_p4 = scmp.ne.s32.totalorder (%p3552_p1), %s9748_s27, %s7788_s16 }
 0x526   : >> { %v4616_v18 = vld [vmem:[#allocation5] sm:$0xff]  ;;  %v4618_v62 = vld [vmem:[#allocation5 + $0x10] sm:$0xff]  ;;  %v4617_v51 = vld [vmem:[#allocation5 + $0x8] sm:$0xff] }
 0x527   : >> { %4713 = vbcast.lane.b32.xlu1 %v4683_v45, 312  ;;  %4709 = vbcast.lane.b32.xlu0 %v4683_v45, 304  ;;  %v4619_v58 = vld [vmem:[#allocation5 + $0x18] sm:$0xff]  ;;  %v4620_v9 = vld [vmem:[#allocation5 + $0x20] sm:$0xff]  ;;  %v4621_v30 = vld [vmem:[#allocation5 + $0x28] sm:$0xff]  ;;  %p9879_p5 = scmp.ne.s32.totalorder (%p3552_p1), %s9877_s24, 0 }
 0x528   : >> { %v4622_v3 = vld [vmem:[#allocation5 + $0x30] sm:$0xff]  ;;  %v4623_v40 = vld [vmem:[#allocation5 + $0x38] sm:$0xff]  ;;  %v4625_v5 = vld [vmem:[#allocation5 + $0x48] sm:$0xff] }
 0x529   : >> { %v4624_v60 = vld [vmem:[#allocation5 + $0x40] sm:$0xff]  ;;  %v5247_v31 = vld [vmem:[%s9876_s26 + $0x18] sm:$0xff] (%p3552_p1)  ;;  %v5250_v42 = vld [vmem:[%s9876_s26 + $0x30] sm:$0xff] (%p3552_p1)  ;;  %s9746_s17 = scalar_lea.hbm (%p3552_p1), %s9878_s14, %s6187_s12  ;;  %p7790_p6 = pnand (%p3552_p1), %p7789_p4, %p9879_p5 }
 0x52a   : > { %v5248_v26 = vld [vmem:[%s9876_s26 + $0x20] sm:$0xff] (%p3552_p1)  ;;  %v5249_v20 = vld [vmem:[%s9876_s26 + $0x28] sm:$0xff] (%p3552_p1)  ;;  %v5270_v21 = vand.u32 (%p3552_p1), 4294901760, %v5247_v31  ;;  %v5251_v47 = vld [vmem:[%s9876_s26 + $0x38] sm:$0xff] (%p3552_p1) }
 0x52b   : >> { %4724 = vbcast.lane.b32.xlu1 %v4718_v53, 264  ;;  %4720 = vbcast.lane.b32.xlu0 %v4718_v53, 256  ;;  %v5273_v23 = vand.u32 (%p3552_p1), 4294901760, %v5248_v26  ;;  %v5276_v36 = vand.u32 (%p3552_p1), 4294901760, %v5249_v20  ;;  %p7791_p7 = pneg (%p3552_p1), %p7790_p6 }
 0x52f   : >> { %4732 = vbcast.lane.b32.xlu1 %v4718_v53, 280  ;;  %4728 = vbcast.lane.b32.xlu0 %v4718_v53, 272 }
 0x533   : >> { %4740 = vbcast.lane.b32.xlu1 %v4718_v53, 296  ;;  %4736 = vbcast.lane.b32.xlu0 %v4718_v53, 288 }
 0x537   : >> { %4748 = vbcast.lane.b32.xlu1 %v4718_v53, 312  ;;  %4744 = vbcast.lane.b32.xlu0 %v4718_v53, 304 }
 0x53b   : >> { %4759 = vbcast.lane.b32.xlu1 %v4753_v15, 264  ;;  %4755 = vbcast.lane.b32.xlu0 %v4753_v15, 256 }
 0x53f   : >> { %4794 = vbcast.lane.b32.xlu1 %v4788_v1, 264  ;;  %4790 = vbcast.lane.b32.xlu0 %v4788_v1, 256 }
 0x543   : >> { %4825 = vbcast.lane.b32.xlu1 %v4823_v52, 256  ;;  %4763 = vbcast.lane.b32.xlu0 %v4753_v15, 272 }
 0x547   : >> { %4798 = vbcast.lane.b32.xlu1 %v4788_v1, 272  ;;  %4829 = vbcast.lane.b32.xlu0 %v4823_v52, 264 }
 0x54b   : >> { %4864 = vbcast.lane.b32.xlu1 %v4858_v12, 264  ;;  %4860 = vbcast.lane.b32.xlu0 %v4858_v12, 256 }
 0x54f   : >> { %4833 = vbcast.lane.b32.xlu1 %v4823_v52, 272  ;;  %4767 = vbcast.lane.b32.xlu0 %v4753_v15, 280 }
 0x553   : >> { %4899 = vbcast.lane.b32.xlu1 %v4893_v50, 264  ;;  %4895 = vbcast.lane.b32.xlu0 %v4893_v50, 256 }
 0x557   : >> { %4868 = vbcast.lane.b32.xlu1 %v4858_v12, 272  ;;  %4802 = vbcast.lane.b32.xlu0 %v4788_v1, 280 }
 0x55b   : >> { %4934 = vbcast.lane.b32.xlu1 %v4928_v44, 264  ;;  %4930 = vbcast.lane.b32.xlu0 %v4928_v44, 256 }
 0x55f   : >> { %4837 = vbcast.lane.b32.xlu1 %v4823_v52, 280  ;;  %4771 = vbcast.lane.b32.xlu0 %v4753_v15, 288 }
 0x563   : >> { %4806 = vbcast.lane.b32.xlu1 %v4788_v1, 288  ;;  %4903 = vbcast.lane.b32.xlu0 %v4893_v50, 272 }
 0x567   : >> { %4938 = vbcast.lane.b32.xlu1 %v4928_v44, 272  ;;  %4872 = vbcast.lane.b32.xlu0 %v4858_v12, 280 }
 0x56b   : >> { %4841 = vbcast.lane.b32.xlu1 %v4823_v52, 288  ;;  %4775 = vbcast.lane.b32.xlu0 %v4753_v15, 296 }
 0x56f   : >> { %4810 = vbcast.lane.b32.xlu1 %v4788_v1, 296  ;;  %4907 = vbcast.lane.b32.xlu0 %v4893_v50, 280 }
 0x573   : >> { %4942 = vbcast.lane.b32.xlu1 %v4928_v44, 280  ;;  %4876 = vbcast.lane.b32.xlu0 %v4858_v12, 288 }
 0x577   : >> { %4845 = vbcast.lane.b32.xlu1 %v4823_v52, 296  ;;  %4779 = vbcast.lane.b32.xlu0 %v4753_v15, 304 }
 0x57b   : >> { %4814 = vbcast.lane.b32.xlu1 %v4788_v1, 304  ;;  %4911 = vbcast.lane.b32.xlu0 %v4893_v50, 288 }
 0x57f   : >> { %4946 = vbcast.lane.b32.xlu1 %v4928_v44, 288  ;;  %4880 = vbcast.lane.b32.xlu0 %v4858_v12, 296 }
 0x583   : >> { %4849 = vbcast.lane.b32.xlu1 %v4823_v52, 304  ;;  %4783 = vbcast.lane.b32.xlu0 %v4753_v15, 312  ;;  %v4627_v15 = vld [vmem:[#allocation5 + $0x58] sm:$0xff] }
 0x587   : >> { %4818 = vbcast.lane.b32.xlu1 %v4788_v1, 312  ;;  %4915 = vbcast.lane.b32.xlu0 %v4893_v50, 296  ;;  %v4626_v1 = vld [vmem:[#allocation5 + $0x50] sm:$0xff] }
 0x58b   : >> { %4950 = vbcast.lane.b32.xlu1 %v4928_v44, 296  ;;  %4884 = vbcast.lane.b32.xlu0 %v4858_v12, 304 }
 0x58d   : >> { %v4694_v28 = vpop.permute.xlu1 %4693  ;;  %v4686_v27 = vpop.permute.xlu0 %4685 }
 0x58e   : >> { %v4960_v35 = vmul.f32 %v4686_v27, %v4616_v18  ;;  %v4962_v57 = vmul.f32 %v4694_v28, %v4618_v62 }
 0x58f   : >> { %4919 = vbcast.lane.b32.xlu1 %v4893_v50, 304  ;;  %4853 = vbcast.lane.b32.xlu0 %v4823_v52, 312 }
 0x590   : >> { %v5024_v8 = vsel %vm1685_vm8, %v4960_v35, 0.0  ;;  %v5027_v39 = vsel %vm1685_vm8, %v4962_v57, 0.0  ;;  %v4629_v35 = vld [vmem:[#allocation5 + $0x68] sm:$0xff] }
 0x591   : >> { %v4698_v33 = vpop.permute.xlu1 %4697  ;;  %v4690_v56 = vpop.permute.xlu0 %4689 }
 0x592   : >> { %v4961_v2 = vmul.f32 %v4690_v56, %v4617_v51  ;;  %v4963_v29 = vmul.f32 %v4698_v33, %v4619_v58  ;;  %v4628_v33 = vld [vmem:[#allocation5 + $0x60] sm:$0xff] }
 0x593   : >> { %4954 = vbcast.lane.b32.xlu1 %v4928_v44, 304  ;;  %4888 = vbcast.lane.b32.xlu0 %v4858_v12, 312 }
 0x594   : >> { %v5025_v14 = vsel %vm1685_vm8, %v4961_v2, 0.0  ;;  %v5029_v59 = vsel %vm1685_vm8, %v4963_v29, 0.0 }
 0x595   : >> { %v5026_v0 = vadd.f32 %v5025_v14, %v5024_v8  ;;  %v4706_v38 = vpop.permute.xlu1 %4705  ;;  %v4702_v13 = vpop.permute.xlu0 %4701 }
 0x596   : >> { %v4964_v41 = vmul.f32 %v4702_v13, %v4620_v9  ;;  %v4965_v46 = vmul.f32 %v4706_v38, %v4621_v30  ;;  %v4631_v38 = vld [vmem:[#allocation5 + $0x78] sm:$0xff]  ;;  %v4630_v30 = vld [vmem:[#allocation5 + $0x70] sm:$0xff] }
 0x597   : >> { %v5028_v61 = vadd.f32 %v5027_v39, %v5026_v0  ;;  %4958 = vbcast.lane.b32.xlu1 %v4928_v44, 312  ;;  %4923 = vbcast.lane.b32.xlu0 %v4893_v50, 312 }
 0x598   : >> { %v5031_v6 = vsel %vm1685_vm8, %v4964_v41, 0.0  ;;  %v5033_v43 = vsel %vm1685_vm8, %v4965_v46, 0.0 }
 0x599   : >> { %v5030_v24 = vadd.f32 %v5029_v59, %v5028_v61  ;;  %v4714_v37 = vpop.permute.xlu1 %4713  ;;  %v4710_v16 = vpop.permute.xlu0 %4709 }
 0x59a   : >> { %v4966_v32 = vmul.f32 %v4710_v16, %v4622_v3  ;;  %v4967_v54 = vmul.f32 %v4714_v37, %v4623_v40  ;;  %v4633_v40 = vld [vmem:[#allocation5 + $0x88] sm:$0xff]  ;;  %v4632_v16 = vld [vmem:[#allocation5 + $0x80] sm:$0xff] }
 0x59b   : >> { %v5032_v34 = vadd.f32 %v5031_v6, %v5030_v24 }
 0x59c   : >> { %v5035_v22 = vsel %vm1685_vm8, %v4966_v32, 0.0  ;;  %v5037_v52 = vsel %vm1685_vm8, %v4967_v54, 0.0 }
 0x59d   : >> { %v5034_v4 = vadd.f32 %v5033_v43, %v5032_v34  ;;  %v4725_v49 = vpop.permute.xlu1 %4724  ;;  %v4721_v10 = vpop.permute.xlu0 %4720 }
 0x59e   : >> { %v4969_v7 = vmul.f32 %v4725_v49, %v4625_v5  ;;  %v4968_v45 = vmul.f32 %v4721_v10, %v4624_v60  ;;  %v4641_v10 = vld [vmem:[#allocation5 + $0xc8] sm:$0xff] }
 0x59f   : >> { %v5036_v53 = vadd.f32 %v5035_v22, %v5034_v4  ;;  %v4640_v22 = vld [vmem:[#allocation5 + $0xc0] sm:$0xff] }
 0x5a0   : >> { %v5046_v12 = vsel %vm1685_vm8, %v4969_v7, 0.0  ;;  %v5045_v50 = vsel %vm1685_vm8, %v4968_v45, 0.0 }
 0x5a1   : >> { %v5038_v44 = vadd.f32 %v5037_v52, %v5036_v53  ;;  %v5047_v28 = vadd.f32 %v5046_v12, %v5045_v50  ;;  %v4733_v27 = vpop.permute.xlu1 %4732  ;;  %v4729_v18 = vpop.permute.xlu0 %4728 }
 0x5a2   : >> { %v4971_v62 = vmul.f32 %v4733_v27, %v4627_v15  ;;  %v4970_v51 = vmul.f32 %v4729_v18, %v4626_v1  ;;  %v4634_v27 = vld [vmem:[#allocation5 + $0x90] sm:$0xff] }
 0x5a3   : >> { %v5039_v14 = vrot.slane %v5038_v44, 4 }
 0x5a4   : >> { %v5050_v58 = vsel %vm1685_vm8, %v4971_v62, 0.0  ;;  %v5048_v56 = vsel %vm1685_vm8, %v4970_v51, 0.0 }
 0x5a5   : >> { %v5049_v57 = vadd.f32 %v5048_v56, %v5047_v28  ;;  %v4741_v2 = vpop.permute.xlu1 %4740  ;;  %v4737_v9 = vpop.permute.xlu0 %4736  ;;  %v5040_v24 = vadd.f32 %v5039_v14, %v5038_v44 }
 0x5a6   : >> { %v4973_v8 = vmul.f32 %v4741_v2, %v4629_v35  ;;  %v4972_v29 = vmul.f32 %v4737_v9, %v4628_v33 }
 0x5a7   : >> { %v5051_v0 = vadd.f32 %v5050_v58, %v5049_v57  ;;  %v5041_v4 = vrot.slane %v5040_v24, 2  ;;  %v4648_v58 = vld [vmem:[#allocation5 + $0x100] sm:$0xff] }
 0x5a8   : >> { %v5054_v13 = vsel %vm1685_vm8, %v4973_v8, 0.0  ;;  %v5052_v39 = vsel %vm1685_vm8, %v4972_v29, 0.0  ;;  %v4642_v8 = vld [vmem:[#allocation5 + $0xd0] sm:$0xff]  ;;  %v4649_v29 = vld [vmem:[#allocation5 + $0x108] sm:$0xff] }
 0x5a9   : >> { %v5053_v41 = vadd.f32 %v5052_v39, %v5051_v0  ;;  %v4749_v61 = vpop.permute.xlu1 %4748  ;;  %v4745_v3 = vpop.permute.xlu0 %4744  ;;  %v5042_v44 = vadd.f32 %v5041_v4, %v5040_v24 }
 0x5aa   : >> { %v4975_v59 = vmul.f32 %v4749_v61, %v4631_v38  ;;  %v4974_v46 = vmul.f32 %v4745_v3, %v4630_v30 }
 0x5ab   : >> { %v5055_v37 = vadd.f32 %v5054_v13, %v5053_v41  ;;  %v5043_v2 = vrot.slane %v5042_v44, 1 }
 0x5ac   : >> { %v5058_v6 = vsel %vm1685_vm8, %v4975_v59, 0.0  ;;  %v5056_v32 = vsel %vm1685_vm8, %v4974_v46, 0.0 }
 0x5ad   : >> { %v5057_v34 = vadd.f32 %v5056_v32, %v5055_v37  ;;  %v4760_v5 = vpop.permute.xlu1 %4759  ;;  %v4756_v60 = vpop.permute.xlu0 %4755  ;;  %v5044_v3 = vadd.f32 %v5043_v2, %v5042_v44 }
 0x5ae   : >> { %v4977_v43 = vmul.f32 %v4760_v5, %v4633_v40  ;;  %v4976_v54 = vmul.f32 %v4756_v60, %v4632_v16 }
 0x5af   : >> { %v5059_v49 = vadd.f32 %v5058_v6, %v5057_v34 }
 0x5b0   : >> { %v5067_v7 = vsel %vm1685_vm8, %v4977_v43, 0.0  ;;  %v5066_v45 = vsel %vm1685_vm8, %v4976_v54, 0.0 }
 0x5b1   : >> { %v5060_v53 = vrot.slane %v5059_v49, 4  ;;  %v5068_v15 = vadd.f32 %v5067_v7, %v5066_v45  ;;  %v4795_v1 = vpop.permute.xlu1 %4794  ;;  %v4791_v52 = vpop.permute.xlu0 %4790 }
 0x5b2   : >> { %v4985_v12 = vmul.f32 %v4795_v1, %v4641_v10  ;;  %v4984_v50 = vmul.f32 %v4791_v52, %v4640_v22 }
 0x5b3   : >> { %v5061_v28 = vadd.f32 %v5060_v53, %v5059_v49 }
 0x5b4   : >> { %v5088_v18 = vsel %vm1685_vm8, %v4985_v12, 0.0  ;;  %v5087_v62 = vsel %vm1685_vm8, %v4984_v50, 0.0 }
 0x5b5   : >> { %v5062_v51 = vrot.slane %v5061_v28, 2  ;;  %v5089_v35 = vadd.f32 %v5088_v18, %v5087_v62  ;;  %v4826_v33 = vpop.permute.xlu1 %4825  ;;  %v4764_v56 = vpop.permute.xlu0 %4763  ;;  %v4656_v18 = vld [vmem:[#allocation5 + $0x140] sm:$0xff]  ;;  %v4650_v62 = vld [vmem:[#allocation5 + $0x110] sm:$0xff] }
 0x5b6   : >> { %v4978_v57 = vmul.f32 %v4764_v56, %v4634_v27  ;;  %v4992_v14 = vmul.f32 %v4826_v33, %v4648_v58  ;;  %v4657_v27 = vld [vmem:[#allocation5 + $0x148] sm:$0xff]  ;;  %v4635_v33 = vld [vmem:[#allocation5 + $0x98] sm:$0xff] }
 0x5b7   : >> { %v5063_v9 = vadd.f32 %v5062_v51, %v5061_v28  ;;  %v4665_v58 = vld [vmem:[#allocation5 + $0x188] sm:$0xff] }
 0x5b8   : >> { %v5069_v0 = vsel %vm1685_vm8, %v4978_v57, 0.0  ;;  %v5108_v46 = vsel %vm1685_vm8, %v4992_v14, 0.0  ;;  %v4664_v57 = vld [vmem:[#allocation5 + $0x180] sm:$0xff]  ;;  %v4658_v14 = vld [vmem:[#allocation5 + $0x150] sm:$0xff] }
 0x5b9   : >> { %v5064_v38 = vrot.slane %v5063_v9, 1  ;;  %v9510_v30 = vadd.f32 %v5069_v0, %v5068_v15  ;;  %v4799_v13 = vpop.permute.xlu1 %4798  ;;  %v4830_v39 = vpop.permute.xlu0 %4829  ;;  %v4636_v0 = vld [vmem:[#allocation5 + $0xa0] sm:$0xff] }
 0x5ba   : >> { %v4986_v41 = vmul.f32 %v4799_v13, %v4642_v8  ;;  %v4993_v61 = vmul.f32 %v4830_v39, %v4649_v29 }
 0x5bb   : >> { %v5065_v59 = vadd.f32 %v5064_v38, %v5063_v9 }
 0x5bc   : >> { %v5090_v24 = vsel %vm1685_vm8, %v4986_v41, 0.0  ;;  %v5109_v37 = vsel %vm1685_vm8, %v4993_v61, 0.0  ;;  %v4643_v41 = vld [vmem:[#allocation5 + $0xd8] sm:$0xff] }
 0x5bd   : >> { %v9515_v40 = vsel %vm5200_vm11, %v5065_v59, %v5044_v3  ;;  %v9517_v16 = vadd.f32 %v5090_v24, %v5089_v35  ;;  %v5110_v6 = vadd.f32 %v5109_v37, %v5108_v46  ;;  %v4865_v32 = vpop.permute.xlu1 %4864  ;;  %v4861_v34 = vpop.permute.xlu0 %4860  ;;  %v4673_v3 = vld [vmem:[#allocation5 + $0x1c8] sm:$0xff]  ;;  %v4672_v59 = vld [vmem:[#allocation5 + $0x1c0] sm:$0xff] }
 0x5be   : >> { %v5001_v56 = vmul.f32 %v4865_v32, %v4657_v27  ;;  %v5000_v2 = vmul.f32 %v4861_v34, %v4656_v18  ;;  %v4637_v46 = vld [vmem:[#allocation5 + $0xa8] sm:$0xff]  ;;  %v4651_v34 = vld [vmem:[#allocation5 + $0x118] sm:$0xff]  ;;  %v4644_v18 = vld [vmem:[#allocation5 + $0xe0] sm:$0xff] }
 0x5c0   : >> { %v5130_v61 = vsel %vm1685_vm8, %v5001_v56, 0.0  ;;  %v5129_v24 = vsel %vm1685_vm8, %v5000_v2, 0.0  ;;  %v4666_v2 = vld [vmem:[#allocation5 + $0x190] sm:$0xff] }
 0x5c1   : >> { %v4834_v5 = vpop.permute.xlu1 %4833  ;;  %v4768_v60 = vpop.permute.xlu0 %4767 }
 0x5c2   : >> { %v4994_v9 = vmul.f32 %v4834_v5, %v4650_v62  ;;  %v4979_v8 = vmul.f32 %v4768_v60, %v4635_v33 }
 0x5c4   : >> { %v5111_v37 = vsel %vm1685_vm8, %v4994_v9, 0.0  ;;  %v5071_v60 = vsel %vm1685_vm8, %v4979_v8, 0.0  ;;  %v5131_v9 = vadd.f32 %v5130_v61, %v5129_v24  ;;  %v4659_v61 = vld [vmem:[#allocation5 + $0x158] sm:$0xff] }
 0x5c5   : >> { %v4900_v43 = vpop.permute.xlu1 %4899  ;;  %v4896_v54 = vpop.permute.xlu0 %4895  ;;  %v5072_v17 = vadd.f32 %v5071_v60, %v9510_v30 }
 0x5c6   : >> { %v5009_v29 = vmul.f32 %v4900_v43, %v4665_v58  ;;  %v5008_v39 = vmul.f32 %v4896_v54, %v4664_v57  ;;  %v4638_v54 = vld [vmem:[#allocation5 + $0xb0] sm:$0xff] }
 0x5c8   : >> { %v5151_v43 = vsel %vm1685_vm8, %v5009_v29, 0.0  ;;  %v5150_v58 = vsel %vm1685_vm8, %v5008_v39, 0.0 }
 0x5c9   : >> { %v4869_v4 = vpop.permute.xlu1 %4868  ;;  %v4803_v49 = vpop.permute.xlu0 %4802  ;;  %v5152_v19 = vadd.f32 %v5151_v43, %v5150_v58 }
 0x5ca   : >> { %v5002_v32 = vmul.f32 %v4869_v4, %v4658_v14  ;;  %v4987_v27 = vmul.f32 %v4803_v49, %v4643_v41  ;;  %v5112_v4 = vadd.f32 %v5111_v37, %v5110_v6  ;;  %v4639_v37 = vld [vmem:[#allocation5 + $0xb8] sm:$0xff] }
 0x5cc   : >> { %v5132_v8 = vsel %vm1685_vm8, %v5002_v32, 0.0  ;;  %v5092_v39 = vsel %vm1685_vm8, %v4987_v27, 0.0 }
 0x5cd   : >> { %v4935_v10 = vpop.permute.xlu1 %4934  ;;  %v4931_v22 = vpop.permute.xlu0 %4930  ;;  %v5093_v32 = vadd.f32 %v5092_v39, %v9517_v16 }
 0x5ce   : >> { %v5017_v56 = vmul.f32 %v4935_v10, %v4673_v3  ;;  %v5016_v57 = vmul.f32 %v4931_v22, %v4672_v59  ;;  %v4646_v22 = vld [vmem:[#allocation5 + $0xf0] sm:$0xff] }
 0x5d0   : >> { %v5172_v6 = vsel %vm1685_vm8, %v5017_v56, 0.0 }
 0x5d1   : >> { %v4838_v7 = vpop.permute.xlu1 %4837  ;;  %v4772_v45 = vpop.permute.xlu0 %4771 }
 0x5d2   : >> { %v4980_v5 = vmul.f32 %v4772_v45, %v4636_v0  ;;  %v4995_v14 = vmul.f32 %v4838_v7, %v4651_v34  ;;  %v4645_v45 = vld [vmem:[#allocation5 + $0xe8] sm:$0xff]  ;;  %v4674_v0 = vld [vmem:[#allocation5 + $0x1d0] sm:$0xff]  ;;  %v5171_v7 = vsel %vm1685_vm8, %v5016_v57, 0.0 }
 0x5d3   : >> { %v5173_v27 = vadd.f32 %v5172_v6, %v5171_v7  ;;  %v4653_v57 = vld [vmem:[#allocation5 + $0x128] sm:$0xff]  ;;  %v4676_v6 = vld [vmem:[#allocation5 + $0x1e0] sm:$0xff] }
 0x5d4   : >> { %v5073_v29 = vsel %vm1685_vm8, %v4980_v5, 0.0  ;;  %v5113_v30 = vsel %vm1685_vm8, %v4995_v14, 0.0  ;;  %v4667_v5 = vld [vmem:[#allocation5 + $0x198] sm:$0xff] }
 0x5d5   : >> { %v4807_v53 = vpop.permute.xlu1 %4806  ;;  %v4904_v15 = vpop.permute.xlu0 %4903 }
 0x5d6   : >> { %v4988_v49 = vmul.f32 %v4807_v53, %v4644_v18  ;;  %v5010_v10 = vmul.f32 %v4904_v15, %v4666_v2  ;;  %v4652_v15 = vld [vmem:[#allocation5 + $0x120] sm:$0xff] }
 0x5d8   : >> { %v5094_v34 = vsel %vm1685_vm8, %v4988_v49, 0.0 }
 0x5d9   : >> { %v9519_v1 = vpop.permute.xlu1 %4938  ;;  %v9521_v52 = vpop.permute.xlu0 %4872 }
 0x5da   : >> { %v5018_v24 = vmul.f32 %v9519_v1, %v4674_v0  ;;  %v5114_v1 = vadd.f32 %v5113_v30, %v5112_v4  ;;  %v4654_v4 = vld [vmem:[#allocation5 + $0x130] sm:$0xff] }
 0x5dc   : >> { %v5174_v14 = vsel %vm1685_vm8, %v5018_v24, 0.0 }
 0x5dd   : >> { %v9523_v12 = vpop.permute.xlu1 %4841  ;;  %v4776_v50 = vpop.permute.xlu0 %4775 }
 0x5de   : >> { %v4981_v11 = vmul.f32 %v4776_v50, %v4637_v46  ;;  %v9550_v46 = vadd.f32 %v5132_v8, %v5131_v9  ;;  %v4996_v56 = vmul.f32 %v9523_v12, %v4652_v15  ;;  %v5095_v9 = vadd.f32 %v5094_v34, %v5093_v32 }
 0x5e0   : >> { %v5075_v59 = vsel %vm1685_vm8, %v4981_v11, 0.0  ;;  %v5153_v11 = vsel %vm1685_vm8, %v5010_v10, 0.0 }
 0x5e1   : >> { %v4811_v44 = vpop.permute.xlu1 %4810  ;;  %v9525_v28 = vpop.permute.xlu0 %4907 }
 0x5e2   : >> { %v4989_v53 = vmul.f32 %v4811_v44, %v4645_v45  ;;  %v5003_v44 = vmul.f32 %v9521_v52, %v4659_v61  ;;  %v4660_v45 = vld [vmem:[#allocation5 + $0x160] sm:$0xff]  ;;  %v5154_v52 = vadd.f32 %v5153_v11, %v5152_v19  ;;  %v5115_v19 = vsel %vm1685_vm8, %v4996_v56, 0.0 }
 0x5e4   : >> { %v5096_v16 = vsel %vm1685_vm8, %v4989_v53, 0.0  ;;  %v4661_v53 = vld [vmem:[#allocation5 + $0x168] sm:$0xff] }
 0x5e5   : >> { %v9527_v51 = vpop.permute.xlu1 %4942  ;;  %v9529_v35 = vpop.permute.xlu0 %4876  ;;  %v5097_v39 = vadd.f32 %v5096_v16, %v5095_v9 }
 0x5e9   : >> { %v9531_v38 = vpop.permute.xlu1 %4845  ;;  %v4780_v13 = vpop.permute.xlu0 %4779 }
 0x5ea   : >> { %v4982_v41 = vmul.f32 %v4780_v13, %v4638_v54  ;;  %v5074_v13 = vadd.f32 %v5073_v29, %v5072_v17  ;;  %v4675_v54 = vld [vmem:[#allocation5 + $0x1d8] sm:$0xff]  ;;  %v4997_v10 = vmul.f32 %v9531_v38, %v4653_v57 }
 0x5eb   : >> { %v4647_v29 = vld [vmem:[#allocation5 + $0xf8] sm:$0xff]  ;;  %v5019_v49 = vmul.f32 %v9527_v51, %v4675_v54  ;;  %v5004_v51 = vmul.f32 %v9529_v35, %v4660_v45 }
 0x5ec   : >> { %v5077_v60 = vsel %vm1685_vm8, %v4982_v41, 0.0  ;;  %v5076_v18 = vadd.f32 %v5075_v59, %v5074_v13  ;;  %v5134_v41 = vsel %vm1685_vm8, %v5003_v44, 0.0  ;;  %v5175_v59 = vadd.f32 %v5174_v14, %v5173_v27  ;;  %v4655_v14 = vld [vmem:[#allocation5 + $0x138] sm:$0xff] }
 0x5ed   : >> { %v4815_v62 = vpop.permute.xlu1 %4814  ;;  %v9538_v33 = vpop.permute.xlu0 %4911  ;;  %v5176_v32 = vsel %vm1685_vm8, %v5019_v49, 0.0  ;;  %v5135_v54 = vadd.f32 %v5134_v41, %v9550_v46  ;;  %v5136_v56 = vsel %vm1685_vm8, %v5004_v51, 0.0 }
 0x5ee   : >> { %v4990_v43 = vmul.f32 %v4815_v62, %v4646_v22  ;;  %v5011_v62 = vmul.f32 %v9525_v28, %v4667_v5  ;;  %v5078_v8 = vadd.f32 %v5077_v60, %v5076_v18  ;;  %v4668_v22 = vld [vmem:[#allocation5 + $0x1a0] sm:$0xff]  ;;  %v4662_v60 = vld [vmem:[#allocation5 + $0x170] sm:$0xff] }
 0x5ef   : >> { %v5012_v38 = vmul.f32 %v9538_v33, %v4668_v22  ;;  %v4669_v33 = vld [vmem:[#allocation5 + $0x1a8] sm:$0xff] }
 0x5f0   : >> { %v5098_v0 = vsel %vm1685_vm8, %v4990_v43, 0.0  ;;  %v5155_v13 = vsel %vm1685_vm8, %v5011_v62, 0.0  ;;  %v5117_v43 = vsel %vm1685_vm8, %v4997_v10, 0.0  ;;  %v5177_v62 = vadd.f32 %v5176_v32, %v5175_v59  ;;  %v4678_v59 = vld [vmem:[#allocation5 + $0x1f0] sm:$0xff] }
 0x5f1   : >> { %v4947_v3 = vpop.permute.xlu1 %4946  ;;  %v9545_v50 = vpop.permute.xlu0 %4880  ;;  %v5099_v24 = vadd.f32 %v5098_v0, %v5097_v39  ;;  %v5157_v45 = vsel %vm1685_vm8, %v5012_v38, 0.0 }
 0x5f2   : >> { %v5020_v34 = vmul.f32 %v4947_v3, %v4676_v6  ;;  %v5005_v35 = vmul.f32 %v9545_v50, %v4661_v53 }
 0x5f4   : >> { %v5138_v46 = vsel %vm1685_vm8, %v5005_v35, 0.0 }
 0x5f5   : >> { %v4850_v17 = vpop.permute.xlu1 %4849  ;;  %v4784_v58 = vpop.permute.xlu0 %4783 }
 0x5f6   : >> { %v4983_v2 = vmul.f32 %v4784_v58, %v4639_v37  ;;  %v4998_v15 = vmul.f32 %v4850_v17, %v4654_v4  ;;  %v5116_v17 = vadd.f32 %v5115_v19, %v5114_v1  ;;  %v5156_v58 = vadd.f32 %v5155_v13, %v5154_v52  ;;  %v4663_v19 = vld [vmem:[#allocation5 + $0x178] sm:$0xff] }
 0x5f8   : >> { %v5079_v12 = vsel %vm1685_vm8, %v4983_v2, 0.0  ;;  %v5119_v3 = vsel %vm1685_vm8, %v4998_v15, 0.0  ;;  %v4677_v2 = vld [vmem:[#allocation5 + $0x1e8] sm:$0xff]  ;;  %v5118_v50 = vadd.f32 %v5117_v43, %v5116_v17  ;;  %v5158_v51 = vadd.f32 %v5157_v45, %v5156_v58 }
 0x5f9   : >> { %v5080_v7 = vadd.f32 %v5079_v12, %v5078_v8  ;;  %v4819_v28 = vpop.permute.xlu1 %4818  ;;  %v4916_v61 = vpop.permute.xlu0 %4915  ;;  %v5178_v8 = vsel %vm1685_vm8, %v5020_v34, 0.0  ;;  %v5137_v12 = vadd.f32 %v5136_v56, %v5135_v54  ;;  %v4671_v54 = vld [vmem:[#allocation5 + $0x1b8] sm:$0xff] }
 0x5fa   : >> { %v4991_v30 = vmul.f32 %v4819_v28, %v4647_v29  ;;  %v4670_v29 = vld [vmem:[#allocation5 + $0x1b0] sm:$0xff]  ;;  %v5013_v49 = vmul.f32 %v4916_v61, %v4669_v33  ;;  %v5120_v41 = vadd.f32 %v5119_v3, %v5118_v50  ;;  %v5179_v53 = vadd.f32 %v5178_v8, %v5177_v62 }
 0x5fb   : >> { %v5081_v37 = vrot.slane %v5080_v7, 4 }
 0x5fc   : >> { %v5100_v5 = vsel %vm1685_vm8, %v4991_v30, 0.0  ;;  %v5139_v30 = vadd.f32 %v5138_v46, %v5137_v12  ;;  %v5159_v15 = vsel %vm1685_vm8, %v5013_v49, 0.0 }
 0x5fd   : >> { %v5082_v27 = vadd.f32 %v5081_v37, %v5080_v7  ;;  %v5101_v11 = vadd.f32 %v5100_v5, %v5099_v24  ;;  %v4951_v44 = vpop.permute.xlu1 %4950  ;;  %v4885_v18 = vpop.permute.xlu0 %4884  ;;  %v5160_v17 = vadd.f32 %v5159_v15, %v5158_v51 }
 0x5fe   : >> { %v5006_v9 = vmul.f32 %v4885_v18, %v4662_v60  ;;  %v5021_v39 = vmul.f32 %v4951_v44, %v4677_v2  ;;  %v4679_v18 = vld [vmem:[#allocation5 + $0x1f8] sm:$0xff] }
 0x5ff   : >> { %v5083_v16 = vrot.slane %v5082_v27, 2  ;;  %v5102_v57 = vrot.slane %v5101_v11, 4 }
 0x600   : >> { %v5140_v7 = vsel %vm1685_vm8, %v5006_v9, 0.0  ;;  %v5180_v34 = vsel %vm1685_vm8, %v5021_v39, 0.0 }
 0x601   : >> { %v5084_v1 = vadd.f32 %v5083_v16, %v5082_v27  ;;  %v5103_v52 = vadd.f32 %v5102_v57, %v5101_v11  ;;  %v4920_v0 = vpop.permute.xlu1 %4919  ;;  %v4854_v4 = vpop.permute.xlu0 %4853  ;;  %v5141_v5 = vadd.f32 %v5140_v7, %v5139_v30  ;;  %v5181_v3 = vadd.f32 %v5180_v34, %v5179_v53 }
 0x602   : >> { %v4999_v10 = vmul.f32 %v4854_v4, %v4655_v14  ;;  %v5014_v28 = vmul.f32 %v4920_v0, %v4670_v29 }
 0x603   : >> { %v5085_v22 = vrot.slane %v5084_v1, 1  ;;  %v5104_v6 = vrot.slane %v5103_v52, 2 }
 0x604   : >> { %v5121_v13 = vsel %vm1685_vm8, %v4999_v10, 0.0  ;;  %v5161_v11 = vsel %vm1685_vm8, %v5014_v28, 0.0 }
 0x605   : >> { %v5086_v24 = vadd.f32 %v5085_v22, %v5084_v1  ;;  %v5105_v61 = vadd.f32 %v5104_v6, %v5103_v52  ;;  %v5122_v37 = vadd.f32 %v5121_v13, %v5120_v41  ;;  %v4955_v32 = vpop.permute.xlu1 %4954  ;;  %v4889_v38 = vpop.permute.xlu0 %4888  ;;  %v5162_v14 = vadd.f32 %v5161_v11, %v5160_v17 }
 0x606   : >> { %v5022_v60 = vmul.f32 %v4955_v32, %v4678_v59  ;;  %v5007_v43 = vmul.f32 %v4889_v38, %v4663_v19  ;;  %v5236_v11 = vmul.f32 (%p3552_p1), 0.5, %v8627_v63 }
 0x607   : >> { %v5203_v35 = vsel %vm5202_vm12, %v5086_v24, %v9515_v40  ;;  %v5106_v27 = vrot.slane %v5105_v61, 1  ;;  %v5123_v44 = vrot.slane %v5122_v37, 4 }
 0x608   : >> { %v5182_v58 = vsel %vm1685_vm8, %v5022_v60, 0.0  ;;  %v5142_v56 = vsel %vm1685_vm8, %v5007_v43, 0.0  ;;  %v5244_v60 = vld [vmem:[%s9876_s26] sm:$0xff] (%p3552_p1)  ;;  %v5245_v43 = vld [vmem:[%s9876_s26 + $0x8] sm:$0xff] (%p3552_p1) }
 0x609   : >> { %v5107_v33 = vadd.f32 %v5106_v27, %v5105_v61  ;;  %v5124_v16 = vadd.f32 %v5123_v44, %v5122_v37  ;;  %v5143_v57 = vadd.f32 %v5142_v56, %v5141_v5  ;;  %v4959_v2 = vpop.permute.xlu1 %4958  ;;  %v4924_v9 = vpop.permute.xlu0 %4923  ;;  %v5183_v8 = vadd.f32 %v5182_v58, %v5181_v3  ;;  %v6183_v56 = vld [vmem:[#allocation20] ss:$0 sm:$0xff] (%p3552_p1)  ;;  %v5221_v3 = vld [vmem:[#allocation7 + $0x8] sm:$0xff] (%p3552_p1) }
 0x60a   : >> { %v5023_v40 = vmul.f32 %v4959_v2, %v4679_v18  ;;  %v5015_v62 = vmul.f32 %v4924_v9, %v4671_v54  ;;  %v5232_v27 = vmul.f32 (%p3552_p1), 0.125, %v8627_v63  ;;  %v5233_v44 = vmul.f32 (%p3552_p1), 0.125, %v8625_v55 }
 0x60b   : >> { %v5205_v50 = vsel %vm5204_vm13, %v5107_v33, %v5203_v35  ;;  %v5125_v45 = vrot.slane %v5124_v16, 2  ;;  %v5144_v29 = vrot.slane %v5143_v57, 4  ;;  %v5246_v35 = vld [vmem:[%s9876_s26 + $0x10] sm:$0xff] (%p3552_p1)  ;;  %v5261_v18 = vand.u32 (%p3552_p1), 4294901760, %v5244_v60 }
 0x60c   : >> { %v5184_v46 = vsel %vm1685_vm8, %v5023_v40, 0.0  ;;  %v5163_v1 = vsel %vm1685_vm8, %v5015_v62, 0.0  ;;  %v5264_v54 = vand.u32 (%p3552_p1), 4294901760, %v5245_v43  ;;  %v5267_v25 = vand.u32 (%p3552_p1), 4294901760, %v5246_v35  ;;  %v5220_v33 = vld [vmem:[#allocation7] sm:$0xff] (%p3552_p1) }
 0x60d   : >> { %v5126_v52 = vadd.f32 %v5125_v45, %v5124_v16  ;;  %v5145_v49 = vadd.f32 %v5144_v29, %v5143_v57  ;;  %v5185_v0 = vadd.f32 %v5184_v46, %v5183_v8  ;;  %v5164_v4 = vadd.f32 %v5163_v1, %v5162_v14 }
 0x60e   : > { %v5234_v17 = vmul.f32 (%p3552_p1), %v5232_v27, %v8627_v63  ;;  %v9626_v58 = vpack.c.bf16 (%p3552_p1), %v5264_v54, %v5261_v18  ;;  %v9628_v16 = vsub.f32 (%p3552_p1), %v5244_v60, %v5261_v18  ;;  %v9630_v57 = vpack.c.bf16 (%p3552_p1), %v5270_v21, %v5267_v25 }
 0x60f   : >> { %v5127_v12 = vrot.slane %v5126_v52, 1  ;;  %v5146_v41 = vrot.slane %v5145_v49, 2  ;;  %v5186_v39 = vrot.slane %v5185_v0, 4  ;;  %v5165_v10 = vrot.slane %v5164_v4, 4 }
 0x610   : > { %v5279_v2 = vand.u32 (%p3552_p1), 4294901760, %v5250_v42  ;;  %v5228_v9 = vmul.f32 (%p3552_p1), %v6183_v56, %v5220_v33  ;;  %v5229_v14 = vmul.f32 (%p3552_p1), %v6183_v56, %v5221_v3  ;;  %7086 = vmatprep.subr.bf16.mxu0 (%p3552_p1), %v9626_v58  ;;  %v5282_v40 = vand.u32 (%p3552_p1), 4294901760, %v5251_v47 }
 0x611   : >> { %v5128_v22 = vadd.f32 %v5127_v12, %v5126_v52  ;;  %v5147_v6 = vadd.f32 %v5146_v41, %v5145_v49  ;;  %v5187_v7 = vadd.f32 %v5186_v39, %v5185_v0  ;;  %v5166_v28 = vadd.f32 %v5165_v10, %v5164_v4  ;;  %7088 = vmatpush3.bf16.msra.mxu0 (%p3552_p1), %v9626_v58 }
 0x612   : > { %v5238_v62 = vadd.f32 (%p3552_p1), %v5236_v11, %v5234_v17  ;;  %v9634_v45 = vsub.f32 (%p3552_p1), %v5245_v43, %v5264_v54  ;;  %v9637_v8 = vpack.c.bf16 (%p3552_p1), %v5276_v36, %v5273_v23  ;;  %v5235_v46 = vmul.f32 (%p3552_p1), %v8625_v55, %v5233_v44  ;;  %7090 = vmatprep.subr.bf16.mxu0 (%p3552_p1), %v9630_v57 }
 0x613   : >> { %v5207_v59 = vsel %vm5206_vm14, %v5128_v22, %v5205_v50  ;;  %v5148_v19 = vrot.slane %v5147_v6, 1  ;;  %v5188_v51 = vrot.slane %v5187_v7, 2  ;;  %v5167_v53 = vrot.slane %v5166_v28, 2 }
 0x614   : > { %v5356_v50 = vand.u32 (%p3552_p1), 4294901760, %v9628_v16  ;;  %v5237_v1 = vmul.f32 (%p3552_p1), 0.5, %v8625_v55  ;;  %v5240_v52 = vadd.f32 (%p3552_p1), 0.125, %v5238_v62  ;;  %v5363_v0 = vand.u32 (%p3552_p1), 4294901760, %v9634_v45 }
 0x615   : >> { %v5189_v30 = vadd.f32 %v5188_v51, %v5187_v7  ;;  %v5168_v13 = vadd.f32 %v5167_v53, %v5166_v28  ;;  %v5149_v24 = vadd.f32 %v5148_v19, %v5147_v6  ;;  %v9646_v4 = vsub.f32 (%p3552_p1), %v5246_v35, %v5267_v25  ;;  %7092 = vmatpush3.bf16.msra.mxu0 (%p3552_p1), %v9630_v57 }
 0x616   : > { %v5357_v49 = vsub.f32 (%p3552_p1), %v9628_v16, %v5356_v50  ;;  %v5239_v41 = vadd.f32 (%p3552_p1), %v5237_v1, %v5235_v46  ;;  %v9648_v39 = vsub.f32 (%p3552_p1), %v5247_v31, %v5270_v21  ;;  %v5364_v55 = vsub.f32 (%p3552_p1), %v9634_v45, %v5363_v0  ;;  %7094 = vmatprep.subr.bf16.mxu0 (%p3552_p1), %v9637_v8 }
 0x617   : >> { %v5190_v61 = vrot.slane %v5189_v30, 1  ;;  %v5169_v15 = vrot.slane %v5168_v13, 1  ;;  %v5209_v38 = vsel %vm5208_vm15, %v5149_v24, %v5207_v59  ;;  %3554 = sbr.rel (!%p3552_p1) target bundleno = 1034 (0x40a), region = 166  ;;  %v9653_v22 = vsub.f32 (%p3552_p1), %v5248_v26, %v5273_v23 }
 0x618   : > { %v9655_v6 = vsub.f32 (%p3552_p1), %v5249_v20, %v5276_v36  ;;  %v9658_v7 = vpack.c.bf16 (%p3552_p1), %v5282_v40, %v5279_v2  ;;  %v5241_v28 = vadd.f32 (%p3552_p1), 0.125, %v5239_v41  ;;  %v5370_v59 = vand.u32 (%p3552_p1), 4294901760, %v9646_v4 }
 0x619   : >> { %v5191_v37 = vadd.f32 %v5190_v61, %v5189_v30  ;;  %v5170_v32 = vadd.f32 %v5169_v15, %v5168_v13  ;;  %v5358_v51 = vand.u32 (%p3552_p1), 4294901760, %v5357_v49  ;;  %v5365_v53 = vand.u32 (%p3552_p1), 4294901760, %v5364_v55  ;;  %7096 = vmatpush3.bf16.msra.mxu0 (%p3552_p1), %v9637_v8 }
 0x61a   : > { %v5377_v30 = vand.u32 (%p3552_p1), 4294901760, %v9648_v39  ;;  %v5384_v61 = vand.u32 (%p3552_p1), 4294901760, %v9653_v22  ;;  %v5391_v15 = vand.u32 (%p3552_p1), 4294901760, %v9655_v6  ;;  %7098 = vmatprep.subr.bf16.mxu0 (%p3552_p1), %v9658_v7  ;;  %v9682_v35 = vsub.f32 (%p3552_p1), %v5251_v47, %v5282_v40 }
 0x61b   : >> { %v5211_v34 = vsel %vm5210_vm0, %v5170_v32, %v5209_v38  ;;  %v5371_v38 = vsub.f32 (%p3552_p1), %v9646_v4, %v5370_v59  ;;  %v7117_v40 = vpack.c.bf16 (%p3552_p1), %v9634_v45, %v9628_v16  ;;  %v7121_v62 = vpack.c.bf16 (%p3552_p1), %v9648_v39, %v9646_v4 }
 0x61c   : >> { %v5213_v5 = vsel %vm5212_vm1, %v5191_v37, %v5211_v34  ;;  %v9674_v34 = vsub.f32 (%p3552_p1), %v5250_v42, %v5279_v2  ;;  %v5378_v43 = vsub.f32 (%p3552_p1), %v9648_v39, %v5377_v30  ;;  %v5385_v54 = vsub.f32 (%p3552_p1), %v9653_v22, %v5384_v61 }
 0x61d   : >> { %5216 = vst.msk [vmem:[%s5215_s29] sm:$0xff] %vm1685_vm8, %v5213_v5  ;;  %v7101_v5 = vpack.c.bf16 (%p3552_p1), %v5365_v53, %v5358_v51  ;;  %7100 = vmatpush3.bf16.msra.mxu0 (%p3552_p1), %v9658_v7  ;;  %v5372_v18 = vand.u32 (%p3552_p1), 4294901760, %v5371_v38  ;;  %v5392_v31 = vsub.f32 (%p3552_p1), %v9655_v6, %v5391_v15  ;;  %v5405_v21 = vand.u32 (%p3552_p1), 4294901760, %v9682_v35 }
 0x61e   : > { %v5379_v26 = vand.u32 4294901760, %v5378_v43  ;;  %v5398_v20 = vand.u32 4294901760, %v9674_v34  ;;  %v5386_v42 = vand.u32 4294901760, %v5385_v54  ;;  %v7149_v46 = vpack.c.bf16 %v5363_v0, %v5356_v50 }
 0x61f   : > { %7102 = vmatprep.subr.bf16.mxu0 %v7101_v5  ;;  %v5393_v47 = vand.u32 4294901760, %v5392_v31  ;;  %v5406_v33 = vsub.f32 %v9682_v35, %v5405_v21  ;;  %v7153_v1 = vpack.c.bf16 %v5377_v30, %v5370_v59  ;;  %v7157_v16 = vpack.c.bf16 %v5391_v15, %v5384_v61 }
 0x620   : > { %v7105_v17 = vpack.c.bf16 %v5379_v26, %v5372_v18  ;;  %v5399_v56 = vsub.f32 %v9674_v34, %v5398_v20  ;;  %v7161_v50 = vpack.c.bf16 %v5405_v21, %v5398_v20 }
 0x621   : > { %v7109_v3 = vpack.c.bf16 %v5393_v47, %v5386_v42 }
 0x622   : > { %v5400_v2 = vand.u32 4294901760, %v5399_v56 }
 0x624   : > { %v5217_v48 = vld [vmem:[#allocation10] sm:$0xff]  ;;  %v5218_v63 = vld [vmem:[#allocation10 + $0x8] sm:$0xff] }
 0x625   : > { %v5230_v29 = vadd.f32 %v5228_v9, %v5217_v48  ;;  %v5231_v12 = vadd.f32 %v5229_v14, %v5218_v63  ;;  %v5407_v9 = vand.u32 4294901760, %v5406_v33  ;;  %v7125_v63 = vpack.c.bf16 %v9655_v6, %v9653_v22 }
 0x627   : > { %v5242_v10 = vmul.f32 %v5240_v52, %v5230_v29  ;;  %v5243_v24 = vmul.f32 %v5241_v28, %v5231_v12  ;;  %v7113_v14 = vpack.c.bf16 %v5407_v9, %v5400_v2  ;;  %v7129_v29 = vpack.c.bf16 %v9682_v35, %v9674_v34 }
 0x629   : > { %v5255_v19 = vsel %vm1685_vm8, %v5242_v10, 0  ;;  %v5258_v32 = vsel %vm1685_vm8, %v5243_v24, 0 }
 0x62a   : > { %v9664_v13 = vand.u32 4294901760, %v5255_v19  ;;  %v9677_v60 = vand.u32 4294901760, %v5258_v32 }
 0x62c   : > { %v5334_v37 = vsub.f32 %v5255_v19, %v9664_v13  ;;  %v5344_v11 = vsub.f32 %v5258_v32, %v9677_v60 }
 0x62e   : > { %v5335_v27 = vand.u32 4294901760, %v5334_v37  ;;  %v5345_v25 = vand.u32 4294901760, %v5344_v11 }
 0x630   : > { %v5336_v44 = vsub.f32 %v5334_v37, %v5335_v27  ;;  %v5346_v36 = vsub.f32 %v5344_v11, %v5345_v25 }
 0x632   : > { %v5337_v23 = vand.u32 4294901760, %v5336_v44  ;;  %v5347_v48 = vand.u32 4294901760, %v5346_v36 }
 0x634   : > { %6699 = vmatprep.mubr.f32.mxu0 %v5337_v23 }
 0x635   : > { %6700 = vmatmul.mubr.f32.vlgmr.msra.gmra.mrb[6].mxu0 %v5347_v48 }
 0x636   : > { %7104 = vmatpush3.bf16.msra.mxu0 %v7101_v5  ;;  %6718 = vmatprep.mubr.f32.mxu0 %v9664_v13 }
 0x637   : > { %7106 = vmatprep.subr.bf16.mxu0 %v7105_v17 }
 0x63a   : > { %7108 = vmatpush3.bf16.msra.mxu0 %v7105_v17 }
 0x63b   : > { %7110 = vmatprep.subr.bf16.mxu0 %v7109_v3 }
 0x63e   : > { %7112 = vmatpush3.bf16.msra.mxu0 %v7109_v3 }
 0x63f   : > { %7114 = vmatprep.subr.bf16.mxu0 %v7113_v14 }
 0x642   : > { %7116 = vmatpush3.bf16.msra.mxu0 %v7113_v14 }
 0x643   : > { %7118 = vmatprep.subr.bf16.mxu0 %v7117_v40 }
 0x645   : > { %6719 = vmatmul.mubr.f32.vlgmr.msra.gmra.mrb[6].mxu0 %v9677_v60 }
 0x646   : > { %7120 = vmatpush3.bf16.msra.mxu0 %v7117_v40  ;;  %6737 = vmatprep.mubr.f32.mxu0 %v5334_v37 }
 0x647   : > { %7122 = vmatprep.subr.bf16.mxu0 %v7121_v62 }
 0x64a   : > { %7124 = vmatpush3.bf16.msra.mxu0 %v7121_v62 }
 0x64b   : > { %7126 = vmatprep.subr.bf16.mxu0 %v7125_v63 }
 0x64e   : > { %7128 = vmatpush3.bf16.msra.mxu0 %v7125_v63 }
 0x64f   : > { %7130 = vmatprep.subr.bf16.mxu0 %v7129_v29 }
 0x652   : > { %7132 = vmatpush3.bf16.msra.mxu0 %v7129_v29 }
 0x653   : > { %7134 = vmatprep.subr.bf16.mxu0 %v9626_v58 }
 0x655   : > { %6738 = vmatmul.mubr.f32.vlgmr.msra.gmra.mrb[6].mxu0 %v5344_v11 }
 0x656   : > { %7136 = vmatpush3.bf16.msra.mxu0 %v9626_v58  ;;  %6756 = vmatprep.mubr.f32.mxu0 %v5335_v27 }
 0x657   : > { %7138 = vmatprep.subr.bf16.mxu0 %v9630_v57 }
 0x65a   : > { %7140 = vmatpush3.bf16.msra.mxu0 %v9630_v57 }
 0x65b   : > { %7142 = vmatprep.subr.bf16.mxu0 %v9637_v8 }
 0x65e   : > { %7144 = vmatpush3.bf16.msra.mxu0 %v9637_v8 }
 0x65f   : > { %7146 = vmatprep.subr.bf16.mxu0 %v9658_v7 }
 0x662   : > { %7148 = vmatpush3.bf16.msra.mxu0 %v9658_v7 }
 0x663   : > { %7150 = vmatprep.subr.bf16.mxu0 %v7149_v46 }
 0x665   : > { %6757 = vmatmul.mubr.f32.vlgmr.msra.gmra.mrb[6].mxu0 %v5345_v25 }
 0x666   : > { %7152 = vmatpush3.bf16.msra.mxu0 %v7149_v46  ;;  %6775 = vmatprep.mubr.f32.mxu0 %v9664_v13 }
 0x667   : > { %7154 = vmatprep.subr.bf16.mxu0 %v7153_v1 }
 0x66a   : > { %7156 = vmatpush3.bf16.msra.mxu0 %v7153_v1 }
 0x66b   : > { %7158 = vmatprep.subr.bf16.mxu0 %v7157_v16 }
 0x66e   : > { %7160 = vmatpush3.bf16.msra.mxu0 %v7157_v16 }
 0x66f   : > { %7162 = vmatprep.subr.bf16.mxu0 %v7161_v50 }
 0x672   : > { %7164 = vmatpush3.bf16.msra.mxu0 %v7161_v50 }
 0x673   : > { %7166 = vmatprep.subr.bf16.mxu0 %v9626_v58 }
 0x675   : > { %6776 = vmatmul.mubr.f32.vlgmr.msra.gmra.mrb[6].mxu0 %v9677_v60 }
 0x676   : > { %7168 = vmatpush3.bf16.msra.mxu0 %v9626_v58  ;;  %6794 = vmatprep.mubr.f32.mxu0 %v9664_v13  ;;  %v5253_v58 = vld [vmem:[%s8301_s30 + $0x8] sm:$0xff] }
 0x677   : > { %7170 = vmatprep.subr.bf16.mxu0 %v9630_v57 }
 0x67a   : > { %7172 = vmatpush3.bf16.msra.mxu0 %v9630_v57  ;;  %v5252_v57 = vld [vmem:[%s8301_s30] sm:$0xff]  ;;  %s7993_s30 = smov [#allocation22]  }
 0x67b   : > { %7174 = vmatprep.subr.bf16.mxu0 %v9637_v8  ;;  %s7792_s13 = sshll.u32 %s7993_s30, 4  ;;  %s7793_s13 = int_to_ptr.vmem [resolvable:$false] %s7792_s13 }
 0x67c   : > { %s7794_s19 = scalar_lea.vmem %s7793_s13, 512  ;;  %p7795_p9 = scmp.lt.s32.totalorder %s9748_s27, %s7793_s13 }
 0x67d   : > { %p7796_p11 = scmp.lt.s32.totalorder %s7794_s19, %s7788_s16 }
 0x67e   : > { %7176 = vmatpush3.bf16.msra.mxu0 %v9637_v8 }
 0x67f   : > { %7178 = vmatprep.subr.bf16.mxu0 %v9658_v7  ;;  %p7797_p13 = por %p7796_p11, %p7795_p9 }
 0x681   : > { %p7798_p3 = pnand %p7797_p13, %p7791_p7 }
 0x682   : > { %7180 = vmatpush3.bf16.msra.mxu0 %v9658_v7 }
 0x685   : > { %6795 = vmatmul.mubr.f32.vlgmr.msra.gmra.mrb[6].mxu0 %v9677_v60 }
 0x758   : > { %v6796_v45 = vpop.f32.mrb[6].mxu0 }
 0x759   : > { %v7187_v52 = vadd.f32 %v6796_v45, %v5253_v58  ;;  %v5830_v49 = vpop.f32.mrb[7].mxu0 }
 0x75a   : > { %v7188_v8 = vadd.f32 %v5830_v49, %v5252_v57 }
 0x75b   : > { %5841 = vst.msk [vmem:[%s8303_s11 + $0x8] sm:$0xff] %vm519_vm2, %v7187_v52 }
 0x75c   : > { %5840 = vst.msk [vmem:[%s8303_s11] sm:$0xff] %vm519_vm2, %v7188_v8 }
 0x75d   : > { %7801 = shalt.err (!%p7798_p3)
}
 0x75e   : > { %s7802_s22 = scalar_lea.hbm %s9746_s17, 256  ;;  %s7806_s10 = scalar_lea.hbm %s9878_s14, 1024 }
 0x75f   : > { %p7803_p8 = scmp.ne.s32.totalorder %s9746_s17, %s7802_s22  ;;  %p7807_p10 = scmp.lt.u32.totalorder %s9746_s17, %s9878_s14 }
 0x760   : > { %p7808_p12 = scmp.lt.u32.totalorder %s7806_s10, %s7802_s22  ;;  %p7810_p4 = scmp.lt.u32.totalorder %s7802_s22, %s9746_s17 }
 0x761   : > { %p7804_p0 = pnand %p7803_p8, %p9879_p5 }
 0x762   : > { %p7809_p1 = por %p7808_p12, %p7807_p10 }
 0x763   : > { %p7805_p2 = pneg %p7804_p0 }
 0x764   : > { %p7811_p6 = por %p7810_p4, %p7809_p1 }
 0x766   : > { %p7812_p7 = pnand %p7811_p6, %p7805_p2 }
 0x768   : > { %7815 = shalt.err (!%p7812_p7)
}
 0x769   : > { %s7994_s28 = smov 128   ;;  %s7995_s12 = smov 8  }
 0x76a   : > { %7279 = dma.vmem_to_hbm [thread:$0]  (%p9879_p5), %s9748_s27, 256, %s9746_s17, %s9756_s21, %s7994_s28, %s7994_s28, %s7995_s12  }
 0x76b PF: > { %s9880_s25 = sld [smem:[#allocation32_spill]]  ;;  %s9881_s20 = sld [smem:[#allocation28_spill]] }
 0x76c   : > { %s9882_s16 = sld [smem:[#allocation36_spill]] }
 0x771   : > { %p7316_p9 = scmp.ge.s32.totalorder %s9880_s25, 2  ;;  %s5873_s30 = sand.u32 1, %s9881_s20  }
 0x772   : > { %p9883_p11 = scmp.ne.s32.totalorder %s9882_s16, 0  ;;  %s5874_s13 = scalar_lea.sflag [#allocation13], %s5873_s30 }
 0x774   : > { %p7301_p13 = pnand %p7316_p9, %p9883_p11 }
 0x776   : > { %7905 = dma.done.wait (!%p7301_p13), %s5874_s13, 256  }
 0x777   : > { %7907 = vsyncadd (!%p7301_p13), %s5874_s13, 4294967040  ;;  %s28_s24 = sadd.s32 1, %s9880_s25   ;;  %s9884_s19 = sld [smem:[#allocation29_spill]] }
 0x778   : > { %p25_p3 = scmp.ge.s32.totalorder %s28_s24, 6   ;;  %s9885_s22 = sld [smem:[#allocation37_spill]] }
 0x779   : > { %s9886_s20 = sld [smem:[#allocation30_spill]]  ;;  %s9887_s21 = sld [smem:[#allocation31_spill]] }
 0x77a   : > { %s9888_s27 = sld [smem:[#allocation33_spill]]  ;;  %s9889_s23 = sld [smem:[#allocation35_spill]] }
 0x77b   : > { %s9890_s17 = smov %s7914_s18  ;;  %27 = sbr.rel (!%p25_p3) target bundleno = 12 (0xc), region = 177 }
 0x77d   : > { %s9891_s18 = smov %s9884_s19 }
 0x77e   : > { %s9892_s19 = smov %s9885_s22 }
 0x780   : > { %s9893_s22 = smov %s9888_s27 }
 0x782   :  { %5879 = vsyncpa [#allocation12], 1 }
 0x783   :  { %5881 = vsyncpa [#allocation12 + $0x1], 1 }
 0x784   :  { %5882 = vsyncpa [#allocation15], 1 }
 0x785   :  { %5883 = vsyncpa [#allocation18], 1 }
 0x786   :  { %5884 = vsyncpa [#allocation21], 1 }
 0x787   :  { %5885 = vsyncpa [#allocation13], 1 }
 0x788   :  { %5887 = vsyncpa [#allocation13 + $0x1], 1 }

// kernel: tpu_custom_call.1
= control target key start
LH: loop header
LB: loop body
LE: loop exit
PB: predicated region body
PF: predicated region fallthrough
CT: control target
= control target key end

     0   :  { %s9808_s0 = inlined_call_operand.vmem [shape: f32[2,32,32], index: 0, kind: input, shape index: {}]   ;;  %s9809_s1 = inlined_call_operand.vmem [shape: f32[32,64], index: 1, kind: input, shape index: {}]   ;;  %s9810_s2 = inlined_call_operand.hbm [shape: f32[32,64], index: 2, kind: input, shape index: {}]   ;;  %s9811_s3 = inlined_call_operand.vmem [shape: f32[4,64], index: 3, kind: input, shape index: {}]   ;;  %s9812_s4 = inlined_call_operand.vmem [shape: f32[1,64], index: 4, kind: input, shape index: {}]   ;;  %s9813_s5 = inlined_call_operand.hbm [shape: f32[64,384], index: 5, kind: input, shape index: {}]   ;;  %s9814_s6 = inlined_call_operand.hbm [shape: f32[2,64], index: 6, kind: input, shape index: {}]   ;;  %s9815_s7 = inlined_call_operand.hbm [shape: f32[1,64], index: 7, kind: input, shape index: {}]   ;;  %s9816_s8 = inlined_call_operand.hbm [shape: f32[64,64], index: 8, kind: input, shape index: {}]   ;;  %s9817_s9 = inlined_call_operand.hbm [shape: f32[1,64], index: 9, kind: input, shape index: {}]   ;;  %s9818_s10 = inlined_call_operand.vmem [shape: f32[64,32], index: 10, kind: input, shape index: {}]   ;;  %s9819_s11 = inlined_call_operand.hbm [shape: f32[2,32,32], index: 11, kind: output, shape index: {}]  }
   0x1   :  { %9842 = sst [smem:[#allocation41_spill]] %s9818_s10 }
   0x2   :  { %9843 = sst [smem:[#allocation42_spill]] %s9819_s11 }
   0x3   :  { %16 = vsyncpa [#allocation12], 0 }
   0x4   :  { %17 = vsyncpa [#allocation15], 0 }
   0x5   :  { %18 = vsyncpa [#allocation18], 0 }
   0x6   :  { %19 = vsyncpa [#allocation21], 0 }
   0x7   :  { %20 = vsyncpa [#allocation13], 0 }
   0x8   :  { %22 = vsyncpa [#allocation13 + $0x1], 0  ;;  %s8056_s17 = smov 0   ;;  %s8058_s18 = smov 0  }
   0x9   :  { %s8060_s19 = smov 0   ;;  %s8062_s20 = smov 0  }
   0xa   :  { %s8064_s21 = smov 0   ;;  %s8066_s22 = smov 0  }
   0xb   :  { %s8068_s23 = smov 0   ;;  %s8070_s24 = smov 0  }
   0xc LB: > { %9844 = sst [smem:[#allocation28_spill]] %s7910_s17  ;;  %s6072_s25 = sadd.s32 4294967295, %s7938_s24   ;;  %s7938_s24 = sphi %s8070_s24, %s28_s24   ;;  %s7934_s23 = sphi %s8068_s23, %s9889_s23   ;;  %s7930_s22 = sphi %s8066_s22, %s9893_s22   ;;  %s7926_s21 = sphi %s8064_s21, %s9887_s21   ;;  %s7922_s20 = sphi %s8062_s20, %s9886_s20   ;;  %s7918_s19 = sphi %s8060_s19, %s9892_s19   ;;  %s7914_s18 = sphi %s8058_s18, %s9891_s18   ;;  %s7910_s17 = sphi %s8056_s17, %s9890_s17  }
   0xd   : > { %9845 = sst [smem:[#allocation29_spill]] %s7918_s19  ;;  %s6073_s26 = sadd.s32 4294967294, %s7938_s24  }
   0xe   : > { %9846 = sst [smem:[#allocation30_spill]] %s7930_s22  ;;  %s37_s27 = sadd.s32 1, %s7930_s22 }
   0xf   : > { %9847 = sst [smem:[#allocation31_spill]] %s7934_s23  ;;  %s40_s28 = sadd.s32 1, %s7934_s23 }
  0x10   : > { %9848 = sst [smem:[#allocation32_spill]] %s7938_s24  ;;  %p38_p0 = scmp.ge.s32.totalorder %s37_s27, 2 }
  0x11   : > { %s287_s29 = sadd.s32 1, %s7918_s19  ;;  %p297_p1 = scmp.ne.s32.totalorder %s7918_s19, %s7914_s18 }
  0x12   : > { %p298_p2 = scmp.eq.s32.totalorder %s6072_s25, 3  ;;  %s9895_s27 = smov (%p38_p0, %s37_s27), 0 }
  0x13   : > { %9849 = sst [smem:[#allocation33_spill]] %s9895_s27  ;;  %s9897_s28 = smov (!%p38_p0, %s40_s28), %s7934_s23 }
  0x14   : > { %s283_s30 = ssub.s32 %s7930_s22, %s9895_s27  ;;  %p8108_p3 = por %p298_p2, %p297_p1 }
  0x15   : > { %p42_p4 = scmp.ge.s32.totalorder %s9897_s28, 2  ;;  %p303_p5 = scmp.ne.s32.totalorder %s7914_s18, %s7910_s17 }
  0x16   : > { %s9850_s12 = scalar_select %p8108_p3, 1, 0 }
  0x17   : > { %p304_p6 = scmp.eq.s32.totalorder %s6073_s26, 3  ;;  %p6074_p7 = scmp.ge.s32.totalorder %s7938_s24, 1 }
  0x18   : > { %9851 = sst [smem:[#allocation34_spill]] %s9850_s12  ;;  %s9899_s28 = smov (%p42_p4, %s9897_s28), 0 }
  0x19   : > { %9852 = sst [smem:[#allocation35_spill]] %s9899_s28  ;;  %p8117_p8 = por %p304_p6, %p303_p5 }
  0x1a   : > { %p311_p9 = scmp.lt.s32.totalorder %s7938_s24, 5  ;;  %s282_s14 = ssub.s32 %s7934_s23, %s9899_s28 }
  0x1b   : > { %s9853_s13 = scalar_select %p8117_p8, 1, 0 }
  0x1c   : > { %s284_s15 = sor.u32 %s283_s30, %s282_s14  ;;  %p8124_p10 = pnand %p6074_p7, %p311_p9 }
  0x1d   : > { %9854 = sst [smem:[#allocation36_spill]] %s9853_s13  ;;  %p285_p11 = scmp.eq.s32.totalorder %s284_s15, 0 }
  0x1e   : > { %s9855_s16 = scalar_select %p8124_p10, 1, 0 }
  0x1f   : > { %p8128_p12 = scmp.eq.s32.totalorder %s6072_s25, 0  ;;  %p7281_p13 = pneg %p8124_p10 }
  0x20   : > { %s8135_s26 = scalar_select %p285_p11, %s7918_s19, %s287_s29  }
  0x21   : > { %s9856_s27 = scalar_select %p8128_p12, 1, 0 }
  0x22   : > { %9857 = sst [smem:[#allocation37_spill]] %s8135_s26  ;;  %p8139_p0 = pnand %p8128_p12, %p7281_p13 }
  0x23   : > { %s7980_s30 = smov [#allocation14]   ;;  %s7620_s25 = scalar_lea.hbm %s9813_s5, 3072 }
  0x24   : > { %s345_s14 = sshll.u32 %s7980_s30, 4  ;;  %p7621_p1 = scmp.ne.s32.totalorder %s9813_s5, %s7620_s25  ;;  %s346_s14 = int_to_ptr.vmem [resolvable:$true] %s345_s14 }
  0x25   : > { %p8151_p2 = pneg %p8139_p0  ;;  %p7627_p6 = scmp.lt.u32.totalorder %s7620_s25, %s9813_s5 }
  0x27   : > { %p7623_p4 = pnand %p8151_p2, %p7621_p1 }
  0x29   : > { %p7624_p5 = pneg %p7623_p4 }
  0x2b   : > { %p7629_p7 = pnand %p7627_p6, %p7624_p5 }
  0x2d   : > { %7632 = shalt.err (!%p7629_p7)
}
  0x2e   : > { %s7633_s28 = scalar_lea.vmem %s346_s14, 3072  ;;  %p7641_p8 = scmp.lt.s32.totalorder %s346_s14, %s346_s14 }
  0x2f   : > { %p7634_p9 = scmp.ne.s32.totalorder %s346_s14, %s7633_s28  ;;  %p7642_p3 = scmp.lt.s32.totalorder %s7633_s28, %s7633_s28 }
  0x31   : > { %p7636_p11 = pnand %p7634_p9, %p8151_p2  ;;  %p7643_p12 = por %p7642_p3, %p7641_p8 }
  0x33   : > { %p7637_p13 = pneg %p7636_p11 }
  0x35   : > { %p7644_p10 = pnand %p7643_p12, %p7637_p13 }
  0x37   : > { %7647 = shalt.err (!%p7644_p10)
}
  0x38   : > { %s7981_s23 = smov 384   ;;  %s7982_s13 = smov 24  }
  0x39   : > { %7287 = dma.hbm_to_vmem [thread:$0]  (!%p8139_p0), %s9813_s5, 3072, %s346_s14, [#allocation15], %s7981_s23, %s7981_s23, %s7982_s13  }
  0x3a   : > { %s7983_s25 = smov [#allocation17]   ;;  %s7648_s24 = scalar_lea.hbm %s9815_s7, 16 }
  0x3b   : > { %s370_s30 = sshll.u32 %s7983_s25, 4  ;;  %p7649_p3 = scmp.ne.s32.totalorder %s9815_s7, %s7648_s24  ;;  %s371_s30 = int_to_ptr.vmem [resolvable:$true] %s370_s30 }
  0x3c   : > { %p7655_p12 = scmp.lt.u32.totalorder %s7648_s24, %s9815_s7 }
  0x3d   : > { %p7651_p8 = pnand %p7649_p3, %p8151_p2 }
  0x3f   : > { %p7652_p10 = pneg %p7651_p8 }
  0x41   : > { %p7657_p1 = pnand %p7655_p12, %p7652_p10 }
  0x43   : > { %7660 = shalt.err (!%p7657_p1)
}
  0x44   : > { %s7661_s14 = scalar_lea.vmem %s371_s30, 16  ;;  %s7668_s17 = scalar_lea.vmem %s371_s30, 32 }
  0x45   : > { %p7662_p4 = scmp.ne.s32.totalorder %s371_s30, %s7661_s14  ;;  %p7669_p7 = scmp.lt.s32.totalorder %s371_s30, %s371_s30 }
  0x46   : > { %p7670_p9 = scmp.lt.s32.totalorder %s7668_s17, %s7661_s14 }
  0x47   : > { %p7664_p5 = pnand %p7662_p4, %p8151_p2 }
  0x48   : > { %p7671_p11 = por %p7670_p9, %p7669_p7 }
  0x49   : > { %p7665_p6 = pneg %p7664_p5 }
  0x4b   : > { %p7672_p13 = pnand %p7671_p11, %p7665_p6 }
  0x4d   : > { %7675 = shalt.err (!%p7672_p13)
}
  0x4e   : > { %7293 = dma.hbm_to_vmem [thread:$0]  (!%p8139_p0), %s9815_s7, 16, %s371_s30, [#allocation18]  }
  0x4f   : > { %s7984_s10 = smov [#allocation11]   ;;  %s7676_s13 = scalar_lea.hbm %s9810_s2, 512 }
  0x50   : > { %s326_s24 = sshll.u32 %s7984_s10, 4  ;;  %p7677_p3 = scmp.ne.s32.totalorder %s9810_s2, %s7676_s13  ;;  %s327_s24 = int_to_ptr.vmem [resolvable:$true] %s326_s24 }
  0x51   : > { %p7683_p12 = scmp.lt.u32.totalorder %s7676_s13, %s9810_s2 }
  0x52   : > { %p7679_p8 = pnand %p7677_p3, %p8151_p2 }
  0x54   : > { %p7680_p10 = pneg %p7679_p8 }
  0x56   : > { %p7685_p1 = pnand %p7683_p12, %p7680_p10 }
  0x58   : > { %7688 = shalt.err (!%p7685_p1)
}
  0x59   : > { %s7689_s30 = scalar_lea.vmem %s327_s24, 512  ;;  %p7697_p7 = scmp.lt.s32.totalorder %s327_s24, %s327_s24 }
  0x5a   : > { %p7690_p4 = scmp.ne.s32.totalorder %s327_s24, %s7689_s30  ;;  %p7698_p9 = scmp.lt.s32.totalorder %s7689_s30, %s7689_s30 }
  0x5c   : > { %p7692_p5 = pnand %p7690_p4, %p8151_p2  ;;  %p7699_p11 = por %p7698_p9, %p7697_p7 }
  0x5e   : > { %p7693_p6 = pneg %p7692_p5 }
  0x60   : > { %p7700_p13 = pnand %p7699_p11, %p7693_p6 }
  0x62   : > { %7703 = shalt.err (!%p7700_p13)
}
  0x63   : > { %s7985_s14 = smov 128   ;;  %s7986_s17 = smov 8  }
  0x64   : > { %7284 = dma.hbm_to_vmem [thread:$0]  (!%p8139_p0), %s9810_s2, 512, %s327_s24, [#allocation12], %s7985_s14, %s7985_s14, %s7986_s17  }
  0x65   : > { %s7987_s10 = smov [#allocation16]   ;;  %s7988_s23 = smov [#allocation19]  }
  0x66   : > { %s359_s12 = sshll.u32 %s7987_s10, 4  ;;  %s380_s13 = sshll.u32 %s7988_s23, 4  ;;  %s360_s12 = int_to_ptr.vmem [resolvable:$true] %s359_s12  ;;  %s8206_s13 = int_to_ptr.vmem [resolvable:$true] %s380_s13 }
  0x67   : > { %s7704_s25 = scalar_lea.hbm %s9814_s6, 32 }
  0x68   : > { %p7705_p3 = scmp.ne.s32.totalorder %s9814_s6, %s7704_s25  ;;  %p7711_p12 = scmp.lt.u32.totalorder %s7704_s25, %s9814_s6 }
  0x6a   : > { %p7707_p8 = pnand %p7705_p3, %p8151_p2 }
  0x6c   : > { %p7708_p10 = pneg %p7707_p8 }
  0x6e   : > { %p7713_p1 = pnand %p7711_p12, %p7708_p10 }
  0x70   : > { %7716 = shalt.err (!%p7713_p1)
}
  0x71   : > { %s7717_s19 = scalar_lea.vmem %s360_s12, 32  ;;  %p7725_p7 = scmp.lt.s32.totalorder %s360_s12, %s360_s12 }
  0x72   : > { %p7718_p4 = scmp.ne.s32.totalorder %s360_s12, %s7717_s19  ;;  %p7726_p9 = scmp.lt.s32.totalorder %s7717_s19, %s7717_s19 }
  0x74   : > { %p7720_p5 = pnand %p7718_p4, %p8151_p2  ;;  %p7727_p11 = por %p7726_p9, %p7725_p7 }
  0x76   : > { %p7721_p6 = pneg %p7720_p5 }
  0x78   : > { %p7728_p13 = pnand %p7727_p11, %p7721_p6 }
  0x7a   : > { %7731 = shalt.err (!%p7728_p13)
}
  0x7b   : > { %7290 = dma.hbm_to_vmem [thread:$0]  (!%p8139_p0), %s9814_s6, 32, %s360_s12, [#allocation15]  }
  0x7c   : > { %s7732_s25 = scalar_lea.hbm %s9816_s8, 1024 }
  0x7d   : > { %p7733_p3 = scmp.ne.s32.totalorder %s9816_s8, %s7732_s25  ;;  %p7739_p12 = scmp.lt.u32.totalorder %s7732_s25, %s9816_s8 }
  0x7f   : > { %p7735_p8 = pnand %p7733_p3, %p8151_p2 }
  0x81   : > { %p7736_p10 = pneg %p7735_p8 }
  0x83   : > { %p7741_p1 = pnand %p7739_p12, %p7736_p10 }
  0x85   : > { %7744 = shalt.err (!%p7741_p1)
}
  0x86   : > { %s7745_s12 = scalar_lea.vmem %s8206_s13, 1024  ;;  %p7753_p7 = scmp.lt.s32.totalorder %s8206_s13, %s8206_s13 }
  0x87   : > { %p7746_p4 = scmp.ne.s32.totalorder %s8206_s13, %s7745_s12  ;;  %p7754_p9 = scmp.lt.s32.totalorder %s7745_s12, %s7745_s12 }
  0x89   : > { %p7748_p5 = pnand %p7746_p4, %p8151_p2  ;;  %p7755_p11 = por %p7754_p9, %p7753_p7 }
  0x8b   : > { %p7749_p6 = pneg %p7748_p5 }
  0x8d   : > { %p7756_p13 = pnand %p7755_p11, %p7749_p6 }
  0x8f   : > { %7759 = shalt.err (!%p7756_p13)
}
  0x90   : > { %7296 = dma.hbm_to_vmem [thread:$0]  (!%p8139_p0), %s9816_s8, 1024, %s8206_s13, [#allocation18], %s7985_s14, %s7985_s14, %s7986_s17  }
  0x91   : > { %s7989_s23 = smov [#allocation20]   ;;  %s7760_s28 = scalar_lea.hbm %s9817_s9, 16 }
  0x92   : > { %s394_s26 = sshll.u32 %s7989_s23, 4  ;;  %p7761_p3 = scmp.ne.s32.totalorder %s9817_s9, %s7760_s28  ;;  %s395_s26 = int_to_ptr.vmem [resolvable:$true] %s394_s26 }
  0x93   : > { %p7767_p12 = scmp.lt.u32.totalorder %s7760_s28, %s9817_s9 }
  0x94   : > { %p7763_p8 = pnand %p7761_p3, %p8151_p2 }
  0x96   : > { %p7764_p10 = pneg %p7763_p8 }
  0x98   : > { %p7769_p1 = pnand %p7767_p12, %p7764_p10 }
  0x9a   : > { %7772 = shalt.err (!%p7769_p1)
}
  0x9b   : > { %s7773_s14 = scalar_lea.vmem %s395_s26, 16  ;;  %s7780_s17 = scalar_lea.vmem %s395_s26, 32 }
  0x9c   : > { %p7774_p4 = scmp.ne.s32.totalorder %s395_s26, %s7773_s14  ;;  %p7781_p7 = scmp.lt.s32.totalorder %s395_s26, %s395_s26 }
  0x9d   : > { %p7782_p9 = scmp.lt.s32.totalorder %s7780_s17, %s7773_s14 }
  0x9e   : > { %p7776_p5 = pnand %p7774_p4, %p8151_p2 }
  0x9f   : > { %p7783_p11 = por %p7782_p9, %p7781_p7 }
  0xa0   : > { %p7777_p6 = pneg %p7776_p5 }
  0xa2   : > { %p7784_p13 = pnand %p7783_p11, %p7777_p6 }
  0xa4   : > { %7787 = shalt.err (!%p7784_p13)
}
  0xa5   : > { %7299 = dma.hbm_to_vmem [thread:$0]  (!%p8139_p0), %s9817_s9, 16, %s395_s26, [#allocation21]  }
  0xa6   : > { %p9860_p3 = scmp.ne.s32.totalorder %s9855_s16, 0 }
  0xa8   : > { %423 = sbr.rel (%p9860_p3) target bundleno = 1899 (0x76b), region = 64 }
  0xaf   : > { %p9861_p8 = scmp.ne.s32.totalorder %s9856_s27, 0 }
  0xb1   : > { %7889 = dma.done.wait (%p9861_p8), [#allocation12], 512  }
  0xb2   : > { %7891 = vsyncadd (%p9861_p8), [#allocation12], 4294966784 }
  0xb3   : > { %7893 = dma.done.wait (%p9861_p8), [#allocation15], 3104  }
  0xb4   : > { %7895 = vsyncadd (%p9861_p8), [#allocation15], 4294964192 }
  0xb5   : > { %7897 = dma.done.wait (%p9861_p8), [#allocation18], 1040  }
  0xb6   : > { %7899 = vsyncadd (%p9861_p8), [#allocation18], 4294966256 }
  0xb7   : > { %7901 = dma.done.wait (%p9861_p8), [#allocation21], 16  }
  0xb8   : > { %7903 = vsyncadd (%p9861_p8), [#allocation21], 4294967280  ;;  %s484_s22 = sand.u32 1, %s7914_s18   ;;  %s8290_s16 = sshll.u32 %s7922_s20, 1 }
  0xb9   : > { %s6089_s29 = sshll.u32 %s484_s22, 4  ;;  %p488_p0 = scmp.lt.s32.totalorder %s7926_s21, 1 }
  0xba   : > { %p490_p2 = scmp.lt.s32.totalorder %s8290_s16, 3  ;;  %s8303_s11 = scalar_lea.vmem [#allocation22], %s6089_s29 }
  0xbb   : > { %s489_s10 = scalar_select %p488_p0, %s7926_s21, 1 }
  0xbc   : > { %s491_s23 = scalar_select %p490_p2, %s8290_s16, 3 }
  0xbd   : > { %s6091_s26 = sshll.u32 %s489_s10, 2  ;;  %p6093_p10 = scmp.ne.s32.totalorder %s7922_s20, 0 }
  0xbe   : > { %s493_s15 = sadd.s32 %s6091_s26, %s491_s23  ;;  %vm502_vm0 = vcmask (!%p6093_p10), 523264   ;;  %vm511_vm1 = vcmask (!%p6093_p10), 518144   ;;  %v7990_v0 = vmov (!%p6093_p10), 0.0  }
  0xbf   : > { %s6092_s27 = sshll.u32 %s493_s15, 3  ;;  %501 = sbr.rel (%p6093_p10) target bundleno = 198 (0xc6), region = 92  ;;  %503 = vst.msk [vmem:[#allocation2] sm:$0xff] (!%p6093_p10), %vm502_vm0, %v7990_v0  ;;  %504 = vst.msk [vmem:[#allocation2 + $0x8] sm:$0xff] (!%p6093_p10), %vm502_vm0, %v7990_v0 }
  0xc0   : > { %s8301_s30 = scalar_lea.vmem %s9808_s0, %s6092_s27  ;;  %505 = vst.msk [vmem:[#allocation2 + $0x10] sm:$0xff] (!%p6093_p10), %vm502_vm0, %v7990_v0  ;;  %506 = vst.msk [vmem:[#allocation2 + $0x18] sm:$0xff] (!%p6093_p10), %vm502_vm0, %v7990_v0 }
  0xc1   : > { %507 = vst.msk [vmem:[#allocation2 + $0x20] sm:$0xff] (!%p6093_p10), %vm502_vm0, %v7990_v0  ;;  %508 = vst.msk [vmem:[#allocation2 + $0x28] sm:$0xff] (!%p6093_p10), %vm502_vm0, %v7990_v0 }
  0xc2   : > { %509 = vst.msk [vmem:[#allocation2 + $0x30] sm:$0xff] (!%p6093_p10), %vm502_vm0, %v7990_v0  ;;  %510 = vst.msk [vmem:[#allocation2 + $0x38] sm:$0xff] (!%p6093_p10), %vm502_vm0, %v7990_v0 }
  0xc3   : > { %512 = vst.msk [vmem:[#allocation3] sm:$0x7] (!%p6093_p10), %vm511_vm1, %v7990_v0 }
  0xc6 PF: > { %v515_v1 = vld [vmem:[%s9809_s1] sm:$0xff]  ;;  %v516_v2 = vld [vmem:[%s9809_s1 + $0x8] sm:$0xff]  ;;  %v517_v3 = vld [vmem:[%s9809_s1 + $0x10] sm:$0xff]  ;;  %vm519_vm2 = vcmask 261120   ;;  %vm1587_vm3 = vcmask 523269   ;;  %vm1591_vm4 = vcmask 1042432  }
  0xc7   : > { %v527_v4 = vand.u32 4294901760, %v515_v1  ;;  %v530_v5 = vand.u32 4294901760, %v516_v2  ;;  %v518_v6 = vld [vmem:[%s9809_s1 + $0x18] sm:$0xff]  ;;  %v533_v7 = vand.u32 4294901760, %v517_v3  ;;  %v513_v8 = vld [vmem:[%s8301_s30] sm:$0xff]  ;;  %v514_v9 = vld [vmem:[%s8301_s30 + $0x8] sm:$0xff] }
  0xc8   : > { %v536_v10 = vand.u32 4294901760, %v518_v6  ;;  %v521_v11 = vsel %vm519_vm2, %v513_v8, 0  ;;  %v524_v12 = vsel %vm519_vm2, %v514_v9, 0  ;;  %v1054_v24 = vld [vmem:[#allocation11] sm:$0xff]  ;;  %v1055_v31 = vld [vmem:[#allocation11 + $0x8] sm:$0xff]  ;;  %v1056_v36 = vld [vmem:[#allocation11 + $0x10] sm:$0xff] }
  0xc9   : > { %v8322_v13 = vpack.c.bf16 %v530_v5, %v527_v4  ;;  %v8324_v14 = vand.u32 4294901760, %v521_v11  ;;  %v8326_v15 = vand.u32 4294901760, %v524_v12  ;;  %v8328_v16 = vsub.f32 %v515_v1, %v527_v4  ;;  %v1057_v37 = vld [vmem:[#allocation11 + $0x18] sm:$0xff]  ;;  %s8847_s27 = smov 0  }
  0xca   : > { %v8330_v17 = vpack.c.bf16 %v536_v10, %v533_v7  ;;  %v8332_v18 = vsub.f32 %v516_v2, %v530_v5  ;;  %v8334_v19 = vsub.f32 %v517_v3, %v533_v7  ;;  %v8336_v20 = vsub.f32 %v518_v6, %v536_v10 }
  0xcb   : > { %6798 = vmatprep.subr.bf16.mxu0 %v8322_v13  ;;  %v8340_v21 = vsub.f32 %v521_v11, %v8324_v14  ;;  %v8343_v22 = vsub.f32 %v524_v12, %v8326_v15  ;;  %v618_v23 = vand.u32 4294901760, %v8328_v16  ;;  %v1059_v35 = vand.u32 4294901760, %v1054_v24 }
  0xcc   : > { %6800 = vmatpush3.bf16.msra.mxu0 %v8322_v13  ;;  %v625_v25 = vand.u32 4294901760, %v8332_v18  ;;  %v632_v26 = vand.u32 4294901760, %v8334_v19  ;;  %v639_v27 = vand.u32 4294901760, %v8336_v20  ;;  %v1062_v44 = vand.u32 4294901760, %v1055_v31 }
  0xcd   : > { %6802 = vmatprep.subr.bf16.mxu0 %v8330_v17  ;;  %v8352_v28 = vand.u32 4294901760, %v8340_v21  ;;  %v8355_v29 = vand.u32 4294901760, %v8343_v22  ;;  %v619_v30 = vsub.f32 %v8328_v16, %v618_v23  ;;  %v1065_v47 = vand.u32 4294901760, %v1056_v36 }
  0xce   : > { %v626_v32 = vsub.f32 %v8332_v18, %v625_v25  ;;  %v633_v33 = vsub.f32 %v8334_v19, %v632_v26  ;;  %v640_v34 = vsub.f32 %v8336_v20, %v639_v27  ;;  %v1068_v48 = vand.u32 4294901760, %v1057_v37 }
  0xcf   : > { %v598_v38 = vsub.f32 %v8340_v21, %v8352_v28  ;;  %v608_v39 = vsub.f32 %v8343_v22, %v8355_v29  ;;  %v620_v40 = vand.u32 4294901760, %v619_v30  ;;  %v8374_v51 = vpack.c.bf16 %v1062_v44, %v1059_v35 }
  0xd0   : > { %6804 = vmatpush3.bf16.msra.mxu0 %v8330_v17  ;;  %v627_v41 = vand.u32 4294901760, %v626_v32  ;;  %v634_v42 = vand.u32 4294901760, %v633_v33  ;;  %v641_v43 = vand.u32 4294901760, %v640_v34  ;;  %v8376_v52 = vsub.f32 %v1054_v24, %v1059_v35  ;;  %v1694_v32 = vld [vmem:[#allocation14 + $0x30] sm:$0xff]  ;;  %v1697_v33 = vld [vmem:[#allocation14 + $0x48] sm:$0xff] }
  0xd1   : > { %v599_v45 = vand.u32 4294901760, %v598_v38  ;;  %v609_v46 = vand.u32 4294901760, %v608_v39  ;;  %v8378_v53 = vsub.f32 %v1055_v31, %v1062_v44  ;;  %v8380_v54 = vsub.f32 %v1056_v36, %v1065_v47  ;;  %6846 = vmatprep.subr.bf16.mxu1 %v8374_v51 }
  0xd2   : > { %v6805_v49 = vpack.c.bf16 %v627_v41, %v620_v40  ;;  %v6809_v50 = vpack.c.bf16 %v641_v43, %v634_v42  ;;  %v8382_v55 = vpack.c.bf16 %v1068_v48, %v1065_v47  ;;  %v1150_v56 = vand.u32 4294901760, %v8376_v52  ;;  %6848 = vmatpush3.bf16.msra.mxu1 %v8374_v51  ;;  %v1701_v41 = vld [vmem:[#allocation14 + $0x68] sm:$0xff]  ;;  %v1704_v42 = vld [vmem:[#allocation14 + $0x80] sm:$0xff] }
  0xd3   : > { %6415 = vmatprep.mubr.f32.mxu0 %v599_v45  ;;  %6481 = vmatprep.mubr.f32.mxu1 %v599_v45  ;;  %v8385_v57 = vsub.f32 %v1057_v37, %v1068_v48  ;;  %v1157_v58 = vand.u32 4294901760, %v8378_v53  ;;  %v1164_v59 = vand.u32 4294901760, %v8380_v54  ;;  %v6813_v60 = vpack.c.bf16 %v8332_v18, %v8328_v16  ;;  %v1700_v43 = vld [vmem:[#allocation14 + $0x60] sm:$0xff]  ;;  %v1703_v48 = vld [vmem:[#allocation14 + $0x78] sm:$0xff] }
  0xd4   : > { %6416 = vmatmul.mubr.f32.vlgmr.msra.gmra.mrb[0].mxu0 %v609_v46  ;;  %6806 = vmatprep.subr.bf16.mxu0 %v6805_v49  ;;  %v1151_v61 = vsub.f32 %v8376_v52, %v1150_v56  ;;  %v6817_v5 = vpack.c.bf16 %v8336_v20, %v8334_v19  ;;  %v6861_v9 = vpack.c.bf16 %v8378_v53, %v8376_v52  ;;  %v1728_v35 = vand.u32 4294901760, %v1694_v32 }
  0xd5   : > { %6808 = vmatpush3.bf16.msra.mxu0 %v6805_v49  ;;  %6426 = vmatprep.mubr.f32.mxu0 %v8324_v14  ;;  %v1171_v62 = vand.u32 4294901760, %v8385_v57  ;;  %v1158_v63 = vsub.f32 %v8378_v53, %v1157_v58  ;;  %v1165_v0 = vsub.f32 %v8380_v54, %v1164_v59  ;;  %v6865_v10 = vpack.c.bf16 %v8385_v57, %v8380_v54  ;;  %v1707_v49 = vld [vmem:[#allocation14 + $0x98] sm:$0xff] }
  0xd6   : > { %6810 = vmatprep.subr.bf16.mxu0 %v6809_v50  ;;  %6850 = vmatprep.subr.bf16.mxu1 %v8382_v55  ;;  %v1152_v1 = vand.u32 4294901760, %v1151_v61  ;;  %v6829_v11 = vpack.c.bf16 %v625_v25, %v618_v23  ;;  %v6833_v12 = vpack.c.bf16 %v639_v27, %v632_v26  ;;  %v6877_v16 = vpack.c.bf16 %v1157_v58, %v1150_v56  ;;  %v1709_v56 = vld [vmem:[#allocation14 + $0xa8] sm:$0xff] }
  0xd7   : > { %v1172_v2 = vsub.f32 %v8385_v57, %v1171_v62  ;;  %v1159_v3 = vand.u32 4294901760, %v1158_v63  ;;  %v1166_v4 = vand.u32 4294901760, %v1165_v0  ;;  %6852 = vmatpush3.bf16.msra.mxu1 %v8382_v55  ;;  %v6881_v18 = vpack.c.bf16 %v1171_v62, %v1164_v59 }
  0xd8   : > { %v1732_v36 = vand.u32 4294901760, %v1697_v33  ;;  %v8478_v44 = vsub.f32 %v1694_v32, %v1728_v35  ;;  %v1738_v47 = vand.u32 4294901760, %v1704_v42  ;;  %v1736_v52 = vand.u32 4294901760, %v1700_v43 }
  0xd9   : > { %6812 = vmatpush3.bf16.msra.mxu0 %v6809_v50  ;;  %v1173_v6 = vand.u32 4294901760, %v1172_v2  ;;  %v6853_v7 = vpack.c.bf16 %v1159_v3, %v1152_v1  ;;  %v1710_v50 = vld [vmem:[#allocation14 + $0xb0] sm:$0xff]  ;;  %v1740_v53 = vand.u32 4294901760, %v1703_v48  ;;  %v1742_v63 = vand.u32 4294901760, %v1707_v49 }
  0xda   : > { %6814 = vmatprep.subr.bf16.mxu0 %v6813_v60  ;;  %6482 = vmatmul.mubr.f32.vlgmr.msra.gmra.mrb[0].mxu1 %v609_v46  ;;  %v8480_v45 = vsub.f32 %v1697_v33, %v1732_v36  ;;  %v1734_v46 = vand.u32 4294901760, %v1701_v41  ;;  %v8492_v59 = vsub.f32 %v1704_v42, %v1738_v47  ;;  %v8496_v61 = vsub.f32 %v1700_v43, %v1736_v52 }
  0xdb   : > { %v6857_v8 = vpack.c.bf16 %v1173_v6, %v1166_v4  ;;  %6854 = vmatprep.subr.bf16.mxu1 %v6853_v7  ;;  %6492 = vmatprep.mubr.f32.mxu1 %v8324_v14  ;;  %v8498_v62 = vsub.f32 %v1703_v48, %v1740_v53  ;;  %v1746_v0 = vand.u32 4294901760, %v1710_v50  ;;  %v1748_v3 = vand.u32 4294901760, %v1709_v56 }
  0xdc   : > { %6427 = vmatmul.mubr.f32.vlgmr.msra.gmra.mrb[0].mxu0 %v8326_v15  ;;  %6856 = vmatpush3.bf16.msra.mxu1 %v6853_v7  ;;  %v6931_v57 = vpack.c.bf16 %v8480_v45, %v8478_v44  ;;  %v8490_v58 = vsub.f32 %v1701_v41, %v1734_v46  ;;  %v8503_v4 = vpack.c.bf16 %v1738_v47, %v1734_v46  ;;  %v1883_v47 = vand.u32 4294901760, %v8492_v59 }
  0xdd   : > { %6816 = vmatpush3.bf16.msra.mxu0 %v6813_v60  ;;  %6437 = vmatprep.mubr.f32.mxu0 %v8340_v21  ;;  %v8494_v60 = vpack.c.bf16 %v1732_v36, %v1728_v35  ;;  %v8507_v6 = vsub.f32 %v1707_v49, %v1742_v63  ;;  %v8509_v7 = vsub.f32 %v1710_v50, %v1746_v0  ;;  %v1877_v50 = vand.u32 4294901760, %v8496_v61 }
  0xde   : > { %6818 = vmatprep.subr.bf16.mxu0 %v6817_v5  ;;  %6858 = vmatprep.subr.bf16.mxu1 %v6857_v8  ;;  %v6933_v1 = vpack.c.bf16 %v8492_v59, %v8490_v58  ;;  %v1871_v46 = vand.u32 4294901760, %v8490_v58  ;;  %vm1625_vm5 = vcmask 1046528   ;;  %vm1645_vm6 = vcmask 1045504  }
  0xdf   : > { %vm1665_vm7 = vcmask 1044480   ;;  %vm1685_vm8 = vcmask 523264   ;;  %vm3013_vm9 = vcmask 1041408   ;;  %vm3006_vm10 = vcmask 15360  }
  0xe0   : > { %6860 = vmatpush3.bf16.msra.mxu1 %v6857_v8 }
  0xe1   : > { %6820 = vmatpush3.bf16.msra.mxu0 %v6817_v5  ;;  %6862 = vmatprep.subr.bf16.mxu1 %v6861_v9  ;;  %v6935_v5 = vpack.c.bf16 %v8498_v62, %v8496_v61 }
  0xe2   : > { %6822 = vmatprep.subr.bf16.mxu0 %v8322_v13 }
  0xe3   : > { %6493 = vmatmul.mubr.f32.vlgmr.msra.gmra.mrb[0].mxu1 %v8326_v15 }
  0xe4   : > { %6438 = vmatmul.mubr.f32.vlgmr.msra.gmra.mrb[0].mxu0 %v8343_v22  ;;  %6864 = vmatpush3.bf16.msra.mxu1 %v6861_v9  ;;  %v8514_v9 = vsub.f32 %v1709_v56, %v1748_v3 }
  0xe5   : > { %6824 = vmatpush3.bf16.msra.mxu0 %v8322_v13  ;;  %6448 = vmatprep.mubr.f32.mxu0 %v8352_v28 }
  0xe6   : > { %6826 = vmatprep.subr.bf16.mxu0 %v8330_v17  ;;  %6503 = vmatprep.mubr.f32.mxu1 %v8340_v21  ;;  %v1688_v21 = vld [vmem:[#allocation14] sm:$0xff] }
  0xe7   : > { %6866 = vmatprep.subr.bf16.mxu1 %v6865_v10  ;;  %v1720_v23 = vand.u32 4294901760, %v1688_v21 }
  0xe8   : > { %6868 = vmatpush3.bf16.msra.mxu1 %v6865_v10  ;;  %v8516_v10 = vpack.c.bf16 %v1740_v53, %v1736_v52  ;;  %v1878_v52 = vsub.f32 %v8496_v61, %v1877_v50 }
  0xe9   : > { %6828 = vmatpush3.bf16.msra.mxu0 %v8330_v17  ;;  %6870 = vmatprep.subr.bf16.mxu1 %v8374_v51  ;;  %v8462_v27 = vsub.f32 %v1688_v21, %v1720_v23 }
  0xea   : > { %6830 = vmatprep.subr.bf16.mxu0 %v6829_v11 }
  0xeb   : > { %6504 = vmatmul.mubr.f32.vlgmr.msra.gmra.mrb[0].mxu1 %v8343_v22  ;;  %v1691_v22 = vld [vmem:[#allocation14 + $0x18] sm:$0xff] }
  0xec   : > { %6449 = vmatmul.mubr.f32.vlgmr.msra.gmra.mrb[0].mxu0 %v8355_v29  ;;  %6872 = vmatpush3.bf16.msra.mxu1 %v8374_v51  ;;  %v1724_v24 = vand.u32 4294901760, %v1691_v22 }
  0xed   : > { %6832 = vmatpush3.bf16.msra.mxu0 %v6829_v11  ;;  %6459 = vmatprep.mubr.f32.mxu0 %v8324_v14  ;;  %v6937_v11 = vpack.c.bf16 %v8509_v7, %v8507_v6 }
  0xee   : > { %6834 = vmatprep.subr.bf16.mxu0 %v6833_v12  ;;  %6514 = vmatprep.mubr.f32.mxu1 %v8352_v28  ;;  %v1695_v28 = vld [vmem:[#allocation14 + $0x38] sm:$0xff]  ;;  %v8476_v40 = vpack.c.bf16 %v1724_v24, %v1720_v23 }
  0xef   : > { %6874 = vmatprep.subr.bf16.mxu1 %v8382_v55  ;;  %v1726_v30 = vand.u32 4294901760, %v1695_v28 }
  0xf0   : > { %6876 = vmatpush3.bf16.msra.mxu1 %v8382_v55 }
  0xf1   : > { %6836 = vmatpush3.bf16.msra.mxu0 %v6833_v12  ;;  %6878 = vmatprep.subr.bf16.mxu1 %v6877_v16  ;;  %v8470_v37 = vsub.f32 %v1695_v28, %v1726_v30  ;;  %v7991_v12 = vmov 0.0  }
  0xf2   : > { %6838 = vmatprep.subr.bf16.mxu0 %v8322_v13 }
  0xf3   : > { %6515 = vmatmul.mubr.f32.vlgmr.msra.gmra.mrb[0].mxu1 %v8355_v29  ;;  %v1698_v29 = vld [vmem:[#allocation14 + $0x50] sm:$0xff] }
  0xf4   : > { %6460 = vmatmul.mubr.f32.vlgmr.msra.gmra.mrb[0].mxu0 %v8326_v15  ;;  %6880 = vmatpush3.bf16.msra.mxu1 %v6877_v16  ;;  %v1730_v31 = vand.u32 4294901760, %v1698_v29 }
  0xf5   : > { %6840 = vmatpush3.bf16.msra.mxu0 %v8322_v13  ;;  %6470 = vmatprep.mubr.f32.mxu0 %v8324_v14  ;;  %v1689_v13 = vld [vmem:[#allocation14 + $0x8] sm:$0xff] }
  0xf6   : > { %6842 = vmatprep.subr.bf16.mxu0 %v8330_v17  ;;  %6525 = vmatprep.mubr.f32.mxu1 %v8324_v14  ;;  %v1718_v19 = vand.u32 4294901760, %v1689_v13  ;;  %v8472_v38 = vsub.f32 %v1698_v29, %v1730_v31  ;;  %v8485_v54 = vpack.c.bf16 %v1730_v31, %v1726_v30  ;;  %v1847_v30 = vand.u32 4294901760, %v8470_v37 }
  0xf7   : > { %6882 = vmatprep.subr.bf16.mxu1 %v6881_v18 }
  0xf8   : > { %6884 = vmatpush3.bf16.msra.mxu1 %v6881_v18  ;;  %v8458_v25 = vsub.f32 %v1689_v13, %v1718_v19  ;;  %v1859_v31 = vand.u32 4294901760, %v8472_v38 }
  0xf9   : > { %6844 = vmatpush3.bf16.msra.mxu0 %v8330_v17  ;;  %6886 = vmatprep.subr.bf16.mxu1 %v8374_v51  ;;  %v1692_v17 = vld [vmem:[#allocation14 + $0x20] sm:$0xff] }
  0xfa   : > { %v1722_v20 = vand.u32 4294901760, %v1692_v17  ;;  %v1823_v18 = vand.u32 4294901760, %v8458_v25 }
  0xfb   : > { %6526 = vmatmul.mubr.f32.vlgmr.msra.gmra.mrb[0].mxu1 %v8326_v15 }
  0xfc   : > { %6471 = vmatmul.mubr.f32.vlgmr.msra.gmra.mrb[0].mxu0 %v8326_v15  ;;  %6888 = vmatpush3.bf16.msra.mxu1 %v8374_v51  ;;  %v8460_v26 = vsub.f32 %v1692_v17, %v1722_v20  ;;  %v8474_v39 = vpack.c.bf16 %v1722_v20, %v1718_v19  ;;  %v6929_v51 = vpack.c.bf16 %v8472_v38, %v8470_v37  ;;  %v1829_v17 = vand.u32 4294901760, %v8462_v27 }
  0xfd   : > { %6536 = vmatprep.mubr.f32.mxu1 %v8324_v14  ;;  %6890 = vmatprep.subr.bf16.mxu1 %v8382_v55  ;;  %v8464_v14 = vsub.f32 %v1691_v22, %v1724_v24  ;;  %v8531_v20 = vpack.c.bf16 %v1746_v0, %v1742_v63  ;;  %v1824_v22 = vsub.f32 %v8458_v25, %v1823_v18  ;;  %v1907_v63 = vand.u32 4294901760, %v8509_v7 }
  0xfe   : > { %2076 = vmatprep.mubr.f32.mxu0 %v7991_v12  ;;  %v1835_v13 = vand.u32 4294901760, %v8460_v26  ;;  %v1830_v24 = vsub.f32 %v8462_v27, %v1829_v17  ;;  %v1879_v0 = vand.u32 4294901760, %v1878_v52 }
  0xff   : > { %v6927_v34 = vpack.c.bf16 %v8464_v14, %v8462_v27  ;;  %v1841_v19 = vand.u32 4294901760, %v8464_v14  ;;  %v1825_v29 = vand.u32 4294901760, %v1824_v22  ;;  %v1848_v27 = vsub.f32 %v8470_v37, %v1847_v30 }
 0x100   : > { %6892 = vmatpush3.bf16.msra.mxu1 %v8382_v55  ;;  %v1706_v55 = vld [vmem:[#allocation14 + $0x90] sm:$0xff]  ;;  %v1836_v23 = vsub.f32 %v8460_v26, %v1835_v13  ;;  %v1831_v32 = vand.u32 4294901760, %v1830_v24  ;;  %v1889_v37 = vand.u32 4294901760, %v8498_v62  ;;  %v1908_v61 = vsub.f32 %v8509_v7, %v1907_v63 }
 0x101   : > { %6894 = vmatprep.subr.bf16.mxu1 %v8474_v39  ;;  %v1744_v2 = vand.u32 4294901760, %v1706_v55  ;;  %v1842_v28 = vsub.f32 %v8464_v14, %v1841_v19  ;;  %v1860_v14 = vsub.f32 %v8472_v38, %v1859_v31  ;;  %v1849_v42 = vand.u32 4294901760, %v1848_v27 }
 0x102   : > { %v1890_v53 = vsub.f32 %v8498_v62, %v1889_v37  ;;  %v8577_v24 = vpack.c.bf16 %v1841_v19, %v1829_v17 }
 0x103   : > { %6537 = vmatmul.mubr.f32.vlgmr.msra.gmra.mrb[0].mxu1 %v8326_v15  ;;  %v6925_v15 = vpack.c.bf16 %v8460_v26, %v8458_v25  ;;  %v8512_v8 = vsub.f32 %v1706_v55, %v1744_v2  ;;  %v8533_v21 = vpack.c.bf16 %v1748_v3, %v1744_v2  ;;  %v1843_v33 = vand.u32 4294901760, %v1842_v28 }
 0x104   : > { %6896 = vmatpush1.bf16.msra.mxu1 %v8476_v40  ;;  %1798 = vmatprep.mubr.f32.mxu1 %v7991_v12  ;;  %v1853_v25 = vand.u32 4294901760, %v8478_v44  ;;  %v1865_v26 = vand.u32 4294901760, %v8480_v45  ;;  %v1861_v43 = vand.u32 4294901760, %v1860_v14 }
 0x105   : > { %6926 = vmatprep.subr.bf16.mxu0 %v6925_v15  ;;  %6898 = vmatprep.subr.bf16.mxu1 %v8485_v54  ;;  %v6939_v16 = vpack.c.bf16 %v8514_v9, %v8512_v8  ;;  %v1837_v15 = vand.u32 4294901760, %v1836_v23  ;;  %v8547_v35 = vpack.c.bf16 %v1843_v33, %v1831_v32  ;;  %v1901_v2 = vand.u32 4294901760, %v8512_v8 }
 0x106   : > { %6928 = vmatpush1.bf16.msra.mxu0 %v6927_v34  ;;  %v1854_v36 = vsub.f32 %v8478_v44, %v1853_v25  ;;  %v1866_v41 = vsub.f32 %v8480_v45, %v1865_v26  ;;  %v8555_v38 = vpack.c.bf16 %v1861_v43, %v1849_v42  ;;  %v1884_v44 = vsub.f32 %v8492_v59, %v1883_v47 }
 0x107   : > { %6930 = vmatprep.subr.bf16.mxu0 %v6929_v51  ;;  %v6909_v34 = vpack.c.bf16 %v1837_v15, %v1825_v29  ;;  %v1872_v51 = vsub.f32 %v8490_v58, %v1871_v46  ;;  %v1913_v58 = vand.u32 4294901760, %v8514_v9  ;;  %v1902_v62 = vsub.f32 %v8512_v8, %v1901_v2 }
 0x108   : > { %6900 = vmatpush1.bf16.msra.mxu1 %v8494_v60  ;;  %v1855_v48 = vand.u32 4294901760, %v1854_v36  ;;  %v1867_v49 = vand.u32 4294901760, %v1866_v41  ;;  %v1885_v56 = vand.u32 4294901760, %v1884_v44  ;;  %v1909_v23 = vand.u32 4294901760, %v1908_v61 }
 0x109   : > { %6902 = vmatprep.subr.bf16.mxu1 %v8503_v4  ;;  %v1873_v55 = vand.u32 4294901760, %v1872_v51  ;;  %v1903_v28 = vand.u32 4294901760, %v1902_v62  ;;  %v8585_v7 = vpack.c.bf16 %v1865_v26, %v1853_v25  ;;  %v8587_v33 = vpack.c.bf16 %v1883_v47, %v1871_v46 }
 0x10a   : > { %6932 = vmatpush1.bf16.msra.mxu0 %v6931_v57  ;;  %v8559_v45 = vpack.c.bf16 %v1867_v49, %v1855_v48  ;;  %v1895_v57 = vand.u32 4294901760, %v8507_v6  ;;  %v8589_v8 = vpack.c.bf16 %v1889_v37, %v1877_v50  ;;  %v6094_v37 = vld [vmem:[%s9812_s4] ss:$0 sm:$0xff] }
 0x10b   : > { %6934 = vmatprep.subr.bf16.mxu0 %v6933_v1  ;;  %v1891_v1 = vand.u32 4294901760, %v1890_v53  ;;  %v8567_v3 = vpack.c.bf16 %v1885_v56, %v1873_v55 }
 0x10c   : > { %6904 = vmatpush1.bf16.msra.mxu1 %v8516_v10  ;;  %v1896_v59 = vsub.f32 %v8507_v6, %v1895_v57  ;;  %v8583_v6 = vpack.c.bf16 %v1859_v31, %v1847_v30  ;;  %v1599_v30 = vld [vmem:[%s9811_s3] sm:$0xf] }
 0x10d   : > { %6906 = vmatprep.subr.bf16.mxu1 %v8531_v20 }
 0x10e   : > { %6936 = vmatpush1.bf16.msra.mxu0 %v6935_v5  ;;  %v8571_v5 = vpack.c.bf16 %v1891_v1, %v1879_v0  ;;  %v1897_v22 = vand.u32 4294901760, %v1896_v59 }
 0x10f   : > { %6938 = vmatprep.subr.bf16.mxu0 %v6937_v11  ;;  %v1914_v11 = vsub.f32 %v8514_v9, %v1913_v58  ;;  %v8591_v9 = vpack.c.bf16 %v1907_v63, %v1895_v57 }
 0x110   : > { %6908 = vmatpush1.bf16.msra.mxu1 %v8533_v21  ;;  %v8579_v15 = vpack.c.bf16 %v1909_v23, %v1897_v22 }
 0x111   : > { %6910 = vmatprep.subr.bf16.mxu1 %v6909_v34  ;;  %v1915_v29 = vand.u32 4294901760, %v1914_v11  ;;  %v1586_v34 = vld [vmem:[#allocation3] sm:$0x7] }
 0x112   : > { %6940 = vmatpush1.bf16.msra.mxu0 %v6939_v16  ;;  %v8575_v16 = vpack.c.bf16 %v1835_v13, %v1823_v18  ;;  %v8593_v18 = vpack.c.bf16 %v1913_v58, %v1901_v2  ;;  %v1607_v13 = vlaneseq }
 0x113   : > { %6942 = vmatprep.subr.bf16.mxu0 %v8474_v39  ;;  %v8581_v32 = vpack.c.bf16 %v1915_v29, %v1903_v28 }
 0x114   : > { %v8595_v17 = vshrl.u32 %v1607_v13, 7 }
 0x116   : > { %9862 = vst [vmem:[#allocation38_spill] sm:$0xff] %v8595_v17  ;;  %v8598_v19 = vsub.s32 1, %v8595_v17  ;;  %v8604_v31 = vsub.s32 2, %v8595_v17  ;;  %v8607_v25 = vsub.s32 3, %v8595_v17  ;;  %v8610_v26 = vsub.s32 0, %v8595_v17 }
 0x118   : > { %9863 = vst [vmem:[#allocation39_spill] sm:$0xff] %v8598_v19  ;;  %v1618_v27 = vrot.slane %v1599_v30, %v8598_v19  ;;  %v1638_v36 = vrot.slane %v1599_v30, %v8604_v31  ;;  %v1658_v42 = vrot.slane %v1599_v30, %v8607_v25  ;;  %v1610_v46 = vrot.slane %v1599_v30, %v8610_v26 }
 0x1cf   : > { %v6472_v14 = vpop.f32.mrb[0].mxu0 }
 0x1d0   : > { %1588 = vst.msk [vmem:[#allocation3 - $0x5] sm:$0xe0] %vm1587_vm3, %v6472_v14  ;;  %v1593_v41 = vrot.slane %v6472_v14, 5  ;;  %v1044_v43 = vpop.f32.mrb[1].mxu0 }
 0x1d1   : > { %v1592_v47 = vrot.slane %v1044_v43, 5 }
 0x1d2   : > { %v1621_v48 = vmul.f32 %v1618_v27, %v1593_v41  ;;  %v1641_v44 = vmul.f32 %v1638_v36, %v1593_v41  ;;  %v1661_v52 = vmul.f32 %v1658_v42, %v1593_v41 }
 0x1d3   : > { %v1594_v49 = vsel %vm1591_vm4, %v1592_v47, %v1593_v41  ;;  %v1598_v50 = vsel %vm1591_vm4, %v1586_v34, %v1592_v47 }
 0x1d4   : > { %v1629_v51 = vrot.slane %v1621_v48, 1  ;;  %v1611_v53 = vmul.f32 %v1610_v46, %v1598_v50  ;;  %v1612_v55 = vmul.f32 %v1610_v46, %v1594_v49  ;;  %v1619_v56 = vmul.f32 %v1618_v27, %v1598_v50 }
 0x1d5   : > { %v1620_v57 = vmul.f32 %v1618_v27, %v1594_v49  ;;  %v1639_v63 = vmul.f32 %v1638_v36, %v1598_v50  ;;  %v1640_v1 = vmul.f32 %v1638_v36, %v1594_v49  ;;  %v1659_v2 = vmul.f32 %v1658_v42, %v1598_v50 }
 0x1d6   : > { %v1613_v0 = vadd.f32 %v6094_v37, %v1611_v53  ;;  %v1660_v58 = vmul.f32 %v1658_v42, %v1594_v49  ;;  %v1614_v59 = vadd.f32 %v6094_v37, %v1612_v55  ;;  %v1626_v61 = vrot.slane %v1619_v56, 1  ;;  %v8625_v55 = vpop.f32.mrb[0].mxu1 }
 0x1d7   : > { %v1627_v62 = vrot.slane %v1620_v57, 1  ;;  %v1646_v11 = vrot.slane %v1639_v63, 2  ;;  %v1649_v22 = vrot.slane %v1641_v44, 2  ;;  %v1647_v23 = vrot.slane %v1640_v1, 2  ;;  %v8627_v63 = vpop.f32.mrb[1].mxu1 }
 0x1d8   : > { %v1666_v28 = vrot.slane %v1659_v2, 3  ;;  %v1667_v29 = vrot.slane %v1660_v58, 3  ;;  %v1669_v13 = vrot.slane %v1661_v52, 3 }
 0x1d9   : > { %v1628_v30 = vsel %vm1625_vm5, %v1626_v61, %v1627_v62  ;;  %v1630_v34 = vsel %vm1625_vm5, %v1627_v62, %v1629_v51  ;;  %v1648_v41 = vsel %vm1645_vm6, %v1646_v11, %v1647_v23  ;;  %v1650_v36 = vsel %vm1645_vm6, %v1647_v23, %v1649_v22 }
 0x1da   : > { %v1633_v14 = vadd.f32 %v1628_v30, %v1613_v0  ;;  %v1634_v27 = vadd.f32 %v1630_v34, %v1614_v59  ;;  %v1668_v42 = vsel %vm1665_vm7, %v1666_v28, %v1667_v29  ;;  %v1670_v43 = vsel %vm1665_vm7, %v1667_v29, %v1669_v13  ;;  %v1690_v34 = vld [vmem:[#allocation14 + $0x10] sm:$0xff] }
 0x1dc   : > { %v1653_v46 = vadd.f32 %v1648_v41, %v1633_v14  ;;  %v1654_v47 = vadd.f32 %v1650_v36, %v1634_v27  ;;  %v1693_v14 = vld [vmem:[#allocation14 + $0x28] sm:$0xff]  ;;  %v1699_v41 = vld [vmem:[#allocation14 + $0x58] sm:$0xff] }
 0x1dd   : > { %v2418_v27 = vand.u32 4294901760, %v1693_v14 }
 0x1de   : > { %v1673_v48 = vadd.f32 %v1668_v42, %v1653_v46  ;;  %v1674_v49 = vadd.f32 %v1670_v43, %v1654_v47  ;;  %v2424_v43 = vand.u32 4294901760, %v1699_v41  ;;  %v1702_v46 = vld [vmem:[#allocation14 + $0x70] sm:$0xff]  ;;  %v1711_v47 = vld [vmem:[#allocation14 + $0xb8] sm:$0xff] }
 0x1df   : > { %v8680_v42 = vsub.f32 %v1693_v14, %v2418_v27 }
 0x1e0   : > { %v1675_v50 = vmul.f32 0.125, %v1673_v48  ;;  %v1676_v37 = vmul.f32 0.125, %v1674_v49  ;;  %v1679_v52 = vmul.f32 0.5, %v1673_v48  ;;  %v1680_v51 = vmul.f32 0.5, %v1674_v49 }
 0x1e2   : > { %v1677_v44 = vmul.f32 %v1675_v50, %v1673_v48  ;;  %v1678_v53 = vmul.f32 %v1676_v37, %v1674_v49  ;;  %v8694_v50 = vsub.f32 %v1699_v41, %v2424_v43  ;;  %v2427_v37 = vand.u32 4294901760, %v1702_v46 }
 0x1e4   : > { %v1681_v56 = vadd.f32 %v1679_v52, %v1677_v44  ;;  %v1682_v57 = vadd.f32 %v1680_v51, %v1678_v53  ;;  %v2436_v44 = vand.u32 4294901760, %v1711_v47  ;;  %v2531_v51 = vand.u32 4294901760, %v8694_v50 }
 0x1e6   : > { %v1683_v0 = vadd.f32 0.125, %v1681_v56  ;;  %v1684_v1 = vadd.f32 0.125, %v1682_v57  ;;  %v8717_v56 = vsub.f32 %v1702_v46, %v2427_v37 }
 0x1e8   : > { %1686 = vst.msk [vmem:[#allocation7] sm:$0xff] %vm1685_vm8, %v1683_v0  ;;  %v1713_v2 = vsel %vm1685_vm8, %v1683_v0, 0  ;;  %1687 = vst.msk [vmem:[#allocation7 + $0x8] sm:$0xff] %vm1685_vm8, %v1684_v1  ;;  %v1716_v58 = vsel %vm1685_vm8, %v1684_v1, 0 }
 0x1e9   : > { %v8633_v59 = vand.u32 4294901760, %v1713_v2  ;;  %v8635_v61 = vand.u32 4294901760, %v1716_v58 }
 0x1eb   : > { %v8638_v62 = vsub.f32 %v1713_v2, %v8633_v59  ;;  %v8641_v11 = vsub.f32 %v1716_v58, %v8635_v61 }
 0x1ed   : > { %2079 = vmatmul.mubr.f32.vlgmr.msra.gmra.mrb[2].mxu0 %v8638_v62  ;;  %v8645_v22 = vand.u32 4294901760, %v8638_v62  ;;  %v8648_v23 = vand.u32 4294901760, %v8641_v11 }
 0x1ee   : > { %6944 = vmatpush1.bf16.msra.mxu0 %v8476_v40  ;;  %2084 = vmatprep.mubr.f32.mxu0 %v7991_v12 }
 0x1ef   : > { %6946 = vmatprep.subr.bf16.mxu0 %v8485_v54  ;;  %v1802_v28 = vsub.f32 %v8638_v62, %v8645_v22  ;;  %v1813_v13 = vsub.f32 %v8641_v11, %v8648_v23 }
 0x1f1   : > { %2087 = vmatmul.mubr.f32.gmra.mrb[4].mxu0 %v8641_v11  ;;  %v8656_v29 = vand.u32 4294901760, %v1802_v28  ;;  %v8667_v30 = vand.u32 4294901760, %v1813_v13 }
 0x1f2   : > { %6948 = vmatpush1.bf16.msra.mxu0 %v8494_v60  ;;  %2173 = vmatprep.mubr.f32.mxu0 %v7991_v12 }
 0x1f3   : > { %1804 = vmatmul.mubr.f32.vlgmr.msra.gmra.mrb[2].mxu1 %v8656_v29  ;;  %6950 = vmatprep.subr.bf16.mxu0 %v8503_v4 }
 0x1f4   : > { %6912 = vmatpush1.bf16.msra.mxu1 %v8547_v35  ;;  %1809 = vmatprep.mubr.f32.mxu1 %v7991_v12  ;;  %v2415_v35 = vand.u32 4294901760, %v1690_v34 }
 0x1f5   : > { %6914 = vmatprep.subr.bf16.mxu1 %v8555_v38  ;;  %v1696_v38 = vld [vmem:[#allocation14 + $0x40] sm:$0xff] }
 0x1f6   : > { %6952 = vmatpush1.bf16.msra.mxu0 %v8516_v10  ;;  %v8678_v36 = vsub.f32 %v1690_v34, %v2415_v35  ;;  %v8739_v34 = vsub.f32 %v1711_v47, %v2436_v44 }
 0x1f7   : > { %1815 = vmatmul.mubr.f32.gmra.mrb[4].mxu1 %v8667_v30  ;;  %6954 = vmatprep.subr.bf16.mxu0 %v8531_v20 }
 0x1f8   : > { %6916 = vmatpush1.bf16.msra.mxu1 %v8559_v45  ;;  %1965 = vmatprep.mubr.f32.mxu1 %v7991_v12  ;;  %v8684_v45 = vpack.c.bf16 %v2418_v27, %v2415_v35  ;;  %v2510_v48 = vand.u32 4294901760, %v8678_v36 }
 0x1f9   : > { %6918 = vmatprep.subr.bf16.mxu1 %v8567_v3  ;;  %v2421_v3 = vand.u32 4294901760, %v1696_v38 }
 0x1fa   : > { %6956 = vmatpush1.bf16.msra.mxu0 %v8533_v21  ;;  %v2511_v52 = vsub.f32 %v8678_v36, %v2510_v48 }
 0x1fb   : > { %6958 = vmatprep.subr.bf16.mxu0 %v8575_v16  ;;  %v1705_v16 = vld [vmem:[#allocation14 + $0x88] sm:$0xff]  ;;  %v8692_v49 = vsub.f32 %v1696_v38, %v2421_v3 }
 0x1fc   : > { %6920 = vmatpush1.bf16.msra.mxu1 %v8571_v5  ;;  %v1708_v5 = vld [vmem:[#allocation14 + $0xa0] sm:$0xff]  ;;  %v2512_v1 = vand.u32 4294901760, %v2511_v52 }
 0x1fd   : > { %2177 = vmatmul.mubr.f32.vlgmr.msra.gmra.mrb[2].mxu0 %v8645_v22  ;;  %6922 = vmatprep.subr.bf16.mxu1 %v8579_v15  ;;  %v2517_v15 = vand.u32 4294901760, %v8680_v42  ;;  %v2524_v53 = vand.u32 4294901760, %v8692_v49 }
 0x1fe   : > { %6960 = vmatpush1.bf16.msra.mxu0 %v8577_v24  ;;  %2182 = vmatprep.mubr.f32.mxu0 %v7991_v12  ;;  %v8698_v24 = vpack.c.bf16 %v2424_v43, %v2421_v3 }
 0x1ff   : > { %6962 = vmatprep.subr.bf16.mxu0 %v8583_v6  ;;  %v2430_v6 = vand.u32 4294901760, %v1705_v16  ;;  %v2525_v58 = vsub.f32 %v8692_v49, %v2524_v53 }
 0x200   : > { %6924 = vmatpush1.bf16.msra.mxu1 %v8581_v32  ;;  %v2433_v32 = vand.u32 4294901760, %v1708_v5 }
 0x201   : > { %2186 = vmatmul.mubr.f32.gmra.mrb[4].mxu0 %v8648_v23  ;;  %6990 = vmatprep.subr.bf16.mxu1 %v8684_v45  ;;  %v8719_v57 = vsub.f32 %v1705_v16, %v2430_v6  ;;  %v2526_v14 = vand.u32 4294901760, %v2525_v58 }
 0x202   : > { %6964 = vmatpush1.bf16.msra.mxu0 %v8585_v7  ;;  %2304 = vmatprep.mubr.f32.mxu0 %v7991_v12  ;;  %v2518_v7 = vsub.f32 %v8680_v42, %v2517_v15  ;;  %v8724_v0 = vpack.c.bf16 %v2436_v44, %v2433_v32  ;;  %v8737_v13 = vsub.f32 %v1708_v5, %v2433_v32 }
 0x203   : > { %1967 = vmatmul.mubr.f32.vlgmr.msra.gmra.mrb[2].mxu1 %v8633_v59  ;;  %6966 = vmatprep.subr.bf16.mxu0 %v8587_v33  ;;  %v8715_v33 = vpack.c.bf16 %v2430_v6, %v2427_v37  ;;  %v2545_v28 = vand.u32 4294901760, %v8719_v57 }
 0x204   : > { %6992 = vmatpush3.bf16.msra.mxu1 %v8684_v45  ;;  %1972 = vmatprep.mubr.f32.mxu1 %v7991_v12  ;;  %v2519_v2 = vand.u32 4294901760, %v2518_v7 }
 0x205   : > { %6994 = vmatprep.subr.bf16.mxu1 %v8698_v24  ;;  %v2546_v38 = vsub.f32 %v8719_v57, %v2545_v28 }
 0x206   : > { %6968 = vmatpush1.bf16.msra.mxu0 %v8589_v8  ;;  %v2532_v8 = vsub.f32 %v8694_v50, %v2531_v51 }
 0x207   : > { %1974 = vmatmul.mubr.f32.gmra.mrb[4].mxu1 %v8635_v61  ;;  %6970 = vmatprep.subr.bf16.mxu0 %v8591_v9  ;;  %v2538_v9 = vand.u32 4294901760, %v8717_v56  ;;  %v2547_v43 = vand.u32 4294901760, %v2546_v38  ;;  %v3522_v38 = vld [vmem:[#allocation19 + $0x20] sm:$0xff] }
 0x208   : > { %6996 = vmatpush3.bf16.msra.mxu1 %v8698_v24  ;;  %6555 = vmatprep.mubr.f32.mxu1 %v8656_v29  ;;  %v7005_v29 = vpack.c.bf16 %v2519_v2, %v2512_v1  ;;  %v2533_v35 = vand.u32 4294901760, %v2532_v8 }
 0x209   : > { %6998 = vmatprep.subr.bf16.mxu1 %v8715_v33  ;;  %v2539_v27 = vsub.f32 %v8717_v56, %v2538_v9 }
 0x20a   : > { %6972 = vmatpush1.bf16.msra.mxu0 %v8593_v18  ;;  %v2552_v18 = vand.u32 4294901760, %v8737_v13  ;;  %v7009_v41 = vpack.c.bf16 %v2533_v35, %v2526_v14  ;;  %v3519_v14 = vld [vmem:[#allocation19 + $0x8] sm:$0xff]  ;;  %v3520_v35 = vld [vmem:[#allocation19 + $0x10] sm:$0xff] }
 0x20b   : > { %6974 = vmatprep.subr.bf16.mxu0 %v8474_v39  ;;  %v2559_v39 = vand.u32 4294901760, %v8739_v34  ;;  %v2540_v3 = vand.u32 4294901760, %v2539_v27  ;;  %v3521_v27 = vld [vmem:[#allocation19 + $0x18] sm:$0xff] }
 0x20c   : > { %7000 = vmatpush3.bf16.msra.mxu1 %v8715_v33  ;;  %v2553_v46 = vsub.f32 %v8737_v13, %v2552_v18 }
 0x20d   : > { %2306 = vmatmul.mubr.f32.vlgmr.msra.gmra.mrb[2].mxu0 %v8633_v59  ;;  %7002 = vmatprep.subr.bf16.mxu1 %v8724_v0 }
 0x20e   : > { %6976 = vmatpush1.bf16.msra.mxu0 %v8476_v40  ;;  %2311 = vmatprep.mubr.f32.mxu0 %v7991_v12  ;;  %v2560_v40 = vsub.f32 %v8739_v34, %v2559_v39  ;;  %v2554_v16 = vand.u32 4294901760, %v2553_v46  ;;  %v3525_v46 = vld [vmem:[#allocation19 + $0x38] sm:$0xff] }
 0x20f   : > { %6978 = vmatprep.subr.bf16.mxu0 %v8485_v54  ;;  %v7013_v54 = vpack.c.bf16 %v2547_v43, %v2540_v3  ;;  %v3528_v3 = vmul.f32 1.442695, %v3519_v14  ;;  %v3530_v43 = vmul.f32 1.442695, %v3520_v35 }
 0x210   : > { %7004 = vmatpush3.bf16.msra.mxu1 %v8724_v0  ;;  %v2561_v5 = vand.u32 4294901760, %v2560_v40  ;;  %v3532_v40 = vmul.f32 1.442695, %v3521_v27 }
 0x211   : > { %2313 = vmatmul.mubr.f32.gmra.mrb[4].mxu0 %v8635_v61  ;;  %7006 = vmatprep.subr.bf16.mxu1 %v7005_v29 }
 0x212   : > { %6980 = vmatpush1.bf16.msra.mxu0 %v8494_v60  ;;  %2399 = vmatprep.mubr.f32.mxu0 %v7991_v12  ;;  %v7017_v60 = vpack.c.bf16 %v2561_v5, %v2554_v16 }
 0x213   : > { %6556 = vmatmul.mubr.f32.vlgmr.msra.gmra.mrb[6].mxu1 %v8667_v30  ;;  %6982 = vmatprep.subr.bf16.mxu0 %v8503_v4  ;;  %v7021_v4 = vpack.c.bf16 %v8680_v42, %v8678_v36 }
 0x214   : > { %7008 = vmatpush3.bf16.msra.mxu1 %v7005_v29  ;;  %6574 = vmatprep.mubr.f32.mxu1 %v8633_v59  ;;  %v3518_v29 = vld [vmem:[#allocation19] sm:$0xff] }
 0x215   : > { %7010 = vmatprep.subr.bf16.mxu1 %v7009_v41 }
 0x216   : > { %6984 = vmatpush1.bf16.msra.mxu0 %v8516_v10  ;;  %v7025_v10 = vpack.c.bf16 %v8694_v50, %v8692_v49 }
 0x217   : > { %6986 = vmatprep.subr.bf16.mxu0 %v8531_v20  ;;  %v7029_v20 = vpack.c.bf16 %v8719_v57, %v8717_v56 }
 0x218   : > { %7012 = vmatpush3.bf16.msra.mxu1 %v7009_v41  ;;  %v3524_v41 = vld [vmem:[#allocation19 + $0x30] sm:$0xff] }
 0x219   : > { %7014 = vmatprep.subr.bf16.mxu1 %v7013_v54  ;;  %v3538_v5 = vmul.f32 1.442695, %v3524_v41 }
 0x21a   : > { %6988 = vmatpush1.bf16.msra.mxu0 %v8533_v21  ;;  %v7053_v21 = vpack.c.bf16 %v2517_v15, %v2510_v48 }
 0x21c   : > { %7016 = vmatpush3.bf16.msra.mxu1 %v7013_v54  ;;  %v3534_v54 = vmul.f32 1.442695, %v3522_v38 }
 0x21d   : > { %2401 = vmatmul.mubr.f32.vlgmr.msra.gmra.mrb[2].mxu0 %v8633_v59  ;;  %7018 = vmatprep.subr.bf16.mxu1 %v7017_v60 }
 0x21e   : > { %2406 = vmatprep.mubr.f32.mxu0 %v7991_v12  ;;  %v7033_v12 = vpack.c.bf16 %v8739_v34, %v8737_v13 }
 0x220   : > { %7020 = vmatpush3.bf16.msra.mxu1 %v7017_v60  ;;  %v3540_v60 = vmul.f32 1.442695, %v3525_v46 }
 0x221   : > { %2408 = vmatmul.mubr.f32.gmra.mrb[4].mxu0 %v8635_v61  ;;  %7022 = vmatprep.subr.bf16.mxu1 %v7021_v4 }
 0x223   : > { %6575 = vmatmul.mubr.f32.vlgmr.msra.gmra.mrb[6].mxu1 %v8635_v61 }
 0x224   : > { %7024 = vmatpush3.bf16.msra.mxu1 %v7021_v4  ;;  %6593 = vmatprep.mubr.f32.mxu1 %v8638_v62  ;;  %v7057_v62 = vpack.c.bf16 %v2531_v51, %v2524_v53 }
 0x225   : > { %7026 = vmatprep.subr.bf16.mxu1 %v7025_v10 }
 0x228   : > { %7028 = vmatpush3.bf16.msra.mxu1 %v7025_v10 }
 0x229   : > { %7030 = vmatprep.subr.bf16.mxu1 %v7029_v20 }
 0x22c   : > { %7032 = vmatpush3.bf16.msra.mxu1 %v7029_v20 }
 0x22d   : > { %7034 = vmatprep.subr.bf16.mxu1 %v7033_v12 }
 0x230   : > { %7036 = vmatpush3.bf16.msra.mxu1 %v7033_v12 }
 0x231   : > { %7038 = vmatprep.subr.bf16.mxu1 %v8684_v45 }
 0x233   : > { %6594 = vmatmul.mubr.f32.vlgmr.msra.gmra.mrb[6].mxu1 %v8641_v11  ;;  %v7061_v11 = vpack.c.bf16 %v2545_v28, %v2538_v9 }
 0x234   : > { %7040 = vmatpush3.bf16.msra.mxu1 %v8684_v45  ;;  %6612 = vmatprep.mubr.f32.mxu1 %v8645_v22  ;;  %v7065_v22 = vpack.c.bf16 %v2559_v39, %v2552_v18  ;;  %v3523_v18 = vld [vmem:[#allocation19 + $0x28] sm:$0xff]  ;;  %v3526_v39 = vmul.f32 1.442695, %v3518_v29 }
 0x235   : > { %7042 = vmatprep.subr.bf16.mxu1 %v8698_v24  ;;  %v3536_v16 = vmul.f32 1.442695, %v3523_v18 }
 0x236   : > { %7476 = vpow2.f32 %v3526_v39 }
 0x237   : > { %7478 = vpow2.f32 %v3528_v3 }
 0x238   : > { %7044 = vmatpush3.bf16.msra.mxu1 %v8698_v24  ;;  %7480 = vpow2.f32 %v3530_v43 }
 0x239   : > { %7046 = vmatprep.subr.bf16.mxu1 %v8715_v33  ;;  %7482 = vpow2.f32 %v3532_v40 }
 0x23a   : > { %7484 = vpow2.f32 %v3534_v54 }
 0x23b   : > { %7486 = vpow2.f32 %v3536_v16 }
 0x23c   : > { %7048 = vmatpush3.bf16.msra.mxu1 %v8715_v33  ;;  %7488 = vpow2.f32 %v3538_v5 }
 0x23d   : > { %7050 = vmatprep.subr.bf16.mxu1 %v8724_v0  ;;  %7490 = vpow2.f32 %v3540_v60 }
 0x240   : > { %7052 = vmatpush3.bf16.msra.mxu1 %v8724_v0  ;;  %v7477_v4 = vpop.eup %7476 }
 0x241   : > { %7054 = vmatprep.subr.bf16.mxu1 %v7053_v21  ;;  %v7479_v10 = vpop.eup %7478  ;;  %v8829_v20 = vsub.f32 0.0, %v7477_v4 }
 0x242   : > { %v7481_v12 = vpop.eup %7480 }
 0x243   : > { %6613 = vmatmul.mubr.f32.vlgmr.msra.gmra.mrb[6].mxu1 %v8648_v23  ;;  %v2998_v23 = vld [vmem:[#allocation16] sm:$0x3] }
 0x244   : > { %7056 = vmatpush3.bf16.msra.mxu1 %v7053_v21  ;;  %6631 = vmatprep.mubr.f32.mxu1 %v8633_v59  ;;  %v3015_v30 = vsel %vm3013_vm9, %v2998_v23, 0  ;;  %v8831_v21 = vsub.f32 0.0, %v7479_v10 }
 0x245   : > { %7058 = vmatprep.subr.bf16.mxu1 %v7057_v62  ;;  %v3018_v36 = vand.u32 4294901760, %v3015_v30 }
 0x248   : > { %7060 = vmatpush3.bf16.msra.mxu1 %v7057_v62  ;;  %v7483_v62 = vpop.eup %7482 }
 0x249   : > { %7062 = vmatprep.subr.bf16.mxu1 %v7061_v11  ;;  %v8835_v23 = vsub.f32 0.0, %v7483_v62 }
 0x24c   : > { %7064 = vmatpush3.bf16.msra.mxu1 %v7061_v11  ;;  %v8833_v11 = vsub.f32 0.0, %v7481_v12 }
 0x24d   : > { %7066 = vmatprep.subr.bf16.mxu1 %v7065_v22 }
 0x24e   : > { %9864 = vst [vmem:[#allocation40_spill] sm:$0xff] %v8833_v11 }
 0x250   : > { %7068 = vmatpush3.bf16.msra.mxu1 %v7065_v22  ;;  %v7485_v22 = vpop.eup %7484 }
 0x251   : > { %7070 = vmatprep.subr.bf16.mxu1 %v8684_v45 }
 0x253   : > { %6632 = vmatmul.mubr.f32.vlgmr.msra.gmra.mrb[6].mxu1 %v8635_v61 }
 0x254   : > { %7072 = vmatpush3.bf16.msra.mxu1 %v8684_v45  ;;  %6650 = vmatprep.mubr.f32.mxu1 %v8633_v59  ;;  %v3105_v59 = vsub.f32 %v3015_v30, %v3018_v36  ;;  %v7487_v30 = vpop.eup %7486 }
 0x255   : > { %7074 = vmatprep.subr.bf16.mxu1 %v8698_v24 }
 0x256   : > { %v3106_v42 = vand.u32 4294901760, %v3105_v59 }
 0x258   : > { %7076 = vmatpush3.bf16.msra.mxu1 %v8698_v24  ;;  %v3107_v45 = vsub.f32 %v3105_v59, %v3106_v42 }
 0x259   : > { %7078 = vmatprep.subr.bf16.mxu1 %v8715_v33 }
 0x25a   : > { %v3108_v47 = vand.u32 4294901760, %v3107_v45 }
 0x25c   : > { %7080 = vmatpush3.bf16.msra.mxu1 %v8715_v33 }
 0x25d   : > { %7082 = vmatprep.subr.bf16.mxu1 %v8724_v0 }
 0x260   : > { %7084 = vmatpush3.bf16.msra.mxu1 %v8724_v0 }
 0x261   : > { %6653 = vmatprep.subr.mxu1 %v3018_v36 }
 0x263   : > { %6651 = vmatmul.mubr.f32.vlgmr.msra.gmra.mrb[6].mxu1 %v8635_v61 }
 0x264   : > { %6654 = vmatpush3.msra.mxu1 %v3018_v36 }
 0x265   : > { %6658 = vmatprep.subr.mxu1 %v3108_v47 }
 0x2d6   : > { %v1968_v48 = vpop.f32.mrb[2].mxu1 }
 0x2d7   : > { %v1970_v15 = vpop.f32.mrb[3].mxu1 }
 0x2da   : > { %v1975_v49 = vpop.f32.mrb[4].mxu1 }
 0x2db   : > { %v1977_v50 = vpop.f32.mrb[5].mxu1 }
 0x2f0   : > { %v2402_v24 = vpop.f32.mrb[2].mxu0 }
 0x2f1   : > { %v7181_v37 = vadd.f32 %v2402_v24, %v1968_v48  ;;  %v2404_v6 = vpop.f32.mrb[3].mxu0 }
 0x2f2   : > { %v7182_v61 = vadd.f32 %v2404_v6, %v1970_v15  ;;  %v6095_v15 = vld [vmem:[#allocation17] ss:$0 sm:$0xff] }
 0x2f3   : > { %v3008_v32 = vsel %vm3006_vm10, %v7181_v37, 0 }
 0x2f4   : > { %v3083_v44 = vand.u32 4294901760, %v3008_v32  ;;  %2994 = vst.msk [vmem:[#allocation8] sm:$0xff] %vm1685_vm8, %v7182_v61  ;;  %v2409_v52 = vpop.f32.mrb[4].mxu0 }
 0x2f5   : > { %v7183_v7 = vadd.f32 %v2409_v52, %v1975_v49  ;;  %v2411_v53 = vpop.f32.mrb[5].mxu0 }
 0x2f6   : > { %v3084_v51 = vsub.f32 %v3008_v32, %v3083_v44  ;;  %v7184_v33 = vadd.f32 %v2411_v53, %v1977_v50 }
 0x2f7   : > { %v3011_v56 = vsel %vm3006_vm10, %v7183_v7, 0 }
 0x2f8   : > { %v3093_v57 = vand.u32 4294901760, %v3011_v56  ;;  %2995 = vst.msk [vmem:[#allocation8 + $0x8] sm:$0xff] %vm1685_vm8, %v7184_v33  ;;  %v3085_v0 = vand.u32 4294901760, %v3084_v51 }
 0x2fa   : > { %v3094_v1 = vsub.f32 %v3011_v56, %v3093_v57  ;;  %v3086_v2 = vsub.f32 %v3084_v51, %v3085_v0 }
 0x2fc   : > { %v3095_v58 = vand.u32 4294901760, %v3094_v1  ;;  %v3087_v8 = vand.u32 4294901760, %v3086_v2 }
 0x2fe   : > { %6655 = vmatprep.mubr.f32.mxu1 %v3087_v8  ;;  %v3096_v9 = vsub.f32 %v3094_v1, %v3095_v58 }
 0x300   : > { %v3097_v28 = vand.u32 4294901760, %v3096_v9 }
 0x302   : > { %6656 = vmatmul.mubr.f32.vlgmr.msra.gmra.mrb[8].mxu1 %v3097_v28 }
 0x303   : > { %6659 = vmatpush3.msra.mxu1 %v3108_v47  ;;  %6660 = vmatprep.mubr.f32.mxu1 %v3083_v44 }
 0x304   : > { %6663 = vmatprep.subr.mxu1 %v3105_v59 }
 0x30a   : > { %6661 = vmatmul.mubr.f32.vlgmr.msra.gmra.mrb[8].mxu1 %v3093_v57 }
 0x30b   : > { %6664 = vmatpush3.msra.mxu1 %v3105_v59  ;;  %6665 = vmatprep.mubr.f32.mxu1 %v3084_v51  ;;  %v7489_v59 = vpop.eup %7488 }
 0x30c   : > { %6668 = vmatprep.subr.mxu1 %v3018_v36  ;;  %v7491_v45 = vpop.eup %7490  ;;  %v8841_v47 = vsub.f32 0.0, %v7489_v59 }
 0x30d   : > { %v8843_v48 = vsub.f32 0.0, %v7491_v45 }
 0x312   : > { %6666 = vmatmul.mubr.f32.vlgmr.msra.gmra.mrb[8].mxu1 %v3094_v1 }
 0x313   : > { %6669 = vmatpush3.msra.mxu1 %v3018_v36  ;;  %6670 = vmatprep.mubr.f32.mxu1 %v3085_v0 }
 0x314   : > { %6673 = vmatprep.subr.mxu1 %v3106_v42 }
 0x31a   : > { %6671 = vmatmul.mubr.f32.vlgmr.msra.gmra.mrb[8].mxu1 %v3095_v58 }
 0x31b   : > { %6674 = vmatpush3.msra.mxu1 %v3106_v42  ;;  %6675 = vmatprep.mubr.f32.mxu1 %v3083_v44  ;;  %v8839_v42 = vsub.f32 0.0, %v7487_v30 }
 0x31c   : > { %6678 = vmatprep.subr.mxu1 %v3018_v36 }
 0x322   : > { %6676 = vmatmul.mubr.f32.vlgmr.msra.gmra.mrb[8].mxu1 %v3093_v57 }
 0x323   : > { %6679 = vmatpush3.msra.mxu1 %v3018_v36  ;;  %6680 = vmatprep.mubr.f32.mxu1 %v3083_v44  ;;  %v8837_v36 = vsub.f32 0.0, %v7485_v22 }
 0x32a   : > { %6681 = vmatmul.mubr.f32.vlgmr.msra.gmra.mrb[8].mxu1 %v3093_v57 }
 0x336   : > { %v6652_v13 = vpop.f32.mrb[6].mxu1 }
 0x337   : > { %2997 = vst.msk [vmem:[#allocation9 + $0x8] sm:$0xff] %vm1685_vm8, %v6652_v13  ;;  %v2984_v34 = vpop.f32.mrb[7].mxu1 }
 0x338   : > { %2996 = vst.msk [vmem:[#allocation9] sm:$0xff] %vm1685_vm8, %v2984_v34 }
 0x3fd   : > { %v6682_v49 = vpop.f32.mrb[8].mxu1 }
 0x3fe   : > { %v7185_v50 = vadd.f32 %v6682_v49, %v6095_v15  ;;  %v3496_v24 = vpop.f32.mrb[9].mxu1 }
 0x3ff   : > { %v7186_v37 = vadd.f32 %v6095_v15, %v3496_v24 }
 0x400   : > { %v3507_v6 = vmul.f32 0.0625, %v7185_v50  ;;  %v3511_v44 = vmul.f32 0.5, %v7185_v50 }
 0x401   : > { %v3506_v61 = vmul.f32 0.0625, %v7186_v37  ;;  %v3510_v7 = vmul.f32 0.5, %v7186_v37 }
 0x402   : > { %v3509_v32 = vmul.f32 %v7185_v50, %v3507_v6 }
 0x403   : > { %v3508_v52 = vmul.f32 %v7186_v37, %v3506_v61 }
 0x404   : > { %v3513_v53 = vadd.f32 %v3511_v44, %v3509_v32 }
 0x405   : > { %v3512_v51 = vadd.f32 %v3510_v7, %v3508_v52 }
 0x406   : > { %v3515_v33 = vadd.f32 1.0, %v3513_v53 }
 0x407   : > { %v3514_v56 = vadd.f32 1.0, %v3512_v51 }
 0x408   : > { %3517 = vst.msk [vmem:[#allocation6 + $0x8] sm:$0xff] %vm1685_vm8, %v3515_v33 }
 0x409   : > { %3516 = vst.msk [vmem:[#allocation6] sm:$0xff] %vm1685_vm8, %v3514_v56 }
 0x40a LB: >> { %v9865_v19 = vld [vmem:[#allocation39_spill] sm:$0xff]  ;;  %v9866_v17 = vld [vmem:[#allocation38_spill] sm:$0xff]  ;;  %v9867_v11 = vld [vmem:[#allocation40_spill] sm:$0xff]  ;;  %s8853_s25 = sshll.u32 %s7942_s27, 3  ;;  %v7992_v57 = vmov 1966171168   ;;  %s7942_s27 = sphi %s8847_s27, %s3555_s27  }
 0x40b   : >> { %v3568_v0 = vunpack.c.l.s4 %v7992_v57  ;;  %s3561_s28 = scalar_lea.vmem [#allocation8], %s8853_s25  ;;  %s3557_s24 = scalar_lea.vmem [#allocation6], %s8853_s25 }
 0x40c   : >> { %v8856_v1 = vld [vmem:[%s3561_s28] sm:$0xff]  ;;  %s3559_s12 = scalar_lea.vmem [#allocation7], %s8853_s25  ;;  %s3563_s20 = scalar_lea.vmem [#allocation9], %s8853_s25 }
 0x40d   : >> { %v3569_v2 = vunpack.c.0.s8 %v3568_v0  ;;  %v3965_v8 = vrot.slane %v8856_v1, %v8610_v26  ;;  %v3560_v9 = vld [vmem:[%s3559_s12] sm:$0xff]  ;;  %v4000_v39 = vrot.slane %v8856_v1, %v9865_v19  ;;  %v8901_v50 = vrot.slane %v8856_v1, %v8604_v31  ;;  %s9296_s14 = smov 0  }
 0x40e   : >> { %v8865_v28 = vld [vmem:[%s3563_s20] sm:$0xff] }
 0x40f   : >> { %3975 = vbcast.lane.b32.xlu1 %v3965_v8, 272  ;;  %3967 = vbcast.lane.b32.xlu0 %v3965_v8, 256  ;;  %v8868_v13 = vsub.s32 %v3569_v2, %v9866_v17 }
 0x410   : >> { %v8859_v58 = vld [vmem:[%s3557_s24] sm:$0xff] }
 0x411   : >> { %v8871_v34 = vmul.f32 %v3560_v9, %v8859_v58  ;;  %v3573_v14 = vrot.slane %v8859_v58, %v8868_v13 }
 0x413   : >> { %v3920_v29 = vrot.slane %v8871_v34, %v8868_v13  ;;  %3979 = vbcast.lane.b32.xlu1 %v3965_v8, 280  ;;  %3971 = vbcast.lane.b32.xlu0 %v3965_v8, 264  ;;  %v3589_v27 = vrot.slane %v3573_v14, %v8868_v13  ;;  %v3581_v43 = vcombine.high %v3573_v14, %v3573_v14 }
 0x415   : >> { %v8878_v35 = vrot.slane %v3920_v29, %v8868_v13  ;;  %v3618_v38 = vrot.slane %v3589_v27, %v8610_v26  ;;  %v8887_v40 = vrot.slane %v3581_v43, %v8868_v13  ;;  %v3928_v10 = vcombine.high %v3920_v29, %v3920_v29 }
 0x416   : >> { %v3611_v22 = vcombine.high %v3589_v27, %v3589_v27 }
 0x417   : >> { %3987 = vbcast.lane.b32.xlu1 %v3965_v8, 296  ;;  %3983 = vbcast.lane.b32.xlu0 %v3965_v8, 288  ;;  %v3655_v18 = vmul.f32 %v3618_v38, %v8829_v20  ;;  %v3656_v3 = vmul.f32 %v3618_v38, %v8831_v21  ;;  %v3622_v54 = vrot.slane %v8887_v40, %v8610_v26 }
 0x418   : >> { %v3657_v16 = vmul.f32 %v3618_v38, %v9867_v11  ;;  %v3658_v5 = vmul.f32 %v3618_v38, %v8835_v23  ;;  %v3659_v60 = vmul.f32 %v3618_v38, %v8837_v36  ;;  %v3660_v4 = vmul.f32 %v3618_v38, %v8839_v42 }
 0x419   : >> { %v3719_v41 = vmul.f32 1.442695, %v3655_v18  ;;  %v3721_v46 = vmul.f32 1.442695, %v3656_v3  ;;  %v3661_v12 = vmul.f32 %v3618_v38, %v8841_v47  ;;  %v3662_v30 = vmul.f32 %v3618_v38, %v8843_v48 }
 0x41a   : >> { %v3663_v59 = vmul.f32 %v3622_v54, %v8829_v20  ;;  %v3723_v45 = vmul.f32 1.442695, %v3657_v16  ;;  %v3725_v15 = vmul.f32 1.442695, %v3658_v5  ;;  %v3727_v49 = vmul.f32 1.442695, %v3659_v60 }
 0x41b   : >> { %3995 = vbcast.lane.b32.xlu1 %v3965_v8, 312  ;;  %3991 = vbcast.lane.b32.xlu0 %v3965_v8, 304  ;;  %7492 = vpow2.f32 %v3719_v41  ;;  %v3664_v24 = vmul.f32 %v3622_v54, %v8831_v21  ;;  %v3729_v37 = vmul.f32 1.442695, %v3660_v4  ;;  %v8905_v6 = vrot.slane %v3928_v10, %v8868_v13 }
 0x41c   : >> { %7494 = vpow2.f32 %v3721_v46  ;;  %v3665_v61 = vmul.f32 %v3622_v54, %v9867_v11  ;;  %v3731_v32 = vmul.f32 1.442695, %v3661_v12  ;;  %v3666_v44 = vmul.f32 %v3622_v54, %v8835_v23 }
 0x41d   : >> { %7496 = vpow2.f32 %v3723_v45  ;;  %v3733_v52 = vmul.f32 1.442695, %v3662_v30  ;;  %v3626_v7 = vrot.slane %v3611_v22, %v8610_v26  ;;  %v3667_v53 = vmul.f32 %v3622_v54, %v8837_v36 }
 0x41e   : >> { %7498 = vpow2.f32 %v3725_v15  ;;  %v3735_v51 = vmul.f32 1.442695, %v3663_v59  ;;  %v3668_v33 = vmul.f32 %v3622_v54, %v8839_v42  ;;  %v3737_v56 = vmul.f32 1.442695, %v3664_v24 }
 0x41f   : >> { %4006 = vbcast.lane.b32.xlu1 %v4000_v39, 264  ;;  %4002 = vbcast.lane.b32.xlu0 %v4000_v39, 256  ;;  %7500 = vpow2.f32 %v3727_v49  ;;  %v3669_v57 = vmul.f32 %v3622_v54, %v8841_v47  ;;  %v3739_v0 = vmul.f32 1.442695, %v3665_v61  ;;  %v3670_v8 = vmul.f32 %v3622_v54, %v8843_v48 }
 0x420   : >> { %7502 = vpow2.f32 %v3729_v37  ;;  %v3741_v9 = vmul.f32 1.442695, %v3666_v44  ;;  %v3613_v29 = vcombine.high %v8887_v40, %v8887_v40  ;;  %v3671_v14 = vmul.f32 %v3626_v7, %v8829_v20 }
 0x421   : >> { %7504 = vpow2.f32 %v3731_v32  ;;  %v3743_v27 = vmul.f32 1.442695, %v3667_v53  ;;  %v3672_v38 = vmul.f32 %v3626_v7, %v8831_v21  ;;  %v3745_v18 = vmul.f32 1.442695, %v3668_v33 }
 0x422   : >> { %7506 = vpow2.f32 %v3733_v52  ;;  %v3747_v41 = vmul.f32 1.442695, %v3669_v57  ;;  %v3566_v3 = vcombine.high %v8859_v58, %v8859_v58  ;;  %v3674_v43 = vmul.f32 %v3626_v7, %v8835_v23 }
 0x423   : >> { %4014 = vbcast.lane.b32.xlu1 %v4000_v39, 280  ;;  %4010 = vbcast.lane.b32.xlu0 %v4000_v39, 272  ;;  %7508 = vpow2.f32 %v3735_v51  ;;  %v3749_v46 = vmul.f32 1.442695, %v3670_v8  ;;  %v8928_v54 = vrot.slane %v3613_v29, %v8610_v26  ;;  %v3675_v16 = vmul.f32 %v3626_v7, %v8837_v36 }
 0x424   : >> { %7510 = vpow2.f32 %v3737_v56  ;;  %v3751_v5 = vmul.f32 1.442695, %v3671_v14  ;;  %v3676_v4 = vmul.f32 %v3626_v7, %v8839_v42  ;;  %v3753_v58 = vmul.f32 1.442695, %v3672_v38 }
 0x425   : >> { %v7493_v62 = vpop.eup %7492  ;;  %7512 = vpow2.f32 %v3739_v0  ;;  %v3677_v12 = vmul.f32 %v3626_v7, %v8841_v47  ;;  %v3678_v30 = vmul.f32 %v3626_v7, %v8843_v48  ;;  %v3757_v59 = vmul.f32 1.442695, %v3674_v43 }
 0x426   : >> { %3847 = vst.msk [vmem:[#allocation4] sm:$0xff] %vm1685_vm8, %v7493_v62  ;;  %v7495_v2 = vpop.eup %7494  ;;  %7514 = vpow2.f32 %v3741_v9  ;;  %v8940_v15 = vrot.slane %v3566_v3, %v8868_v13  ;;  %v3679_v49 = vmul.f32 %v8928_v54, %v8829_v20  ;;  %v3759_v24 = vmul.f32 1.442695, %v3675_v16 }
 0x427   : >> { %4022 = vbcast.lane.b32.xlu1 %v4000_v39, 296  ;;  %4018 = vbcast.lane.b32.xlu0 %v4000_v39, 288  ;;  %3848 = vst.msk [vmem:[#allocation4 + $0x8] sm:$0xff] %vm1685_vm8, %v7495_v2  ;;  %v7497_v40 = vpop.eup %7496  ;;  %7516 = vpow2.f32 %v3743_v27  ;;  %v8949_v61 = vrot.slane %v8856_v1, %v8607_v25  ;;  %v3680_v32 = vmul.f32 %v8928_v54, %v8831_v21  ;;  %v3761_v44 = vmul.f32 1.442695, %v3676_v4 }
 0x428   : >> { %v7499_v60 = vpop.eup %7498  ;;  %7518 = vpow2.f32 %v3745_v18  ;;  %3849 = vst.msk [vmem:[#allocation4 + $0x10] sm:$0xff] %vm1685_vm8, %v7497_v40  ;;  %v3681_v53 = vmul.f32 %v8928_v54, %v9867_v11  ;;  %v3682_v33 = vmul.f32 %v8928_v54, %v8835_v23  ;;  %v3765_v56 = vmul.f32 1.442695, %v3678_v30 }
 0x429   : >> { %v7501_v10 = vpop.eup %7500  ;;  %7520 = vpow2.f32 %v3747_v41  ;;  %3850 = vst.msk [vmem:[#allocation4 + $0x18] sm:$0xff] %vm1685_vm8, %v7499_v60  ;;  %v3683_v2 = vmul.f32 %v8928_v54, %v8837_v36  ;;  %v3767_v8 = vmul.f32 1.442695, %v3679_v49  ;;  %v3684_v29 = vmul.f32 %v8928_v54, %v8839_v42 }
 0x42a   : >> { %v7503_v22 = vpop.eup %7502  ;;  %7522 = vpow2.f32 %v3749_v46  ;;  %3851 = vst.msk [vmem:[#allocation4 + $0x20] sm:$0xff] %vm1685_vm8, %v7501_v10  ;;  %v3769_v14 = vmul.f32 1.442695, %v3680_v32  ;;  %v3913_v27 = vcombine.high %v8871_v34, %v8871_v34  ;;  %v3582_v18 = vcombine.high %v8940_v15, %v8940_v15 }
 0x42b   : >> { %4030 = vbcast.lane.b32.xlu1 %v4000_v39, 312  ;;  %4026 = vbcast.lane.b32.xlu0 %v4000_v39, 304  ;;  %v3673_v39 = vmul.f32 %v3626_v7, %v9867_v11  ;;  %v7505_v45 = vpop.eup %7504  ;;  %7524 = vpow2.f32 %v3751_v5  ;;  %3852 = vst.msk [vmem:[#allocation4 + $0x28] sm:$0xff] %vm1685_vm8, %v7503_v22  ;;  %v8956_v7 = vrot.slane %v8940_v15, %v8868_v13  ;;  %v3771_v41 = vmul.f32 1.442695, %v3681_v53 }
 0x42c   : >> { %v7507_v37 = vpop.eup %7506  ;;  %7526 = vpow2.f32 %v3753_v58  ;;  %3853 = vst.msk [vmem:[#allocation4 + $0x30] sm:$0xff] %vm1685_vm8, %v7505_v45  ;;  %v3686_v43 = vmul.f32 %v8928_v54, %v8843_v48  ;;  %v3773_v46 = vmul.f32 1.442695, %v3682_v33  ;;  %v8987_v34 = vrot.slane %v3913_v27, %v8868_v13 }
 0x42d   : >> { %v3755_v62 = vmul.f32 1.442695, %v3673_v39  ;;  %v7509_v52 = vpop.eup %7508  ;;  %3854 = vst.msk [vmem:[#allocation4 + $0x38] sm:$0xff] %vm1685_vm8, %v7507_v37  ;;  %v8966_v0 = vrot.slane %v8956_v7, %v8610_v26  ;;  %v3685_v39 = vmul.f32 %v8928_v54, %v8841_v47  ;;  %v3775_v5 = vmul.f32 1.442695, %v3683_v2 }
 0x42e   : >> { %v7511_v51 = vpop.eup %7510  ;;  %3855 = vst.msk [vmem:[#allocation4 + $0x40] sm:$0xff] %vm1685_vm8, %v7509_v52  ;;  %v3777_v4 = vmul.f32 1.442695, %v3684_v29  ;;  %v8999_v58 = vrot.slane %v8987_v34, %v8868_v13  ;;  %v3781_v45 = vmul.f32 1.442695, %v3686_v43 }
 0x42f   : >> { %4041 = vbcast.lane.b32.xlu1 %v8901_v50, 264  ;;  %4037 = vbcast.lane.b32.xlu0 %v8901_v50, 256  ;;  %7528 = vpow2.f32 %v3755_v62  ;;  %v7513_v57 = vpop.eup %7512  ;;  %3856 = vst.msk [vmem:[#allocation4 + $0x48] sm:$0xff] %vm1685_vm8, %v7511_v51  ;;  %v3687_v16 = vmul.f32 %v8966_v0, %v8829_v20  ;;  %v3688_v54 = vmul.f32 %v8966_v0, %v8831_v21  ;;  %v3779_v22 = vmul.f32 1.442695, %v3685_v39 }
 0x430   : >> { %7530 = vpow2.f32 %v3757_v59  ;;  %v7515_v9 = vpop.eup %7514  ;;  %3857 = vst.msk [vmem:[#allocation4 + $0x50] sm:$0xff] %vm1685_vm8, %v7513_v57  ;;  %v3689_v62 = vmul.f32 %v8966_v0, %v9867_v11  ;;  %v3690_v59 = vmul.f32 %v8966_v0, %v8835_v23  ;;  %v3692_v52 = vmul.f32 %v8966_v0, %v8839_v42 }
 0x431   : >> { %7532 = vpow2.f32 %v3759_v24  ;;  %v7517_v38 = vpop.eup %7516  ;;  %3858 = vst.msk [vmem:[#allocation4 + $0x58] sm:$0xff] %vm1685_vm8, %v7515_v9  ;;  %v3691_v24 = vmul.f32 %v8966_v0, %v8837_v36  ;;  %v3783_v37 = vmul.f32 1.442695, %v3687_v16  ;;  %v3785_v53 = vmul.f32 1.442695, %v3688_v54 }
 0x432   : >> { %7534 = vpow2.f32 %v3761_v44  ;;  %v7519_v3 = vpop.eup %7518  ;;  %3859 = vst.msk [vmem:[#allocation4 + $0x60] sm:$0xff] %vm1685_vm8, %v7517_v38  ;;  %v4104_v44 = vsub.s32 4, %v9866_v17  ;;  %v3693_v51 = vmul.f32 %v8966_v0, %v8841_v47  ;;  %v3787_v33 = vmul.f32 1.442695, %v3689_v62 }
 0x433   : >> { %4049 = vbcast.lane.b32.xlu1 %v8901_v50, 280  ;;  %4045 = vbcast.lane.b32.xlu0 %v8901_v50, 272  ;;  %v7521_v40 = vpop.eup %7520  ;;  %3860 = vst.msk [vmem:[#allocation4 + $0x68] sm:$0xff] %vm1685_vm8, %v7519_v3  ;;  %v3612_v57 = vcombine.high %v8956_v7, %v8956_v7  ;;  %v3694_v2 = vmul.f32 %v8966_v0, %v8843_v48  ;;  %v3793_v38 = vmul.f32 1.442695, %v3692_v52 }
 0x434   : >> { %v7523_v60 = vpop.eup %7522  ;;  %3861 = vst.msk [vmem:[#allocation4 + $0x70] sm:$0xff] %vm1685_vm8, %v7521_v40  ;;  %v9039_v7 = vrot.slane %v8856_v1, %v4104_v44 }
 0x435   : >> { %v7525_v10 = vpop.eup %7524  ;;  %3862 = vst.msk [vmem:[#allocation4 + $0x78] sm:$0xff] %vm1685_vm8, %v7523_v60  ;;  %v9050_v43 = vrot.slane %v3612_v57, %v8610_v26  ;;  %v3797_v40 = vmul.f32 1.442695, %v3694_v2 }
 0x436   : >> { %v7527_v30 = vpop.eup %7526  ;;  %3863 = vst.msk [vmem:[#allocation4 + $0x80] sm:$0xff] %vm1685_vm8, %v7525_v10 }
 0x437   : >> { %4057 = vbcast.lane.b32.xlu1 %v8901_v50, 296  ;;  %4053 = vbcast.lane.b32.xlu0 %v8901_v50, 288  ;;  %3864 = vst.msk [vmem:[#allocation4 + $0x88] sm:$0xff] %vm1685_vm8, %v7527_v30 }
 0x439   : >> { %v7529_v15 = vpop.eup %7528 }
 0x43a   : >> { %v7531_v32 = vpop.eup %7530  ;;  %3865 = vst.msk [vmem:[#allocation4 + $0x90] sm:$0xff] %vm1685_vm8, %v7529_v15 }
 0x43b   : >> { %4065 = vbcast.lane.b32.xlu1 %v8901_v50, 312  ;;  %4061 = vbcast.lane.b32.xlu0 %v8901_v50, 304  ;;  %v3763_v50 = vmul.f32 1.442695, %v3677_v12  ;;  %v9002_v12 = vrot.slane %v3582_v18, %v8868_v13  ;;  %3866 = vst.msk [vmem:[#allocation4 + $0x98] sm:$0xff] %vm1685_vm8, %v7531_v32 }
 0x43d   : >> { %7536 = vpow2.f32 %v3763_v50  ;;  %v9012_v49 = vrot.slane %v9002_v12, %v8610_v26  ;;  %v7533_v50 = vpop.eup %7532 }
 0x43e   : >> { %7538 = vpow2.f32 %v3765_v56  ;;  %v7535_v56 = vpop.eup %7534  ;;  %3867 = vst.msk [vmem:[#allocation4 + $0xa0] sm:$0xff] %vm1685_vm8, %v7533_v50  ;;  %v3705_v50 = vmul.f32 %v9050_v43, %v9867_v11 }
 0x43f   : >> { %4076 = vbcast.lane.b32.xlu1 %v8949_v61, 264  ;;  %4072 = vbcast.lane.b32.xlu0 %v8949_v61, 256  ;;  %7540 = vpow2.f32 %v3767_v8  ;;  %v3789_v8 = vmul.f32 1.442695, %v3690_v59  ;;  %v3695_v29 = vmul.f32 %v9012_v49, %v8829_v20  ;;  %3868 = vst.msk [vmem:[#allocation4 + $0xa8] sm:$0xff] %vm1685_vm8, %v7535_v56  ;;  %v3696_v0 = vmul.f32 %v9012_v49, %v8831_v21 }
 0x440   : >> { %7542 = vpow2.f32 %v3769_v14  ;;  %v3791_v14 = vmul.f32 1.442695, %v3691_v24  ;;  %v3697_v39 = vmul.f32 %v9012_v49, %v9867_v11  ;;  %v3702_v59 = vmul.f32 %v9012_v49, %v8843_v48 }
 0x441   : >> { %7544 = vpow2.f32 %v3771_v41  ;;  %v3795_v41 = vmul.f32 1.442695, %v3693_v51  ;;  %v3799_v60 = vmul.f32 1.442695, %v3695_v29  ;;  %v3801_v10 = vmul.f32 1.442695, %v3696_v0 }
 0x442   : >> { %7546 = vpow2.f32 %v3773_v46  ;;  %v3698_v46 = vmul.f32 %v9012_v49, %v8835_v23  ;;  %v3803_v30 = vmul.f32 1.442695, %v3697_v39  ;;  %v3614_v24 = vcombine.high %v9002_v12, %v9002_v12 }
 0x443   : >> { %4084 = vbcast.lane.b32.xlu1 %v8949_v61, 280  ;;  %4080 = vbcast.lane.b32.xlu0 %v8949_v61, 272  ;;  %7548 = vpow2.f32 %v3775_v5  ;;  %v3699_v5 = vmul.f32 %v9012_v49, %v8837_v36  ;;  %v3706_v56 = vmul.f32 %v9050_v43, %v8835_v23  ;;  %v3813_v57 = vmul.f32 1.442695, %v3702_v59 }
 0x444   : >> { %7550 = vpow2.f32 %v3777_v4  ;;  %v3700_v4 = vmul.f32 %v9012_v49, %v8839_v42  ;;  %v3708_v0 = vmul.f32 %v9050_v43, %v8839_v42  ;;  %v3709_v39 = vmul.f32 %v9050_v43, %v8841_v47 }
 0x445   : >> { %7552 = vpow2.f32 %v3779_v22  ;;  %v3701_v22 = vmul.f32 %v9012_v49, %v8841_v47  ;;  %v3807_v32 = vmul.f32 1.442695, %v3699_v5  ;;  %v3704_v49 = vmul.f32 %v9050_v43, %v8831_v21 }
 0x446   : >> { %7554 = vpow2.f32 %v3781_v45  ;;  %v3805_v45 = vmul.f32 1.442695, %v3698_v46  ;;  %v3821_v46 = vmul.f32 1.442695, %v3706_v56 }
 0x447   : >> { %4092 = vbcast.lane.b32.xlu1 %v8949_v61, 296  ;;  %4088 = vbcast.lane.b32.xlu0 %v8949_v61, 288  ;;  %v7537_v9 = vpop.eup %7536  ;;  %7556 = vpow2.f32 %v3783_v37  ;;  %v3703_v37 = vmul.f32 %v9050_v43, %v8829_v20  ;;  %v3811_v51 = vmul.f32 1.442695, %v3701_v22  ;;  %v3827_v22 = vmul.f32 1.442695, %v3709_v39 }
 0x448   : >> { %v7539_v27 = vpop.eup %7538  ;;  %7558 = vpow2.f32 %v3785_v53  ;;  %3869 = vst.msk [vmem:[#allocation4 + $0xb0] sm:$0xff] %vm1685_vm8, %v7537_v9  ;;  %v3809_v53 = vmul.f32 1.442695, %v3700_v4  ;;  %v3707_v9 = vmul.f32 %v9050_v43, %v8837_v36  ;;  %v3825_v4 = vmul.f32 1.442695, %v3708_v0 }
 0x449   : >> { %v7541_v18 = vpop.eup %7540  ;;  %7560 = vpow2.f32 %v3787_v33  ;;  %3870 = vst.msk [vmem:[#allocation4 + $0xb8] sm:$0xff] %vm1685_vm8, %v7539_v27  ;;  %v3815_v29 = vmul.f32 1.442695, %v3703_v37  ;;  %v4139_v27 = vsub.s32 5, %v9866_v17 }
 0x44a   : >> { %v7543_v3 = vpop.eup %7542  ;;  %7562 = vpow2.f32 %v3789_v8  ;;  %3871 = vst.msk [vmem:[#allocation4 + $0xc0] sm:$0xff] %vm1685_vm8, %v7541_v18  ;;  %v9089_v8 = vrot.slane %v3614_v24, %v8610_v26  ;;  %v3823_v5 = vmul.f32 1.442695, %v3707_v9 }
 0x44b   : >> { %4100 = vbcast.lane.b32.xlu1 %v8949_v61, 312  ;;  %4096 = vbcast.lane.b32.xlu0 %v8949_v61, 304  ;;  %v3929_v61 = vcombine.high %v8987_v34, %v8987_v34  ;;  %v7545_v16 = vpop.eup %7544  ;;  %7564 = vpow2.f32 %v3791_v14  ;;  %3872 = vst.msk [vmem:[#allocation4 + $0xc8] sm:$0xff] %vm1685_vm8, %v7543_v3  ;;  %v3710_v3 = vmul.f32 %v9050_v43, %v8843_v48 }
 0x44c   : >> { %v7547_v54 = vpop.eup %7546  ;;  %7566 = vpow2.f32 %v3793_v38  ;;  %3873 = vst.msk [vmem:[#allocation4 + $0xd0] sm:$0xff] %vm1685_vm8, %v7545_v16  ;;  %v3817_v38 = vmul.f32 1.442695, %v3704_v49  ;;  %v3711_v16 = vmul.f32 %v9089_v8, %v8829_v20  ;;  %v9114_v43 = vrot.slane %v8856_v1, %v4139_v27 }
 0x44d   : >> { %v9059_v34 = vrot.slane %v3929_v61, %v8868_v13  ;;  %v7549_v62 = vpop.eup %7548  ;;  %7568 = vpow2.f32 %v3795_v41  ;;  %3874 = vst.msk [vmem:[#allocation4 + $0xd8] sm:$0xff] %vm1685_vm8, %v7547_v54  ;;  %v3819_v41 = vmul.f32 1.442695, %v3705_v50  ;;  %v3712_v54 = vmul.f32 %v9089_v8, %v8831_v21 }
 0x44e   : >> { %v7551_v13 = vpop.eup %7550  ;;  %7570 = vpow2.f32 %v3797_v40  ;;  %3875 = vst.msk [vmem:[#allocation4 + $0xe0] sm:$0xff] %vm1685_vm8, %v7549_v62  ;;  %v3713_v62 = vmul.f32 %v9089_v8, %v9867_v11  ;;  %v3716_v37 = vmul.f32 %v9089_v8, %v8839_v42  ;;  %v3717_v49 = vmul.f32 %v9089_v8, %v8841_v47 }
 0x44f   : >> { %4111 = vbcast.lane.b32.xlu1 %v9039_v7, 264  ;;  %4107 = vbcast.lane.b32.xlu0 %v9039_v7, 256  ;;  %v7553_v15 = vpop.eup %7552  ;;  %7572 = vpow2.f32 %v3799_v60  ;;  %3876 = vst.msk [vmem:[#allocation4 + $0xe8] sm:$0xff] %vm1685_vm8, %v7551_v13  ;;  %v3829_v13 = vmul.f32 1.442695, %v3710_v3  ;;  %v3718_v50 = vmul.f32 %v9089_v8, %v8843_v48 }
 0x450   : >> { %v7555_v52 = vpop.eup %7554  ;;  %7574 = vpow2.f32 %v3801_v10  ;;  %3877 = vst.msk [vmem:[#allocation4 + $0xf0] sm:$0xff] %vm1685_vm8, %v7553_v15  ;;  %v3831_v15 = vmul.f32 1.442695, %v3711_v16 }
 0x451   : >> { %v7557_v12 = vpop.eup %7556  ;;  %7576 = vpow2.f32 %v3803_v30  ;;  %3878 = vst.msk [vmem:[#allocation4 + $0xf8] sm:$0xff] %vm1685_vm8, %v7555_v52  ;;  %v3714_v30 = vmul.f32 %v9089_v8, %v8835_v23 }
 0x452   : >> { %v7559_v33 = vpop.eup %7558  ;;  %7578 = vpow2.f32 %v3805_v45  ;;  %3879 = vst.msk [vmem:[#allocation4 + $0x100] sm:$0xff] %vm1685_vm8, %v7557_v12  ;;  %v3715_v45 = vmul.f32 %v9089_v8, %v8837_v36  ;;  %v3843_v8 = vmul.f32 1.442695, %v3717_v49  ;;  %v9186_v49 = vld [vmem:[#allocation2 + $0x30] sm:$0xff]  }
 0x453   : >> { %4119 = vbcast.lane.b32.xlu1 %v9039_v7, 280  ;;  %4115 = vbcast.lane.b32.xlu0 %v9039_v7, 272  ;;  %v7561_v2 = vpop.eup %7560  ;;  %7580 = vpow2.f32 %v3807_v32  ;;  %3880 = vst.msk [vmem:[#allocation4 + $0x108] sm:$0xff] %vm1685_vm8, %v7559_v33  ;;  %v3833_v32 = vmul.f32 1.442695, %v3712_v54 }
 0x454   : >> { %v7563_v14 = vpop.eup %7562  ;;  %7582 = vpow2.f32 %v3809_v53  ;;  %3881 = vst.msk [vmem:[#allocation4 + $0x110] sm:$0xff] %vm1685_vm8, %v7561_v2  ;;  %v3835_v53 = vmul.f32 1.442695, %v3713_v62  ;;  %v3839_v56 = vmul.f32 1.442695, %v3715_v45  ;;  %v4209_v62 = vsub.s32 7, %v9866_v17 }
 0x455   : >> { %v7565_v18 = vpop.eup %7564  ;;  %7584 = vpow2.f32 %v3811_v51  ;;  %3882 = vst.msk [vmem:[#allocation4 + $0x118] sm:$0xff] %vm1685_vm8, %v7563_v14  ;;  %v3837_v51 = vmul.f32 1.442695, %v3714_v30  ;;  %v3841_v2 = vmul.f32 1.442695, %v3716_v37  ;;  %v9174_v30 = vld [vmem:[#allocation2] sm:$0xff]  }
 0x456   : >> { %v7567_v61 = vpop.eup %7566  ;;  %7586 = vpow2.f32 %v3813_v57  ;;  %3883 = vst.msk [vmem:[#allocation4 + $0x120] sm:$0xff] %vm1685_vm8, %v7565_v18  ;;  %v3845_v14 = vmul.f32 1.442695, %v3718_v50  ;;  %v4174_v18 = vsub.s32 6, %v9866_v17  ;;  %v9182_v37 = vld [vmem:[#allocation2 + $0x20] sm:$0xff]  }
 0x457   : >> { %4127 = vbcast.lane.b32.xlu1 %v9039_v7, 296  ;;  %4123 = vbcast.lane.b32.xlu0 %v9039_v7, 288  ;;  %v7569_v40 = vpop.eup %7568  ;;  %7588 = vpow2.f32 %v3815_v29  ;;  %3884 = vst.msk [vmem:[#allocation4 + $0x128] sm:$0xff] %vm1685_vm8, %v7567_v61 }
 0x458   : >> { %v7571_v60 = vpop.eup %7570  ;;  %7590 = vpow2.f32 %v3817_v38  ;;  %3885 = vst.msk [vmem:[#allocation4 + $0x130] sm:$0xff] %vm1685_vm8, %v7569_v40 }
 0x459   : >> { %v7573_v10 = vpop.eup %7572  ;;  %7592 = vpow2.f32 %v3819_v41  ;;  %3886 = vst.msk [vmem:[#allocation4 + $0x138] sm:$0xff] %vm1685_vm8, %v7571_v60 }
 0x45a   : >> { %7594 = vpow2.f32 %v3821_v46  ;;  %3887 = vst.msk [vmem:[#allocation4 + $0x140] sm:$0xff] %vm1685_vm8, %v7573_v10  ;;  %v4175_v46 = vrot.slane %v8856_v1, %v4174_v18 }
 0x45b   : >> { %4135 = vbcast.lane.b32.xlu1 %v9039_v7, 312  ;;  %4131 = vbcast.lane.b32.xlu0 %v9039_v7, 304  ;;  %v7575_v7 = vpop.eup %7574  ;;  %7596 = vpow2.f32 %v3823_v5 }
 0x45c   : >> { %v7577_v59 = vpop.eup %7576  ;;  %3888 = vst.msk [vmem:[#allocation4 + $0x148] sm:$0xff] %vm1685_vm8, %v7575_v7  ;;  %7598 = vpow2.f32 %v3825_v4  ;;  %v4245_v7 = vrot.slane %v8878_v35, %v8610_v26 }
 0x45d   : >> { %v7579_v24 = vpop.eup %7578  ;;  %3889 = vst.msk [vmem:[#allocation4 + $0x150] sm:$0xff] %vm1685_vm8, %v7577_v59  ;;  %7600 = vpow2.f32 %v3827_v22  ;;  %v4210_v22 = vrot.slane %v8856_v1, %v4209_v62  ;;  %v9178_v59 = vld [vmem:[#allocation2 + $0x10] sm:$0xff]  }
 0x45e   : >> { %v7581_v52 = vpop.eup %7580  ;;  %3890 = vst.msk [vmem:[#allocation4 + $0x158] sm:$0xff] %vm1685_vm8, %v7579_v24  ;;  %7602 = vpow2.f32 %v3829_v13  ;;  %v9176_v13 = vld [vmem:[#allocation2 + $0x8] sm:$0xff]   ;;  %v9180_v24 = vld [vmem:[#allocation2 + $0x18] sm:$0xff]  }
 0x45f   : >> { %4146 = vbcast.lane.b32.xlu1 %v9114_v43, 264  ;;  %4142 = vbcast.lane.b32.xlu0 %v9114_v43, 256  ;;  %v7583_v12 = vpop.eup %7582  ;;  %3891 = vst.msk [vmem:[#allocation4 + $0x160] sm:$0xff] %vm1685_vm8, %v7581_v52  ;;  %7604 = vpow2.f32 %v3831_v15 }
 0x460   : >> { %v7585_v33 = vpop.eup %7584  ;;  %3892 = vst.msk [vmem:[#allocation4 + $0x168] sm:$0xff] %vm1685_vm8, %v7583_v12  ;;  %7606 = vpow2.f32 %v3833_v32  ;;  %v9184_v32 = vld [vmem:[#allocation2 + $0x28] sm:$0xff]  }
 0x461   : >> { %v7587_v57 = vpop.eup %7586  ;;  %3893 = vst.msk [vmem:[#allocation4 + $0x170] sm:$0xff] %vm1685_vm8, %v7585_v33  ;;  %7608 = vpow2.f32 %v3835_v53  ;;  %v9188_v53 = vld [vmem:[#allocation2 + $0x38] sm:$0xff]  }
 0x462   : >> { %v7589_v9 = vpop.eup %7588  ;;  %3894 = vst.msk [vmem:[#allocation4 + $0x178] sm:$0xff] %vm1685_vm8, %v7587_v57  ;;  %7610 = vpow2.f32 %v3837_v51 }
 0x463   : >> { %4154 = vbcast.lane.b32.xlu1 %v9114_v43, 280  ;;  %4150 = vbcast.lane.b32.xlu0 %v9114_v43, 272  ;;  %v7591_v29 = vpop.eup %7590  ;;  %3895 = vst.msk [vmem:[#allocation4 + $0x180] sm:$0xff] %vm1685_vm8, %v7589_v9  ;;  %7612 = vpow2.f32 %v3839_v56 }
 0x464   : >> { %v7593_v0 = vpop.eup %7592  ;;  %3896 = vst.msk [vmem:[#allocation4 + $0x188] sm:$0xff] %vm1685_vm8, %v7591_v29  ;;  %7614 = vpow2.f32 %v3841_v2 }
 0x465   : >> { %v7595_v38 = vpop.eup %7594  ;;  %3897 = vst.msk [vmem:[#allocation4 + $0x190] sm:$0xff] %vm1685_vm8, %v7593_v0  ;;  %7616 = vpow2.f32 %v3843_v8 }
 0x466   : >> { %v7597_v39 = vpop.eup %7596  ;;  %3898 = vst.msk [vmem:[#allocation4 + $0x198] sm:$0xff] %vm1685_vm8, %v7595_v38  ;;  %7618 = vpow2.f32 %v3845_v14  ;;  %v4249_v38 = vrot.slane %v8905_v6, %v8610_v26 }
 0x467   : >> { %4162 = vbcast.lane.b32.xlu1 %v9114_v43, 296  ;;  %4158 = vbcast.lane.b32.xlu0 %v9114_v43, 288  ;;  %v7599_v41 = vpop.eup %7598  ;;  %3899 = vst.msk [vmem:[#allocation4 + $0x1a0] sm:$0xff] %vm1685_vm8, %v7597_v39 }
 0x468   : >> { %v7601_v61 = vpop.eup %7600  ;;  %3900 = vst.msk [vmem:[#allocation4 + $0x1a8] sm:$0xff] %vm1685_vm8, %v7599_v41 }
 0x469   : >> { %v7603_v3 = vpop.eup %7602  ;;  %3901 = vst.msk [vmem:[#allocation4 + $0x1b0] sm:$0xff] %vm1685_vm8, %v7601_v61 }
 0x46a   : >> { %v7605_v40 = vpop.eup %7604  ;;  %3902 = vst.msk [vmem:[#allocation4 + $0x1b8] sm:$0xff] %vm1685_vm8, %v7603_v3 }
 0x46b   : >> { %4170 = vbcast.lane.b32.xlu1 %v9114_v43, 312  ;;  %4166 = vbcast.lane.b32.xlu0 %v9114_v43, 304  ;;  %v7607_v16 = vpop.eup %7606  ;;  %3903 = vst.msk [vmem:[#allocation4 + $0x1c0] sm:$0xff] %vm1685_vm8, %v7605_v40 }
 0x46c   : >> { %v7609_v5 = vpop.eup %7608  ;;  %3904 = vst.msk [vmem:[#allocation4 + $0x1c8] sm:$0xff] %vm1685_vm8, %v7607_v16 }
 0x46d   : >> { %v7611_v60 = vpop.eup %7610  ;;  %3905 = vst.msk [vmem:[#allocation4 + $0x1d0] sm:$0xff] %vm1685_vm8, %v7609_v5 }
 0x46e   : >> { %v7613_v43 = vpop.eup %7612  ;;  %3906 = vst.msk [vmem:[#allocation4 + $0x1d8] sm:$0xff] %vm1685_vm8, %v7611_v60 }
 0x46f   : >> { %4181 = vbcast.lane.b32.xlu1 %v4175_v46, 264  ;;  %4177 = vbcast.lane.b32.xlu0 %v4175_v46, 256  ;;  %v7615_v54 = vpop.eup %7614  ;;  %3907 = vst.msk [vmem:[#allocation4 + $0x1e0] sm:$0xff] %vm1685_vm8, %v7613_v43 }
 0x470   : >> { %v7617_v4 = vpop.eup %7616  ;;  %3908 = vst.msk [vmem:[#allocation4 + $0x1e8] sm:$0xff] %vm1685_vm8, %v7615_v54 }
 0x471   : >> { %v7619_v10 = vpop.eup %7618  ;;  %3909 = vst.msk [vmem:[#allocation4 + $0x1f0] sm:$0xff] %vm1685_vm8, %v7617_v4 }
 0x472   : >> { %3910 = vst.msk [vmem:[#allocation4 + $0x1f8] sm:$0xff] %vm1685_vm8, %v7619_v10  ;;  %v3958_v10 = vcombine.high %v8878_v35, %v8878_v35 }
 0x473   : >> { %4189 = vbcast.lane.b32.xlu1 %v4175_v46, 280  ;;  %4185 = vbcast.lane.b32.xlu0 %v4175_v46, 272 }
 0x477   : >> { %4197 = vbcast.lane.b32.xlu1 %v4175_v46, 296  ;;  %4193 = vbcast.lane.b32.xlu0 %v4175_v46, 288 }
 0x47b   : >> { %4205 = vbcast.lane.b32.xlu1 %v4175_v46, 312  ;;  %4201 = vbcast.lane.b32.xlu0 %v4175_v46, 304 }
 0x47f   : >> { %4216 = vbcast.lane.b32.xlu1 %v4210_v22, 264  ;;  %4212 = vbcast.lane.b32.xlu0 %v4210_v22, 256 }
 0x481   : >> { %v3976_v45 = vpop.permute.xlu1 %3975  ;;  %v3968_v15 = vpop.permute.xlu0 %3967 }
 0x482   : >> { %v4284_v1 = vmul.f32 %v4245_v7, %v3976_v45  ;;  %v4282_v52 = vmul.f32 %v4245_v7, %v3968_v15 }
 0x483   : >> { %4224 = vbcast.lane.b32.xlu1 %v4210_v22, 280  ;;  %4220 = vbcast.lane.b32.xlu0 %v4210_v22, 272 }
 0x484   : >> { %4348 = vst.msk [vmem:[#allocation5 + $0x10] sm:$0xff] %vm1685_vm8, %v4284_v1  ;;  %4346 = vst.msk [vmem:[#allocation5] sm:$0xff] %vm1685_vm8, %v4282_v52  ;;  %v4253_v1 = vrot.slane %v3958_v10, %v8610_v26 }
 0x485   : >> { %v3980_v12 = vpop.permute.xlu1 %3979  ;;  %v3972_v50 = vpop.permute.xlu0 %3971 }
 0x486   : >> { %v4285_v51 = vmul.f32 %v4245_v7, %v3980_v12  ;;  %v4283_v33 = vmul.f32 %v4245_v7, %v3972_v50 }
 0x487   : >> { %4232 = vbcast.lane.b32.xlu1 %v4210_v22, 296  ;;  %4228 = vbcast.lane.b32.xlu0 %v4210_v22, 288 }
 0x488   : >> { %4349 = vst.msk [vmem:[#allocation5 + $0x18] sm:$0xff] %vm1685_vm8, %v4285_v51  ;;  %4347 = vst.msk [vmem:[#allocation5 + $0x8] sm:$0xff] %vm1685_vm8, %v4283_v33 }
 0x489   : >> { %v3988_v56 = vpop.permute.xlu1 %3987  ;;  %v3984_v57 = vpop.permute.xlu0 %3983 }
 0x48a   : >> { %v4287_v2 = vmul.f32 %v4245_v7, %v3988_v56  ;;  %v4286_v9 = vmul.f32 %v4245_v7, %v3984_v57 }
 0x48b   : >> { %4240 = vbcast.lane.b32.xlu1 %v4210_v22, 312  ;;  %4236 = vbcast.lane.b32.xlu0 %v4210_v22, 304 }
 0x48c   : >> { %4351 = vst.msk [vmem:[#allocation5 + $0x28] sm:$0xff] %vm1685_vm8, %v4287_v2  ;;  %4350 = vst.msk [vmem:[#allocation5 + $0x20] sm:$0xff] %vm1685_vm8, %v4286_v9 }
 0x48d   : >> { %v3996_v8 = vpop.permute.xlu1 %3995  ;;  %v3992_v29 = vpop.permute.xlu0 %3991 }
 0x48e   : >> { %v4289_v14 = vmul.f32 %v4245_v7, %v3996_v8  ;;  %v4288_v0 = vmul.f32 %v4245_v7, %v3992_v29 }
 0x490   : >> { %4353 = vst.msk [vmem:[#allocation5 + $0x38] sm:$0xff] %vm1685_vm8, %v4289_v14  ;;  %4352 = vst.msk [vmem:[#allocation5 + $0x30] sm:$0xff] %vm1685_vm8, %v4288_v0  ;;  %v3960_v14 = vcombine.high %v8905_v6, %v8905_v6 }
 0x491   : >> { %v4007_v39 = vpop.permute.xlu1 %4006  ;;  %v4003_v41 = vpop.permute.xlu0 %4002 }
 0x492   : >> { %v4291_v61 = vmul.f32 %v4249_v38, %v4007_v39  ;;  %v4290_v3 = vmul.f32 %v4249_v38, %v4003_v41 }
 0x494   : >> { %4355 = vst.msk [vmem:[#allocation5 + $0x48] sm:$0xff] %vm1685_vm8, %v4291_v61  ;;  %4354 = vst.msk [vmem:[#allocation5 + $0x40] sm:$0xff] %vm1685_vm8, %v4290_v3  ;;  %v4257_v61 = vrot.slane %v3960_v14, %v8610_v26 }
 0x495   : >> { %v4015_v46 = vpop.permute.xlu1 %4014  ;;  %v4011_v40 = vpop.permute.xlu0 %4010 }
 0x496   : >> { %v4293_v16 = vmul.f32 %v4249_v38, %v4015_v46  ;;  %v4292_v5 = vmul.f32 %v4249_v38, %v4011_v40 }
 0x498   : >> { %4357 = vst.msk [vmem:[#allocation5 + $0x58] sm:$0xff] %vm1685_vm8, %v4293_v16  ;;  %4356 = vst.msk [vmem:[#allocation5 + $0x50] sm:$0xff] %vm1685_vm8, %v4292_v5 }
 0x499   : >> { %v4023_v60 = vpop.permute.xlu1 %4022  ;;  %v4019_v43 = vpop.permute.xlu0 %4018 }
 0x49a   : >> { %v4295_v54 = vmul.f32 %v4249_v38, %v4023_v60  ;;  %v4294_v4 = vmul.f32 %v4249_v38, %v4019_v43 }
 0x49c   : >> { %4359 = vst.msk [vmem:[#allocation5 + $0x68] sm:$0xff] %vm1685_vm8, %v4295_v54  ;;  %4358 = vst.msk [vmem:[#allocation5 + $0x60] sm:$0xff] %vm1685_vm8, %v4294_v4 }
 0x49d   : >> { %v4031_v22 = vpop.permute.xlu1 %4030  ;;  %v4027_v7 = vpop.permute.xlu0 %4026 }
 0x49e   : >> { %v4297_v45 = vmul.f32 %v4249_v38, %v4031_v22  ;;  %v4296_v15 = vmul.f32 %v4249_v38, %v4027_v7 }
 0x4a0   : >> { %4361 = vst.msk [vmem:[#allocation5 + $0x78] sm:$0xff] %vm1685_vm8, %v4297_v45  ;;  %4360 = vst.msk [vmem:[#allocation5 + $0x70] sm:$0xff] %vm1685_vm8, %v4296_v15 }
 0x4a1   : >> { %v4042_v52 = vpop.permute.xlu1 %4041  ;;  %v4038_v12 = vpop.permute.xlu0 %4037 }
 0x4a2   : >> { %v4299_v50 = vmul.f32 %v4253_v1, %v4042_v52  ;;  %v4298_v51 = vmul.f32 %v4253_v1, %v4038_v12  ;;  %v4261_v52 = vrot.slane %v8999_v58, %v8610_v26 }
 0x4a4   : >> { %4363 = vst.msk [vmem:[#allocation5 + $0x88] sm:$0xff] %vm1685_vm8, %v4299_v50  ;;  %4362 = vst.msk [vmem:[#allocation5 + $0x80] sm:$0xff] %vm1685_vm8, %v4298_v51 }
 0x4a5   : >> { %v4050_v35 = vpop.permute.xlu1 %4049  ;;  %v4046_v33 = vpop.permute.xlu0 %4045 }
 0x4a6   : >> { %v4301_v56 = vmul.f32 %v4253_v1, %v4050_v35  ;;  %v4300_v57 = vmul.f32 %v4253_v1, %v4046_v33 }
 0x4a8   : >> { %4365 = vst.msk [vmem:[#allocation5 + $0x98] sm:$0xff] %vm1685_vm8, %v4301_v56  ;;  %4364 = vst.msk [vmem:[#allocation5 + $0x90] sm:$0xff] %vm1685_vm8, %v4300_v57 }
 0x4a9   : >> { %v4058_v2 = vpop.permute.xlu1 %4057  ;;  %v4054_v9 = vpop.permute.xlu0 %4053 }
 0x4aa   : >> { %v4303_v8 = vmul.f32 %v4253_v1, %v4058_v2  ;;  %v4302_v29 = vmul.f32 %v4253_v1, %v4054_v9 }
 0x4ac   : >> { %4367 = vst.msk [vmem:[#allocation5 + $0xa8] sm:$0xff] %vm1685_vm8, %v4303_v8  ;;  %4366 = vst.msk [vmem:[#allocation5 + $0xa0] sm:$0xff] %vm1685_vm8, %v4302_v29 }
 0x4ad   : >> { %v4066_v0 = vpop.permute.xlu1 %4065  ;;  %v4062_v38 = vpop.permute.xlu0 %4061 }
 0x4ae   : >> { %v4305_v39 = vmul.f32 %v4253_v1, %v4066_v0  ;;  %v4304_v41 = vmul.f32 %v4253_v1, %v4062_v38 }
 0x4b0   : >> { %4369 = vst.msk [vmem:[#allocation5 + $0xb8] sm:$0xff] %vm1685_vm8, %v4305_v39  ;;  %4368 = vst.msk [vmem:[#allocation5 + $0xb0] sm:$0xff] %vm1685_vm8, %v4304_v41 }
 0x4b1   : >> { %v4077_v3 = vpop.permute.xlu1 %4076  ;;  %v4073_v46 = vpop.permute.xlu0 %4072 }
 0x4b2   : >> { %v4307_v40 = vmul.f32 %v4257_v61, %v4077_v3  ;;  %v4306_v16 = vmul.f32 %v4257_v61, %v4073_v46 }
 0x4b4   : >> { %4371 = vst.msk [vmem:[#allocation5 + $0xc8] sm:$0xff] %vm1685_vm8, %v4307_v40  ;;  %4370 = vst.msk [vmem:[#allocation5 + $0xc0] sm:$0xff] %vm1685_vm8, %v4306_v16 }
 0x4b5   : >> { %v4085_v6 = vpop.permute.xlu1 %4084  ;;  %v4081_v5 = vpop.permute.xlu0 %4080 }
 0x4b6   : >> { %v4309_v60 = vmul.f32 %v4257_v61, %v4085_v6  ;;  %v4308_v43 = vmul.f32 %v4257_v61, %v4081_v5 }
 0x4b8   : >> { %4373 = vst.msk [vmem:[#allocation5 + $0xd8] sm:$0xff] %vm1685_vm8, %v4309_v60  ;;  %4372 = vst.msk [vmem:[#allocation5 + $0xd0] sm:$0xff] %vm1685_vm8, %v4308_v43 }
 0x4b9   : >> { %v4093_v54 = vpop.permute.xlu1 %4092  ;;  %v4089_v4 = vpop.permute.xlu0 %4088 }
 0x4ba   : >> { %v4311_v10 = vmul.f32 %v4257_v61, %v4093_v54  ;;  %v4310_v22 = vmul.f32 %v4257_v61, %v4089_v4 }
 0x4bc   : >> { %4375 = vst.msk [vmem:[#allocation5 + $0xe8] sm:$0xff] %vm1685_vm8, %v4311_v10  ;;  %4374 = vst.msk [vmem:[#allocation5 + $0xe0] sm:$0xff] %vm1685_vm8, %v4310_v22 }
 0x4bd   : >> { %v4101_v7 = vpop.permute.xlu1 %4100  ;;  %v4097_v45 = vpop.permute.xlu0 %4096 }
 0x4be   : >> { %v4313_v15 = vmul.f32 %v4257_v61, %v4101_v7  ;;  %v4312_v1 = vmul.f32 %v4257_v61, %v4097_v45  ;;  %v4265_v61 = vrot.slane %v9059_v34, %v8610_v26  ;;  %v3959_v7 = vcombine.high %v8999_v58, %v8999_v58 }
 0x4c0   : >> { %4377 = vst.msk [vmem:[#allocation5 + $0xf8] sm:$0xff] %vm1685_vm8, %v4313_v15  ;;  %4376 = vst.msk [vmem:[#allocation5 + $0xf0] sm:$0xff] %vm1685_vm8, %v4312_v1 }
 0x4c1   : >> { %v4112_v12 = vpop.permute.xlu1 %4111  ;;  %v4108_v50 = vpop.permute.xlu0 %4107 }
 0x4c2   : >> { %v4315_v51 = vmul.f32 %v4261_v52, %v4112_v12  ;;  %v4314_v35 = vmul.f32 %v4261_v52, %v4108_v50  ;;  %v4269_v12 = vrot.slane %v3959_v7, %v8610_v26 }
 0x4c4   : >> { %4379 = vst.msk [vmem:[#allocation5 + $0x108] sm:$0xff] %vm1685_vm8, %v4315_v51  ;;  %4378 = vst.msk [vmem:[#allocation5 + $0x100] sm:$0xff] %vm1685_vm8, %v4314_v35 }
 0x4c5   : >> { %v4120_v33 = vpop.permute.xlu1 %4119  ;;  %v4116_v56 = vpop.permute.xlu0 %4115 }
 0x4c6   : >> { %v4317_v57 = vmul.f32 %v4261_v52, %v4120_v33  ;;  %v4316_v2 = vmul.f32 %v4261_v52, %v4116_v56 }
 0x4c8   : >> { %4381 = vst.msk [vmem:[#allocation5 + $0x118] sm:$0xff] %vm1685_vm8, %v4317_v57  ;;  %4380 = vst.msk [vmem:[#allocation5 + $0x110] sm:$0xff] %vm1685_vm8, %v4316_v2 }
 0x4c9   : >> { %v4128_v9 = vpop.permute.xlu1 %4127  ;;  %v4124_v8 = vpop.permute.xlu0 %4123 }
 0x4ca   : >> { %v4319_v29 = vmul.f32 %v4261_v52, %v4128_v9  ;;  %v4318_v14 = vmul.f32 %v4261_v52, %v4124_v8 }
 0x4cc   : >> { %4383 = vst.msk [vmem:[#allocation5 + $0x128] sm:$0xff] %vm1685_vm8, %v4319_v29  ;;  %4382 = vst.msk [vmem:[#allocation5 + $0x120] sm:$0xff] %vm1685_vm8, %v4318_v14 }
 0x4cd   : >> { %v4136_v0 = vpop.permute.xlu1 %4135  ;;  %v4132_v38 = vpop.permute.xlu0 %4131 }
 0x4ce   : >> { %v4321_v39 = vmul.f32 %v4261_v52, %v4136_v0  ;;  %v4320_v41 = vmul.f32 %v4261_v52, %v4132_v38  ;;  %v3961_v0 = vcombine.high %v9059_v34, %v9059_v34 }
 0x4d0   : >> { %4385 = vst.msk [vmem:[#allocation5 + $0x138] sm:$0xff] %vm1685_vm8, %v4321_v39  ;;  %4384 = vst.msk [vmem:[#allocation5 + $0x130] sm:$0xff] %vm1685_vm8, %v4320_v41 }
 0x4d1   : >> { %v4147_v3 = vpop.permute.xlu1 %4146  ;;  %v4143_v46 = vpop.permute.xlu0 %4142 }
 0x4d2   : >> { %v4323_v40 = vmul.f32 %v4265_v61, %v4147_v3  ;;  %v4322_v16 = vmul.f32 %v4265_v61, %v4143_v46  ;;  %v4273_v3 = vrot.slane %v3961_v0, %v8610_v26 }
 0x4d4   : >> { %4387 = vst.msk [vmem:[#allocation5 + $0x148] sm:$0xff] %vm1685_vm8, %v4323_v40  ;;  %4386 = vst.msk [vmem:[#allocation5 + $0x140] sm:$0xff] %vm1685_vm8, %v4322_v16 }
 0x4d5   : >> { %v4155_v6 = vpop.permute.xlu1 %4154  ;;  %v4151_v5 = vpop.permute.xlu0 %4150 }
 0x4d6   : >> { %v4325_v60 = vmul.f32 %v4265_v61, %v4155_v6  ;;  %v4324_v43 = vmul.f32 %v4265_v61, %v4151_v5 }
 0x4d8   : >> { %4389 = vst.msk [vmem:[#allocation5 + $0x158] sm:$0xff] %vm1685_vm8, %v4325_v60  ;;  %4388 = vst.msk [vmem:[#allocation5 + $0x150] sm:$0xff] %vm1685_vm8, %v4324_v43 }
 0x4d9   : >> { %v4163_v54 = vpop.permute.xlu1 %4162  ;;  %v4159_v4 = vpop.permute.xlu0 %4158 }
 0x4da   : >> { %v4327_v10 = vmul.f32 %v4265_v61, %v4163_v54  ;;  %v4326_v22 = vmul.f32 %v4265_v61, %v4159_v4 }
 0x4dc   : >> { %4391 = vst.msk [vmem:[#allocation5 + $0x168] sm:$0xff] %vm1685_vm8, %v4327_v10  ;;  %4390 = vst.msk [vmem:[#allocation5 + $0x160] sm:$0xff] %vm1685_vm8, %v4326_v22 }
 0x4dd   : >> { %v4171_v45 = vpop.permute.xlu1 %4170  ;;  %v4167_v15 = vpop.permute.xlu0 %4166 }
 0x4de   : >> { %v4329_v1 = vmul.f32 %v4265_v61, %v4171_v45  ;;  %v4328_v52 = vmul.f32 %v4265_v61, %v4167_v15 }
 0x4e0   : >> { %4393 = vst.msk [vmem:[#allocation5 + $0x178] sm:$0xff] %vm1685_vm8, %v4329_v1  ;;  %4392 = vst.msk [vmem:[#allocation5 + $0x170] sm:$0xff] %vm1685_vm8, %v4328_v52 }
 0x4e1   : >> { %v4182_v50 = vpop.permute.xlu1 %4181  ;;  %v4178_v51 = vpop.permute.xlu0 %4177 }
 0x4e2   : >> { %v4331_v35 = vmul.f32 %v4269_v12, %v4182_v50  ;;  %v4330_v33 = vmul.f32 %v4269_v12, %v4178_v51 }
 0x4e4   : >> { %4395 = vst.msk [vmem:[#allocation5 + $0x188] sm:$0xff] %vm1685_vm8, %v4331_v35  ;;  %4394 = vst.msk [vmem:[#allocation5 + $0x180] sm:$0xff] %vm1685_vm8, %v4330_v33 }
 0x4e5   : >> { %v4190_v58 = vpop.permute.xlu1 %4189  ;;  %v4186_v56 = vpop.permute.xlu0 %4185 }
 0x4e6   : >> { %v4333_v57 = vmul.f32 %v4269_v12, %v4190_v58  ;;  %v4332_v2 = vmul.f32 %v4269_v12, %v4186_v56 }
 0x4e8   : >> { %4397 = vst.msk [vmem:[#allocation5 + $0x198] sm:$0xff] %vm1685_vm8, %v4333_v57  ;;  %4396 = vst.msk [vmem:[#allocation5 + $0x190] sm:$0xff] %vm1685_vm8, %v4332_v2 }
 0x4e9   : >> { %v4198_v9 = vpop.permute.xlu1 %4197  ;;  %v4194_v8 = vpop.permute.xlu0 %4193 }
 0x4ea   : >> { %v4335_v29 = vmul.f32 %v4269_v12, %v4198_v9  ;;  %v4334_v14 = vmul.f32 %v4269_v12, %v4194_v8 }
 0x4ec   : >> { %4399 = vst.msk [vmem:[#allocation5 + $0x1a8] sm:$0xff] %vm1685_vm8, %v4335_v29  ;;  %4398 = vst.msk [vmem:[#allocation5 + $0x1a0] sm:$0xff] %vm1685_vm8, %v4334_v14 }
 0x4ed   : >> { %v4206_v38 = vpop.permute.xlu1 %4205  ;;  %v4202_v39 = vpop.permute.xlu0 %4201 }
 0x4ee   : >> { %v4337_v41 = vmul.f32 %v4269_v12, %v4206_v38  ;;  %v4336_v61 = vmul.f32 %v4269_v12, %v4202_v39 }
 0x4f0   : >> { %4401 = vst.msk [vmem:[#allocation5 + $0x1b8] sm:$0xff] %vm1685_vm8, %v4337_v41  ;;  %4400 = vst.msk [vmem:[#allocation5 + $0x1b0] sm:$0xff] %vm1685_vm8, %v4336_v61 }
 0x4f1   : >> { %v4217_v46 = vpop.permute.xlu1 %4216  ;;  %v4213_v40 = vpop.permute.xlu0 %4212 }
 0x4f2   : >> { %v4339_v16 = vmul.f32 %v4273_v3, %v4217_v46  ;;  %v4338_v6 = vmul.f32 %v4273_v3, %v4213_v40 }
 0x4f4   : >> { %4403 = vst.msk [vmem:[#allocation5 + $0x1c8] sm:$0xff] %vm1685_vm8, %v4339_v16  ;;  %4402 = vst.msk [vmem:[#allocation5 + $0x1c0] sm:$0xff] %vm1685_vm8, %v4338_v6 }
 0x4f5   : >> { %v4225_v34 = vpop.permute.xlu1 %4224  ;;  %v4221_v5 = vpop.permute.xlu0 %4220 }
 0x4f6   : >> { %v4341_v60 = vmul.f32 %v4273_v3, %v4225_v34  ;;  %v4340_v43 = vmul.f32 %v4273_v3, %v4221_v5 }
 0x4f8   : >> { %4405 = vst.msk [vmem:[#allocation5 + $0x1d8] sm:$0xff] %vm1685_vm8, %v4341_v60  ;;  %4404 = vst.msk [vmem:[#allocation5 + $0x1d0] sm:$0xff] %vm1685_vm8, %v4340_v43 }
 0x4f9   : >> { %v4233_v54 = vpop.permute.xlu1 %4232  ;;  %v4229_v4 = vpop.permute.xlu0 %4228 }
 0x4fa   : >> { %v4343_v10 = vmul.f32 %v4273_v3, %v4233_v54  ;;  %v4342_v22 = vmul.f32 %v4273_v3, %v4229_v4 }
 0x4fc   : >> { %4407 = vst.msk [vmem:[#allocation5 + $0x1e8] sm:$0xff] %vm1685_vm8, %v4343_v10  ;;  %4406 = vst.msk [vmem:[#allocation5 + $0x1e0] sm:$0xff] %vm1685_vm8, %v4342_v22 }
 0x4fd   : >> { %v4241_v7 = vpop.permute.xlu1 %4240  ;;  %v4237_v45 = vpop.permute.xlu0 %4236 }
 0x4fe   : >> { %v4345_v15 = vmul.f32 %v4273_v3, %v4241_v7  ;;  %v4344_v1 = vmul.f32 %v4273_v3, %v4237_v45 }
 0x500   : >> { %4409 = vst.msk [vmem:[#allocation5 + $0x1f8] sm:$0xff] %vm1685_vm8, %v4345_v15  ;;  %4408 = vst.msk [vmem:[#allocation5 + $0x1f0] sm:$0xff] %vm1685_vm8, %v4344_v1 }
 0x501 LB: >>> { %s6190_s17 = sshll.u32 %s7978_s14, 8  ;;  %s4423_s14 = sadd.s32 1, %s7978_s14   ;;  %s7978_s14 = sphi %s9296_s14, %s4423_s14   ;;  %v7974_v30 = vphi %v9174_v30, %v9875_v30   ;;  %v7970_v13 = vphi %v9176_v13, %v9874_v13   ;;  %v7966_v59 = vphi %v9178_v59, %v9873_v59   ;;  %v7962_v24 = vphi %v9180_v24, %v9872_v24   ;;  %v7958_v37 = vphi %v9182_v37, %v9871_v37   ;;  %v7954_v32 = vphi %v9184_v32, %v9870_v32   ;;  %v7950_v49 = vphi %v9186_v49, %v9869_v49   ;;  %v7946_v53 = vphi %v9188_v53, %v9868_v53  }
 0x502   : >>> { %s9310_s13 = scalar_lea.vmem [#allocation4], %s6190_s17  ;;  %s9313_s19 = scalar_lea.vmem [#allocation5], %s6190_s17 }
 0x503   : >>> { %v4435_v52 = vld [vmem:[%s9310_s13] sm:$0xff]  ;;  %v4436_v50 = vld [vmem:[%s9310_s13 + $0x8] sm:$0xff]  ;;  %v4437_v58 = vld [vmem:[%s9310_s13 + $0x10] sm:$0xff]  ;;  %p4420_p12 = scmp.ge.s32.totalorder %s4423_s14, 2  }
 0x504   : >>> { %v4443_v51 = vmul.f32 %v7974_v30, %v4435_v52  ;;  %v4444_v35 = vmul.f32 %v7970_v13, %v4436_v50  ;;  %v4445_v57 = vmul.f32 %v7966_v59, %v4437_v58  ;;  %v4438_v2 = vld [vmem:[%s9310_s13 + $0x18] sm:$0xff]  ;;  %v4439_v8 = vld [vmem:[%s9310_s13 + $0x20] sm:$0xff]  ;;  %v4440_v13 = vld [vmem:[%s9310_s13 + $0x28] sm:$0xff]  ;;  %vm5200_vm11 = vcmask (%p4420_p12), 1041409   ;;  %s5215_s29 = scalar_lea.vmem (%p4420_p12), [#allocation10], %s8853_s25  ;;  %s3555_s27 = sadd.s32 (%p4420_p12), 1, %s7942_s27  }
 0x505   : >>> { %v4446_v0 = vmul.f32 %v7962_v24, %v4438_v2  ;;  %v4447_v38 = vmul.f32 %v7958_v37, %v4439_v8  ;;  %v4448_v61 = vmul.f32 %v7954_v32, %v4440_v13  ;;  %v4441_v59 = vld [vmem:[%s9310_s13 + $0x30] sm:$0xff]  ;;  %v4442_v46 = vld [vmem:[%s9310_s13 + $0x38] sm:$0xff]  ;;  %v6101_v32 = vld [vmem:[%s9310_s13 + $0x40] sm:$0xff]  ;;  %vm5202_vm12 = vcmask (%p4420_p12), 1042434   ;;  %p3552_p1 = scmp.ge.s32.totalorder (%p4420_p12), %s3555_s27, 2  }
 0x506   : >>> { %v4449_v40 = vmul.f32 %v7950_v49, %v4441_v59  ;;  %v4450_v16 = vmul.f32 %v7946_v53, %v4442_v46  ;;  %v6102_v43 = vld [vmem:[%s9310_s13 + $0x48] sm:$0xff]  ;;  %v6103_v4 = vld [vmem:[%s9310_s13 + $0x50] sm:$0xff]  ;;  %v6104_v45 = vld [vmem:[%s9310_s13 + $0x58] sm:$0xff]  ;;  %vm5204_vm13 = vcmask (%p4420_p12), 1043459   ;;  %vm5206_vm14 = vcmask (%p4420_p12), 1044484  }
 0x507   : >>> { %v4452_v12 = vld [vmem:[%s9313_s19] sm:$0xff]  ;;  %v4453_v33 = vld [vmem:[%s9313_s19 + $0x8] sm:$0xff]  ;;  %v4454_v56 = vld [vmem:[%s9313_s19 + $0x10] sm:$0xff]  ;;  %vm5208_vm15 = vcmask (%p4420_p12), 1045509   ;;  %vm5210_vm0 = vcmask (%p4420_p12), 1046534   ;;  %vm5212_vm1 = vcmask (%p4420_p12), 1047559  }
 0x508   : >>> { %v4455_v9 = vld [vmem:[%s9313_s19 + $0x18] sm:$0xff]  ;;  %v4460_v29 = vadd.f32 %v4452_v12, %v4443_v51  ;;  %v4461_v14 = vadd.f32 %v4453_v33, %v4444_v35  ;;  %v4456_v30 = vld [vmem:[%s9313_s19 + $0x20] sm:$0xff]  ;;  %v4457_v39 = vld [vmem:[%s9313_s19 + $0x28] sm:$0xff]  ;;  %v4462_v41 = vadd.f32 %v4454_v56, %v4445_v57 }
 0x509   : >>> { %v4458_v3 = vld [vmem:[%s9313_s19 + $0x30] sm:$0xff]  ;;  %v4463_v24 = vadd.f32 %v4455_v9, %v4446_v0  ;;  %v4464_v37 = vadd.f32 %v4456_v30, %v4447_v38  ;;  %v4459_v6 = vld [vmem:[%s9313_s19 + $0x38] sm:$0xff]  ;;  %v6111_v34 = vld [vmem:[%s9313_s19 + $0x40] sm:$0xff]  ;;  %v4465_v5 = vadd.f32 %v4457_v39, %v4448_v61 }
 0x50a   : >>> { %4468 = vst.msk [vmem:[%s9313_s19] sm:$0xff] %vm1685_vm8, %v4460_v29  ;;  %4469 = vst.msk [vmem:[%s9313_s19 + $0x8] sm:$0xff] %vm1685_vm8, %v4461_v14  ;;  %v4487_v60 = vmul.f32 %v6101_v32, %v4460_v29  ;;  %v6112_v54 = vld [vmem:[%s9313_s19 + $0x48] sm:$0xff]  ;;  %v4466_v49 = vadd.f32 %v4458_v3, %v4449_v40  ;;  %v4467_v53 = vadd.f32 %v4459_v6, %v4450_v16  ;;  %v6113_v7 = vld [vmem:[%s9313_s19 + $0x50] sm:$0xff] }
 0x50b   : >>> { %4470 = vst.msk [vmem:[%s9313_s19 + $0x10] sm:$0xff] %vm1685_vm8, %v4462_v41  ;;  %4471 = vst.msk [vmem:[%s9313_s19 + $0x18] sm:$0xff] %vm1685_vm8, %v4463_v24  ;;  %v4488_v10 = vmul.f32 %v6102_v43, %v4461_v14  ;;  %v4489_v22 = vmul.f32 %v6103_v4, %v4462_v41  ;;  %v6114_v15 = vld [vmem:[%s9313_s19 + $0x58] sm:$0xff]  ;;  %v4490_v52 = vmul.f32 %v6104_v45, %v4463_v24  ;;  %v6105_v12 = vld [vmem:[%s9310_s13 + $0x60] sm:$0xff] }
 0x50c   : >>> { %4472 = vst.msk [vmem:[%s9313_s19 + $0x20] sm:$0xff] %vm1685_vm8, %v4464_v37  ;;  %4473 = vst.msk [vmem:[%s9313_s19 + $0x28] sm:$0xff] %vm1685_vm8, %v4465_v5  ;;  %v4504_v1 = vadd.f32 %v6111_v34, %v4487_v60  ;;  %v6115_v50 = vld [vmem:[%s9313_s19 + $0x60] sm:$0xff]  ;;  %v6106_v51 = vld [vmem:[%s9310_s13 + $0x68] sm:$0xff]  ;;  %v4491_v58 = vmul.f32 %v6105_v12, %v4464_v37 }
 0x50d   : >>> { %4474 = vst.msk [vmem:[%s9313_s19 + $0x30] sm:$0xff] %vm1685_vm8, %v4466_v49  ;;  %4475 = vst.msk [vmem:[%s9313_s19 + $0x38] sm:$0xff] %vm1685_vm8, %v4467_v53  ;;  %v4505_v35 = vadd.f32 %v6112_v54, %v4488_v10  ;;  %v4506_v33 = vadd.f32 %v6113_v7, %v4489_v22  ;;  %v4492_v56 = vmul.f32 %v6106_v51, %v4465_v5  ;;  %v6116_v57 = vld [vmem:[%s9313_s19 + $0x68] sm:$0xff]  ;;  %v6107_v2 = vld [vmem:[%s9310_s13 + $0x70] sm:$0xff] }
 0x50e   : >>> { %v6117_v9 = vld [vmem:[%s9313_s19 + $0x70] sm:$0xff]  ;;  %6119 = vst.msk [vmem:[%s9313_s19 + $0x40] sm:$0xff] %vm1685_vm8, %v4504_v1  ;;  %v4507_v8 = vadd.f32 %v6114_v15, %v4490_v52  ;;  %v4493_v29 = vmul.f32 %v6107_v2, %v4466_v49  ;;  %v6108_v14 = vld [vmem:[%s9310_s13 + $0x78] sm:$0xff]  ;;  %v6129_v38 = vld [vmem:[%s9310_s13 + $0x80] sm:$0xff]  ;;  %v4508_v30 = vadd.f32 %v6115_v50, %v4491_v58 }
 0x50f   : >>> { %v6118_v0 = vld [vmem:[%s9313_s19 + $0x78] sm:$0xff]  ;;  %6120 = vst.msk [vmem:[%s9313_s19 + $0x48] sm:$0xff] %vm1685_vm8, %v4505_v35  ;;  %6121 = vst.msk [vmem:[%s9313_s19 + $0x50] sm:$0xff] %vm1685_vm8, %v4506_v33  ;;  %v4509_v13 = vadd.f32 %v6116_v57, %v4492_v56  ;;  %v4494_v39 = vmul.f32 %v6108_v14, %v4467_v53  ;;  %v4531_v41 = vmul.f32 %v6129_v38, %v4504_v1  ;;  %v6139_v61 = vld [vmem:[%s9313_s19 + $0x80] sm:$0xff] }
 0x510   : >>> { %v6130_v59 = vld [vmem:[%s9310_s13 + $0x88] sm:$0xff]  ;;  %6122 = vst.msk [vmem:[%s9313_s19 + $0x58] sm:$0xff] %vm1685_vm8, %v4507_v8  ;;  %v4510_v46 = vadd.f32 %v6117_v9, %v4493_v29  ;;  %v6131_v37 = vld [vmem:[%s9310_s13 + $0x90] sm:$0xff]  ;;  %v6132_v16 = vld [vmem:[%s9310_s13 + $0x98] sm:$0xff] }
 0x511   : >>> { %v6140_v3 = vld [vmem:[%s9313_s19 + $0x88] sm:$0xff]  ;;  %v4532_v24 = vmul.f32 %v6130_v59, %v4505_v35  ;;  %v6141_v40 = vld [vmem:[%s9313_s19 + $0x90] sm:$0xff]  ;;  %6123 = vst.msk [vmem:[%s9313_s19 + $0x60] sm:$0xff] %vm1685_vm8, %v4508_v30  ;;  %6124 = vst.msk [vmem:[%s9313_s19 + $0x68] sm:$0xff] %vm1685_vm8, %v4509_v13  ;;  %v4511_v6 = vadd.f32 %v6118_v0, %v4494_v39  ;;  %v4548_v32 = vadd.f32 %v6139_v61, %v4531_v41 }
 0x512   : >>> { %v4533_v34 = vmul.f32 %v6131_v37, %v4506_v33  ;;  %v4534_v5 = vmul.f32 %v6132_v16, %v4507_v8  ;;  %v6142_v60 = vld [vmem:[%s9313_s19 + $0x98] sm:$0xff]  ;;  %v6133_v43 = vld [vmem:[%s9310_s13 + $0xa0] sm:$0xff]  ;;  %6125 = vst.msk [vmem:[%s9313_s19 + $0x70] sm:$0xff] %vm1685_vm8, %v4510_v46  ;;  %v6134_v53 = vld [vmem:[%s9310_s13 + $0xa8] sm:$0xff] }
 0x513   : >>> { %v6143_v54 = vld [vmem:[%s9313_s19 + $0xa0] sm:$0xff]  ;;  %v4549_v4 = vadd.f32 %v6140_v3, %v4532_v24  ;;  %v4535_v49 = vmul.f32 %v6133_v43, %v4508_v30  ;;  %v6144_v10 = vld [vmem:[%s9313_s19 + $0xa8] sm:$0xff]  ;;  %v6135_v22 = vld [vmem:[%s9310_s13 + $0xb0] sm:$0xff]  ;;  %6126 = vst.msk [vmem:[%s9313_s19 + $0x78] sm:$0xff] %vm1685_vm8, %v4511_v6  ;;  %v4536_v15 = vmul.f32 %v6134_v53, %v4509_v13 }
 0x514   : >>> { %6147 = vst.msk [vmem:[%s9313_s19 + $0x80] sm:$0xff] %vm1685_vm8, %v4548_v32  ;;  %v4550_v7 = vadd.f32 %v6141_v40, %v4533_v34  ;;  %v4551_v45 = vadd.f32 %v6142_v60, %v4534_v5  ;;  %v4537_v1 = vmul.f32 %v6135_v22, %v4510_v46  ;;  %v6145_v52 = vld [vmem:[%s9313_s19 + $0xb0] sm:$0xff]  ;;  %v6136_v12 = vld [vmem:[%s9310_s13 + $0xb8] sm:$0xff]  ;;  %v6157_v33 = vld [vmem:[%s9310_s13 + $0xc0] sm:$0xff] }
 0x515   : >>> { %v6146_v50 = vld [vmem:[%s9313_s19 + $0xb8] sm:$0xff]  ;;  %6148 = vst.msk [vmem:[%s9313_s19 + $0x88] sm:$0xff] %vm1685_vm8, %v4549_v4  ;;  %v4552_v51 = vadd.f32 %v6143_v54, %v4535_v49  ;;  %v4538_v35 = vmul.f32 %v6136_v12, %v4511_v6  ;;  %v6167_v58 = vld [vmem:[%s9313_s19 + $0xc0] sm:$0xff]  ;;  %v6158_v56 = vld [vmem:[%s9310_s13 + $0xc8] sm:$0xff]  ;;  %v4553_v57 = vadd.f32 %v6144_v10, %v4536_v15  ;;  %v4575_v9 = vmul.f32 %v6157_v33, %v4548_v32 }
 0x516   : >>> { %6149 = vst.msk [vmem:[%s9313_s19 + $0x90] sm:$0xff] %vm1685_vm8, %v4550_v7  ;;  %6150 = vst.msk [vmem:[%s9313_s19 + $0x98] sm:$0xff] %vm1685_vm8, %v4551_v45  ;;  %v4554_v2 = vadd.f32 %v6145_v52, %v4537_v1  ;;  %v4576_v8 = vmul.f32 %v6158_v56, %v4549_v4  ;;  %v6168_v29 = vld [vmem:[%s9313_s19 + $0xc8] sm:$0xff]  ;;  %v6159_v14 = vld [vmem:[%s9310_s13 + $0xd0] sm:$0xff]  ;;  %v4753_v15 = vrot.slane (%p4420_p12), %v8865_v28, %v8604_v31 }
 0x517   : >>> { %v6169_v0 = vld [vmem:[%s9313_s19 + $0xd0] sm:$0xff]  ;;  %6151 = vst.msk [vmem:[%s9313_s19 + $0xa0] sm:$0xff] %vm1685_vm8, %v4552_v51  ;;  %v4555_v38 = vadd.f32 %v6146_v50, %v4538_v35  ;;  %v4577_v30 = vmul.f32 %v6159_v14, %v4550_v7  ;;  %v6160_v13 = vld [vmem:[%s9310_s13 + $0xd8] sm:$0xff]  ;;  %v6161_v41 = vld [vmem:[%s9310_s13 + $0xe0] sm:$0xff]  ;;  %v4592_v61 = vadd.f32 %v6167_v58, %v4575_v9   ;;  %v4788_v1 = vrot.slane (%p4420_p12), %v8865_v28, %v8607_v25 }
 0x518   : >>> { %v6170_v39 = vld [vmem:[%s9313_s19 + $0xd8] sm:$0xff]  ;;  %6152 = vst.msk [vmem:[%s9313_s19 + $0xa8] sm:$0xff] %vm1685_vm8, %v4553_v57  ;;  %6153 = vst.msk [vmem:[%s9313_s19 + $0xb0] sm:$0xff] %vm1685_vm8, %v4554_v2  ;;  %v4593_v3 = vadd.f32 %v6168_v29, %v4576_v8   ;;  %v4578_v59 = vmul.f32 %v6160_v13, %v4551_v45  ;;  %v4579_v46 = vmul.f32 %v6161_v41, %v4552_v51  ;;  %v6171_v24 = vld [vmem:[%s9313_s19 + $0xe0] sm:$0xff] }
 0x519   : >>> { %v6162_v37 = vld [vmem:[%s9310_s13 + $0xe8] sm:$0xff]  ;;  %6154 = vst.msk [vmem:[%s9313_s19 + $0xb8] sm:$0xff] %vm1685_vm8, %v4555_v38  ;;  %v4594_v16 = vadd.f32 %v6169_v0, %v4577_v30   ;;  %v6163_v32 = vld [vmem:[%s9310_s13 + $0xf0] sm:$0xff]  ;;  %v6164_v5 = vld [vmem:[%s9310_s13 + $0xf8] sm:$0xff]  ;;  %v9875_v30 = vmov %v4592_v61  ;;  %4422 = sbr.rel (!%p4420_p12) target bundleno = 1281 (0x501), region = 155  ;;  %v4683_v45 = vrot.slane (%p4420_p12), %v8865_v28, %v8610_v26  ;;  %v4823_v52 = vrot.slane (%p4420_p12), %v8865_v28, %v4104_v44 }
 0x51a   : >>> { %v6172_v40 = vld [vmem:[%s9313_s19 + $0xe8] sm:$0xff]  ;;  %v4580_v6 = vmul.f32 %v6162_v37, %v4553_v57  ;;  %v6173_v34 = vld [vmem:[%s9313_s19 + $0xf0] sm:$0xff]  ;;  %6175 = vst.msk [vmem:[%s9313_s19 + $0xc0] sm:$0xff] %vm1685_vm8, %v4592_v61  ;;  %6176 = vst.msk [vmem:[%s9313_s19 + $0xc8] sm:$0xff] %vm1685_vm8, %v4593_v3  ;;  %v4595_v60 = vadd.f32 %v6170_v39, %v4578_v59   ;;  %v4596_v43 = vadd.f32 %v6171_v24, %v4579_v46   ;;  %v9874_v13 = vmov %v4593_v3 }
 0x51b   : >>> { %v4581_v54 = vmul.f32 %v6163_v32, %v4554_v2  ;;  %v4582_v4 = vmul.f32 %v6164_v5, %v4555_v38  ;;  %v6174_v49 = vld [vmem:[%s9313_s19 + $0xf8] sm:$0xff]  ;;  %6177 = vst.msk [vmem:[%s9313_s19 + $0xd0] sm:$0xff] %vm1685_vm8, %v4594_v16  ;;  %v9873_v59 = vmov %v4594_v16  ;;  %4608 = vst.msk [vmem:[#allocation2] sm:$0xff] (%p4420_p12), %vm1685_vm8, %v4592_v61  ;;  %4693 = vbcast.lane.b32.xlu1 (%p4420_p12), %v4683_v45, 272  ;;  %4685 = vbcast.lane.b32.xlu0 (%p4420_p12), %v4683_v45, 256 }
 0x51c   : >>> { %v4597_v10 = vadd.f32 %v6172_v40, %v4580_v6   ;;  %6178 = vst.msk [vmem:[%s9313_s19 + $0xd8] sm:$0xff] %vm1685_vm8, %v4595_v60  ;;  %6179 = vst.msk [vmem:[%s9313_s19 + $0xe0] sm:$0xff] %vm1685_vm8, %v4596_v43  ;;  %v9871_v37 = vmov %v4596_v43  ;;  %v9872_v24 = vmov %v4595_v60  ;;  %v4858_v12 = vrot.slane (%p4420_p12), %v8865_v28, %v4139_v27 }
 0x51d   : >>> { %v4598_v22 = vadd.f32 %v6173_v34, %v4581_v54   ;;  %v4599_v7 = vadd.f32 %v6174_v49, %v4582_v4   ;;  %4609 = vst.msk [vmem:[#allocation2 + $0x8] sm:$0xff] (%p4420_p12), %vm1685_vm8, %v4593_v3  ;;  %4610 = vst.msk [vmem:[#allocation2 + $0x10] sm:$0xff] (%p4420_p12), %vm1685_vm8, %v4594_v16  ;;  %v4893_v50 = vrot.slane (%p4420_p12), %v8865_v28, %v4174_v18 }
 0x51e   : >>> { %6180 = vst.msk [vmem:[%s9313_s19 + $0xe8] sm:$0xff] %vm1685_vm8, %v4597_v10  ;;  %v9870_v32 = vmov %v4597_v10  ;;  %4611 = vst.msk [vmem:[#allocation2 + $0x18] sm:$0xff] (%p4420_p12), %vm1685_vm8, %v4595_v60  ;;  %v4928_v44 = vrot.slane (%p4420_p12), %v8865_v28, %v4209_v62 }
 0x51f   : >>> { %6181 = vst.msk [vmem:[%s9313_s19 + $0xf0] sm:$0xff] %vm1685_vm8, %v4598_v22  ;;  %6182 = vst.msk [vmem:[%s9313_s19 + $0xf8] sm:$0xff] %vm1685_vm8, %v4599_v7  ;;  %v9868_v53 = vmov %v4599_v7  ;;  %v9869_v49 = vmov %v4598_v22  ;;  %4697 = vbcast.lane.b32.xlu1 (%p4420_p12), %v4683_v45, 280  ;;  %4689 = vbcast.lane.b32.xlu0 (%p4420_p12), %v4683_v45, 264 }
 0x520   : >> { %4612 = vst.msk [vmem:[#allocation2 + $0x20] sm:$0xff] %vm1685_vm8, %v4596_v43  ;;  %4613 = vst.msk [vmem:[#allocation2 + $0x28] sm:$0xff] %vm1685_vm8, %v4597_v10  ;;  %v4718_v53 = vrot.slane %v8865_v28, %v9865_v19  ;;  %s9876_s26 = sld [smem:[#allocation41_spill]] (%p3552_p1)  ;;  %s6186_s15 = sshll.u32 (%p3552_p1), %s7926_s21, 2 }
 0x521   : >> { %4614 = vst.msk [vmem:[#allocation2 + $0x30] sm:$0xff] %vm1685_vm8, %v4598_v22  ;;  %4615 = vst.msk [vmem:[#allocation2 + $0x38] sm:$0xff] %vm1685_vm8, %v4599_v7  ;;  %s5855_s28 = sadd.s32 (%p3552_p1), %s6186_s15, %s8290_s16  ;;  %s9877_s24 = sld [smem:[#allocation34_spill]] (%p3552_p1) }
 0x522   : > { %s6187_s12 = sshll.u32 (%p3552_p1), %s5855_s28, 7  ;;  %s5858_s27 = sshll.u32 (%p3552_p1), %s8303_s11, 4  ;;  %s9748_s27 = int_to_ptr.vmem [resolvable:$true] %s5858_s27 }
 0x523   : >> { %4705 = vbcast.lane.b32.xlu1 %v4683_v45, 296  ;;  %4701 = vbcast.lane.b32.xlu0 %v4683_v45, 288  ;;  %s9878_s14 = sld [smem:[#allocation42_spill]] (%p3552_p1)  ;;  %s9756_s21 = scalar_lea.sflag (%p3552_p1), [#allocation13], %s484_s22 }
 0x524   : > { %s7788_s16 = scalar_lea.vmem (%p3552_p1), %s9748_s27, 256 }
 0x525   : > { %p7789_p4 = scmp.ne.s32.totalorder (%p3552_p1), %s9748_s27, %s7788_s16 }
 0x526   : >> { %v4616_v18 = vld [vmem:[#allocation5] sm:$0xff]  ;;  %v4618_v62 = vld [vmem:[#allocation5 + $0x10] sm:$0xff]  ;;  %v4617_v51 = vld [vmem:[#allocation5 + $0x8] sm:$0xff] }
 0x527   : >> { %4713 = vbcast.lane.b32.xlu1 %v4683_v45, 312  ;;  %4709 = vbcast.lane.b32.xlu0 %v4683_v45, 304  ;;  %v4619_v58 = vld [vmem:[#allocation5 + $0x18] sm:$0xff]  ;;  %v4620_v9 = vld [vmem:[#allocation5 + $0x20] sm:$0xff]  ;;  %v4621_v30 = vld [vmem:[#allocation5 + $0x28] sm:$0xff]  ;;  %p9879_p5 = scmp.ne.s32.totalorder (%p3552_p1), %s9877_s24, 0 }
 0x528   : >> { %v4622_v3 = vld [vmem:[#allocation5 + $0x30] sm:$0xff]  ;;  %v4623_v40 = vld [vmem:[#allocation5 + $0x38] sm:$0xff]  ;;  %v4625_v5 = vld [vmem:[#allocation5 + $0x48] sm:$0xff] }
 0x529   : >> { %v4624_v60 = vld [vmem:[#allocation5 + $0x40] sm:$0xff]  ;;  %v5247_v31 = vld [vmem:[%s9876_s26 + $0x18] sm:$0xff] (%p3552_p1)  ;;  %v5250_v42 = vld [vmem:[%s9876_s26 + $0x30] sm:$0xff] (%p3552_p1)  ;;  %s9746_s17 = scalar_lea.hbm (%p3552_p1), %s9878_s14, %s6187_s12  ;;  %p7790_p6 = pnand (%p3552_p1), %p7789_p4, %p9879_p5 }
 0x52a   : > { %v5248_v26 = vld [vmem:[%s9876_s26 + $0x20] sm:$0xff] (%p3552_p1)  ;;  %v5249_v20 = vld [vmem:[%s9876_s26 + $0x28] sm:$0xff] (%p3552_p1)  ;;  %v5270_v21 = vand.u32 (%p3552_p1), 4294901760, %v5247_v31  ;;  %v5251_v47 = vld [vmem:[%s9876_s26 + $0x38] sm:$0xff] (%p3552_p1) }
 0x52b   : >> { %4724 = vbcast.lane.b32.xlu1 %v4718_v53, 264  ;;  %4720 = vbcast.lane.b32.xlu0 %v4718_v53, 256  ;;  %v5273_v23 = vand.u32 (%p3552_p1), 4294901760, %v5248_v26  ;;  %v5276_v36 = vand.u32 (%p3552_p1), 4294901760, %v5249_v20  ;;  %p7791_p7 = pneg (%p3552_p1), %p7790_p6 }
 0x52f   : >> { %4732 = vbcast.lane.b32.xlu1 %v4718_v53, 280  ;;  %4728 = vbcast.lane.b32.xlu0 %v4718_v53, 272 }
 0x533   : >> { %4740 = vbcast.lane.b32.xlu1 %v4718_v53, 296  ;;  %4736 = vbcast.lane.b32.xlu0 %v4718_v53, 288 }
 0x537   : >> { %4748 = vbcast.lane.b32.xlu1 %v4718_v53, 312  ;;  %4744 = vbcast.lane.b32.xlu0 %v4718_v53, 304 }
 0x53b   : >> { %4759 = vbcast.lane.b32.xlu1 %v4753_v15, 264  ;;  %4755 = vbcast.lane.b32.xlu0 %v4753_v15, 256 }
 0x53f   : >> { %4794 = vbcast.lane.b32.xlu1 %v4788_v1, 264  ;;  %4790 = vbcast.lane.b32.xlu0 %v4788_v1, 256 }
 0x543   : >> { %4825 = vbcast.lane.b32.xlu1 %v4823_v52, 256  ;;  %4763 = vbcast.lane.b32.xlu0 %v4753_v15, 272 }
 0x547   : >> { %4798 = vbcast.lane.b32.xlu1 %v4788_v1, 272  ;;  %4829 = vbcast.lane.b32.xlu0 %v4823_v52, 264 }
 0x54b   : >> { %4864 = vbcast.lane.b32.xlu1 %v4858_v12, 264  ;;  %4860 = vbcast.lane.b32.xlu0 %v4858_v12, 256 }
 0x54f   : >> { %4833 = vbcast.lane.b32.xlu1 %v4823_v52, 272  ;;  %4767 = vbcast.lane.b32.xlu0 %v4753_v15, 280 }
 0x553   : >> { %4899 = vbcast.lane.b32.xlu1 %v4893_v50, 264  ;;  %4895 = vbcast.lane.b32.xlu0 %v4893_v50, 256 }
 0x557   : >> { %4868 = vbcast.lane.b32.xlu1 %v4858_v12, 272  ;;  %4802 = vbcast.lane.b32.xlu0 %v4788_v1, 280 }
 0x55b   : >> { %4934 = vbcast.lane.b32.xlu1 %v4928_v44, 264  ;;  %4930 = vbcast.lane.b32.xlu0 %v4928_v44, 256 }
 0x55f   : >> { %4837 = vbcast.lane.b32.xlu1 %v4823_v52, 280  ;;  %4771 = vbcast.lane.b32.xlu0 %v4753_v15, 288 }
 0x563   : >> { %4806 = vbcast.lane.b32.xlu1 %v4788_v1, 288  ;;  %4903 = vbcast.lane.b32.xlu0 %v4893_v50, 272 }
 0x567   : >> { %4938 = vbcast.lane.b32.xlu1 %v4928_v44, 272  ;;  %4872 = vbcast.lane.b32.xlu0 %v4858_v12, 280 }
 0x56b   : >> { %4841 = vbcast.lane.b32.xlu1 %v4823_v52, 288  ;;  %4775 = vbcast.lane.b32.xlu0 %v4753_v15, 296 }
 0x56f   : >> { %4810 = vbcast.lane.b32.xlu1 %v4788_v1, 296  ;;  %4907 = vbcast.lane.b32.xlu0 %v4893_v50, 280 }
 0x573   : >> { %4942 = vbcast.lane.b32.xlu1 %v4928_v44, 280  ;;  %4876 = vbcast.lane.b32.xlu0 %v4858_v12, 288 }
 0x577   : >> { %4845 = vbcast.lane.b32.xlu1 %v4823_v52, 296  ;;  %4779 = vbcast.lane.b32.xlu0 %v4753_v15, 304 }
 0x57b   : >> { %4814 = vbcast.lane.b32.xlu1 %v4788_v1, 304  ;;  %4911 = vbcast.lane.b32.xlu0 %v4893_v50, 288 }
 0x57f   : >> { %4946 = vbcast.lane.b32.xlu1 %v4928_v44, 288  ;;  %4880 = vbcast.lane.b32.xlu0 %v4858_v12, 296 }
 0x583   : >> { %4849 = vbcast.lane.b32.xlu1 %v4823_v52, 304  ;;  %4783 = vbcast.lane.b32.xlu0 %v4753_v15, 312  ;;  %v4627_v15 = vld [vmem:[#allocation5 + $0x58] sm:$0xff] }
 0x587   : >> { %4818 = vbcast.lane.b32.xlu1 %v4788_v1, 312  ;;  %4915 = vbcast.lane.b32.xlu0 %v4893_v50, 296  ;;  %v4626_v1 = vld [vmem:[#allocation5 + $0x50] sm:$0xff] }
 0x58b   : >> { %4950 = vbcast.lane.b32.xlu1 %v4928_v44, 296  ;;  %4884 = vbcast.lane.b32.xlu0 %v4858_v12, 304 }
 0x58d   : >> { %v4694_v28 = vpop.permute.xlu1 %4693  ;;  %v4686_v27 = vpop.permute.xlu0 %4685 }
 0x58e   : >> { %v4960_v35 = vmul.f32 %v4686_v27, %v4616_v18  ;;  %v4962_v57 = vmul.f32 %v4694_v28, %v4618_v62 }
 0x58f   : >> { %4919 = vbcast.lane.b32.xlu1 %v4893_v50, 304  ;;  %4853 = vbcast.lane.b32.xlu0 %v4823_v52, 312 }
 0x590   : >> { %v5024_v8 = vsel %vm1685_vm8, %v4960_v35, 0.0  ;;  %v5027_v39 = vsel %vm1685_vm8, %v4962_v57, 0.0  ;;  %v4629_v35 = vld [vmem:[#allocation5 + $0x68] sm:$0xff] }
 0x591   : >> { %v4698_v33 = vpop.permute.xlu1 %4697  ;;  %v4690_v56 = vpop.permute.xlu0 %4689 }
 0x592   : >> { %v4961_v2 = vmul.f32 %v4690_v56, %v4617_v51  ;;  %v4963_v29 = vmul.f32 %v4698_v33, %v4619_v58  ;;  %v4628_v33 = vld [vmem:[#allocation5 + $0x60] sm:$0xff] }
 0x593   : >> { %4954 = vbcast.lane.b32.xlu1 %v4928_v44, 304  ;;  %4888 = vbcast.lane.b32.xlu0 %v4858_v12, 312 }
 0x594   : >> { %v5025_v14 = vsel %vm1685_vm8, %v4961_v2, 0.0  ;;  %v5029_v59 = vsel %vm1685_vm8, %v4963_v29, 0.0 }
 0x595   : >> { %v5026_v0 = vadd.f32 %v5025_v14, %v5024_v8  ;;  %v4706_v38 = vpop.permute.xlu1 %4705  ;;  %v4702_v13 = vpop.permute.xlu0 %4701 }
 0x596   : >> { %v4964_v41 = vmul.f32 %v4702_v13, %v4620_v9  ;;  %v4965_v46 = vmul.f32 %v4706_v38, %v4621_v30  ;;  %v4631_v38 = vld [vmem:[#allocation5 + $0x78] sm:$0xff]  ;;  %v4630_v30 = vld [vmem:[#allocation5 + $0x70] sm:$0xff] }
 0x597   : >> { %v5028_v61 = vadd.f32 %v5027_v39, %v5026_v0  ;;  %4958 = vbcast.lane.b32.xlu1 %v4928_v44, 312  ;;  %4923 = vbcast.lane.b32.xlu0 %v4893_v50, 312 }
 0x598   : >> { %v5031_v6 = vsel %vm1685_vm8, %v4964_v41, 0.0  ;;  %v5033_v43 = vsel %vm1685_vm8, %v4965_v46, 0.0 }
 0x599   : >> { %v5030_v24 = vadd.f32 %v5029_v59, %v5028_v61  ;;  %v4714_v37 = vpop.permute.xlu1 %4713  ;;  %v4710_v16 = vpop.permute.xlu0 %4709 }
 0x59a   : >> { %v4966_v32 = vmul.f32 %v4710_v16, %v4622_v3  ;;  %v4967_v54 = vmul.f32 %v4714_v37, %v4623_v40  ;;  %v4633_v40 = vld [vmem:[#allocation5 + $0x88] sm:$0xff]  ;;  %v4632_v16 = vld [vmem:[#allocation5 + $0x80] sm:$0xff] }
 0x59b   : >> { %v5032_v34 = vadd.f32 %v5031_v6, %v5030_v24 }
 0x59c   : >> { %v5035_v22 = vsel %vm1685_vm8, %v4966_v32, 0.0  ;;  %v5037_v52 = vsel %vm1685_vm8, %v4967_v54, 0.0 }
 0x59d   : >> { %v5034_v4 = vadd.f32 %v5033_v43, %v5032_v34  ;;  %v4725_v49 = vpop.permute.xlu1 %4724  ;;  %v4721_v10 = vpop.permute.xlu0 %4720 }
 0x59e   : >> { %v4969_v7 = vmul.f32 %v4725_v49, %v4625_v5  ;;  %v4968_v45 = vmul.f32 %v4721_v10, %v4624_v60  ;;  %v4641_v10 = vld [vmem:[#allocation5 + $0xc8] sm:$0xff] }
 0x59f   : >> { %v5036_v53 = vadd.f32 %v5035_v22, %v5034_v4  ;;  %v4640_v22 = vld [vmem:[#allocation5 + $0xc0] sm:$0xff] }
 0x5a0   : >> { %v5046_v12 = vsel %vm1685_vm8, %v4969_v7, 0.0  ;;  %v5045_v50 = vsel %vm1685_vm8, %v4968_v45, 0.0 }
 0x5a1   : >> { %v5038_v44 = vadd.f32 %v5037_v52, %v5036_v53  ;;  %v5047_v28 = vadd.f32 %v5046_v12, %v5045_v50  ;;  %v4733_v27 = vpop.permute.xlu1 %4732  ;;  %v4729_v18 = vpop.permute.xlu0 %4728 }
 0x5a2   : >> { %v4971_v62 = vmul.f32 %v4733_v27, %v4627_v15  ;;  %v4970_v51 = vmul.f32 %v4729_v18, %v4626_v1  ;;  %v4634_v27 = vld [vmem:[#allocation5 + $0x90] sm:$0xff] }
 0x5a3   : >> { %v5039_v14 = vrot.slane %v5038_v44, 4 }
 0x5a4   : >> { %v5050_v58 = vsel %vm1685_vm8, %v4971_v62, 0.0  ;;  %v5048_v56 = vsel %vm1685_vm8, %v4970_v51, 0.0 }
 0x5a5   : >> { %v5049_v57 = vadd.f32 %v5048_v56, %v5047_v28  ;;  %v4741_v2 = vpop.permute.xlu1 %4740  ;;  %v4737_v9 = vpop.permute.xlu0 %4736  ;;  %v5040_v24 = vadd.f32 %v5039_v14, %v5038_v44 }
 0x5a6   : >> { %v4973_v8 = vmul.f32 %v4741_v2, %v4629_v35  ;;  %v4972_v29 = vmul.f32 %v4737_v9, %v4628_v33 }
 0x5a7   : >> { %v5051_v0 = vadd.f32 %v5050_v58, %v5049_v57  ;;  %v5041_v4 = vrot.slane %v5040_v24, 2  ;;  %v4648_v58 = vld [vmem:[#allocation5 + $0x100] sm:$0xff] }
 0x5a8   : >> { %v5054_v13 = vsel %vm1685_vm8, %v4973_v8, 0.0  ;;  %v5052_v39 = vsel %vm1685_vm8, %v4972_v29, 0.0  ;;  %v4642_v8 = vld [vmem:[#allocation5 + $0xd0] sm:$0xff]  ;;  %v4649_v29 = vld [vmem:[#allocation5 + $0x108] sm:$0xff] }
 0x5a9   : >> { %v5053_v41 = vadd.f32 %v5052_v39, %v5051_v0  ;;  %v4749_v61 = vpop.permute.xlu1 %4748  ;;  %v4745_v3 = vpop.permute.xlu0 %4744  ;;  %v5042_v44 = vadd.f32 %v5041_v4, %v5040_v24 }
 0x5aa   : >> { %v4975_v59 = vmul.f32 %v4749_v61, %v4631_v38  ;;  %v4974_v46 = vmul.f32 %v4745_v3, %v4630_v30 }
 0x5ab   : >> { %v5055_v37 = vadd.f32 %v5054_v13, %v5053_v41  ;;  %v5043_v2 = vrot.slane %v5042_v44, 1 }
 0x5ac   : >> { %v5058_v6 = vsel %vm1685_vm8, %v4975_v59, 0.0  ;;  %v5056_v32 = vsel %vm1685_vm8, %v4974_v46, 0.0 }
 0x5ad   : >> { %v5057_v34 = vadd.f32 %v5056_v32, %v5055_v37  ;;  %v4760_v5 = vpop.permute.xlu1 %4759  ;;  %v4756_v60 = vpop.permute.xlu0 %4755  ;;  %v5044_v3 = vadd.f32 %v5043_v2, %v5042_v44 }
 0x5ae   : >> { %v4977_v43 = vmul.f32 %v4760_v5, %v4633_v40  ;;  %v4976_v54 = vmul.f32 %v4756_v60, %v4632_v16 }
 0x5af   : >> { %v5059_v49 = vadd.f32 %v5058_v6, %v5057_v34 }
 0x5b0   : >> { %v5067_v7 = vsel %vm1685_vm8, %v4977_v43, 0.0  ;;  %v5066_v45 = vsel %vm1685_vm8, %v4976_v54, 0.0 }
 0x5b1   : >> { %v5060_v53 = vrot.slane %v5059_v49, 4  ;;  %v5068_v15 = vadd.f32 %v5067_v7, %v5066_v45  ;;  %v4795_v1 = vpop.permute.xlu1 %4794  ;;  %v4791_v52 = vpop.permute.xlu0 %4790 }
 0x5b2   : >> { %v4985_v12 = vmul.f32 %v4795_v1, %v4641_v10  ;;  %v4984_v50 = vmul.f32 %v4791_v52, %v4640_v22 }
 0x5b3   : >> { %v5061_v28 = vadd.f32 %v5060_v53, %v5059_v49 }
 0x5b4   : >> { %v5088_v18 = vsel %vm1685_vm8, %v4985_v12, 0.0  ;;  %v5087_v62 = vsel %vm1685_vm8, %v4984_v50, 0.0 }
 0x5b5   : >> { %v5062_v51 = vrot.slane %v5061_v28, 2  ;;  %v5089_v35 = vadd.f32 %v5088_v18, %v5087_v62  ;;  %v4826_v33 = vpop.permute.xlu1 %4825  ;;  %v4764_v56 = vpop.permute.xlu0 %4763  ;;  %v4656_v18 = vld [vmem:[#allocation5 + $0x140] sm:$0xff]  ;;  %v4650_v62 = vld [vmem:[#allocation5 + $0x110] sm:$0xff] }
 0x5b6   : >> { %v4978_v57 = vmul.f32 %v4764_v56, %v4634_v27  ;;  %v4992_v14 = vmul.f32 %v4826_v33, %v4648_v58  ;;  %v4657_v27 = vld [vmem:[#allocation5 + $0x148] sm:$0xff]  ;;  %v4635_v33 = vld [vmem:[#allocation5 + $0x98] sm:$0xff] }
 0x5b7   : >> { %v5063_v9 = vadd.f32 %v5062_v51, %v5061_v28  ;;  %v4665_v58 = vld [vmem:[#allocation5 + $0x188] sm:$0xff] }
 0x5b8   : >> { %v5069_v0 = vsel %vm1685_vm8, %v4978_v57, 0.0  ;;  %v5108_v46 = vsel %vm1685_vm8, %v4992_v14, 0.0  ;;  %v4664_v57 = vld [vmem:[#allocation5 + $0x180] sm:$0xff]  ;;  %v4658_v14 = vld [vmem:[#allocation5 + $0x150] sm:$0xff] }
 0x5b9   : >> { %v5064_v38 = vrot.slane %v5063_v9, 1  ;;  %v9510_v30 = vadd.f32 %v5069_v0, %v5068_v15  ;;  %v4799_v13 = vpop.permute.xlu1 %4798  ;;  %v4830_v39 = vpop.permute.xlu0 %4829  ;;  %v4636_v0 = vld [vmem:[#allocation5 + $0xa0] sm:$0xff] }
 0x5ba   : >> { %v4986_v41 = vmul.f32 %v4799_v13, %v4642_v8  ;;  %v4993_v61 = vmul.f32 %v4830_v39, %v4649_v29 }
 0x5bb   : >> { %v5065_v59 = vadd.f32 %v5064_v38, %v5063_v9 }
 0x5bc   : >> { %v5090_v24 = vsel %vm1685_vm8, %v4986_v41, 0.0  ;;  %v5109_v37 = vsel %vm1685_vm8, %v4993_v61, 0.0  ;;  %v4643_v41 = vld [vmem:[#allocation5 + $0xd8] sm:$0xff] }
 0x5bd   : >> { %v9515_v40 = vsel %vm5200_vm11, %v5065_v59, %v5044_v3  ;;  %v9517_v16 = vadd.f32 %v5090_v24, %v5089_v35  ;;  %v5110_v6 = vadd.f32 %v5109_v37, %v5108_v46  ;;  %v4865_v32 = vpop.permute.xlu1 %4864  ;;  %v4861_v34 = vpop.permute.xlu0 %4860  ;;  %v4673_v3 = vld [vmem:[#allocation5 + $0x1c8] sm:$0xff]  ;;  %v4672_v59 = vld [vmem:[#allocation5 + $0x1c0] sm:$0xff] }
 0x5be   : >> { %v5001_v56 = vmul.f32 %v4865_v32, %v4657_v27  ;;  %v5000_v2 = vmul.f32 %v4861_v34, %v4656_v18  ;;  %v4637_v46 = vld [vmem:[#allocation5 + $0xa8] sm:$0xff]  ;;  %v4651_v34 = vld [vmem:[#allocation5 + $0x118] sm:$0xff]  ;;  %v4644_v18 = vld [vmem:[#allocation5 + $0xe0] sm:$0xff] }
 0x5c0   : >> { %v5130_v61 = vsel %vm1685_vm8, %v5001_v56, 0.0  ;;  %v5129_v24 = vsel %vm1685_vm8, %v5000_v2, 0.0  ;;  %v4666_v2 = vld [vmem:[#allocation5 + $0x190] sm:$0xff] }
 0x5c1   : >> { %v4834_v5 = vpop.permute.xlu1 %4833  ;;  %v4768_v60 = vpop.permute.xlu0 %4767 }
 0x5c2   : >> { %v4994_v9 = vmul.f32 %v4834_v5, %v4650_v62  ;;  %v4979_v8 = vmul.f32 %v4768_v60, %v4635_v33 }
 0x5c4   : >> { %v5111_v37 = vsel %vm1685_vm8, %v4994_v9, 0.0  ;;  %v5071_v60 = vsel %vm1685_vm8, %v4979_v8, 0.0  ;;  %v5131_v9 = vadd.f32 %v5130_v61, %v5129_v24  ;;  %v4659_v61 = vld [vmem:[#allocation5 + $0x158] sm:$0xff] }
 0x5c5   : >> { %v4900_v43 = vpop.permute.xlu1 %4899  ;;  %v4896_v54 = vpop.permute.xlu0 %4895  ;;  %v5072_v17 = vadd.f32 %v5071_v60, %v9510_v30 }
 0x5c6   : >> { %v5009_v29 = vmul.f32 %v4900_v43, %v4665_v58  ;;  %v5008_v39 = vmul.f32 %v4896_v54, %v4664_v57  ;;  %v4638_v54 = vld [vmem:[#allocation5 + $0xb0] sm:$0xff] }
 0x5c8   : >> { %v5151_v43 = vsel %vm1685_vm8, %v5009_v29, 0.0  ;;  %v5150_v58 = vsel %vm1685_vm8, %v5008_v39, 0.0 }
 0x5c9   : >> { %v4869_v4 = vpop.permute.xlu1 %4868  ;;  %v4803_v49 = vpop.permute.xlu0 %4802  ;;  %v5152_v19 = vadd.f32 %v5151_v43, %v5150_v58 }
 0x5ca   : >> { %v5002_v32 = vmul.f32 %v4869_v4, %v4658_v14  ;;  %v4987_v27 = vmul.f32 %v4803_v49, %v4643_v41  ;;  %v5112_v4 = vadd.f32 %v5111_v37, %v5110_v6  ;;  %v4639_v37 = vld [vmem:[#allocation5 + $0xb8] sm:$0xff] }
 0x5cc   : >> { %v5132_v8 = vsel %vm1685_vm8, %v5002_v32, 0.0  ;;  %v5092_v39 = vsel %vm1685_vm8, %v4987_v27, 0.0 }
 0x5cd   : >> { %v4935_v10 = vpop.permute.xlu1 %4934  ;;  %v4931_v22 = vpop.permute.xlu0 %4930  ;;  %v5093_v32 = vadd.f32 %v5092_v39, %v9517_v16 }
 0x5ce   : >> { %v5017_v56 = vmul.f32 %v4935_v10, %v4673_v3  ;;  %v5016_v57 = vmul.f32 %v4931_v22, %v4672_v59  ;;  %v4646_v22 = vld [vmem:[#allocation5 + $0xf0] sm:$0xff] }
 0x5d0   : >> { %v5172_v6 = vsel %vm1685_vm8, %v5017_v56, 0.0 }
 0x5d1   : >> { %v4838_v7 = vpop.permute.xlu1 %4837  ;;  %v4772_v45 = vpop.permute.xlu0 %4771 }
 0x5d2   : >> { %v4980_v5 = vmul.f32 %v4772_v45, %v4636_v0  ;;  %v4995_v14 = vmul.f32 %v4838_v7, %v4651_v34  ;;  %v4645_v45 = vld [vmem:[#allocation5 + $0xe8] sm:$0xff]  ;;  %v4674_v0 = vld [vmem:[#allocation5 + $0x1d0] sm:$0xff]  ;;  %v5171_v7 = vsel %vm1685_vm8, %v5016_v57, 0.0 }
 0x5d3   : >> { %v5173_v27 = vadd.f32 %v5172_v6, %v5171_v7  ;;  %v4653_v57 = vld [vmem:[#allocation5 + $0x128] sm:$0xff]  ;;  %v4676_v6 = vld [vmem:[#allocation5 + $0x1e0] sm:$0xff] }
 0x5d4   : >> { %v5073_v29 = vsel %vm1685_vm8, %v4980_v5, 0.0  ;;  %v5113_v30 = vsel %vm1685_vm8, %v4995_v14, 0.0  ;;  %v4667_v5 = vld [vmem:[#allocation5 + $0x198] sm:$0xff] }
 0x5d5   : >> { %v4807_v53 = vpop.permute.xlu1 %4806  ;;  %v4904_v15 = vpop.permute.xlu0 %4903 }
 0x5d6   : >> { %v4988_v49 = vmul.f32 %v4807_v53, %v4644_v18  ;;  %v5010_v10 = vmul.f32 %v4904_v15, %v4666_v2  ;;  %v4652_v15 = vld [vmem:[#allocation5 + $0x120] sm:$0xff] }
 0x5d8   : >> { %v5094_v34 = vsel %vm1685_vm8, %v4988_v49, 0.0 }
 0x5d9   : >> { %v9519_v1 = vpop.permute.xlu1 %4938  ;;  %v9521_v52 = vpop.permute.xlu0 %4872 }
 0x5da   : >> { %v5018_v24 = vmul.f32 %v9519_v1, %v4674_v0  ;;  %v5114_v1 = vadd.f32 %v5113_v30, %v5112_v4  ;;  %v4654_v4 = vld [vmem:[#allocation5 + $0x130] sm:$0xff] }
 0x5dc   : >> { %v5174_v14 = vsel %vm1685_vm8, %v5018_v24, 0.0 }
 0x5dd   : >> { %v9523_v12 = vpop.permute.xlu1 %4841  ;;  %v4776_v50 = vpop.permute.xlu0 %4775 }
 0x5de   : >> { %v4981_v11 = vmul.f32 %v4776_v50, %v4637_v46  ;;  %v9550_v46 = vadd.f32 %v5132_v8, %v5131_v9  ;;  %v4996_v56 = vmul.f32 %v9523_v12, %v4652_v15  ;;  %v5095_v9 = vadd.f32 %v5094_v34, %v5093_v32 }
 0x5e0   : >> { %v5075_v59 = vsel %vm1685_vm8, %v4981_v11, 0.0  ;;  %v5153_v11 = vsel %vm1685_vm8, %v5010_v10, 0.0 }
 0x5e1   : >> { %v4811_v44 = vpop.permute.xlu1 %4810  ;;  %v9525_v28 = vpop.permute.xlu0 %4907 }
 0x5e2   : >> { %v4989_v53 = vmul.f32 %v4811_v44, %v4645_v45  ;;  %v5003_v44 = vmul.f32 %v9521_v52, %v4659_v61  ;;  %v4660_v45 = vld [vmem:[#allocation5 + $0x160] sm:$0xff]  ;;  %v5154_v52 = vadd.f32 %v5153_v11, %v5152_v19  ;;  %v5115_v19 = vsel %vm1685_vm8, %v4996_v56, 0.0 }
 0x5e4   : >> { %v5096_v16 = vsel %vm1685_vm8, %v4989_v53, 0.0  ;;  %v4661_v53 = vld [vmem:[#allocation5 + $0x168] sm:$0xff] }
 0x5e5   : >> { %v9527_v51 = vpop.permute.xlu1 %4942  ;;  %v9529_v35 = vpop.permute.xlu0 %4876  ;;  %v5097_v39 = vadd.f32 %v5096_v16, %v5095_v9 }
 0x5e9   : >> { %v9531_v38 = vpop.permute.xlu1 %4845  ;;  %v4780_v13 = vpop.permute.xlu0 %4779 }
 0x5ea   : >> { %v4982_v41 = vmul.f32 %v4780_v13, %v4638_v54  ;;  %v5074_v13 = vadd.f32 %v5073_v29, %v5072_v17  ;;  %v4675_v54 = vld [vmem:[#allocation5 + $0x1d8] sm:$0xff]  ;;  %v4997_v10 = vmul.f32 %v9531_v38, %v4653_v57 }
 0x5eb   : >> { %v4647_v29 = vld [vmem:[#allocation5 + $0xf8] sm:$0xff]  ;;  %v5019_v49 = vmul.f32 %v9527_v51, %v4675_v54  ;;  %v5004_v51 = vmul.f32 %v9529_v35, %v4660_v45 }
 0x5ec   : >> { %v5077_v60 = vsel %vm1685_vm8, %v4982_v41, 0.0  ;;  %v5076_v18 = vadd.f32 %v5075_v59, %v5074_v13  ;;  %v5134_v41 = vsel %vm1685_vm8, %v5003_v44, 0.0  ;;  %v5175_v59 = vadd.f32 %v5174_v14, %v5173_v27  ;;  %v4655_v14 = vld [vmem:[#allocation5 + $0x138] sm:$0xff] }
 0x5ed   : >> { %v4815_v62 = vpop.permute.xlu1 %4814  ;;  %v9538_v33 = vpop.permute.xlu0 %4911  ;;  %v5176_v32 = vsel %vm1685_vm8, %v5019_v49, 0.0  ;;  %v5135_v54 = vadd.f32 %v5134_v41, %v9550_v46  ;;  %v5136_v56 = vsel %vm1685_vm8, %v5004_v51, 0.0 }
 0x5ee   : >> { %v4990_v43 = vmul.f32 %v4815_v62, %v4646_v22  ;;  %v5011_v62 = vmul.f32 %v9525_v28, %v4667_v5  ;;  %v5078_v8 = vadd.f32 %v5077_v60, %v5076_v18  ;;  %v4668_v22 = vld [vmem:[#allocation5 + $0x1a0] sm:$0xff]  ;;  %v4662_v60 = vld [vmem:[#allocation5 + $0x170] sm:$0xff] }
 0x5ef   : >> { %v5012_v38 = vmul.f32 %v9538_v33, %v4668_v22  ;;  %v4669_v33 = vld [vmem:[#allocation5 + $0x1a8] sm:$0xff] }
 0x5f0   : >> { %v5098_v0 = vsel %vm1685_vm8, %v4990_v43, 0.0  ;;  %v5155_v13 = vsel %vm1685_vm8, %v5011_v62, 0.0  ;;  %v5117_v43 = vsel %vm1685_vm8, %v4997_v10, 0.0  ;;  %v5177_v62 = vadd.f32 %v5176_v32, %v5175_v59  ;;  %v4678_v59 = vld [vmem:[#allocation5 + $0x1f0] sm:$0xff] }
 0x5f1   : >> { %v4947_v3 = vpop.permute.xlu1 %4946  ;;  %v9545_v50 = vpop.permute.xlu0 %4880  ;;  %v5099_v24 = vadd.f32 %v5098_v0, %v5097_v39  ;;  %v5157_v45 = vsel %vm1685_vm8, %v5012_v38, 0.0 }
 0x5f2   : >> { %v5020_v34 = vmul.f32 %v4947_v3, %v4676_v6  ;;  %v5005_v35 = vmul.f32 %v9545_v50, %v4661_v53 }
 0x5f4   : >> { %v5138_v46 = vsel %vm1685_vm8, %v5005_v35, 0.0 }
 0x5f5   : >> { %v4850_v17 = vpop.permute.xlu1 %4849  ;;  %v4784_v58 = vpop.permute.xlu0 %4783 }
 0x5f6   : >> { %v4983_v2 = vmul.f32 %v4784_v58, %v4639_v37  ;;  %v4998_v15 = vmul.f32 %v4850_v17, %v4654_v4  ;;  %v5116_v17 = vadd.f32 %v5115_v19, %v5114_v1  ;;  %v5156_v58 = vadd.f32 %v5155_v13, %v5154_v52  ;;  %v4663_v19 = vld [vmem:[#allocation5 + $0x178] sm:$0xff] }
 0x5f8   : >> { %v5079_v12 = vsel %vm1685_vm8, %v4983_v2, 0.0  ;;  %v5119_v3 = vsel %vm1685_vm8, %v4998_v15, 0.0  ;;  %v4677_v2 = vld [vmem:[#allocation5 + $0x1e8] sm:$0xff]  ;;  %v5118_v50 = vadd.f32 %v5117_v43, %v5116_v17  ;;  %v5158_v51 = vadd.f32 %v5157_v45, %v5156_v58 }
 0x5f9   : >> { %v5080_v7 = vadd.f32 %v5079_v12, %v5078_v8  ;;  %v4819_v28 = vpop.permute.xlu1 %4818  ;;  %v4916_v61 = vpop.permute.xlu0 %4915  ;;  %v5178_v8 = vsel %vm1685_vm8, %v5020_v34, 0.0  ;;  %v5137_v12 = vadd.f32 %v5136_v56, %v5135_v54  ;;  %v4671_v54 = vld [vmem:[#allocation5 + $0x1b8] sm:$0xff] }
 0x5fa   : >> { %v4991_v30 = vmul.f32 %v4819_v28, %v4647_v29  ;;  %v4670_v29 = vld [vmem:[#allocation5 + $0x1b0] sm:$0xff]  ;;  %v5013_v49 = vmul.f32 %v4916_v61, %v4669_v33  ;;  %v5120_v41 = vadd.f32 %v5119_v3, %v5118_v50  ;;  %v5179_v53 = vadd.f32 %v5178_v8, %v5177_v62 }
 0x5fb   : >> { %v5081_v37 = vrot.slane %v5080_v7, 4 }
 0x5fc   : >> { %v5100_v5 = vsel %vm1685_vm8, %v4991_v30, 0.0  ;;  %v5139_v30 = vadd.f32 %v5138_v46, %v5137_v12  ;;  %v5159_v15 = vsel %vm1685_vm8, %v5013_v49, 0.0 }
 0x5fd   : >> { %v5082_v27 = vadd.f32 %v5081_v37, %v5080_v7  ;;  %v5101_v11 = vadd.f32 %v5100_v5, %v5099_v24  ;;  %v4951_v44 = vpop.permute.xlu1 %4950  ;;  %v4885_v18 = vpop.permute.xlu0 %4884  ;;  %v5160_v17 = vadd.f32 %v5159_v15, %v5158_v51 }
 0x5fe   : >> { %v5006_v9 = vmul.f32 %v4885_v18, %v4662_v60  ;;  %v5021_v39 = vmul.f32 %v4951_v44, %v4677_v2  ;;  %v4679_v18 = vld [vmem:[#allocation5 + $0x1f8] sm:$0xff] }
 0x5ff   : >> { %v5083_v16 = vrot.slane %v5082_v27, 2  ;;  %v5102_v57 = vrot.slane %v5101_v11, 4 }
 0x600   : >> { %v5140_v7 = vsel %vm1685_vm8, %v5006_v9, 0.0  ;;  %v5180_v34 = vsel %vm1685_vm8, %v5021_v39, 0.0 }
 0x601   : >> { %v5084_v1 = vadd.f32 %v5083_v16, %v5082_v27  ;;  %v5103_v52 = vadd.f32 %v5102_v57, %v5101_v11  ;;  %v4920_v0 = vpop.permute.xlu1 %4919  ;;  %v4854_v4 = vpop.permute.xlu0 %4853  ;;  %v5141_v5 = vadd.f32 %v5140_v7, %v5139_v30  ;;  %v5181_v3 = vadd.f32 %v5180_v34, %v5179_v53 }
 0x602   : >> { %v4999_v10 = vmul.f32 %v4854_v4, %v4655_v14  ;;  %v5014_v28 = vmul.f32 %v4920_v0, %v4670_v29 }
 0x603   : >> { %v5085_v22 = vrot.slane %v5084_v1, 1  ;;  %v5104_v6 = vrot.slane %v5103_v52, 2 }
 0x604   : >> { %v5121_v13 = vsel %vm1685_vm8, %v4999_v10, 0.0  ;;  %v5161_v11 = vsel %vm1685_vm8, %v5014_v28, 0.0 }
 0x605   : >> { %v5086_v24 = vadd.f32 %v5085_v22, %v5084_v1  ;;  %v5105_v61 = vadd.f32 %v5104_v6, %v5103_v52  ;;  %v5122_v37 = vadd.f32 %v5121_v13, %v5120_v41  ;;  %v4955_v32 = vpop.permute.xlu1 %4954  ;;  %v4889_v38 = vpop.permute.xlu0 %4888  ;;  %v5162_v14 = vadd.f32 %v5161_v11, %v5160_v17 }
 0x606   : >> { %v5022_v60 = vmul.f32 %v4955_v32, %v4678_v59  ;;  %v5007_v43 = vmul.f32 %v4889_v38, %v4663_v19  ;;  %v5236_v11 = vmul.f32 (%p3552_p1), 0.5, %v8627_v63 }
 0x607   : >> { %v5203_v35 = vsel %vm5202_vm12, %v5086_v24, %v9515_v40  ;;  %v5106_v27 = vrot.slane %v5105_v61, 1  ;;  %v5123_v44 = vrot.slane %v5122_v37, 4 }
 0x608   : >> { %v5182_v58 = vsel %vm1685_vm8, %v5022_v60, 0.0  ;;  %v5142_v56 = vsel %vm1685_vm8, %v5007_v43, 0.0  ;;  %v5244_v60 = vld [vmem:[%s9876_s26] sm:$0xff] (%p3552_p1)  ;;  %v5245_v43 = vld [vmem:[%s9876_s26 + $0x8] sm:$0xff] (%p3552_p1) }
 0x609   : >> { %v5107_v33 = vadd.f32 %v5106_v27, %v5105_v61  ;;  %v5124_v16 = vadd.f32 %v5123_v44, %v5122_v37  ;;  %v5143_v57 = vadd.f32 %v5142_v56, %v5141_v5  ;;  %v4959_v2 = vpop.permute.xlu1 %4958  ;;  %v4924_v9 = vpop.permute.xlu0 %4923  ;;  %v5183_v8 = vadd.f32 %v5182_v58, %v5181_v3  ;;  %v6183_v56 = vld [vmem:[#allocation20] ss:$0 sm:$0xff] (%p3552_p1)  ;;  %v5221_v3 = vld [vmem:[#allocation7 + $0x8] sm:$0xff] (%p3552_p1) }
 0x60a   : >> { %v5023_v40 = vmul.f32 %v4959_v2, %v4679_v18  ;;  %v5015_v62 = vmul.f32 %v4924_v9, %v4671_v54  ;;  %v5232_v27 = vmul.f32 (%p3552_p1), 0.125, %v8627_v63  ;;  %v5233_v44 = vmul.f32 (%p3552_p1), 0.125, %v8625_v55 }
 0x60b   : >> { %v5205_v50 = vsel %vm5204_vm13, %v5107_v33, %v5203_v35  ;;  %v5125_v45 = vrot.slane %v5124_v16, 2  ;;  %v5144_v29 = vrot.slane %v5143_v57, 4  ;;  %v5246_v35 = vld [vmem:[%s9876_s26 + $0x10] sm:$0xff] (%p3552_p1)  ;;  %v5261_v18 = vand.u32 (%p3552_p1), 4294901760, %v5244_v60 }
 0x60c   : >> { %v5184_v46 = vsel %vm1685_vm8, %v5023_v40, 0.0  ;;  %v5163_v1 = vsel %vm1685_vm8, %v5015_v62, 0.0  ;;  %v5264_v54 = vand.u32 (%p3552_p1), 4294901760, %v5245_v43  ;;  %v5267_v25 = vand.u32 (%p3552_p1), 4294901760, %v5246_v35  ;;  %v5220_v33 = vld [vmem:[#allocation7] sm:$0xff] (%p3552_p1) }
 0x60d   : >> { %v5126_v52 = vadd.f32 %v5125_v45, %v5124_v16  ;;  %v5145_v49 = vadd.f32 %v5144_v29, %v5143_v57  ;;  %v5185_v0 = vadd.f32 %v5184_v46, %v5183_v8  ;;  %v5164_v4 = vadd.f32 %v5163_v1, %v5162_v14 }
 0x60e   : > { %v5234_v17 = vmul.f32 (%p3552_p1), %v5232_v27, %v8627_v63  ;;  %v9626_v58 = vpack.c.bf16 (%p3552_p1), %v5264_v54, %v5261_v18  ;;  %v9628_v16 = vsub.f32 (%p3552_p1), %v5244_v60, %v5261_v18  ;;  %v9630_v57 = vpack.c.bf16 (%p3552_p1), %v5270_v21, %v5267_v25 }
 0x60f   : >> { %v5127_v12 = vrot.slane %v5126_v52, 1  ;;  %v5146_v41 = vrot.slane %v5145_v49, 2  ;;  %v5186_v39 = vrot.slane %v5185_v0, 4  ;;  %v5165_v10 = vrot.slane %v5164_v4, 4 }
 0x610   : > { %v5279_v2 = vand.u32 (%p3552_p1), 4294901760, %v5250_v42  ;;  %v5228_v9 = vmul.f32 (%p3552_p1), %v6183_v56, %v5220_v33  ;;  %v5229_v14 = vmul.f32 (%p3552_p1), %v6183_v56, %v5221_v3  ;;  %7086 = vmatprep.subr.bf16.mxu0 (%p3552_p1), %v9626_v58  ;;  %v5282_v40 = vand.u32 (%p3552_p1), 4294901760, %v5251_v47 }
 0x611   : >> { %v5128_v22 = vadd.f32 %v5127_v12, %v5126_v52  ;;  %v5147_v6 = vadd.f32 %v5146_v41, %v5145_v49  ;;  %v5187_v7 = vadd.f32 %v5186_v39, %v5185_v0  ;;  %v5166_v28 = vadd.f32 %v5165_v10, %v5164_v4  ;;  %7088 = vmatpush3.bf16.msra.mxu0 (%p3552_p1), %v9626_v58 }
 0x612   : > { %v5238_v62 = vadd.f32 (%p3552_p1), %v5236_v11, %v5234_v17  ;;  %v9634_v45 = vsub.f32 (%p3552_p1), %v5245_v43, %v5264_v54  ;;  %v9637_v8 = vpack.c.bf16 (%p3552_p1), %v5276_v36, %v5273_v23  ;;  %v5235_v46 = vmul.f32 (%p3552_p1), %v8625_v55, %v5233_v44  ;;  %7090 = vmatprep.subr.bf16.mxu0 (%p3552_p1), %v9630_v57 }
 0x613   : >> { %v5207_v59 = vsel %vm5206_vm14, %v5128_v22, %v5205_v50  ;;  %v5148_v19 = vrot.slane %v5147_v6, 1  ;;  %v5188_v51 = vrot.slane %v5187_v7, 2  ;;  %v5167_v53 = vrot.slane %v5166_v28, 2 }
 0x614   : > { %v5356_v50 = vand.u32 (%p3552_p1), 4294901760, %v9628_v16  ;;  %v5237_v1 = vmul.f32 (%p3552_p1), 0.5, %v8625_v55  ;;  %v5240_v52 = vadd.f32 (%p3552_p1), 0.125, %v5238_v62  ;;  %v5363_v0 = vand.u32 (%p3552_p1), 4294901760, %v9634_v45 }
 0x615   : >> { %v5189_v30 = vadd.f32 %v5188_v51, %v5187_v7  ;;  %v5168_v13 = vadd.f32 %v5167_v53, %v5166_v28  ;;  %v5149_v24 = vadd.f32 %v5148_v19, %v5147_v6  ;;  %v9646_v4 = vsub.f32 (%p3552_p1), %v5246_v35, %v5267_v25  ;;  %7092 = vmatpush3.bf16.msra.mxu0 (%p3552_p1), %v9630_v57 }
 0x616   : > { %v5357_v49 = vsub.f32 (%p3552_p1), %v9628_v16, %v5356_v50  ;;  %v5239_v41 = vadd.f32 (%p3552_p1), %v5237_v1, %v5235_v46  ;;  %v9648_v39 = vsub.f32 (%p3552_p1), %v5247_v31, %v5270_v21  ;;  %v5364_v55 = vsub.f32 (%p3552_p1), %v9634_v45, %v5363_v0  ;;  %7094 = vmatprep.subr.bf16.mxu0 (%p3552_p1), %v9637_v8 }
 0x617   : >> { %v5190_v61 = vrot.slane %v5189_v30, 1  ;;  %v5169_v15 = vrot.slane %v5168_v13, 1  ;;  %v5209_v38 = vsel %vm5208_vm15, %v5149_v24, %v5207_v59  ;;  %3554 = sbr.rel (!%p3552_p1) target bundleno = 1034 (0x40a), region = 166  ;;  %v9653_v22 = vsub.f32 (%p3552_p1), %v5248_v26, %v5273_v23 }
 0x618   : > { %v9655_v6 = vsub.f32 (%p3552_p1), %v5249_v20, %v5276_v36  ;;  %v9658_v7 = vpack.c.bf16 (%p3552_p1), %v5282_v40, %v5279_v2  ;;  %v5241_v28 = vadd.f32 (%p3552_p1), 0.125, %v5239_v41  ;;  %v5370_v59 = vand.u32 (%p3552_p1), 4294901760, %v9646_v4 }
 0x619   : >> { %v5191_v37 = vadd.f32 %v5190_v61, %v5189_v30  ;;  %v5170_v32 = vadd.f32 %v5169_v15, %v5168_v13  ;;  %v5358_v51 = vand.u32 (%p3552_p1), 4294901760, %v5357_v49  ;;  %v5365_v53 = vand.u32 (%p3552_p1), 4294901760, %v5364_v55  ;;  %7096 = vmatpush3.bf16.msra.mxu0 (%p3552_p1), %v9637_v8 }
 0x61a   : > { %v5377_v30 = vand.u32 (%p3552_p1), 4294901760, %v9648_v39  ;;  %v5384_v61 = vand.u32 (%p3552_p1), 4294901760, %v9653_v22  ;;  %v5391_v15 = vand.u32 (%p3552_p1), 4294901760, %v9655_v6  ;;  %7098 = vmatprep.subr.bf16.mxu0 (%p3552_p1), %v9658_v7  ;;  %v9682_v35 = vsub.f32 (%p3552_p1), %v5251_v47, %v5282_v40 }
 0x61b   : >> { %v5211_v34 = vsel %vm5210_vm0, %v5170_v32, %v5209_v38  ;;  %v5371_v38 = vsub.f32 (%p3552_p1), %v9646_v4, %v5370_v59  ;;  %v7117_v40 = vpack.c.bf16 (%p3552_p1), %v9634_v45, %v9628_v16  ;;  %v7121_v62 = vpack.c.bf16 (%p3552_p1), %v9648_v39, %v9646_v4 }
 0x61c   : >> { %v5213_v5 = vsel %vm5212_vm1, %v5191_v37, %v5211_v34  ;;  %v9674_v34 = vsub.f32 (%p3552_p1), %v5250_v42, %v5279_v2  ;;  %v5378_v43 = vsub.f32 (%p3552_p1), %v9648_v39, %v5377_v30  ;;  %v5385_v54 = vsub.f32 (%p3552_p1), %v9653_v22, %v5384_v61 }
 0x61d   : >> { %5216 = vst.msk [vmem:[%s5215_s29] sm:$0xff] %vm1685_vm8, %v5213_v5  ;;  %v7101_v5 = vpack.c.bf16 (%p3552_p1), %v5365_v53, %v5358_v51  ;;  %7100 = vmatpush3.bf16.msra.mxu0 (%p3552_p1), %v9658_v7  ;;  %v5372_v18 = vand.u32 (%p3552_p1), 4294901760, %v5371_v38  ;;  %v5392_v31 = vsub.f32 (%p3552_p1), %v9655_v6, %v5391_v15  ;;  %v5405_v21 = vand.u32 (%p3552_p1), 4294901760, %v9682_v35 }
 0x61e   : > { %v5379_v26 = vand.u32 4294901760, %v5378_v43  ;;  %v5398_v20 = vand.u32 4294901760, %v9674_v34  ;;  %v5386_v42 = vand.u32 4294901760, %v5385_v54  ;;  %v7149_v46 = vpack.c.bf16 %v5363_v0, %v5356_v50 }
 0x61f   : > { %7102 = vmatprep.subr.bf16.mxu0 %v7101_v5  ;;  %v5393_v47 = vand.u32 4294901760, %v5392_v31  ;;  %v5406_v33 = vsub.f32 %v9682_v35, %v5405_v21  ;;  %v7153_v1 = vpack.c.bf16 %v5377_v30, %v5370_v59  ;;  %v7157_v16 = vpack.c.bf16 %v5391_v15, %v5384_v61 }
 0x620   : > { %v7105_v17 = vpack.c.bf16 %v5379_v26, %v5372_v18  ;;  %v5399_v56 = vsub.f32 %v9674_v34, %v5398_v20  ;;  %v7161_v50 = vpack.c.bf16 %v5405_v21, %v5398_v20 }
 0x621   : > { %v7109_v3 = vpack.c.bf16 %v5393_v47, %v5386_v42 }
 0x622   : > { %v5400_v2 = vand.u32 4294901760, %v5399_v56 }
 0x624   : > { %v5217_v48 = vld [vmem:[#allocation10] sm:$0xff]  ;;  %v5218_v63 = vld [vmem:[#allocation10 + $0x8] sm:$0xff] }
 0x625   : > { %v5230_v29 = vadd.f32 %v5228_v9, %v5217_v48  ;;  %v5231_v12 = vadd.f32 %v5229_v14, %v5218_v63  ;;  %v5407_v9 = vand.u32 4294901760, %v5406_v33  ;;  %v7125_v63 = vpack.c.bf16 %v9655_v6, %v9653_v22 }
 0x627   : > { %v5242_v10 = vmul.f32 %v5240_v52, %v5230_v29  ;;  %v5243_v24 = vmul.f32 %v5241_v28, %v5231_v12  ;;  %v7113_v14 = vpack.c.bf16 %v5407_v9, %v5400_v2  ;;  %v7129_v29 = vpack.c.bf16 %v9682_v35, %v9674_v34 }
 0x629   : > { %v5255_v19 = vsel %vm1685_vm8, %v5242_v10, 0  ;;  %v5258_v32 = vsel %vm1685_vm8, %v5243_v24, 0 }
 0x62a   : > { %v9664_v13 = vand.u32 4294901760, %v5255_v19  ;;  %v9677_v60 = vand.u32 4294901760, %v5258_v32 }
 0x62c   : > { %v5334_v37 = vsub.f32 %v5255_v19, %v9664_v13  ;;  %v5344_v11 = vsub.f32 %v5258_v32, %v9677_v60 }
 0x62e   : > { %v5335_v27 = vand.u32 4294901760, %v5334_v37  ;;  %v5345_v25 = vand.u32 4294901760, %v5344_v11 }
 0x630   : > { %v5336_v44 = vsub.f32 %v5334_v37, %v5335_v27  ;;  %v5346_v36 = vsub.f32 %v5344_v11, %v5345_v25 }
 0x632   : > { %v5337_v23 = vand.u32 4294901760, %v5336_v44  ;;  %v5347_v48 = vand.u32 4294901760, %v5346_v36 }
 0x634   : > { %6699 = vmatprep.mubr.f32.mxu0 %v5337_v23 }
 0x635   : > { %6700 = vmatmul.mubr.f32.vlgmr.msra.gmra.mrb[6].mxu0 %v5347_v48 }
 0x636   : > { %7104 = vmatpush3.bf16.msra.mxu0 %v7101_v5  ;;  %6718 = vmatprep.mubr.f32.mxu0 %v9664_v13 }
 0x637   : > { %7106 = vmatprep.subr.bf16.mxu0 %v7105_v17 }
 0x63a   : > { %7108 = vmatpush3.bf16.msra.mxu0 %v7105_v17 }
 0x63b   : > { %7110 = vmatprep.subr.bf16.mxu0 %v7109_v3 }
 0x63e   : > { %7112 = vmatpush3.bf16.msra.mxu0 %v7109_v3 }
 0x63f   : > { %7114 = vmatprep.subr.bf16.mxu0 %v7113_v14 }
 0x642   : > { %7116 = vmatpush3.bf16.msra.mxu0 %v7113_v14 }
 0x643   : > { %7118 = vmatprep.subr.bf16.mxu0 %v7117_v40 }
 0x645   : > { %6719 = vmatmul.mubr.f32.vlgmr.msra.gmra.mrb[6].mxu0 %v9677_v60 }
 0x646   : > { %7120 = vmatpush3.bf16.msra.mxu0 %v7117_v40  ;;  %6737 = vmatprep.mubr.f32.mxu0 %v5334_v37 }
 0x647   : > { %7122 = vmatprep.subr.bf16.mxu0 %v7121_v62 }
 0x64a   : > { %7124 = vmatpush3.bf16.msra.mxu0 %v7121_v62 }
 0x64b   : > { %7126 = vmatprep.subr.bf16.mxu0 %v7125_v63 }
 0x64e   : > { %7128 = vmatpush3.bf16.msra.mxu0 %v7125_v63 }
 0x64f   : > { %7130 = vmatprep.subr.bf16.mxu0 %v7129_v29 }
 0x652   : > { %7132 = vmatpush3.bf16.msra.mxu0 %v7129_v29 }
 0x653   : > { %7134 = vmatprep.subr.bf16.mxu0 %v9626_v58 }
 0x655   : > { %6738 = vmatmul.mubr.f32.vlgmr.msra.gmra.mrb[6].mxu0 %v5344_v11 }
 0x656   : > { %7136 = vmatpush3.bf16.msra.mxu0 %v9626_v58  ;;  %6756 = vmatprep.mubr.f32.mxu0 %v5335_v27 }
 0x657   : > { %7138 = vmatprep.subr.bf16.mxu0 %v9630_v57 }
 0x65a   : > { %7140 = vmatpush3.bf16.msra.mxu0 %v9630_v57 }
 0x65b   : > { %7142 = vmatprep.subr.bf16.mxu0 %v9637_v8 }
 0x65e   : > { %7144 = vmatpush3.bf16.msra.mxu0 %v9637_v8 }
 0x65f   : > { %7146 = vmatprep.subr.bf16.mxu0 %v9658_v7 }
 0x662   : > { %7148 = vmatpush3.bf16.msra.mxu0 %v9658_v7 }
 0x663   : > { %7150 = vmatprep.subr.bf16.mxu0 %v7149_v46 }
 0x665   : > { %6757 = vmatmul.mubr.f32.vlgmr.msra.gmra.mrb[6].mxu0 %v5345_v25 }
 0x666   : > { %7152 = vmatpush3.bf16.msra.mxu0 %v7149_v46  ;;  %6775 = vmatprep.mubr.f32.mxu0 %v9664_v13 }
 0x667   : > { %7154 = vmatprep.subr.bf16.mxu0 %v7153_v1 }
 0x66a   : > { %7156 = vmatpush3.bf16.msra.mxu0 %v7153_v1 }
 0x66b   : > { %7158 = vmatprep.subr.bf16.mxu0 %v7157_v16 }
 0x66e   : > { %7160 = vmatpush3.bf16.msra.mxu0 %v7157_v16 }
 0x66f   : > { %7162 = vmatprep.subr.bf16.mxu0 %v7161_v50 }
 0x672   : > { %7164 = vmatpush3.bf16.msra.mxu0 %v7161_v50 }
 0x673   : > { %7166 = vmatprep.subr.bf16.mxu0 %v9626_v58 }
 0x675   : > { %6776 = vmatmul.mubr.f32.vlgmr.msra.gmra.mrb[6].mxu0 %v9677_v60 }
 0x676   : > { %7168 = vmatpush3.bf16.msra.mxu0 %v9626_v58  ;;  %6794 = vmatprep.mubr.f32.mxu0 %v9664_v13  ;;  %v5253_v58 = vld [vmem:[%s8301_s30 + $0x8] sm:$0xff] }
 0x677   : > { %7170 = vmatprep.subr.bf16.mxu0 %v9630_v57 }
 0x67a   : > { %7172 = vmatpush3.bf16.msra.mxu0 %v9630_v57  ;;  %v5252_v57 = vld [vmem:[%s8301_s30] sm:$0xff]  ;;  %s7993_s30 = smov [#allocation22]  }
 0x67b   : > { %7174 = vmatprep.subr.bf16.mxu0 %v9637_v8  ;;  %s7792_s13 = sshll.u32 %s7993_s30, 4  ;;  %s7793_s13 = int_to_ptr.vmem [resolvable:$false] %s7792_s13 }
 0x67c   : > { %s7794_s19 = scalar_lea.vmem %s7793_s13, 512  ;;  %p7795_p9 = scmp.lt.s32.totalorder %s9748_s27, %s7793_s13 }
 0x67d   : > { %p7796_p11 = scmp.lt.s32.totalorder %s7794_s19, %s7788_s16 }
 0x67e   : > { %7176 = vmatpush3.bf16.msra.mxu0 %v9637_v8 }
 0x67f   : > { %7178 = vmatprep.subr.bf16.mxu0 %v9658_v7  ;;  %p7797_p13 = por %p7796_p11, %p7795_p9 }
 0x681   : > { %p7798_p3 = pnand %p7797_p13, %p7791_p7 }
 0x682   : > { %7180 = vmatpush3.bf16.msra.mxu0 %v9658_v7 }
 0x685   : > { %6795 = vmatmul.mubr.f32.vlgmr.msra.gmra.mrb[6].mxu0 %v9677_v60 }
 0x758   : > { %v6796_v45 = vpop.f32.mrb[6].mxu0 }
 0x759   : > { %v7187_v52 = vadd.f32 %v6796_v45, %v5253_v58  ;;  %v5830_v49 = vpop.f32.mrb[7].mxu0 }
 0x75a   : > { %v7188_v8 = vadd.f32 %v5830_v49, %v5252_v57 }
 0x75b   : > { %5841 = vst.msk [vmem:[%s8303_s11 + $0x8] sm:$0xff] %vm519_vm2, %v7187_v52 }
 0x75c   : > { %5840 = vst.msk [vmem:[%s8303_s11] sm:$0xff] %vm519_vm2, %v7188_v8 }
 0x75d   : > { %7801 = shalt.err (!%p7798_p3)
}
 0x75e   : > { %s7802_s22 = scalar_lea.hbm %s9746_s17, 256  ;;  %s7806_s10 = scalar_lea.hbm %s9878_s14, 1024 }
 0x75f   : > { %p7803_p8 = scmp.ne.s32.totalorder %s9746_s17, %s7802_s22  ;;  %p7807_p10 = scmp.lt.u32.totalorder %s9746_s17, %s9878_s14 }
 0x760   : > { %p7808_p12 = scmp.lt.u32.totalorder %s7806_s10, %s7802_s22  ;;  %p7810_p4 = scmp.lt.u32.totalorder %s7802_s22, %s9746_s17 }
 0x761   : > { %p7804_p0 = pnand %p7803_p8, %p9879_p5 }
 0x762   : > { %p7809_p1 = por %p7808_p12, %p7807_p10 }
 0x763   : > { %p7805_p2 = pneg %p7804_p0 }
 0x764   : > { %p7811_p6 = por %p7810_p4, %p7809_p1 }
 0x766   : > { %p7812_p7 = pnand %p7811_p6, %p7805_p2 }
 0x768   : > { %7815 = shalt.err (!%p7812_p7)
}
 0x769   : > { %s7994_s28 = smov 128   ;;  %s7995_s12 = smov 8  }
 0x76a   : > { %7279 = dma.vmem_to_hbm [thread:$0]  (%p9879_p5), %s9748_s27, 256, %s9746_s17, %s9756_s21, %s7994_s28, %s7994_s28, %s7995_s12  }
 0x76b PF: > { %s9880_s25 = sld [smem:[#allocation32_spill]]  ;;  %s9881_s20 = sld [smem:[#allocation28_spill]] }
 0x76c   : > { %s9882_s16 = sld [smem:[#allocation36_spill]] }
 0x771   : > { %p7316_p9 = scmp.ge.s32.totalorder %s9880_s25, 2  ;;  %s5873_s30 = sand.u32 1, %s9881_s20  }
 0x772   : > { %p9883_p11 = scmp.ne.s32.totalorder %s9882_s16, 0  ;;  %s5874_s13 = scalar_lea.sflag [#allocation13], %s5873_s30 }
 0x774   : > { %p7301_p13 = pnand %p7316_p9, %p9883_p11 }
 0x776   : > { %7905 = dma.done.wait (!%p7301_p13), %s5874_s13, 256  }
 0x777   : > { %7907 = vsyncadd (!%p7301_p13), %s5874_s13, 4294967040  ;;  %s28_s24 = sadd.s32 1, %s9880_s25   ;;  %s9884_s19 = sld [smem:[#allocation29_spill]] }
 0x778   : > { %p25_p3 = scmp.ge.s32.totalorder %s28_s24, 6   ;;  %s9885_s22 = sld [smem:[#allocation37_spill]] }
 0x779   : > { %s9886_s20 = sld [smem:[#allocation30_spill]]  ;;  %s9887_s21 = sld [smem:[#allocation31_spill]] }
 0x77a   : > { %s9888_s27 = sld [smem:[#allocation33_spill]]  ;;  %s9889_s23 = sld [smem:[#allocation35_spill]] }
 0x77b   : > { %s9890_s17 = smov %s7914_s18  ;;  %27 = sbr.rel (!%p25_p3) target bundleno = 12 (0xc), region = 177 }
 0x77d   : > { %s9891_s18 = smov %s9884_s19 }
 0x77e   : > { %s9892_s19 = smov %s9885_s22 }
 0x780   : > { %s9893_s22 = smov %s9888_s27 }
 0x782   :  { %5879 = vsyncpa [#allocation12], 1 }
 0x783   :  { %5881 = vsyncpa [#allocation12 + $0x1], 1 }
 0x784   :  { %5882 = vsyncpa [#allocation15], 1 }
 0x785   :  { %5883 = vsyncpa [#allocation18], 1 }
 0x786   :  { %5884 = vsyncpa [#allocation21], 1 }
 0x787   :  { %5885 = vsyncpa [#allocation13], 1 }
 0x788   :  { %5887 = vsyncpa [#allocation13 + $0x1], 1 }

</bundles_post_ra>
